<compile_context>
chip_gen: v6e
topology: v6e:2x2x1
jax: 0.10.0
libtpu: 0.0.40
codegen_flags: <defaults>
</compile_context>

<pallas_src>
import numpy as np
import jax
import jax.numpy as jnp
from jax.experimental import pallas as pl
from jax.experimental.pallas import tpu as pltpu

CLASSES = 1108
STEM_CPK = 32          # per-window packed stem channels (4*Cin zero-padded)


# --------------------------------------------------------------------------
# Glue helpers shared by the kernel wrapper and the pure-JAX reference
# --------------------------------------------------------------------------

def _space_to_depth(x_nhwc, cpk=STEM_CPK):
    """Pad by 1, pack the 4 stride-2 phases on the lane axis, zero-pad lanes."""
    B, H, W, Cin = x_nhwc.shape
    assert H % 2 == 0 and W % 2 == 0 and 4 * Cin <= cpk
    xp = jnp.pad(x_nhwc, ((0, 0), (1, 1), (1, 1), (0, 0)))
    OHp, OWp = (H + 2) // 2, (W + 2) // 2
    xs = (xp.reshape(B, OHp, 2, OWp, 2, Cin)
            .transpose(0, 1, 3, 2, 4, 5)
            .reshape(B, OHp, OWp, 4 * Cin))
    xs = jnp.pad(xs, ((0, 0), (0, 0), (0, 0), (0, cpk - 4 * Cin)))
    return xs.astype(jnp.bfloat16)                      # (B, OH+1, OW+1, cpk)


def _pack_stem_weight(w_stem, cpk=STEM_CPK):
    """(3,3,Cin,C0) -> (4*cpk, C0) matrix matching the im2col window layout."""
    Cin, C0 = w_stem.shape[2], w_stem.shape[3]
    blocks = []
    for dh in (0, 1):
        for dw in (0, 1):
            blk = jnp.zeros((cpk, C0), jnp.float32)
            for ph in (0, 1):
                for pw in (0, 1):
                    kh, kw = 2 * dh + ph, 2 * dw + pw
                    if kh < 3 and kw < 3:
                        r0 = (ph * 2 + pw) * Cin
                        blk = blk.at[r0:r0 + Cin, :].set(w_stem[kh, kw])
            blocks.append(blk)
    return jnp.concatenate(blocks, axis=0).astype(jnp.bfloat16)   # (4*cpk, C0)


# --------------------------------------------------------------------------
# Fused backbone kernel: stem -> MBConv (expand, dw+SE, project+res) -> head
# --------------------------------------------------------------------------

def _backbone_kernel(xs_ref, wst_ref, bst_ref, wexp_ref, bexp_ref, wdw_ref,
                     wse1_ref, bse1_ref, wse2_ref, bse2_ref,
                     wpj_ref, bpj_ref, whd_ref, bhd_ref, o_ref):
    Bt, OHp, OWp, cpk = xs_ref.shape
    OH, OW = OHp - 1, OWp - 1
    S = OH * OW
    M = Bt * S

    # ---- Stem 3x3 / stride-2: im2col of the s2d windows -> ONE MXU matmul ----
    xs = xs_ref[...]                                          # (Bt, OH+1, OW+1, cpk) bf16
    patches = jnp.concatenate(
        [xs[:, dh:dh + OH, dw:dw + OW, :] for dh in (0, 1) for dw in (0, 1)],
        axis=-1).reshape(M, 4 * cpk)                          # (M, 128) bf16, lane-dense
    h0 = jnp.dot(patches, wst_ref[...], preferred_element_type=jnp.float32)
    h0 = h0 + bst_ref[...]
    h0 = h0 * jax.nn.sigmoid(h0)                              # (M, C0) f32

    # ---- MBConv expand 1x1 + swish ----
    he = jnp.dot(h0.astype(jnp.bfloat16), wexp_ref[...],
                 preferred_element_type=jnp.float32) + bexp_ref[...]
    he = he * jax.nn.sigmoid(he)                              # (M, Ce) f32
    Ce = he.shape[-1]

    # ---- Depthwise 3x3 + swish (halo padding in-kernel: no extra HBM traffic) ----
    he_sp = he.reshape(Bt, OH, OW, Ce)
    zr = jnp.zeros((Bt, 1, OW, Ce), jnp.float32)
    zc = jnp.zeros((Bt, OH + 2, 1, Ce), jnp.float32)
    hep = jnp.concatenate([zr, he_sp, zr], axis=1)
    hep = jnp.concatenate([zc, hep, zc], axis=2)              # (Bt, OH+2, OW+2, Ce)
    dacc = jnp.zeros((Bt, OH, OW, Ce), jnp.float32)
    # TODO(synk): at real image sizes pre-shift the kw taps with pltpu.roll (XLU slot).
    for kh in range(3):
        for kw in range(3):
            dacc = dacc + hep[:, kh:kh + OH, kw:kw + OW, :] * wdw_ref[kh, kw, :]
    hd = dacc * jax.nn.sigmoid(dacc)                          # (Bt, OH, OW, Ce) f32

    # ---- Squeeze-excite: global pool + both tiny FCs + sigmoid gate ----
    se = jnp.mean(jnp.mean(hd, axis=1), axis=1)               # (Bt, Ce)
    g = jnp.dot(se.astype(jnp.bfloat16), wse1_ref[...],
                preferred_element_type=jnp.float32) + bse1_ref[...]
    g = g * jax.nn.sigmoid(g)
    g = jnp.dot(g.astype(jnp.bfloat16), wse2_ref[...],
                preferred_element_type=jnp.float32) + bse2_ref[...]
    gate = jax.nn.sigmoid(g)                                  # (Bt, Ce)

    # ---- Project 1x1 with SE gating and residual add fused ----
    hs = (hd * gate[:, None, None, :]).reshape(M, Ce)
    hp = jnp.dot(hs.astype(jnp.bfloat16), wpj_ref[...],
                 preferred_element_type=jnp.float32) + bpj_ref[...] + h0

    # ---- Head 1x1 + swish fused with global average pooling ----
    y = jnp.dot(hp.astype(jnp.bfloat16), whd_ref[...],
                preferred_element_type=jnp.float32) + bhd_ref[...]
    y = y * jax.nn.sigmoid(y)                                 # (M, F)
    F = y.shape[-1]
    o_ref[...] = jnp.mean(y.reshape(Bt, S, F), axis=1).astype(o_ref.dtype)


def _pick_batch_tile(B, S, max_rows=4096):
    """Largest batch tile that keeps the (Bt, F) out block legal and VMEM bounded."""
    if B * S <= max_rows:
        return B
    for bt in range(B - 1, 0, -1):
        if B % bt == 0 and bt % 8 == 0 and bt * S <= max_rows:
            return bt
    return B


def backbone(x_nchw, p):
    """Shared EfficientNet-style feature extractor -> [B, F] features."""
    x = jnp.transpose(x_nchw, (0, 2, 3, 1)).astype(jnp.float32)   # NCHW -> NHWC
    B, H, W, Cin = x.shape
    OH, OW = H // 2, W // 2
    S = OH * OW

    x_s2d = _space_to_depth(x)                       # (B, OH+1, OW+1, 32) bf16
    w_stem = _pack_stem_weight(p["w_stem"])          # (128, C0) bf16
    F = p["b_head"].shape[-1]
    Bt = _pick_batch_tile(B, S)
    assert B % Bt == 0

    def full(a):
        return pl.BlockSpec(a.shape, lambda g, _nd=a.ndim: (0,) * _nd)

    return pl.pallas_call(
        _backbone_kernel,
        out_shape=jax.ShapeDtypeStruct((B, F), jnp.float32),
        grid=(B // Bt,),
        in_specs=[pl.BlockSpec((Bt, OH + 1, OW + 1, STEM_CPK),
                               lambda g: (g, 0, 0, 0)),
                  full(w_stem), full(p["b_stem"]),
                  full(p["w_exp"]), full(p["b_exp"]),
                  full(p["w_dw"]),
                  full(p["w_se1"]), full(p["b_se1"]),
                  full(p["w_se2"]), full(p["b_se2"]),
                  full(p["w_proj"]), full(p["b_proj"]),
                  full(p["w_head"]), full(p["b_head"])],
        out_specs=pl.BlockSpec((Bt, F), lambda g: (g, 0)),
        compiler_params=pltpu.CompilerParams(dimension_semantics=("parallel",)),
    )(x_s2d, w_stem, p["b_stem"], p["w_exp"], p["b_exp"], p["w_dw"],
      p["w_se1"], p["b_se1"], p["w_se2"], p["b_se2"],
      p["w_proj"], p["b_proj"], p["w_head"], p["b_head"])


# --------------------------------------------------------------------------
# Final FC kernel (lane-dense 384-wide column tiles)
# --------------------------------------------------------------------------

def _fc_kernel(x_ref, w_ref, b_ref, o_ref):
    acc = jnp.dot(x_ref[...], w_ref[...], preferred_element_type=jnp.float32)
    o_ref[...] = (acc + b_ref[...]).astype(o_ref.dtype)


def fc_matmul(x, w, b, *, tn=384):
    M, K = x.shape
    K2, N = w.shape
    assert K == K2 and N % tn == 0 and tn % 128 == 0   # lane-dense, unmasked stores
    return pl.pallas_call(
        _fc_kernel,
        out_shape=jax.ShapeDtypeStruct((M, N), jnp.float32),
        grid=(N // tn,),
        in_specs=[pl.BlockSpec((M, K), lambda j: (0, 0)),
                  pl.BlockSpec((K, tn), lambda j: (0, j)),
                  pl.BlockSpec((1, tn), lambda j: (0, j))],
        out_specs=pl.BlockSpec((M, tn), lambda j: (0, j)),
        compiler_params=pltpu.CompilerParams(dimension_semantics=("parallel",)),
    )(x, w, b)


# --------------------------------------------------------------------------
# Model (glue in plain JAX, compute in the two kernels above)
# --------------------------------------------------------------------------

def efficientnet_two_inputs(x1, x2, p):
    """Matches EfficientNetTwoInputs.forward: shared backbone, concat, Linear."""
    N = x1.shape[0]
    # One batched pass through the shared backbone (weights are shared).
    feats = backbone(jnp.concatenate([x1, x2], axis=0), p)        # [2N, F]
    f = jnp.concatenate([feats[:N], feats[N:]], axis=1)           # [N, 2F]
    logits = fc_matmul(f.astype(jnp.bfloat16), p["w_fc"], p["b_fc"], tn=384)
    return logits[:, :CLASSES]                                    # drop class padding


# --------------------------------------------------------------------------
# Pure-JAX reference (mirrors the kernel's bf16/f32 dtype handling exactly)
# --------------------------------------------------------------------------

def _ref_backbone(x_nchw, p):
    x = jnp.transpose(x_nchw, (0, 2, 3, 1)).astype(jnp.float32)
    B, H, W, Cin = x.shape
    OH, OW = H // 2, W // 2
    S = OH * OW

    xs = _space_to_depth(x)
    wst = _pack_stem_weight(p["w_stem"])
    patches = jnp.concatenate(
        [xs[:, dh:dh + OH, dw:dw + OW, :] for dh in (0, 1) for dw in (0, 1)],
        axis=-1).reshape(B * S, -1)
    h0 = jnp.dot(patches, wst, preferred_element_type=jnp.float32) + p["b_stem"]
    h0 = h0 * jax.nn.sigmoid(h0)

    he = jnp.dot(h0.astype(jnp.bfloat16), p["w_exp"],
                 preferred_element_type=jnp.float32) + p["b_exp"]
    he = he * jax.nn.sigmoid(he)
    Ce = he.shape[-1]

    hep = jnp.pad(he.reshape(B, OH, OW, Ce), ((0, 0), (1, 1), (1, 1), (0, 0)))
    dacc = jnp.zeros((B, OH, OW, Ce), jnp.float32)
    for kh in range(3):
        for kw in range(3):
            dacc = dacc + hep[:, kh:kh + OH, kw:kw + OW, :] * p["w_dw"][kh, kw, :]
    hd = dacc * jax.nn.sigmoid(dacc)

    se = jnp.mean(hd, axis=(1, 2))
    g = jnp.dot(se.astype(jnp.bfloat16), p["w_se1"],
                preferred_element_type=jnp.float32) + p["b_se1"]
    g = g * jax.nn.sigmoid(g)
    g = jnp.dot(g.astype(jnp.bfloat16), p["w_se2"],
                preferred_element_type=jnp.float32) + p["b_se2"]
    gate = jax.nn.sigmoid(g)

    hs = (hd * gate[:, None, None, :]).reshape(B * S, Ce)
    hp = jnp.dot(hs.astype(jnp.bfloat16), p["w_proj"],
                 preferred_element_type=jnp.float32) + p["b_proj"] + h0

    y = jnp.dot(hp.astype(jnp.bfloat16), p["w_head"],
                preferred_element_type=jnp.float32) + p["b_head"]
    y = y * jax.nn.sigmoid(y)
    F = y.shape[-1]
    return jnp.mean(y.reshape(B, S, F), axis=1)


def _ref_forward(x1, x2, p):
    N = x1.shape[0]
    feats = _ref_backbone(jnp.concatenate([x1, x2], axis=0), p)
    f = jnp.concatenate([feats[:N], feats[N:]], axis=1).astype(jnp.bfloat16)
    out = jnp.dot(f, p["w_fc"], preferred_element_type=jnp.float32) + p["b_fc"]
    return out[:, :CLASSES]


# --------------------------------------------------------------------------
# Deterministic parameter init (lane-dense channel dims, bf16 MXU weights)
# --------------------------------------------------------------------------

def init_params(key):
    Cin, C0, Ce, Cse, F = 3, 128, 256, 128, 256
    CPAD = 1152                          # 1108 classes padded to 9 * 128 lanes
    ks = jax.random.split(key, 16)

    def w(k, shape, fan_in, dtype=jnp.bfloat16):
        return (jax.random.normal(k, shape, jnp.float32) / np.sqrt(fan_in)).astype(dtype)

    def b(k, n):
        return 0.01 * jax.random.normal(k, (1, n), jnp.float32)

    return {
        "w_stem": w(ks[0], (3, 3, Cin, C0), 9 * Cin, jnp.float32),
        "b_stem": b(ks[1], C0),
        "w_exp":  w(ks[2], (C0, Ce), C0),   "b_exp":  b(ks[3], Ce),
        "w_dw":   w(ks[4], (3, 3, Ce), 9, jnp.float32),
        "w_se1":  w(ks[5], (Ce, Cse), Ce),  "b_se1":  b(ks[6], Cse),
        "w_se2":  w(ks[7], (Cse, Ce), Cse), "b_se2":  b(ks[8], Ce),
        "w_proj": w(ks[9], (Ce, C0), Ce),   "b_proj": b(ks[10], C0),
        "w_head": w(ks[11], (C0, F), C0),   "b_head": b(ks[12], F),
        "w_fc":   w(ks[13], (2 * F, CPAD), 2 * F), "b_fc": b(ks[14], CPAD),
    }


# --------------------------------------------------------------------------

if __name__ == "__main__":
    key = jax.random.PRNGKey(0)
    k1, k2, kp = jax.random.split(key, 3)

    N, C, H, W = 2, 3, 16, 16                     # two small NCHW inputs
    x1 = jax.random.normal(k1, (N, C, H, W), jnp.float32)
    x2 = jax.random.normal(k2, (N, C, H, W), jnp.float32)
    params = init_params(kp)

    fwd = jax.jit(efficientnet_two_inputs)
    out = jax.block_until_ready(fwd(x1, x2, params))
    assert out.shape == (N, CLASSES), out.shape

    ref = jax.block_until_ready(_ref_forward(x1, x2, params))
    np.testing.assert_allclose(np.asarray(out), np.asarray(ref),
                               rtol=2e-2, atol=2e-2)

    print("KERNEL_OK")
</pallas_src>

<mosaic_0001>
module attributes {stable_mosaic.version = 11 : i64} {
  func.func @_backbone_kernel(%arg0: i32, %arg1: memref<4x9x9x32xbf16, #tpu.memory_space<vmem>>, %arg2: memref<128x128xbf16, #tpu.memory_space<vmem>>, %arg3: memref<1x128xf32, #tpu.memory_space<vmem>>, %arg4: memref<128x256xbf16, #tpu.memory_space<vmem>>, %arg5: memref<1x256xf32, #tpu.memory_space<vmem>>, %arg6: memref<3x3x256xf32, #tpu.memory_space<vmem>>, %arg7: memref<256x128xbf16, #tpu.memory_space<vmem>>, %arg8: memref<1x128xf32, #tpu.memory_space<vmem>>, %arg9: memref<128x256xbf16, #tpu.memory_space<vmem>>, %arg10: memref<1x256xf32, #tpu.memory_space<vmem>>, %arg11: memref<256x128xbf16, #tpu.memory_space<vmem>>, %arg12: memref<1x128xf32, #tpu.memory_space<vmem>>, %arg13: memref<128x256xbf16, #tpu.memory_space<vmem>>, %arg14: memref<1x256xf32, #tpu.memory_space<vmem>>, %arg15: memref<4x256xf32, #tpu.memory_space<vmem>>) attributes {dimension_semantics = [#tpu.dimension_semantics<parallel>], iteration_bounds = array<i64: 1>, scalar_prefetch = 0 : i64, scratch_operands = 0 : i64, tpu.core_type = #tpu.core_type<tc>, window_params = [{transform_indices = @transform_0, window_bounds = array<i64: 4, 9, 9, 32>}, {pipeline_mode = #tpu.pipeline_mode<synchronous>, transform_indices = @transform_1, window_bounds = array<i64: 128, 128>}, {pipeline_mode = #tpu.pipeline_mode<synchronous>, transform_indices = @transform_2, window_bounds = array<i64: 1, 128>}, {pipeline_mode = #tpu.pipeline_mode<synchronous>, transform_indices = @transform_3, window_bounds = array<i64: 128, 256>}, {pipeline_mode = #tpu.pipeline_mode<synchronous>, transform_indices = @transform_4, window_bounds = array<i64: 1, 256>}, {pipeline_mode = #tpu.pipeline_mode<synchronous>, transform_indices = @transform_5, window_bounds = array<i64: 3, 3, 256>}, {pipeline_mode = #tpu.pipeline_mode<synchronous>, transform_indices = @transform_6, window_bounds = array<i64: 256, 128>}, {pipeline_mode = #tpu.pipeline_mode<synchronous>, transform_indices = @transform_7, window_bounds = array<i64: 1, 128>}, {pipeline_mode = #tpu.pipeline_mode<synchronous>, transform_indices = @transform_8, window_bounds = array<i64: 128, 256>}, {pipeline_mode = #tpu.pipeline_mode<synchronous>, transform_indices = @transform_9, window_bounds = array<i64: 1, 256>}, {pipeline_mode = #tpu.pipeline_mode<synchronous>, transform_indices = @transform_10, window_bounds = array<i64: 256, 128>}, {pipeline_mode = #tpu.pipeline_mode<synchronous>, transform_indices = @transform_11, window_bounds = array<i64: 1, 128>}, {pipeline_mode = #tpu.pipeline_mode<synchronous>, transform_indices = @transform_12, window_bounds = array<i64: 128, 256>}, {pipeline_mode = #tpu.pipeline_mode<synchronous>, transform_indices = @transform_13, window_bounds = array<i64: 1, 256>}, {transform_indices = @transform_14, window_bounds = array<i64: 4, 256>}]} {
    %c0 = arith.constant 0 : index
    %c0_0 = arith.constant 0 : index
    %c0_1 = arith.constant 0 : index
    %c0_2 = arith.constant 0 : index
    %0 = vector.load %arg1[%c0, %c0_0, %c0_1, %c0_2] : memref<4x9x9x32xbf16, #tpu.memory_space<vmem>>, vector<4x9x9x32xbf16>
    %1 = vector.extract_strided_slice %0 {offsets = [0, 0, 0, 0], sizes = [4, 8, 8, 32], strides = [1, 1, 1, 1]} : vector<4x9x9x32xbf16> to vector<4x8x8x32xbf16>
    %2 = vector.extract_strided_slice %0 {offsets = [0, 0, 1, 0], sizes = [4, 8, 8, 32], strides = [1, 1, 1, 1]} : vector<4x9x9x32xbf16> to vector<4x8x8x32xbf16>
    %3 = vector.extract_strided_slice %0 {offsets = [0, 1, 0, 0], sizes = [4, 8, 8, 32], strides = [1, 1, 1, 1]} : vector<4x9x9x32xbf16> to vector<4x8x8x32xbf16>
    %4 = vector.extract_strided_slice %0 {offsets = [0, 1, 1, 0], sizes = [4, 8, 8, 32], strides = [1, 1, 1, 1]} : vector<4x9x9x32xbf16> to vector<4x8x8x32xbf16>
    %5 = tpu.concatenate %1, %2, %3, %4 in 3 : vector<4x8x8x32xbf16>, vector<4x8x8x32xbf16>, vector<4x8x8x32xbf16>, vector<4x8x8x32xbf16> -> vector<4x8x8x128xbf16>
    %6 = vector.shape_cast %5 : vector<4x8x8x128xbf16> to vector<256x128xbf16>
    %c0_3 = arith.constant 0 : index
    %c0_4 = arith.constant 0 : index
    %7 = vector.load %arg2[%c0_3, %c0_4] : memref<128x128xbf16, #tpu.memory_space<vmem>>, vector<128x128xbf16>
    %cst = arith.constant dense<0.000000e+00> : vector<256x128xf32>
    %8 = tpu.matmul %6, %7, %cst {dimension_numbers = #tpu.dot_dimension_numbers<[1], [0], [0], [1], [0, 0, 1, 1], [], []>} : vector<256x128xbf16>, vector<128x128xbf16>, vector<256x128xf32> -> vector<256x128xf32>
    %c0_5 = arith.constant 0 : index
    %c0_6 = arith.constant 0 : index
    %9 = vector.load %arg3[%c0_5, %c0_6] : memref<1x128xf32, #tpu.memory_space<vmem>>, vector<1x128xf32>
    %10 = vector.broadcast %9 : vector<1x128xf32> to vector<256x128xf32>
    %11 = arith.addf %8, %10 : vector<256x128xf32>
    %12 = arith.negf %11 : vector<256x128xf32>
    %13 = math.exp %12 : vector<256x128xf32>
    %cst_7 = arith.constant 1.000000e+00 : f32
    %14 = vector.broadcast %cst_7 : f32 to vector<256x128xf32>
    %15 = arith.addf %14, %13 : vector<256x128xf32>
    %16 = arith.divf %14, %15 : vector<256x128xf32>
    %17 = arith.mulf %11, %16 : vector<256x128xf32>
    %18 = arith.truncf %17 : vector<256x128xf32> to vector<256x128xbf16>
    %c0_8 = arith.constant 0 : index
    %c0_9 = arith.constant 0 : index
    %19 = vector.load %arg4[%c0_8, %c0_9] : memref<128x256xbf16, #tpu.memory_space<vmem>>, vector<128x256xbf16>
    %cst_10 = arith.constant dense<0.000000e+00> : vector<256x256xf32>
    %20 = tpu.matmul %18, %19, %cst_10 {dimension_numbers = #tpu.dot_dimension_numbers<[1], [0], [0], [1], [0, 0, 1, 1], [], []>} : vector<256x128xbf16>, vector<128x256xbf16>, vector<256x256xf32> -> vector<256x256xf32>
    %c0_11 = arith.constant 0 : index
    %c0_12 = arith.constant 0 : index
    %21 = vector.load %arg5[%c0_11, %c0_12] : memref<1x256xf32, #tpu.memory_space<vmem>>, vector<1x256xf32>
    %22 = vector.broadcast %21 : vector<1x256xf32> to vector<256x256xf32>
    %23 = arith.addf %20, %22 : vector<256x256xf32>
    %24 = arith.negf %23 : vector<256x256xf32>
    %25 = math.exp %24 : vector<256x256xf32>
    %cst_13 = arith.constant 1.000000e+00 : f32
    %26 = vector.broadcast %cst_13 : f32 to vector<256x256xf32>
    %27 = arith.addf %26, %25 : vector<256x256xf32>
    %28 = arith.divf %26, %27 : vector<256x256xf32>
    %29 = arith.mulf %23, %28 : vector<256x256xf32>
    %30 = vector.shape_cast %29 : vector<256x256xf32> to vector<4x8x8x256xf32>
    %cst_14 = arith.constant 0.000000e+00 : f32
    %31 = vector.broadcast %cst_14 : f32 to vector<4x1x8x256xf32>
    %cst_15 = arith.constant 0.000000e+00 : f32
    %32 = vector.broadcast %cst_15 : f32 to vector<4x10x1x256xf32>
    %33 = tpu.concatenate %31, %30, %31 in 1 : vector<4x1x8x256xf32>, vector<4x8x8x256xf32>, vector<4x1x8x256xf32> -> vector<4x10x8x256xf32>
    %34 = tpu.concatenate %32, %33, %32 in 2 : vector<4x10x1x256xf32>, vector<4x10x8x256xf32>, vector<4x10x1x256xf32> -> vector<4x10x10x256xf32>
    %cst_16 = arith.constant 0.000000e+00 : f32
    %35 = vector.broadcast %cst_16 : f32 to vector<4x8x8x256xf32>
    %36 = vector.extract_strided_slice %34 {offsets = [0, 0, 0, 0], sizes = [4, 8, 8, 256], strides = [1, 1, 1, 1]} : vector<4x10x10x256xf32> to vector<4x8x8x256xf32>
    %c0_17 = arith.constant 0 : index
    %c0_18 = arith.constant 0 : index
    %c0_19 = arith.constant 0 : index
    %37 = vector.load %arg6[%c0_17, %c0_18, %c0_19] : memref<3x3x256xf32, #tpu.memory_space<vmem>>, vector<1x1x256xf32>
    %38 = vector.shape_cast %37 : vector<1x1x256xf32> to vector<256xf32>
    %39 = vector.shape_cast %38 : vector<256xf32> to vector<1x1x1x256xf32>
    %40 = vector.broadcast %39 : vector<1x1x1x256xf32> to vector<4x8x8x256xf32>
    %41 = arith.mulf %36, %40 : vector<4x8x8x256xf32>
    %42 = arith.addf %35, %41 : vector<4x8x8x256xf32>
    %43 = vector.extract_strided_slice %34 {offsets = [0, 0, 1, 0], sizes = [4, 8, 8, 256], strides = [1, 1, 1, 1]} : vector<4x10x10x256xf32> to vector<4x8x8x256xf32>
    %c0_20 = arith.constant 0 : index
    %c1 = arith.constant 1 : index
    %c0_21 = arith.constant 0 : index
    %44 = vector.load %arg6[%c0_20, %c1, %c0_21] : memref<3x3x256xf32, #tpu.memory_space<vmem>>, vector<1x1x256xf32>
    %45 = vector.shape_cast %44 : vector<1x1x256xf32> to vector<256xf32>
    %46 = vector.shape_cast %45 : vector<256xf32> to vector<1x1x1x256xf32>
    %47 = vector.broadcast %46 : vector<1x1x1x256xf32> to vector<4x8x8x256xf32>
    %48 = arith.mulf %43, %47 : vector<4x8x8x256xf32>
    %49 = arith.addf %42, %48 : vector<4x8x8x256xf32>
    %50 = vector.extract_strided_slice %34 {offsets = [0, 0, 2, 0], sizes = [4, 8, 8, 256], strides = [1, 1, 1, 1]} : vector<4x10x10x256xf32> to vector<4x8x8x256xf32>
    %c0_22 = arith.constant 0 : index
    %c2 = arith.constant 2 : index
    %c0_23 = arith.constant 0 : index
    %51 = vector.load %arg6[%c0_22, %c2, %c0_23] : memref<3x3x256xf32, #tpu.memory_space<vmem>>, vector<1x1x256xf32>
    %52 = vector.shape_cast %51 : vector<1x1x256xf32> to vector<256xf32>
    %53 = vector.shape_cast %52 : vector<256xf32> to vector<1x1x1x256xf32>
    %54 = vector.broadcast %53 : vector<1x1x1x256xf32> to vector<4x8x8x256xf32>
    %55 = arith.mulf %50, %54 : vector<4x8x8x256xf32>
    %56 = arith.addf %49, %55 : vector<4x8x8x256xf32>
    %57 = vector.extract_strided_slice %34 {offsets = [0, 1, 0, 0], sizes = [4, 8, 8, 256], strides = [1, 1, 1, 1]} : vector<4x10x10x256xf32> to vector<4x8x8x256xf32>
    %c1_24 = arith.constant 1 : index
    %c0_25 = arith.constant 0 : index
    %c0_26 = arith.constant 0 : index
    %58 = vector.load %arg6[%c1_24, %c0_25, %c0_26] : memref<3x3x256xf32, #tpu.memory_space<vmem>>, vector<1x1x256xf32>
    %59 = vector.shape_cast %58 : vector<1x1x256xf32> to vector<256xf32>
    %60 = vector.shape_cast %59 : vector<256xf32> to vector<1x1x1x256xf32>
    %61 = vector.broadcast %60 : vector<1x1x1x256xf32> to vector<4x8x8x256xf32>
    %62 = arith.mulf %57, %61 : vector<4x8x8x256xf32>
    %63 = arith.addf %56, %62 : vector<4x8x8x256xf32>
    %64 = vector.extract_strided_slice %34 {offsets = [0, 1, 1, 0], sizes = [4, 8, 8, 256], strides = [1, 1, 1, 1]} : vector<4x10x10x256xf32> to vector<4x8x8x256xf32>
    %c1_27 = arith.constant 1 : index
    %c1_28 = arith.constant 1 : index
    %c0_29 = arith.constant 0 : index
    %65 = vector.load %arg6[%c1_27, %c1_28, %c0_29] : memref<3x3x256xf32, #tpu.memory_space<vmem>>, vector<1x1x256xf32>
    %66 = vector.shape_cast %65 : vector<1x1x256xf32> to vector<256xf32>
    %67 = vector.shape_cast %66 : vector<256xf32> to vector<1x1x1x256xf32>
    %68 = vector.broadcast %67 : vector<1x1x1x256xf32> to vector<4x8x8x256xf32>
    %69 = arith.mulf %64, %68 : vector<4x8x8x256xf32>
    %70 = arith.addf %63, %69 : vector<4x8x8x256xf32>
    %71 = vector.extract_strided_slice %34 {offsets = [0, 1, 2, 0], sizes = [4, 8, 8, 256], strides = [1, 1, 1, 1]} : vector<4x10x10x256xf32> to vector<4x8x8x256xf32>
    %c1_30 = arith.constant 1 : index
    %c2_31 = arith.constant 2 : index
    %c0_32 = arith.constant 0 : index
    %72 = vector.load %arg6[%c1_30, %c2_31, %c0_32] : memref<3x3x256xf32, #tpu.memory_space<vmem>>, vector<1x1x256xf32>
    %73 = vector.shape_cast %72 : vector<1x1x256xf32> to vector<256xf32>
    %74 = vector.shape_cast %73 : vector<256xf32> to vector<1x1x1x256xf32>
    %75 = vector.broadcast %74 : vector<1x1x1x256xf32> to vector<4x8x8x256xf32>
    %76 = arith.mulf %71, %75 : vector<4x8x8x256xf32>
    %77 = arith.addf %70, %76 : vector<4x8x8x256xf32>
    %78 = vector.extract_strided_slice %34 {offsets = [0, 2, 0, 0], sizes = [4, 8, 8, 256], strides = [1, 1, 1, 1]} : vector<4x10x10x256xf32> to vector<4x8x8x256xf32>
    %c2_33 = arith.constant 2 : index
    %c0_34 = arith.constant 0 : index
    %c0_35 = arith.constant 0 : index
    %79 = vector.load %arg6[%c2_33, %c0_34, %c0_35] : memref<3x3x256xf32, #tpu.memory_space<vmem>>, vector<1x1x256xf32>
    %80 = vector.shape_cast %79 : vector<1x1x256xf32> to vector<256xf32>
    %81 = vector.shape_cast %80 : vector<256xf32> to vector<1x1x1x256xf32>
    %82 = vector.broadcast %81 : vector<1x1x1x256xf32> to vector<4x8x8x256xf32>
    %83 = arith.mulf %78, %82 : vector<4x8x8x256xf32>
    %84 = arith.addf %77, %83 : vector<4x8x8x256xf32>
    %85 = vector.extract_strided_slice %34 {offsets = [0, 2, 1, 0], sizes = [4, 8, 8, 256], strides = [1, 1, 1, 1]} : vector<4x10x10x256xf32> to vector<4x8x8x256xf32>
    %c2_36 = arith.constant 2 : index
    %c1_37 = arith.constant 1 : index
    %c0_38 = arith.constant 0 : index
    %86 = vector.load %arg6[%c2_36, %c1_37, %c0_38] : memref<3x3x256xf32, #tpu.memory_space<vmem>>, vector<1x1x256xf32>
    %87 = vector.shape_cast %86 : vector<1x1x256xf32> to vector<256xf32>
    %88 = vector.shape_cast %87 : vector<256xf32> to vector<1x1x1x256xf32>
    %89 = vector.broadcast %88 : vector<1x1x1x256xf32> to vector<4x8x8x256xf32>
    %90 = arith.mulf %85, %89 : vector<4x8x8x256xf32>
    %91 = arith.addf %84, %90 : vector<4x8x8x256xf32>
    %92 = vector.extract_strided_slice %34 {offsets = [0, 2, 2, 0], sizes = [4, 8, 8, 256], strides = [1, 1, 1, 1]} : vector<4x10x10x256xf32> to vector<4x8x8x256xf32>
    %c2_39 = arith.constant 2 : index
    %c2_40 = arith.constant 2 : index
    %c0_41 = arith.constant 0 : index
    %93 = vector.load %arg6[%c2_39, %c2_40, %c0_41] : memref<3x3x256xf32, #tpu.memory_space<vmem>>, vector<1x1x256xf32>
    %94 = vector.shape_cast %93 : vector<1x1x256xf32> to vector<256xf32>
    %95 = vector.shape_cast %94 : vector<256xf32> to vector<1x1x1x256xf32>
    %96 = vector.broadcast %95 : vector<1x1x1x256xf32> to vector<4x8x8x256xf32>
    %97 = arith.mulf %92, %96 : vector<4x8x8x256xf32>
    %98 = arith.addf %91, %97 : vector<4x8x8x256xf32>
    %99 = arith.negf %98 : vector<4x8x8x256xf32>
    %100 = math.exp %99 : vector<4x8x8x256xf32>
    %cst_42 = arith.constant 1.000000e+00 : f32
    %101 = vector.broadcast %cst_42 : f32 to vector<4x8x8x256xf32>
    %102 = arith.addf %101, %100 : vector<4x8x8x256xf32>
    %103 = arith.divf %101, %102 : vector<4x8x8x256xf32>
    %104 = arith.mulf %98, %103 : vector<4x8x8x256xf32>
    %cst_43 = arith.constant dense<0.000000e+00> : vector<4x8x256xf32>
    %105 = vector.multi_reduction <add>, %104, %cst_43 [1] : vector<4x8x8x256xf32> to vector<4x8x256xf32>
    %cst_44 = arith.constant 8.000000e+00 : f32
    %106 = vector.broadcast %cst_44 : f32 to vector<4x8x256xf32>
    %107 = arith.divf %105, %106 : vector<4x8x256xf32>
    %cst_45 = arith.constant dense<0.000000e+00> : vector<4x256xf32>
    %108 = vector.multi_reduction <add>, %107, %cst_45 [1] : vector<4x8x256xf32> to vector<4x256xf32>
    %cst_46 = arith.constant 8.000000e+00 : f32
    %109 = vector.broadcast %cst_46 : f32 to vector<4x256xf32>
    %110 = arith.divf %108, %109 : vector<4x256xf32>
    %111 = arith.truncf %110 : vector<4x256xf32> to vector<4x256xbf16>
    %c0_47 = arith.constant 0 : index
    %c0_48 = arith.constant 0 : index
    %112 = vector.load %arg7[%c0_47, %c0_48] : memref<256x128xbf16, #tpu.memory_space<vmem>>, vector<256x128xbf16>
    %cst_49 = arith.constant dense<0.000000e+00> : vector<4x128xf32>
    %113 = tpu.matmul %111, %112, %cst_49 {dimension_numbers = #tpu.dot_dimension_numbers<[1], [0], [0], [1], [0, 0, 1, 1], [], []>} : vector<4x256xbf16>, vector<256x128xbf16>, vector<4x128xf32> -> vector<4x128xf32>
    %c0_50 = arith.constant 0 : index
    %c0_51 = arith.constant 0 : index
    %114 = vector.load %arg8[%c0_50, %c0_51] : memref<1x128xf32, #tpu.memory_space<vmem>>, vector<1x128xf32>
    %115 = vector.broadcast %114 : vector<1x128xf32> to vector<4x128xf32>
    %116 = arith.addf %113, %115 : vector<4x128xf32>
    %117 = arith.negf %116 : vector<4x128xf32>
    %118 = math.exp %117 : vector<4x128xf32>
    %cst_52 = arith.constant 1.000000e+00 : f32
    %119 = vector.broadcast %cst_52 : f32 to vector<4x128xf32>
    %120 = arith.addf %119, %118 : vector<4x128xf32>
    %121 = arith.divf %119, %120 : vector<4x128xf32>
    %122 = arith.mulf %116, %121 : vector<4x128xf32>
    %123 = arith.truncf %122 : vector<4x128xf32> to vector<4x128xbf16>
    %c0_53 = arith.constant 0 : index
    %c0_54 = arith.constant 0 : index
    %124 = vector.load %arg9[%c0_53, %c0_54] : memref<128x256xbf16, #tpu.memory_space<vmem>>, vector<128x256xbf16>
    %cst_55 = arith.constant dense<0.000000e+00> : vector<4x256xf32>
    %125 = tpu.matmul %123, %124, %cst_55 {dimension_numbers = #tpu.dot_dimension_numbers<[1], [0], [0], [1], [0, 0, 1, 1], [], []>} : vector<4x128xbf16>, vector<128x256xbf16>, vector<4x256xf32> -> vector<4x256xf32>
    %c0_56 = arith.constant 0 : index
    %c0_57 = arith.constant 0 : index
    %126 = vector.load %arg10[%c0_56, %c0_57] : memref<1x256xf32, #tpu.memory_space<vmem>>, vector<1x256xf32>
    %127 = vector.broadcast %126 : vector<1x256xf32> to vector<4x256xf32>
    %128 = arith.addf %125, %127 : vector<4x256xf32>
    %129 = arith.negf %128 : vector<4x256xf32>
    %130 = math.exp %129 : vector<4x256xf32>
    %cst_58 = arith.constant 1.000000e+00 : f32
    %131 = vector.broadcast %cst_58 : f32 to vector<4x256xf32>
    %132 = arith.addf %131, %130 : vector<4x256xf32>
    %133 = arith.divf %131, %132 : vector<4x256xf32>
    %134 = vector.shape_cast %133 : vector<4x256xf32> to vector<4x1x1x256xf32>
    %135 = vector.broadcast %134 : vector<4x1x1x256xf32> to vector<4x8x8x256xf32>
    %136 = arith.mulf %104, %135 : vector<4x8x8x256xf32>
    %137 = vector.shape_cast %136 : vector<4x8x8x256xf32> to vector<256x256xf32>
    %138 = arith.truncf %137 : vector<256x256xf32> to vector<256x256xbf16>
    %c0_59 = arith.constant 0 : index
    %c0_60 = arith.constant 0 : index
    %139 = vector.load %arg11[%c0_59, %c0_60] : memref<256x128xbf16, #tpu.memory_space<vmem>>, vector<256x128xbf16>
    %cst_61 = arith.constant dense<0.000000e+00> : vector<256x128xf32>
    %140 = tpu.matmul %138, %139, %cst_61 {dimension_numbers = #tpu.dot_dimension_numbers<[1], [0], [0], [1], [0, 0, 1, 1], [], []>} : vector<256x256xbf16>, vector<256x128xbf16>, vector<256x128xf32> -> vector<256x128xf32>
    %c0_62 = arith.constant 0 : index
    %c0_63 = arith.constant 0 : index
    %141 = vector.load %arg12[%c0_62, %c0_63] : memref<1x128xf32, #tpu.memory_space<vmem>>, vector<1x128xf32>
    %142 = vector.broadcast %141 : vector<1x128xf32> to vector<256x128xf32>
    %143 = arith.addf %140, %142 : vector<256x128xf32>
    %144 = arith.addf %143, %17 : vector<256x128xf32>
    %145 = arith.truncf %144 : vector<256x128xf32> to vector<256x128xbf16>
    %c0_64 = arith.constant 0 : index
    %c0_65 = arith.constant 0 : index
    %146 = vector.load %arg13[%c0_64, %c0_65] : memref<128x256xbf16, #tpu.memory_space<vmem>>, vector<128x256xbf16>
    %cst_66 = arith.constant dense<0.000000e+00> : vector<256x256xf32>
    %147 = tpu.matmul %145, %146, %cst_66 {dimension_numbers = #tpu.dot_dimension_numbers<[1], [0], [0], [1], [0, 0, 1, 1], [], []>} : vector<256x128xbf16>, vector<128x256xbf16>, vector<256x256xf32> -> vector<256x256xf32>
    %c0_67 = arith.constant 0 : index
    %c0_68 = arith.constant 0 : index
    %148 = vector.load %arg14[%c0_67, %c0_68] : memref<1x256xf32, #tpu.memory_space<vmem>>, vector<1x256xf32>
    %149 = vector.broadcast %148 : vector<1x256xf32> to vector<256x256xf32>
    %150 = arith.addf %147, %149 : vector<256x256xf32>
    %151 = arith.negf %150 : vector<256x256xf32>
    %152 = math.exp %151 : vector<256x256xf32>
    %cst_69 = arith.constant 1.000000e+00 : f32
    %153 = vector.broadcast %cst_69 : f32 to vector<256x256xf32>
    %154 = arith.addf %153, %152 : vector<256x256xf32>
    %155 = arith.divf %153, %154 : vector<256x256xf32>
    %156 = arith.mulf %150, %155 : vector<256x256xf32>
    %157 = vector.shape_cast %156 : vector<256x256xf32> to vector<4x64x256xf32>
    %cst_70 = arith.constant dense<0.000000e+00> : vector<4x256xf32>
    %158 = vector.multi_reduction <add>, %157, %cst_70 [1] : vector<4x64x256xf32> to vector<4x256xf32>
    %cst_71 = arith.constant 6.400000e+01 : f32
    %159 = vector.broadcast %cst_71 : f32 to vector<4x256xf32>
    %160 = arith.divf %158, %159 : vector<4x256xf32>
    %c0_72 = arith.constant 0 : index
    %c0_73 = arith.constant 0 : index
    %161 = vector.load %arg15[%c0_72, %c0_73] : memref<4x256xf32, #tpu.memory_space<vmem>>, vector<4x256xf32>
    tpu.vector_store %arg15[%c0_72, %c0_73], %160 {strides = array<i32>} : memref<4x256xf32, #tpu.memory_space<vmem>>, vector<4x256xf32>,
    return
  }
  func.func @transform_0(%arg0: i32) -> (i32, i32, i32, i32) {
    %c0_i32 = arith.constant 0 : i32
    %c0_i32_0 = arith.constant 0 : i32
    %c0_i32_1 = arith.constant 0 : i32
    %c0_i32_2 = arith.constant 0 : i32
    return %arg0, %c0_i32, %c0_i32_0, %c0_i32_1 : i32, i32, i32, i32
  }
  func.func @transform_1(%arg0: i32) -> (i32, i32) {
    %c0_i32 = arith.constant 0 : i32
    %c0_i32_0 = arith.constant 0 : i32
    %c0_i32_1 = arith.constant 0 : i32
    return %c0_i32, %c0_i32_0 : i32, i32
  }
  func.func @transform_2(%arg0: i32) -> (i32, i32) {
    %c0_i32 = arith.constant 0 : i32
    %c0_i32_0 = arith.constant 0 : i32
    %c0_i32_1 = arith.constant 0 : i32
    return %c0_i32, %c0_i32_0 : i32, i32
  }
  func.func @transform_3(%arg0: i32) -> (i32, i32) {
    %c0_i32 = arith.constant 0 : i32
    %c0_i32_0 = arith.constant 0 : i32
    %c0_i32_1 = arith.constant 0 : i32
    return %c0_i32, %c0_i32_0 : i32, i32
  }
  func.func @transform_4(%arg0: i32) -> (i32, i32) {
    %c0_i32 = arith.constant 0 : i32
    %c0_i32_0 = arith.constant 0 : i32
    %c0_i32_1 = arith.constant 0 : i32
    return %c0_i32, %c0_i32_0 : i32, i32
  }
  func.func @transform_5(%arg0: i32) -> (i32, i32, i32) {
    %c0_i32 = arith.constant 0 : i32
    %c0_i32_0 = arith.constant 0 : i32
    %c0_i32_1 = arith.constant 0 : i32
    %c0_i32_2 = arith.constant 0 : i32
    return %c0_i32, %c0_i32_0, %c0_i32_1 : i32, i32, i32
  }
  func.func @transform_6(%arg0: i32) -> (i32, i32) {
    %c0_i32 = arith.constant 0 : i32
    %c0_i32_0 = arith.constant 0 : i32
    %c0_i32_1 = arith.constant 0 : i32
    return %c0_i32, %c0_i32_0 : i32, i32
  }
  func.func @transform_7(%arg0: i32) -> (i32, i32) {
    %c0_i32 = arith.constant 0 : i32
    %c0_i32_0 = arith.constant 0 : i32
    %c0_i32_1 = arith.constant 0 : i32
    return %c0_i32, %c0_i32_0 : i32, i32
  }
  func.func @transform_8(%arg0: i32) -> (i32, i32) {
    %c0_i32 = arith.constant 0 : i32
    %c0_i32_0 = arith.constant 0 : i32
    %c0_i32_1 = arith.constant 0 : i32
    return %c0_i32, %c0_i32_0 : i32, i32
  }
  func.func @transform_9(%arg0: i32) -> (i32, i32) {
    %c0_i32 = arith.constant 0 : i32
    %c0_i32_0 = arith.constant 0 : i32
    %c0_i32_1 = arith.constant 0 : i32
    return %c0_i32, %c0_i32_0 : i32, i32
  }
  func.func @transform_10(%arg0: i32) -> (i32, i32) {
    %c0_i32 = arith.constant 0 : i32
    %c0_i32_0 = arith.constant 0 : i32
    %c0_i32_1 = arith.constant 0 : i32
    return %c0_i32, %c0_i32_0 : i32, i32
  }
  func.func @transform_11(%arg0: i32) -> (i32, i32) {
    %c0_i32 = arith.constant 0 : i32
    %c0_i32_0 = arith.constant 0 : i32
    %c0_i32_1 = arith.constant 0 : i32
    return %c0_i32, %c0_i32_0 : i32, i32
  }
  func.func @transform_12(%arg0: i32) -> (i32, i32) {
    %c0_i32 = arith.constant 0 : i32
    %c0_i32_0 = arith.constant 0 : i32
    %c0_i32_1 = arith.constant 0 : i32
    return %c0_i32, %c0_i32_0 : i32, i32
  }
  func.func @transform_13(%arg0: i32) -> (i32, i32) {
    %c0_i32 = arith.constant 0 : i32
    %c0_i32_0 = arith.constant 0 : i32
    %c0_i32_1 = arith.constant 0 : i32
    return %c0_i32, %c0_i32_0 : i32, i32
  }
  func.func @transform_14(%arg0: i32) -> (i32, i32) {
    %c0_i32 = arith.constant 0 : i32
    %c0_i32_0 = arith.constant 0 : i32
    return %arg0, %c0_i32 : i32, i32
  }
}

module attributes {stable_mosaic.version = 11 : i64} {
  func.func @_fc_kernel(%arg0: i32, %arg1: memref<2x512xbf16, #tpu.memory_space<vmem>>, %arg2: memref<512x384xbf16, #tpu.memory_space<vmem>>, %arg3: memref<1x384xf32, #tpu.memory_space<vmem>>, %arg4: memref<2x384xf32, #tpu.memory_space<vmem>>) attributes {dimension_semantics = [#tpu.dimension_semantics<parallel>], iteration_bounds = array<i64: 3>, scalar_prefetch = 0 : i64, scratch_operands = 0 : i64, tpu.core_type = #tpu.core_type<tc>, window_params = [{pipeline_mode = #tpu.pipeline_mode<synchronous>, transform_indices = @transform_0, window_bounds = array<i64: 2, 512>}, {transform_indices = @transform_1, window_bounds = array<i64: 512, 384>}, {transform_indices = @transform_2, window_bounds = array<i64: 1, 384>}, {transform_indices = @transform_3, window_bounds = array<i64: 2, 384>}]} {
    %c0 = arith.constant 0 : index
    %c0_0 = arith.constant 0 : index
    %0 = vector.load %arg1[%c0, %c0_0] : memref<2x512xbf16, #tpu.memory_space<vmem>>, vector<2x512xbf16>
    %c0_1 = arith.constant 0 : index
    %c0_2 = arith.constant 0 : index
    %1 = vector.load %arg2[%c0_1, %c0_2] : memref<512x384xbf16, #tpu.memory_space<vmem>>, vector<512x384xbf16>
    %cst = arith.constant dense<0.000000e+00> : vector<2x384xf32>
    %2 = tpu.matmul %0, %1, %cst {dimension_numbers = #tpu.dot_dimension_numbers<[1], [0], [0], [1], [0, 0, 1, 1], [], []>} : vector<2x512xbf16>, vector<512x384xbf16>, vector<2x384xf32> -> vector<2x384xf32>
    %c0_3 = arith.constant 0 : index
    %c0_4 = arith.constant 0 : index
    %3 = vector.load %arg3[%c0_3, %c0_4] : memref<1x384xf32, #tpu.memory_space<vmem>>, vector<1x384xf32>
    %4 = vector.broadcast %3 : vector<1x384xf32> to vector<2x384xf32>
    %5 = arith.addf %2, %4 : vector<2x384xf32>
    %c0_5 = arith.constant 0 : index
    %c0_6 = arith.constant 0 : index
    %6 = vector.load %arg4[%c0_5, %c0_6] : memref<2x384xf32, #tpu.memory_space<vmem>>, vector<2x384xf32>
    tpu.vector_store %arg4[%c0_5, %c0_6], %5 {strides = array<i32>} : memref<2x384xf32, #tpu.memory_space<vmem>>, vector<2x384xf32>,
    return
  }
  func.func @transform_0(%arg0: i32) -> (i32, i32) {
    %c0_i32 = arith.constant 0 : i32
    %c0_i32_0 = arith.constant 0 : i32
    %c0_i32_1 = arith.constant 0 : i32
    return %c0_i32, %c0_i32_0 : i32, i32
  }
  func.func @transform_1(%arg0: i32) -> (i32, i32) {
    %c0_i32 = arith.constant 0 : i32
    %c0_i32_0 = arith.constant 0 : i32
    return %c0_i32, %arg0 : i32, i32
  }
  func.func @transform_2(%arg0: i32) -> (i32, i32) {
    %c0_i32 = arith.constant 0 : i32
    %c0_i32_0 = arith.constant 0 : i32
    return %c0_i32, %arg0 : i32, i32
  }
  func.func @transform_3(%arg0: i32) -> (i32, i32) {
    %c0_i32 = arith.constant 0 : i32
    %c0_i32_0 = arith.constant 0 : i32
    return %c0_i32, %arg0 : i32, i32
  }
}

</mosaic_0001>

<bundles_post_ra>
// kernel: efficientnet_two_inputs.3
= control target key start
LH: loop header
LB: loop body
LE: loop exit
PB: predicated region body
PF: predicated region fallthrough
CT: control target
= control target key end

     0   :  { %8 = vsyncpa [#allocation4], 0  ;;  %s2469_s0 = inlined_call_operand.vmem [shape: bf16[2,512], index: 0, kind: input, shape index: {}]   ;;  %s2470_s1 = inlined_call_operand.vmem [shape: bf16[512,1152], index: 1, kind: input, shape index: {}]   ;;  %s2471_s2 = inlined_call_operand.vmem [shape: f32[1,1152], index: 2, kind: input, shape index: {}]   ;;  %s2472_s3 = inlined_call_operand.hbm [shape: f32[2,1152], index: 3, kind: output, shape index: {}]  }
   0x1   :  { %10 = vsyncpa [#allocation4 + $0x1], 0  ;;  %s1974_s12 = smov 0   ;;  %s1976_s13 = smov 0  }
   0x2   :  { %s1978_s14 = smov 0   ;;  %s1980_s15 = smov 0  }
   0x3 LB: > { %s1995_s16 = sadd.s32 4294967295, %s1949_s15   ;;  %s1438_s17 = sadd.s32 4294967294, %s1949_s15   ;;  %s1949_s15 = sphi %s1980_s15, %s2478_s15   ;;  %s1945_s14 = sphi %s1978_s14, %s2477_s14   ;;  %s1941_s13 = sphi %s1976_s13, %s2476_s13   ;;  %s1937_s12 = sphi %s1974_s12, %s2475_s12  }
   0x4   : > { %s1999_s18 = sadd.s32 1, %s1949_s15   ;;  %s44_s19 = sadd.s32 1, %s1945_s14 }
   0x5   : > { %s41_s20 = ssub.s32 %s1949_s15, %s1999_s18  ;;  %p51_p0 = scmp.ne.s32.totalorder %s1945_s14, %s1941_s13 }
   0x6   : > { %p42_p1 = scmp.eq.s32.totalorder %s41_s20, 0  ;;  %p52_p2 = scmp.eq.s32.totalorder %s1949_s15, 0 }
   0x7   : > { %p107_p3 = scmp.eq.s32.totalorder %s1995_s16, 2  ;;  %p112_p4 = scmp.ne.s32.totalorder %s1941_s13, %s1937_s12 }
   0x8   : > { %s2011_s21 = scalar_select %p42_p1, %s1945_s14, %s44_s19  }
   0x9   : > { %p53_p5 = por %p52_p2, %p51_p0  ;;  %p2013_p6 = por %p107_p3, %p51_p0 }
   0xa   : > { %p113_p7 = scmp.eq.s32.totalorder %s1438_s17, 2  ;;  %p1440_p9 = scmp.ge.s32.totalorder %s1949_s15, 3 }
   0xc   : > { %p2017_p8 = por %p113_p7, %p112_p4  ;;  %132 = sbr.rel (%p1440_p9) target bundleno = 96 (0x60), region = 20 }
  0x11   : > { %135 = sbr.rel (!%p53_p5) target bundleno = 96 (0x60), region = 24  ;;  %s137_s24 = sand.u32 (%p53_p5), 1, %s1945_s14  }
  0x12   : > { %s1671_s25 = smul.u32 (%p53_p5), 12, %s1949_s15 }
  0x13   : > { %s1717_s26 = smul.u32 (%p53_p5), 768, %s137_s24 }
  0x14   : > { %s2027_s29 = scalar_lea.vmem (%p53_p5), %s2470_s1, %s1671_s25 }
  0x15   : > { %v157_v0 = vld [vmem:[%s2027_s29] sm:$0xff] (%p53_p5)  ;;  %v161_v2 = vld [vmem:[%s2027_s29 + $0x48] sm:$0xff] (%p53_p5)  ;;  %s2032_s30 = scalar_lea.vmem (%p53_p5), [#allocation2], %s1717_s26  ;;  %v165_v4 = vld [vmem:[%s2027_s29 + $0x90] sm:$0xff] (%p53_p5) }
  0x16   : > { %v159_v1 = vld [vmem:[%s2027_s29 + $0x24] sm:$0xff]  ;;  %158 = vst [vmem:[%s2032_s30] sm:$0xff] %v157_v0  ;;  %162 = vst [vmem:[%s2032_s30 + $0x18] sm:$0xff] %v161_v2  ;;  %v163_v3 = vld [vmem:[%s2027_s29 + $0x6c] sm:$0xff] }
  0x17   : > { %160 = vst [vmem:[%s2032_s30 + $0xc] sm:$0xff] %v159_v1  ;;  %v167_v5 = vld [vmem:[%s2027_s29 + $0xb4] sm:$0xff]  ;;  %164 = vst [vmem:[%s2032_s30 + $0x24] sm:$0xff] %v163_v3  ;;  %v171_v7 = vld [vmem:[%s2027_s29 + $0xfc] sm:$0xff] }
  0x18   : > { %166 = vst [vmem:[%s2032_s30 + $0x30] sm:$0xff] %v165_v4  ;;  %168 = vst [vmem:[%s2032_s30 + $0x3c] sm:$0xff] %v167_v5  ;;  %v169_v6 = vld [vmem:[%s2027_s29 + $0xd8] sm:$0xff]  ;;  %v173_v8 = vld [vmem:[%s2027_s29 + $0x120] sm:$0xff] }
  0x19   : > { %170 = vst [vmem:[%s2032_s30 + $0x48] sm:$0xff] %v169_v6  ;;  %172 = vst [vmem:[%s2032_s30 + $0x54] sm:$0xff] %v171_v7  ;;  %v175_v9 = vld [vmem:[%s2027_s29 + $0x144] sm:$0xff]  ;;  %v179_v11 = vld [vmem:[%s2027_s29 + $0x18c] sm:$0xff] }
  0x1a   : > { %174 = vst [vmem:[%s2032_s30 + $0x60] sm:$0xff] %v173_v8  ;;  %v177_v10 = vld [vmem:[%s2027_s29 + $0x168] sm:$0xff]  ;;  %176 = vst [vmem:[%s2032_s30 + $0x6c] sm:$0xff] %v175_v9  ;;  %v181_v12 = vld [vmem:[%s2027_s29 + $0x1b0] sm:$0xff] }
  0x1b   : > { %178 = vst [vmem:[%s2032_s30 + $0x78] sm:$0xff] %v177_v10  ;;  %180 = vst [vmem:[%s2032_s30 + $0x84] sm:$0xff] %v179_v11  ;;  %v183_v13 = vld [vmem:[%s2027_s29 + $0x1d4] sm:$0xff]  ;;  %v187_v15 = vld [vmem:[%s2027_s29 + $0x21c] sm:$0xff] }
  0x1c   : > { %v185_v14 = vld [vmem:[%s2027_s29 + $0x1f8] sm:$0xff]  ;;  %182 = vst [vmem:[%s2032_s30 + $0x90] sm:$0xff] %v181_v12  ;;  %184 = vst [vmem:[%s2032_s30 + $0x9c] sm:$0xff] %v183_v13  ;;  %v189_v16 = vld [vmem:[%s2027_s29 + $0x240] sm:$0xff] }
  0x1d   : > { %186 = vst [vmem:[%s2032_s30 + $0xa8] sm:$0xff] %v185_v14  ;;  %v191_v17 = vld [vmem:[%s2027_s29 + $0x264] sm:$0xff]  ;;  %188 = vst [vmem:[%s2032_s30 + $0xb4] sm:$0xff] %v187_v15  ;;  %v195_v19 = vld [vmem:[%s2027_s29 + $0x2ac] sm:$0xff] }
  0x1e   : > { %190 = vst [vmem:[%s2032_s30 + $0xc0] sm:$0xff] %v189_v16  ;;  %192 = vst [vmem:[%s2032_s30 + $0xcc] sm:$0xff] %v191_v17  ;;  %v193_v18 = vld [vmem:[%s2027_s29 + $0x288] sm:$0xff]  ;;  %v197_v20 = vld [vmem:[%s2027_s29 + $0x2d0] sm:$0xff] }
  0x1f   : > { %194 = vst [vmem:[%s2032_s30 + $0xd8] sm:$0xff] %v193_v18  ;;  %196 = vst [vmem:[%s2032_s30 + $0xe4] sm:$0xff] %v195_v19  ;;  %v199_v21 = vld [vmem:[%s2027_s29 + $0x2f4] sm:$0xff]  ;;  %v203_v23 = vld [vmem:[%s2027_s29 + $0x33c] sm:$0xff] }
  0x20   : > { %198 = vst [vmem:[%s2032_s30 + $0xf0] sm:$0xff] %v197_v20  ;;  %v201_v22 = vld [vmem:[%s2027_s29 + $0x318] sm:$0xff]  ;;  %200 = vst [vmem:[%s2032_s30 + $0xfc] sm:$0xff] %v199_v21  ;;  %v205_v24 = vld [vmem:[%s2027_s29 + $0x360] sm:$0xff] }
  0x21   : > { %202 = vst [vmem:[%s2032_s30 + $0x108] sm:$0xff] %v201_v22  ;;  %204 = vst [vmem:[%s2032_s30 + $0x114] sm:$0xff] %v203_v23  ;;  %v207_v25 = vld [vmem:[%s2027_s29 + $0x384] sm:$0xff]  ;;  %v211_v27 = vld [vmem:[%s2027_s29 + $0x3cc] sm:$0xff] }
  0x22   : > { %v209_v26 = vld [vmem:[%s2027_s29 + $0x3a8] sm:$0xff]  ;;  %206 = vst [vmem:[%s2032_s30 + $0x120] sm:$0xff] %v205_v24  ;;  %208 = vst [vmem:[%s2032_s30 + $0x12c] sm:$0xff] %v207_v25  ;;  %v213_v28 = vld [vmem:[%s2027_s29 + $0x3f0] sm:$0xff] }
  0x23   : > { %210 = vst [vmem:[%s2032_s30 + $0x138] sm:$0xff] %v209_v26  ;;  %v215_v29 = vld [vmem:[%s2027_s29 + $0x414] sm:$0xff]  ;;  %212 = vst [vmem:[%s2032_s30 + $0x144] sm:$0xff] %v211_v27  ;;  %v219_v31 = vld [vmem:[%s2027_s29 + $0x45c] sm:$0xff] }
  0x24   : > { %214 = vst [vmem:[%s2032_s30 + $0x150] sm:$0xff] %v213_v28  ;;  %216 = vst [vmem:[%s2032_s30 + $0x15c] sm:$0xff] %v215_v29  ;;  %v217_v30 = vld [vmem:[%s2027_s29 + $0x438] sm:$0xff]  ;;  %v221_v32 = vld [vmem:[%s2027_s29 + $0x480] sm:$0xff] }
  0x25   : > { %218 = vst [vmem:[%s2032_s30 + $0x168] sm:$0xff] %v217_v30  ;;  %220 = vst [vmem:[%s2032_s30 + $0x174] sm:$0xff] %v219_v31  ;;  %v223_v33 = vld [vmem:[%s2027_s29 + $0x4a4] sm:$0xff]  ;;  %v227_v35 = vld [vmem:[%s2027_s29 + $0x4ec] sm:$0xff] }
  0x26   : > { %222 = vst [vmem:[%s2032_s30 + $0x180] sm:$0xff] %v221_v32  ;;  %v225_v34 = vld [vmem:[%s2027_s29 + $0x4c8] sm:$0xff]  ;;  %224 = vst [vmem:[%s2032_s30 + $0x18c] sm:$0xff] %v223_v33  ;;  %v229_v36 = vld [vmem:[%s2027_s29 + $0x510] sm:$0xff] }
  0x27   : > { %226 = vst [vmem:[%s2032_s30 + $0x198] sm:$0xff] %v225_v34  ;;  %228 = vst [vmem:[%s2032_s30 + $0x1a4] sm:$0xff] %v227_v35  ;;  %v231_v37 = vld [vmem:[%s2027_s29 + $0x534] sm:$0xff]  ;;  %v235_v39 = vld [vmem:[%s2027_s29 + $0x57c] sm:$0xff] }
  0x28   : > { %v233_v38 = vld [vmem:[%s2027_s29 + $0x558] sm:$0xff]  ;;  %230 = vst [vmem:[%s2032_s30 + $0x1b0] sm:$0xff] %v229_v36  ;;  %232 = vst [vmem:[%s2032_s30 + $0x1bc] sm:$0xff] %v231_v37  ;;  %v237_v40 = vld [vmem:[%s2027_s29 + $0x5a0] sm:$0xff] }
  0x29   : > { %234 = vst [vmem:[%s2032_s30 + $0x1c8] sm:$0xff] %v233_v38  ;;  %v239_v41 = vld [vmem:[%s2027_s29 + $0x5c4] sm:$0xff]  ;;  %236 = vst [vmem:[%s2032_s30 + $0x1d4] sm:$0xff] %v235_v39  ;;  %v243_v43 = vld [vmem:[%s2027_s29 + $0x60c] sm:$0xff] }
  0x2a   : > { %238 = vst [vmem:[%s2032_s30 + $0x1e0] sm:$0xff] %v237_v40  ;;  %240 = vst [vmem:[%s2032_s30 + $0x1ec] sm:$0xff] %v239_v41  ;;  %v241_v42 = vld [vmem:[%s2027_s29 + $0x5e8] sm:$0xff]  ;;  %v245_v44 = vld [vmem:[%s2027_s29 + $0x630] sm:$0xff] }
  0x2b   : > { %242 = vst [vmem:[%s2032_s30 + $0x1f8] sm:$0xff] %v241_v42  ;;  %244 = vst [vmem:[%s2032_s30 + $0x204] sm:$0xff] %v243_v43  ;;  %v247_v45 = vld [vmem:[%s2027_s29 + $0x654] sm:$0xff]  ;;  %v251_v47 = vld [vmem:[%s2027_s29 + $0x69c] sm:$0xff] }
  0x2c   : > { %246 = vst [vmem:[%s2032_s30 + $0x210] sm:$0xff] %v245_v44  ;;  %v249_v46 = vld [vmem:[%s2027_s29 + $0x678] sm:$0xff]  ;;  %248 = vst [vmem:[%s2032_s30 + $0x21c] sm:$0xff] %v247_v45  ;;  %v253_v48 = vld [vmem:[%s2027_s29 + $0x6c0] sm:$0xff] }
  0x2d   : > { %250 = vst [vmem:[%s2032_s30 + $0x228] sm:$0xff] %v249_v46  ;;  %252 = vst [vmem:[%s2032_s30 + $0x234] sm:$0xff] %v251_v47  ;;  %v255_v49 = vld [vmem:[%s2027_s29 + $0x6e4] sm:$0xff]  ;;  %v259_v51 = vld [vmem:[%s2027_s29 + $0x72c] sm:$0xff] }
  0x2e   : > { %v257_v50 = vld [vmem:[%s2027_s29 + $0x708] sm:$0xff]  ;;  %254 = vst [vmem:[%s2032_s30 + $0x240] sm:$0xff] %v253_v48  ;;  %256 = vst [vmem:[%s2032_s30 + $0x24c] sm:$0xff] %v255_v49  ;;  %v261_v52 = vld [vmem:[%s2027_s29 + $0x750] sm:$0xff] }
  0x2f   : > { %258 = vst [vmem:[%s2032_s30 + $0x258] sm:$0xff] %v257_v50  ;;  %v263_v53 = vld [vmem:[%s2027_s29 + $0x774] sm:$0xff]  ;;  %260 = vst [vmem:[%s2032_s30 + $0x264] sm:$0xff] %v259_v51  ;;  %v267_v55 = vld [vmem:[%s2027_s29 + $0x7bc] sm:$0xff] }
  0x30   : > { %262 = vst [vmem:[%s2032_s30 + $0x270] sm:$0xff] %v261_v52  ;;  %264 = vst [vmem:[%s2032_s30 + $0x27c] sm:$0xff] %v263_v53  ;;  %v265_v54 = vld [vmem:[%s2027_s29 + $0x798] sm:$0xff]  ;;  %v269_v56 = vld [vmem:[%s2027_s29 + $0x7e0] sm:$0xff] }
  0x31   : > { %266 = vst [vmem:[%s2032_s30 + $0x288] sm:$0xff] %v265_v54  ;;  %268 = vst [vmem:[%s2032_s30 + $0x294] sm:$0xff] %v267_v55  ;;  %v271_v57 = vld [vmem:[%s2027_s29 + $0x804] sm:$0xff]  ;;  %v275_v59 = vld [vmem:[%s2027_s29 + $0x84c] sm:$0xff] }
  0x32   : > { %270 = vst [vmem:[%s2032_s30 + $0x2a0] sm:$0xff] %v269_v56  ;;  %v273_v58 = vld [vmem:[%s2027_s29 + $0x828] sm:$0xff]  ;;  %272 = vst [vmem:[%s2032_s30 + $0x2ac] sm:$0xff] %v271_v57  ;;  %v277_v60 = vld [vmem:[%s2027_s29 + $0x870] sm:$0xff] }
  0x33   : > { %274 = vst [vmem:[%s2032_s30 + $0x2b8] sm:$0xff] %v273_v58  ;;  %276 = vst [vmem:[%s2032_s30 + $0x2c4] sm:$0xff] %v275_v59  ;;  %v279_v61 = vld [vmem:[%s2027_s29 + $0x894] sm:$0xff]  ;;  %v283_v63 = vld [vmem:[%s2027_s29 + $0x8dc] sm:$0xff] }
  0x34   : > { %v281_v62 = vld [vmem:[%s2027_s29 + $0x8b8] sm:$0xff]  ;;  %278 = vst [vmem:[%s2032_s30 + $0x2d0] sm:$0xff] %v277_v60  ;;  %280 = vst [vmem:[%s2032_s30 + $0x2dc] sm:$0xff] %v279_v61  ;;  %v1442_v0 = vld [vmem:[%s2027_s29 + $0x8] sm:$0xf] }
  0x35   : > { %282 = vst [vmem:[%s2032_s30 + $0x2e8] sm:$0xff] %v281_v62  ;;  %v1444_v1 = vld [vmem:[%s2027_s29 + $0x2c] sm:$0xf]  ;;  %284 = vst [vmem:[%s2032_s30 + $0x2f4] sm:$0xff] %v283_v63  ;;  %v1446_v2 = vld [vmem:[%s2027_s29 + $0x50] sm:$0xf] }
  0x36   : > { %1443 = vst [vmem:[%s2032_s30 + $0x8] sm:$0xf] %v1442_v0  ;;  %1445 = vst [vmem:[%s2032_s30 + $0x14] sm:$0xf] %v1444_v1  ;;  %v1448_v3 = vld [vmem:[%s2027_s29 + $0x74] sm:$0xf] }
  0x37   : > { %v1450_v4 = vld [vmem:[%s2027_s29 + $0x98] sm:$0xf]  ;;  %1447 = vst [vmem:[%s2032_s30 + $0x20] sm:$0xf] %v1446_v2  ;;  %1449 = vst [vmem:[%s2032_s30 + $0x2c] sm:$0xf] %v1448_v3 }
  0x38   : > { %1451 = vst [vmem:[%s2032_s30 + $0x38] sm:$0xf] %v1450_v4  ;;  %v1452_v5 = vld [vmem:[%s2027_s29 + $0xbc] sm:$0xf]  ;;  %v1454_v6 = vld [vmem:[%s2027_s29 + $0xe0] sm:$0xf] }
  0x39   : > { %v1456_v7 = vld [vmem:[%s2027_s29 + $0x104] sm:$0xf]  ;;  %1453 = vst [vmem:[%s2032_s30 + $0x44] sm:$0xf] %v1452_v5  ;;  %1455 = vst [vmem:[%s2032_s30 + $0x50] sm:$0xf] %v1454_v6 }
  0x3a   : > { %1457 = vst [vmem:[%s2032_s30 + $0x5c] sm:$0xf] %v1456_v7  ;;  %v1458_v8 = vld [vmem:[%s2027_s29 + $0x128] sm:$0xf]  ;;  %v1460_v9 = vld [vmem:[%s2027_s29 + $0x14c] sm:$0xf] }
  0x3b   : > { %v1462_v10 = vld [vmem:[%s2027_s29 + $0x170] sm:$0xf]  ;;  %1459 = vst [vmem:[%s2032_s30 + $0x68] sm:$0xf] %v1458_v8  ;;  %1461 = vst [vmem:[%s2032_s30 + $0x74] sm:$0xf] %v1460_v9 }
  0x3c   : > { %1463 = vst [vmem:[%s2032_s30 + $0x80] sm:$0xf] %v1462_v10  ;;  %v1464_v11 = vld [vmem:[%s2027_s29 + $0x194] sm:$0xf]  ;;  %v1466_v12 = vld [vmem:[%s2027_s29 + $0x1b8] sm:$0xf] }
  0x3d   : > { %v1468_v13 = vld [vmem:[%s2027_s29 + $0x1dc] sm:$0xf]  ;;  %1465 = vst [vmem:[%s2032_s30 + $0x8c] sm:$0xf] %v1464_v11  ;;  %1467 = vst [vmem:[%s2032_s30 + $0x98] sm:$0xf] %v1466_v12 }
  0x3e   : > { %1469 = vst [vmem:[%s2032_s30 + $0xa4] sm:$0xf] %v1468_v13  ;;  %v1470_v14 = vld [vmem:[%s2027_s29 + $0x200] sm:$0xf]  ;;  %v1472_v15 = vld [vmem:[%s2027_s29 + $0x224] sm:$0xf] }
  0x3f   : > { %v1474_v16 = vld [vmem:[%s2027_s29 + $0x248] sm:$0xf]  ;;  %1471 = vst [vmem:[%s2032_s30 + $0xb0] sm:$0xf] %v1470_v14  ;;  %1473 = vst [vmem:[%s2032_s30 + $0xbc] sm:$0xf] %v1472_v15 }
  0x40   : > { %1475 = vst [vmem:[%s2032_s30 + $0xc8] sm:$0xf] %v1474_v16  ;;  %v1476_v17 = vld [vmem:[%s2027_s29 + $0x26c] sm:$0xf]  ;;  %v1478_v18 = vld [vmem:[%s2027_s29 + $0x290] sm:$0xf] }
  0x41   : > { %v1480_v19 = vld [vmem:[%s2027_s29 + $0x2b4] sm:$0xf]  ;;  %1477 = vst [vmem:[%s2032_s30 + $0xd4] sm:$0xf] %v1476_v17  ;;  %1479 = vst [vmem:[%s2032_s30 + $0xe0] sm:$0xf] %v1478_v18 }
  0x42   : > { %1481 = vst [vmem:[%s2032_s30 + $0xec] sm:$0xf] %v1480_v19  ;;  %v1482_v20 = vld [vmem:[%s2027_s29 + $0x2d8] sm:$0xf]  ;;  %v1484_v21 = vld [vmem:[%s2027_s29 + $0x2fc] sm:$0xf] }
  0x43   : > { %v1486_v22 = vld [vmem:[%s2027_s29 + $0x320] sm:$0xf]  ;;  %1483 = vst [vmem:[%s2032_s30 + $0xf8] sm:$0xf] %v1482_v20  ;;  %1485 = vst [vmem:[%s2032_s30 + $0x104] sm:$0xf] %v1484_v21 }
  0x44   : > { %1487 = vst [vmem:[%s2032_s30 + $0x110] sm:$0xf] %v1486_v22  ;;  %v1488_v23 = vld [vmem:[%s2027_s29 + $0x344] sm:$0xf]  ;;  %v1490_v24 = vld [vmem:[%s2027_s29 + $0x368] sm:$0xf] }
  0x45   : > { %v1492_v25 = vld [vmem:[%s2027_s29 + $0x38c] sm:$0xf]  ;;  %1489 = vst [vmem:[%s2032_s30 + $0x11c] sm:$0xf] %v1488_v23  ;;  %1491 = vst [vmem:[%s2032_s30 + $0x128] sm:$0xf] %v1490_v24 }
  0x46   : > { %1493 = vst [vmem:[%s2032_s30 + $0x134] sm:$0xf] %v1492_v25  ;;  %v1494_v26 = vld [vmem:[%s2027_s29 + $0x3b0] sm:$0xf]  ;;  %v1496_v27 = vld [vmem:[%s2027_s29 + $0x3d4] sm:$0xf] }
  0x47   : > { %v1498_v28 = vld [vmem:[%s2027_s29 + $0x3f8] sm:$0xf]  ;;  %1495 = vst [vmem:[%s2032_s30 + $0x140] sm:$0xf] %v1494_v26  ;;  %1497 = vst [vmem:[%s2032_s30 + $0x14c] sm:$0xf] %v1496_v27 }
  0x48   : > { %1499 = vst [vmem:[%s2032_s30 + $0x158] sm:$0xf] %v1498_v28  ;;  %v1500_v29 = vld [vmem:[%s2027_s29 + $0x41c] sm:$0xf]  ;;  %v1502_v30 = vld [vmem:[%s2027_s29 + $0x440] sm:$0xf] }
  0x49   : > { %v1504_v31 = vld [vmem:[%s2027_s29 + $0x464] sm:$0xf]  ;;  %1501 = vst [vmem:[%s2032_s30 + $0x164] sm:$0xf] %v1500_v29  ;;  %1503 = vst [vmem:[%s2032_s30 + $0x170] sm:$0xf] %v1502_v30 }
  0x4a   : > { %1505 = vst [vmem:[%s2032_s30 + $0x17c] sm:$0xf] %v1504_v31  ;;  %v1506_v32 = vld [vmem:[%s2027_s29 + $0x488] sm:$0xf]  ;;  %v1508_v33 = vld [vmem:[%s2027_s29 + $0x4ac] sm:$0xf] }
  0x4b   : > { %v1510_v34 = vld [vmem:[%s2027_s29 + $0x4d0] sm:$0xf]  ;;  %1507 = vst [vmem:[%s2032_s30 + $0x188] sm:$0xf] %v1506_v32  ;;  %1509 = vst [vmem:[%s2032_s30 + $0x194] sm:$0xf] %v1508_v33 }
  0x4c   : > { %1511 = vst [vmem:[%s2032_s30 + $0x1a0] sm:$0xf] %v1510_v34  ;;  %v1512_v35 = vld [vmem:[%s2027_s29 + $0x4f4] sm:$0xf]  ;;  %v1514_v36 = vld [vmem:[%s2027_s29 + $0x518] sm:$0xf] }
  0x4d   : > { %v1516_v37 = vld [vmem:[%s2027_s29 + $0x53c] sm:$0xf]  ;;  %1513 = vst [vmem:[%s2032_s30 + $0x1ac] sm:$0xf] %v1512_v35  ;;  %1515 = vst [vmem:[%s2032_s30 + $0x1b8] sm:$0xf] %v1514_v36 }
  0x4e   : > { %1517 = vst [vmem:[%s2032_s30 + $0x1c4] sm:$0xf] %v1516_v37  ;;  %v1518_v38 = vld [vmem:[%s2027_s29 + $0x560] sm:$0xf]  ;;  %v1520_v39 = vld [vmem:[%s2027_s29 + $0x584] sm:$0xf] }
  0x4f   : > { %v1522_v40 = vld [vmem:[%s2027_s29 + $0x5a8] sm:$0xf]  ;;  %1519 = vst [vmem:[%s2032_s30 + $0x1d0] sm:$0xf] %v1518_v38  ;;  %1521 = vst [vmem:[%s2032_s30 + $0x1dc] sm:$0xf] %v1520_v39 }
  0x50   : > { %1523 = vst [vmem:[%s2032_s30 + $0x1e8] sm:$0xf] %v1522_v40  ;;  %v1524_v41 = vld [vmem:[%s2027_s29 + $0x5cc] sm:$0xf]  ;;  %v1526_v42 = vld [vmem:[%s2027_s29 + $0x5f0] sm:$0xf] }
  0x51   : > { %v1528_v43 = vld [vmem:[%s2027_s29 + $0x614] sm:$0xf]  ;;  %1525 = vst [vmem:[%s2032_s30 + $0x1f4] sm:$0xf] %v1524_v41  ;;  %1527 = vst [vmem:[%s2032_s30 + $0x200] sm:$0xf] %v1526_v42 }
  0x52   : > { %1529 = vst [vmem:[%s2032_s30 + $0x20c] sm:$0xf] %v1528_v43  ;;  %v1530_v44 = vld [vmem:[%s2027_s29 + $0x638] sm:$0xf]  ;;  %v1532_v45 = vld [vmem:[%s2027_s29 + $0x65c] sm:$0xf] }
  0x53   : > { %v1534_v46 = vld [vmem:[%s2027_s29 + $0x680] sm:$0xf]  ;;  %1531 = vst [vmem:[%s2032_s30 + $0x218] sm:$0xf] %v1530_v44  ;;  %1533 = vst [vmem:[%s2032_s30 + $0x224] sm:$0xf] %v1532_v45 }
  0x54   : > { %1535 = vst [vmem:[%s2032_s30 + $0x230] sm:$0xf] %v1534_v46  ;;  %v1536_v47 = vld [vmem:[%s2027_s29 + $0x6a4] sm:$0xf]  ;;  %v1538_v48 = vld [vmem:[%s2027_s29 + $0x6c8] sm:$0xf] }
  0x55   : > { %v1540_v49 = vld [vmem:[%s2027_s29 + $0x6ec] sm:$0xf]  ;;  %1537 = vst [vmem:[%s2032_s30 + $0x23c] sm:$0xf] %v1536_v47  ;;  %1539 = vst [vmem:[%s2032_s30 + $0x248] sm:$0xf] %v1538_v48 }
  0x56   : > { %1541 = vst [vmem:[%s2032_s30 + $0x254] sm:$0xf] %v1540_v49  ;;  %v1542_v50 = vld [vmem:[%s2027_s29 + $0x710] sm:$0xf]  ;;  %v1544_v51 = vld [vmem:[%s2027_s29 + $0x734] sm:$0xf] }
  0x57   : > { %v1546_v52 = vld [vmem:[%s2027_s29 + $0x758] sm:$0xf]  ;;  %1543 = vst [vmem:[%s2032_s30 + $0x260] sm:$0xf] %v1542_v50  ;;  %1545 = vst [vmem:[%s2032_s30 + $0x26c] sm:$0xf] %v1544_v51 }
  0x58   : > { %1547 = vst [vmem:[%s2032_s30 + $0x278] sm:$0xf] %v1546_v52  ;;  %v1548_v53 = vld [vmem:[%s2027_s29 + $0x77c] sm:$0xf]  ;;  %v1550_v54 = vld [vmem:[%s2027_s29 + $0x7a0] sm:$0xf] }
  0x59   : > { %v1552_v55 = vld [vmem:[%s2027_s29 + $0x7c4] sm:$0xf]  ;;  %1549 = vst [vmem:[%s2032_s30 + $0x284] sm:$0xf] %v1548_v53  ;;  %1551 = vst [vmem:[%s2032_s30 + $0x290] sm:$0xf] %v1550_v54 }
  0x5a   : > { %1553 = vst [vmem:[%s2032_s30 + $0x29c] sm:$0xf] %v1552_v55  ;;  %v1554_v56 = vld [vmem:[%s2027_s29 + $0x7e8] sm:$0xf]  ;;  %v1556_v57 = vld [vmem:[%s2027_s29 + $0x80c] sm:$0xf] }
  0x5b   : > { %v1558_v58 = vld [vmem:[%s2027_s29 + $0x830] sm:$0xf]  ;;  %1555 = vst [vmem:[%s2032_s30 + $0x2a8] sm:$0xf] %v1554_v56  ;;  %1557 = vst [vmem:[%s2032_s30 + $0x2b4] sm:$0xf] %v1556_v57 }
  0x5c   : > { %1559 = vst [vmem:[%s2032_s30 + $0x2c0] sm:$0xf] %v1558_v58  ;;  %v1560_v59 = vld [vmem:[%s2027_s29 + $0x854] sm:$0xf]  ;;  %v1562_v60 = vld [vmem:[%s2027_s29 + $0x878] sm:$0xf] }
  0x5d   : > { %v1564_v61 = vld [vmem:[%s2027_s29 + $0x89c] sm:$0xf]  ;;  %1561 = vst [vmem:[%s2032_s30 + $0x2cc] sm:$0xf] %v1560_v59  ;;  %1563 = vst [vmem:[%s2032_s30 + $0x2d8] sm:$0xf] %v1562_v60 }
  0x5e   : > { %1565 = vst [vmem:[%s2032_s30 + $0x2e4] sm:$0xf] %v1564_v61  ;;  %v1566_v62 = vld [vmem:[%s2027_s29 + $0x8c0] sm:$0xf]  ;;  %v1568_v63 = vld [vmem:[%s2027_s29 + $0x8e4] sm:$0xf] }
  0x5f   : > { %1567 = vst [vmem:[%s2032_s30 + $0x2f0] sm:$0xf] %v1566_v62  ;;  %1569 = vst [vmem:[%s2032_s30 + $0x2fc] sm:$0xf] %v1568_v63 }
  0x60 PF: > { %p1570_p10 = scmp.ge.s32.totalorder %s1949_s15, 1  ;;  %p433_p11 = scmp.lt.s32.totalorder %s1949_s15, 4 }
  0x62   : > { %p434_p12 = pnand %p1570_p10, %p433_p11 }
  0x63   : > { %s2290_s4 = sand.u32 (!%p434_p12), 1, %s1941_s13   ;;  %s468_s9 = smul.u32 (!%p434_p12), 3, %s1995_s16 }
  0x64   : > { %437 = sbr.rel (%p434_p12) target bundleno = 421 (0x1a5), region = 54  ;;  %s1346_s29 = scalar_lea.sflag (!%p434_p12), [#allocation4], %s2290_s4 }
  0x65   : > { %s1718_s7 = smul.u32 (!%p434_p12), 768, %s2290_s4  ;;  %p469_p13 = scmp.lt.s32.totalorder (!%p434_p12), %s468_s9, 8 }
  0x66   : > { %s1719_s19 = smul.u32 (!%p434_p12), 6, %s2290_s4  ;;  %s1953_s5 = smov (!%p434_p12), [#allocation3]  }
  0x67   : > { %s2300_s8 = scalar_lea.vmem (!%p434_p12), [#allocation2], %s1718_s7  ;;  %s1672_s20 = smul.u32 (!%p434_p12), 96, %s1995_s16 }
  0x68   : > { %s466_s24 = scalar_lea.vmem (!%p434_p12), [#allocation3], %s1719_s19  ;;  %s1893_s6 = sshll.u32 (!%p434_p12), %s1953_s5, 4  ;;  %s1894_s6 = int_to_ptr.vmem [resolvable:$false] %s1893_s6 }
  0x69   : > { %v2295_v0 = vld.sshfl [vmem:[%s2469_s0] sm:$0x33 pattern:$0x75316420]  ;;  %v606_v1 = vlaneseq  ;;  %v1951_v3 = vmov 1966171168   ;;  %s1358_s28 = scalar_lea.hbm %s2472_s3, %s1672_s20 }
  0x6a   : > { %v631_v4 = vunpack.c.l.s4 %v1951_v3  ;;  %v1761_v5 = vld [vmem:[%s2300_s8 + $0xac] ss:$12 sps:$4 sm:$0xff]   ;;  %v629_v6 = vcombine.high %v2295_v0, %v2295_v0  ;;  %v1765_v9 = vld [vmem:[%s2300_s8 + $0xa8] ss:$12 sps:$4 sm:$0xff]   ;;  %v1771_v14 = vld [vmem:[%s2300_s8 + $0x90] ss:$12 sps:$4 sm:$0xff]  }
  0x6b   : > { %v2298_v2 = vshrl.u32 %v606_v1, 7  ;;  %v1763_v8 = vld [vmem:[%s2300_s8 + $0x22c] ss:$12 sps:$4 sm:$0xff]   ;;  %1162 = vmatprep.subr.bf16.mxu0 %v1761_v5  ;;  %v1766_v10 = vld [vmem:[%s2300_s8 + $0x228] ss:$12 sps:$4 sm:$0xff]   ;;  %s2480_s9 = smov (!%p469_p13, %s468_s9), 8 }
  0x6c   : > { %v632_v7 = vunpack.c.0.s8 %v631_v4  ;;  %1203 = vmatprep.subr.bf16.mxu1 %v1763_v8  ;;  %v1767_v12 = vld [vmem:[%s2300_s8 + $0x94] ss:$12 sps:$4 sm:$0xff]   ;;  %1163 = vmatpush1.bf16.msra.mxu0 %v1765_v9  ;;  %v1772_v16 = vld [vmem:[%s2300_s8 + $0x210] ss:$12 sps:$4 sm:$0xff]   ;;  %v1777_v20 = vld [vmem:[%s2300_s8 + $0x78] ss:$12 sps:$4 sm:$0xff]   ;;  %s471_s17 = scalar_lea.vmem %s2471_s2, %s2480_s9 }
  0x6d   : > { %1204 = vmatpush1.bf16.msra.mxu1 %v1766_v10  ;;  %v1769_v13 = vld [vmem:[%s2300_s8 + $0x214] ss:$12 sps:$4 sm:$0xff]   ;;  %1164 = vmatprep.subr.bf16.mxu0 %v1767_v12  ;;  %v1773_v17 = vld [vmem:[%s2300_s8 + $0x7c] ss:$12 sps:$4 sm:$0xff]   ;;  %v1778_v21 = vld [vmem:[%s2300_s8 + $0x1f8] ss:$12 sps:$4 sm:$0xff]  }
  0x6e   : > { %v2309_v11 = vsub.s32 %v632_v7, %v2298_v2  ;;  %1205 = vmatprep.subr.bf16.mxu1 %v1769_v13  ;;  %v1775_v19 = vld [vmem:[%s2300_s8 + $0x1fc] ss:$12 sps:$4 sm:$0xff]   ;;  %v1779_v22 = vld [vmem:[%s2300_s8 + $0x64] ss:$12 sps:$4 sm:$0xff]   ;;  %v1783_v24 = vld [vmem:[%s2300_s8 + $0x60] ss:$12 sps:$4 sm:$0xff]  }
  0x6f   : > { %v1781_v23 = vld [vmem:[%s2300_s8 + $0x1e4] ss:$12 sps:$4 sm:$0xff]   ;;  %v1784_v25 = vld [vmem:[%s2300_s8 + $0x1e0] ss:$12 sps:$4 sm:$0xff]   ;;  %v1789_v28 = vld [vmem:[%s2300_s8 + $0x48] ss:$12 sps:$4 sm:$0xff]  }
  0x70   : > { %v2315_v15 = vrot.slane %v629_v6, %v2309_v11  ;;  %1165 = vmatpush1.bf16.msra.mxu0 %v1771_v14  ;;  %v1785_v26 = vld [vmem:[%s2300_s8 + $0x4c] ss:$12 sps:$4 sm:$0xff]   ;;  %v1790_v29 = vld [vmem:[%s2300_s8 + $0x1c8] ss:$12 sps:$4 sm:$0xff]   ;;  %v1795_v32 = vld [vmem:[%s2300_s8 + $0x30] ss:$12 sps:$4 sm:$0xff]   ;;  %v2382_v13 = vrot.slane %v2295_v0, %v2309_v11 }
  0x71   : > { %1206 = vmatpush1.bf16.msra.mxu1 %v1772_v16  ;;  %1166 = vmatprep.subr.bf16.mxu0 %v1773_v17  ;;  %v1787_v27 = vld [vmem:[%s2300_s8 + $0x1cc] ss:$12 sps:$4 sm:$0xff]   ;;  %v1791_v30 = vld [vmem:[%s2300_s8 + $0x34] ss:$12 sps:$4 sm:$0xff]   ;;  %v1796_v33 = vld [vmem:[%s2300_s8 + $0x1b0] ss:$12 sps:$4 sm:$0xff]  }
  0x72   : > { %1194 = vmatprep.mubr.bf16.mxu0 %v2315_v15  ;;  %v2322_v18 = vcombine.high %v2315_v15, %v2315_v15  ;;  %1207 = vmatprep.subr.bf16.mxu1 %v1775_v19  ;;  %v1793_v31 = vld [vmem:[%s2300_s8 + $0x1b4] ss:$12 sps:$4 sm:$0xff]   ;;  %v1797_v34 = vld [vmem:[%s2300_s8 + $0x1c] ss:$12 sps:$4 sm:$0xff]   ;;  %v1801_v36 = vld [vmem:[%s2300_s8 + $0x18] ss:$12 sps:$4 sm:$0xff]   ;;  %v2389_v19 = vcombine.high %v2382_v13, %v2382_v13 }
  0x73   : > { %v1799_v35 = vld [vmem:[%s2300_s8 + $0x19c] ss:$12 sps:$4 sm:$0xff]   ;;  %v1802_v37 = vld [vmem:[%s2300_s8 + $0x198] ss:$12 sps:$4 sm:$0xff]   ;;  %v1807_v40 = vld [vmem:[%s2300_s8] ss:$12 sps:$4 sm:$0xff]  }
  0x74   : > { %1235 = vmatprep.mubr.bf16.mxu1 %v2322_v18  ;;  %1167 = vmatpush1.bf16.msra.mxu0 %v1777_v20  ;;  %v1803_v38 = vld [vmem:[%s2300_s8 + $0x4] ss:$12 sps:$4 sm:$0xff]   ;;  %v1808_v41 = vld [vmem:[%s2300_s8 + $0x180] ss:$12 sps:$4 sm:$0xff]   ;;  %v1813_v44 = vld [vmem:[%s2300_s8 + $0x168] ss:$12 sps:$4 sm:$0xff]  }
  0x75   : > { %1208 = vmatpush1.bf16.msra.mxu1 %v1778_v21  ;;  %1168 = vmatprep.subr.bf16.mxu0 %v1779_v22  ;;  %v1805_v39 = vld [vmem:[%s2300_s8 + $0x184] ss:$12 sps:$4 sm:$0xff]   ;;  %v1809_v42 = vld [vmem:[%s2300_s8 + $0x16c] ss:$12 sps:$4 sm:$0xff]   ;;  %v1814_v45 = vld [vmem:[%s2300_s8 + $0x2e8] ss:$12 sps:$4 sm:$0xff]  }
  0x76   : > { %1209 = vmatprep.subr.bf16.mxu1 %v1781_v23  ;;  %v1811_v43 = vld [vmem:[%s2300_s8 + $0x2ec] ss:$12 sps:$4 sm:$0xff]   ;;  %v1815_v46 = vld [vmem:[%s2300_s8 + $0x154] ss:$12 sps:$4 sm:$0xff]   ;;  %v1819_v48 = vld [vmem:[%s2300_s8 + $0x150] ss:$12 sps:$4 sm:$0xff]  }
  0x77   : > { %v1817_v47 = vld [vmem:[%s2300_s8 + $0x2d4] ss:$12 sps:$4 sm:$0xff]   ;;  %v1820_v49 = vld [vmem:[%s2300_s8 + $0x2d0] ss:$12 sps:$4 sm:$0xff]   ;;  %v1825_v52 = vld [vmem:[%s2300_s8 + $0x138] ss:$12 sps:$4 sm:$0xff]  }
  0x78   : > { %1169 = vmatpush1.bf16.msra.mxu0 %v1783_v24  ;;  %v1821_v50 = vld [vmem:[%s2300_s8 + $0x13c] ss:$12 sps:$4 sm:$0xff]   ;;  %v1826_v53 = vld [vmem:[%s2300_s8 + $0x2b8] ss:$12 sps:$4 sm:$0xff]   ;;  %v1831_v56 = vld [vmem:[%s2300_s8 + $0x120] ss:$12 sps:$4 sm:$0xff]  }
  0x79   : > { %1210 = vmatpush1.bf16.msra.mxu1 %v1784_v25  ;;  %1170 = vmatprep.subr.bf16.mxu0 %v1785_v26  ;;  %v1823_v51 = vld [vmem:[%s2300_s8 + $0x2bc] ss:$12 sps:$4 sm:$0xff]   ;;  %v1827_v54 = vld [vmem:[%s2300_s8 + $0x124] ss:$12 sps:$4 sm:$0xff]   ;;  %v1832_v57 = vld [vmem:[%s2300_s8 + $0x2a0] ss:$12 sps:$4 sm:$0xff]  }
  0x7a   : > { %1211 = vmatprep.subr.bf16.mxu1 %v1787_v27  ;;  %v1829_v55 = vld [vmem:[%s2300_s8 + $0x2a4] ss:$12 sps:$4 sm:$0xff]   ;;  %v1833_v58 = vld [vmem:[%s2300_s8 + $0x10c] ss:$12 sps:$4 sm:$0xff]   ;;  %v1837_v60 = vld [vmem:[%s2300_s8 + $0x108] ss:$12 sps:$4 sm:$0xff]  }
  0x7b   : > { %v1835_v59 = vld [vmem:[%s2300_s8 + $0x28c] ss:$12 sps:$4 sm:$0xff]   ;;  %v1838_v61 = vld [vmem:[%s2300_s8 + $0x288] ss:$12 sps:$4 sm:$0xff]   ;;  %v1843_v1 = vld [vmem:[%s2300_s8 + $0xf0] ss:$12 sps:$4 sm:$0xff]  }
  0x7c   : > { %1171 = vmatpush1.bf16.msra.mxu0 %v1789_v28  ;;  %v1839_v62 = vld [vmem:[%s2300_s8 + $0xf4] ss:$12 sps:$4 sm:$0xff]   ;;  %v1844_v3 = vld [vmem:[%s2300_s8 + $0x270] ss:$12 sps:$4 sm:$0xff]   ;;  %v1849_v6 = vld [vmem:[%s2300_s8 + $0xd8] ss:$12 sps:$4 sm:$0xff]  }
  0x7d   : > { %1212 = vmatpush1.bf16.msra.mxu1 %v1790_v29  ;;  %1172 = vmatprep.subr.bf16.mxu0 %v1791_v30  ;;  %v1841_v63 = vld [vmem:[%s2300_s8 + $0x274] ss:$12 sps:$4 sm:$0xff]   ;;  %v1845_v4 = vld [vmem:[%s2300_s8 + $0xdc] ss:$12 sps:$4 sm:$0xff]   ;;  %v1850_v7 = vld [vmem:[%s2300_s8 + $0x258] ss:$12 sps:$4 sm:$0xff]  }
  0x7e   : > { %1213 = vmatprep.subr.bf16.mxu1 %v1793_v31  ;;  %v1847_v5 = vld [vmem:[%s2300_s8 + $0x25c] ss:$12 sps:$4 sm:$0xff]   ;;  %v1851_v8 = vld [vmem:[%s2300_s8 + $0xc4] ss:$12 sps:$4 sm:$0xff]   ;;  %v1855_v10 = vld [vmem:[%s2300_s8 + $0xc0] ss:$12 sps:$4 sm:$0xff]  }
  0x7f   : > { %v1853_v9 = vld [vmem:[%s2300_s8 + $0x244] ss:$12 sps:$4 sm:$0xff]   ;;  %v1856_v12 = vld [vmem:[%s2300_s8 + $0x240] ss:$12 sps:$4 sm:$0xff]   ;;  %v1869_v27 = vld [vmem:[%s2300_s8 + $0x128] ss:$12 sps:$4 sm:$0xff]  }
  0x80   : > { %1173 = vmatpush1.bf16.msra.mxu0 %v1795_v32  ;;  %v1857_v14 = vld [vmem:[%s2300_s8 + $0x170] ss:$12 sps:$4 sm:$0xff]   ;;  %v1861_v0 = vld [vmem:[%s2300_s8 + $0x158] ss:$12 sps:$4 sm:$0xff]   ;;  %v1865_v23 = vld [vmem:[%s2300_s8 + $0x140] ss:$12 sps:$4 sm:$0xff]  }
  0x81   : > { %1214 = vmatpush1.bf16.msra.mxu1 %v1796_v33  ;;  %1174 = vmatprep.subr.bf16.mxu0 %v1797_v34  ;;  %v1858_v16 = vld [vmem:[%s2300_s8 + $0x2f0] ss:$12 sps:$4 sm:$0xff]   ;;  %v1862_v11 = vld [vmem:[%s2300_s8 + $0x2d8] ss:$12 sps:$4 sm:$0xff]   ;;  %v1866_v24 = vld [vmem:[%s2300_s8 + $0x2c0] ss:$12 sps:$4 sm:$0xff]  }
  0x82   : > { %1215 = vmatprep.subr.bf16.mxu1 %v1799_v35  ;;  %v1859_v17 = vld [vmem:[%s2300_s8 + $0xb0] ss:$12 sps:$4 sm:$0xff]   ;;  %v1863_v21 = vld [vmem:[%s2300_s8 + $0x98] ss:$12 sps:$4 sm:$0xff]   ;;  %v1867_v25 = vld [vmem:[%s2300_s8 + $0x80] ss:$12 sps:$4 sm:$0xff]  }
  0x83   : > { %v1860_v20 = vld [vmem:[%s2300_s8 + $0x230] ss:$12 sps:$4 sm:$0xff]   ;;  %v1864_v22 = vld [vmem:[%s2300_s8 + $0x218] ss:$12 sps:$4 sm:$0xff]   ;;  %v1868_v26 = vld [vmem:[%s2300_s8 + $0x200] ss:$12 sps:$4 sm:$0xff]  }
  0x84   : > { %1175 = vmatpush1.bf16.msra.mxu0 %v1801_v36  ;;  %v1870_v28 = vld [vmem:[%s2300_s8 + $0x2a8] ss:$12 sps:$4 sm:$0xff]   ;;  %v1875_v31 = vld [vmem:[%s2300_s8 + $0x50] ss:$12 sps:$4 sm:$0xff]   ;;  %v1877_v33 = vld [vmem:[%s2300_s8 + $0xf8] ss:$12 sps:$4 sm:$0xff]  }
  0x85   : > { %1216 = vmatpush1.bf16.msra.mxu1 %v1802_v37  ;;  %1176 = vmatprep.subr.bf16.mxu0 %v1803_v38  ;;  %v1871_v29 = vld [vmem:[%s2300_s8 + $0x68] ss:$12 sps:$4 sm:$0xff]   ;;  %v1876_v32 = vld [vmem:[%s2300_s8 + $0x1d0] ss:$12 sps:$4 sm:$0xff]   ;;  %v1878_v34 = vld [vmem:[%s2300_s8 + $0x278] ss:$12 sps:$4 sm:$0xff]  }
  0x86   : > { %1217 = vmatprep.subr.bf16.mxu1 %v1805_v39  ;;  %v1872_v30 = vld [vmem:[%s2300_s8 + $0x1e8] ss:$12 sps:$4 sm:$0xff]   ;;  %v1879_v35 = vld [vmem:[%s2300_s8 + $0x38] ss:$12 sps:$4 sm:$0xff]   ;;  %v1881_v37 = vld [vmem:[%s2300_s8 + $0xe0] ss:$12 sps:$4 sm:$0xff]  }
  0x87   : > { %v1880_v36 = vld [vmem:[%s2300_s8 + $0x1b8] ss:$12 sps:$4 sm:$0xff]   ;;  %v1882_v38 = vld [vmem:[%s2300_s8 + $0x260] ss:$12 sps:$4 sm:$0xff]   ;;  %s1360_s25 = sshll.u32 %s466_s24, 4  ;;  %s1895_s16 = scalar_lea.vmem %s1894_s6, 192  ;;  %s1361_s25 = int_to_ptr.vmem [resolvable:$true] %s1360_s25 }
  0x88   : > { %1177 = vmatpush1.bf16.msra.mxu0 %v1807_v40  ;;  %v1883_v39 = vld [vmem:[%s2300_s8 + $0x20] ss:$12 sps:$4 sm:$0xff]   ;;  %s1889_s30 = scalar_lea.vmem %s1361_s25, 96  ;;  %p1896_p3 = scmp.lt.s32.totalorder %s1361_s25, %s1894_s6 }
  0x89   : > { %1218 = vmatpush1.bf16.msra.mxu1 %v1808_v41  ;;  %1178 = vmatprep.subr.bf16.mxu0 %v1809_v42  ;;  %v1884_v40 = vld [vmem:[%s2300_s8 + $0x1a0] ss:$12 sps:$4 sm:$0xff]   ;;  %v1885_v41 = vld [vmem:[%s2300_s8 + $0xc8] ss:$12 sps:$4 sm:$0xff]   ;;  %p1890_p0 = scmp.ne.s32.totalorder %s1361_s25, %s1889_s30  ;;  %p1897_p4 = scmp.lt.s32.totalorder %s1895_s16, %s1889_s30 }
  0x8a   : > { %1219 = vmatprep.subr.bf16.mxu1 %v1811_v43  ;;  %v1886_v42 = vld [vmem:[%s2300_s8 + $0x248] ss:$12 sps:$4 sm:$0xff]  }
  0x8b   : > { %v1887_v43 = vld [vmem:[%s2300_s8 + $0x8] ss:$12 sps:$4 sm:$0xff]   ;;  %p1891_p1 = pnand %p1890_p0, %p2013_p6  ;;  %p1898_p5 = por %p1897_p4, %p1896_p3 }
  0x8c   : > { %1179 = vmatpush2.bf16.msra.mxu0 %v1813_v44  ;;  %v1888_v44 = vld [vmem:[%s2300_s8 + $0x188] ss:$12 sps:$4 sm:$0xff]  }
  0x8d   : > { %1220 = vmatpush2.bf16.msra.mxu1 %v1814_v45  ;;  %1180 = vmatprep.subr.bf16.mxu0 %v1815_v46  ;;  %p1892_p2 = pneg %p1891_p1 }
  0x8e   : > { %1221 = vmatprep.subr.bf16.mxu1 %v1817_v47 }
  0x8f   : > { %p1899_p7 = pnand %p1898_p5, %p1892_p2 }
  0x90   : > { %1181 = vmatpush2.bf16.msra.mxu0 %v1819_v48 }
  0x91   : > { %1222 = vmatpush2.bf16.msra.mxu1 %v1820_v49  ;;  %1182 = vmatprep.subr.bf16.mxu0 %v1821_v50 }
  0x92   : > { %1223 = vmatprep.subr.bf16.mxu1 %v1823_v51 }
  0x94   : > { %1183 = vmatpush2.bf16.msra.mxu0 %v1825_v52 }
  0x95   : > { %1224 = vmatpush2.bf16.msra.mxu1 %v1826_v53  ;;  %1184 = vmatprep.subr.bf16.mxu0 %v1827_v54  ;;  %v608_v53 = vsub.s32 0, %v2298_v2  ;;  %v612_v54 = vsub.s32 1, %v2298_v2 }
  0x96   : > { %1225 = vmatprep.subr.bf16.mxu1 %v1829_v55  ;;  %v604_v55 = vld [vmem:[%s471_s17] sm:$0x7] }
  0x98   : > { %1185 = vmatpush2.bf16.msra.mxu0 %v1831_v56  ;;  %v609_v56 = vrot.slane %v604_v55, %v608_v53 }
  0x99   : > { %1226 = vmatpush2.bf16.msra.mxu1 %v1832_v57  ;;  %1186 = vmatprep.subr.bf16.mxu0 %v1833_v58  ;;  %v613_v57 = vrot.slane %v604_v55, %v612_v54 }
  0x9a   : > { %1227 = vmatprep.subr.bf16.mxu1 %v1835_v59 }
  0x9c   : > { %1187 = vmatpush2.bf16.msra.mxu0 %v1837_v60  ;;  %v1952_v60 = vmov 1983009808  }
  0x9d   : > { %1228 = vmatpush2.bf16.msra.mxu1 %v1838_v61  ;;  %1188 = vmatprep.subr.bf16.mxu0 %v1839_v62  ;;  %v1329_v61 = vunpack.c.l.s4 %v1952_v60  ;;  %v616_v62 = vsub.s32 2, %v2298_v2 }
  0x9e   : > { %1229 = vmatprep.subr.bf16.mxu1 %v1841_v63 }
  0xa0   : > { %1189 = vmatpush2.bf16.msra.mxu0 %v1843_v1 }
  0xa1   : > { %1230 = vmatpush2.bf16.msra.mxu1 %v1844_v3  ;;  %1190 = vmatprep.subr.bf16.mxu0 %v1845_v4 }
  0xa2   : > { %1231 = vmatprep.subr.bf16.mxu1 %v1847_v5  ;;  %v1330_v5 = vunpack.c.0.s8 %v1329_v61 }
  0xa4   : > { %1191 = vmatpush2.bf16.msra.mxu0 %v1849_v6  ;;  %v617_v6 = vrot.slane %v604_v55, %v616_v62 }
  0xa5   : > { %1232 = vmatpush2.bf16.msra.mxu1 %v1850_v7  ;;  %1192 = vmatprep.subr.bf16.mxu0 %v1851_v8 }
  0xa6   : > { %1233 = vmatprep.subr.bf16.mxu1 %v1853_v9 }
  0xa8   : > { %1193 = vmatpush2.bf16.msra.mxu0 %v1855_v10 }
  0xa9   : > { %1234 = vmatpush2.bf16.msra.mxu1 %v1856_v12  ;;  %1673 = vmatprep.subr.bf16.mxu0 %v1857_v14  ;;  %v1333_v14 = vsub.s32 %v1330_v5, %v2298_v2 }
  0xaa   : > { %1695 = vmatprep.subr.bf16.mxu1 %v1858_v16 }
  0xab   : > { %1195 = vmatmul.mubr.bf16.vlgmr.msra.gmra.mxu0 %v2382_v13 }
  0xac   : > { %1236 = vmatmul.mubr.bf16.vlgmr.msra.gmra.mxu1 %v2389_v19  ;;  %1674 = vmatpush3.bf16.msra.mxu0 %v1859_v17 }
  0xad   : > { %1696 = vmatpush3.bf16.msra.mxu1 %v1860_v20  ;;  %1675 = vmatprep.subr.bf16.mxu0 %v1861_v0 }
  0xae   : > { %1697 = vmatprep.subr.bf16.mxu1 %v1862_v11  ;;  %1276 = vmatprep.mubr.bf16.mxu0 %v2315_v15  ;;  %v1873_v15 = vld [vmem:[%s2300_s8 + $0x110] ss:$12 sps:$4 sm:$0xff]  }
  0xaf   : > { %1316 = vmatprep.mubr.bf16.mxu1 %v2322_v18  ;;  %v1874_v18 = vld [vmem:[%s2300_s8 + $0x290] ss:$12 sps:$4 sm:$0xff]  }
  0xb0   : > { %1676 = vmatpush3.bf16.msra.mxu0 %v1863_v21 }
  0xb1   : > { %1698 = vmatpush3.bf16.msra.mxu1 %v1864_v22  ;;  %1677 = vmatprep.subr.bf16.mxu0 %v1865_v23 }
  0xb2   : > { %1699 = vmatprep.subr.bf16.mxu1 %v1866_v24 }
  0xb4   : > { %1678 = vmatpush3.bf16.msra.mxu0 %v1867_v25 }
  0xb5   : > { %1700 = vmatpush3.bf16.msra.mxu1 %v1868_v26  ;;  %1679 = vmatprep.subr.bf16.mxu0 %v1869_v27 }
  0xb6   : > { %1701 = vmatprep.subr.bf16.mxu1 %v1870_v28 }
  0xb8   : > { %1680 = vmatpush3.bf16.msra.mxu0 %v1871_v29 }
  0xb9   : > { %1702 = vmatpush3.bf16.msra.mxu1 %v1872_v30  ;;  %1681 = vmatprep.subr.bf16.mxu0 %v1873_v15 }
  0xba   : > { %1703 = vmatprep.subr.bf16.mxu1 %v1874_v18 }
  0xbc   : > { %1682 = vmatpush3.bf16.msra.mxu0 %v1875_v31 }
  0xbd   : > { %1704 = vmatpush3.bf16.msra.mxu1 %v1876_v32  ;;  %1683 = vmatprep.subr.bf16.mxu0 %v1877_v33 }
  0xbe   : > { %1705 = vmatprep.subr.bf16.mxu1 %v1878_v34 }
  0xc0   : > { %1684 = vmatpush3.bf16.msra.mxu0 %v1879_v35 }
  0xc1   : > { %1706 = vmatpush3.bf16.msra.mxu1 %v1880_v36  ;;  %1685 = vmatprep.subr.bf16.mxu0 %v1881_v37 }
  0xc2   : > { %1707 = vmatprep.subr.bf16.mxu1 %v1882_v38 }
  0xc4   : > { %1686 = vmatpush3.bf16.msra.mxu0 %v1883_v39 }
  0xc5   : > { %1708 = vmatpush3.bf16.msra.mxu1 %v1884_v40  ;;  %1687 = vmatprep.subr.bf16.mxu0 %v1885_v41 }
  0xc6   : > { %1709 = vmatprep.subr.bf16.mxu1 %v1886_v42 }
  0xc8   : > { %1688 = vmatpush3.bf16.msra.mxu0 %v1887_v43 }
  0xc9   : > { %1710 = vmatpush3.bf16.msra.mxu1 %v1888_v44 }
  0xcb   : > { %1277 = vmatmul.mubr.bf16.vlgmr.msra.gmra.mxu0 %v2382_v13 }
  0xcc   : > { %1317 = vmatmul.mubr.bf16.vlgmr.msra.gmra.mxu1 %v2389_v19 }
 0x16b   : > { %v1196_v45 = vpop.f32.mrf.mxu0 }
 0x16c   : > { %v1237_v46 = vpop.f32.mrf.mxu1  ;;  %v1197_v58 = vadd.f32 %v1196_v45, %v609_v56 }
 0x16d   : > { %v1198_v47 = vpop.f32.mrf.mxu0 }
 0x16e   : > { %v1239_v48 = vpop.f32.mrf.mxu1  ;;  %v1199_v59 = vadd.f32 %v1198_v47, %v613_v57  ;;  %v1238_v3 = vadd.f32 %v1237_v46, %v1197_v58 }
 0x16f   : > { %v1200_v49 = vpop.f32.mrf.mxu0 }
 0x170   : > { %v1241_v50 = vpop.f32.mrf.mxu1  ;;  %v1240_v4 = vadd.f32 %v1239_v48, %v1199_v59 }
 0x171   : > { %v1201_v51 = vpop.f32.mrf.mxu0 }
 0x172   : > { %v1242_v52 = vpop.f32.mrf.mxu1  ;;  %v1327_v13 = vcombine.low %v1238_v3, %v1240_v4 }
 0x174   : > { %v1334_v11 = vrot.slane %v1327_v13, %v1333_v14 }
 0x18b   : > { %v1689_v63 = vpop.f32.mrf.mxu0 }
 0x18c   : > { %v1711_v1 = vpop.f32.mrf.mxu1 }
 0x18d   : > { %v1690_v7 = vpop.f32.mrf.mxu0 }
 0x18e   : > { %v1712_v8 = vpop.f32.mrf.mxu1  ;;  %v1691_v9 = vadd.f32 %v1690_v7, %v1689_v63 }
 0x18f   : > { %v1692_v10 = vpop.f32.mrf.mxu0  ;;  %v1713_v17 = vadd.f32 %v1712_v8, %v1711_v1 }
 0x190   : > { %v1714_v12 = vpop.f32.mrf.mxu1  ;;  %v1279_v16 = vadd.f32 %v1691_v9, %v617_v6 }
 0x191   : > { %v1693_v19 = vpop.f32.mrf.mxu0 }
 0x192   : > { %v1715_v20 = vpop.f32.mrf.mxu1  ;;  %v1319_v0 = vadd.f32 %v1713_v17, %v1279_v16 }
 0x194   : > { %v1341_v21 = vrot.slane %v1319_v0, %v1333_v14 }
 0x196   : > { %v1342_v22 = vcombine.low %v1334_v11, %v1341_v21 }
 0x198   : > { %1344 = vst [vmem:[%s466_s24] sm:$0x3f] %v1342_v22 }
 0x199   : > { %1902 = shalt.err (!%p1899_p7)
}
 0x19a   : > { %s1903_s7 = scalar_lea.hbm %s1358_s28, 96  ;;  %s1907_s9 = scalar_lea.hbm %s2472_s3, 288 }
 0x19b   : > { %p1904_p9 = scmp.ne.s32.totalorder %s1358_s28, %s1903_s7  ;;  %p1908_p12 = scmp.lt.s32.totalorder %s1358_s28, %s2472_s3 }
 0x19c   : > { %p1909_p13 = scmp.lt.s32.totalorder %s1907_s9, %s1903_s7 }
 0x19d   : > { %p1905_p10 = pnand %p1904_p9, %p2013_p6 }
 0x19e   : > { %p1910_p0 = por %p1909_p13, %p1908_p12 }
 0x19f   : > { %p1906_p11 = pneg %p1905_p10 }
 0x1a1   : > { %p1911_p1 = pnand %p1910_p0, %p1906_p11 }
 0x1a3   : > { %1914 = shalt.err (!%p1911_p1)
}
 0x1a4   : > { %1720 = dma.vmem_to_hbm [thread:$0]  (%p2013_p6), %s1361_s25, 96, %s1358_s28, %s1346_s29  }
 0x1a5 PF: > { %p1726_p2 = scmp.ge.s32.totalorder %s1949_s15, 2  ;;  %s1372_s17 = sand.u32 1, %s1937_s12  }
 0x1a6   : > { %s1373_s19 = scalar_lea.sflag [#allocation4], %s1372_s17 }
 0x1a7   : > { %p1723_p3 = pnand %p1726_p2, %p2017_p8 }
 0x1a9   : > { %p1724_p4 = pneg %p1723_p3 }
 0x1ab   : > { %1932 = dma.done.wait (%p1724_p4), %s1373_s19, 96  }
 0x1ac   : > { %1934 = vsyncadd (%p1724_p4), %s1373_s19, 4294967200  ;;  %p13_p5 = scmp.ge.s32.totalorder %s1999_s18, 5   ;;  %s2475_s12 = smov %s1941_s13 }
 0x1ad   : > { %s2476_s13 = smov %s1945_s14  ;;  %s2477_s14 = smov %s2011_s21 }
 0x1ae   : > { %s2478_s15 = smov %s1999_s18  ;;  %15 = sbr.rel (!%p13_p5) target bundleno = 3 (0x3), region = 107 }
 0x1b3   :  { %1378 = vsyncpa [#allocation4], 1 }
 0x1b4   :  { %1380 = vsyncpa [#allocation4 + $0x1], 1 }

// kernel: efficientnet_two_inputs.2
= control target key start
LH: loop header
LB: loop body
LE: loop exit
PB: predicated region body
PF: predicated region fallthrough
CT: control target
= control target key end

     0   :  { %s10445_s29 = smov 64   ;;  %s10446_s24 = smov 32   ;;  %vm776_vm0 = vcmask 261120   ;;  %vm873_vm1 = vcmask 523264   ;;  %vm938_vm2 = vcmask 785408   ;;  %vm2515_vm3 = vcmask 1040384   ;;  %s15859_s0 = inlined_call_operand.vmem [shape: bf16[4,9,9,32], index: 0, kind: input, shape index: {}]   ;;  %s15860_s1 = inlined_call_operand.vmem [shape: bf16[128,128], index: 1, kind: input, shape index: {}]   ;;  %s15861_s3 = inlined_call_operand.vmem [shape: bf16[128,256], index: 3, kind: input, shape index: {}]   ;;  %s15862_s2 = inlined_call_operand.vmem [shape: f32[1,128], index: 2, kind: input, shape index: {}]   ;;  %s15863_s4 = inlined_call_operand.vmem [shape: f32[1,256], index: 4, kind: input, shape index: {}]   ;;  %s15864_s5 = inlined_call_operand.vmem [shape: f32[3,3,256], index: 5, kind: input, shape index: {}]   ;;  %s15865_s6 = inlined_call_operand.vmem [shape: bf16[256,128], index: 6, kind: input, shape index: {}]   ;;  %s15866_s8 = inlined_call_operand.vmem [shape: bf16[128,256], index: 8, kind: input, shape index: {}]   ;;  %s15867_s7 = inlined_call_operand.vmem [shape: f32[1,128], index: 7, kind: input, shape index: {}]   ;;  %s15868_s10 = inlined_call_operand.vmem [shape: bf16[256,128], index: 10, kind: input, shape index: {}]   ;;  %s15869_s9 = inlined_call_operand.vmem [shape: f32[1,256], index: 9, kind: input, shape index: {}]   ;;  %s15870_s12 = inlined_call_operand.vmem [shape: bf16[128,256], index: 12, kind: input, shape index: {}]   ;;  %s15871_s11 = inlined_call_operand.vmem [shape: f32[1,128], index: 11, kind: input, shape index: {}]   ;;  %s15872_s13 = inlined_call_operand.vmem [shape: f32[1,256], index: 13, kind: input, shape index: {}]   ;;  %s15873_s14 = inlined_call_operand.vmem [shape: f32[4,256], index: 14, kind: output, shape index: {}]  }
   0x1   :  { %v10529_v0 = vld [vmem:[%s15859_s0 + $0x10] sm:$0xf]  ;;  %v53_v1 = vld [vmem:[%s15859_s0 + $0x14] sm:$0x1]  ;;  %v10537_v2 = vld [vmem:[%s15859_s0 + $0x8] sm:$0xf] }
   0x2   :  { %v8768_v3 = vcombine.low %v10529_v0, %v10529_v0  ;;  %v8737_v4 = vcombine.low %v10529_v0, %v53_v1  ;;  %v51_v5 = vld [vmem:[%s15859_s0 + $0xc] sm:$0x1]  ;;  %v8767_v6 = vcombine.low %v10537_v2, %v10537_v2  ;;  %v10550_v7 = vld [vmem:[%s15859_s0] sm:$0xf]  ;;  %v49_v8 = vld [vmem:[%s15859_s0 + $0x4] sm:$0x1] }
   0x3   :  { %v8736_v9 = vcombine.low %v10537_v2, %v51_v5  ;;  %v8735_v10 = vcombine.low %v10550_v7, %v49_v8  ;;  %v10560_v11 = vld [vmem:[%s15859_s0 + $0x18] sm:$0xf]  ;;  %v55_v12 = vld [vmem:[%s15859_s0 + $0x1c] sm:$0x1]  ;;  %v9400_v23 = vld [vmem:[%s15860_s1 + $0x30] sm:$0xff]   ;;  %s10447_s30 = smov 96  }
   0x4   :  { %610 = vrot.lane.b32.xlu1 %v8768_v3, %s10445_s29  ;;  %608 = vrot.lane.b32.xlu0 %v8767_v6, %s10445_s29  ;;  %v295_v13 = vshrl.u32 %v8737_v4, 16  ;;  %v297_v14 = vshll.u32 %v8737_v4, 16  ;;  %v8738_v15 = vcombine.low %v10560_v11, %v55_v12  ;;  %v9397_v16 = vld [vmem:[%s15860_s1 + $0x38] sm:$0xff]   ;;  %v57_v27 = vld [vmem:[%s15859_s0 + $0x24] sm:$0x1]  ;;  %v8769_v42 = vcombine.low %v10560_v11, %v10560_v11 }
   0x5   :  { %v281_v17 = vshrl.u32 %v8735_v10, 16  ;;  %v283_v18 = vshll.u32 %v8735_v10, 16  ;;  %v290_v19 = vshll.u32 %v8736_v9, 16  ;;  %9303 = vmatprep.subr.bf16.mxu0 %v9397_v16  ;;  %v288_v25 = vshrl.u32 %v8736_v9, 16  ;;  %v9401_v30 = vld [vmem:[%s15860_s1 + $0x28] sm:$0xff]   ;;  %v9403_v38 = vld [vmem:[%s15860_s1 + $0x20] sm:$0xff]  }
   0x6   :  { %v299_v20 = vrot.slane %v297_v14, 1  ;;  %v302_v21 = vshrl.u32 %v8738_v15, 16  ;;  %v304_v22 = vshll.u32 %v8738_v15, 16  ;;  %9304 = vmatpush3.bf16.msra.mxu0 %v9397_v16  ;;  %v10583_v32 = vld [vmem:[%s15859_s0 + $0x20] sm:$0xf]  ;;  %v9405_v47 = vld [vmem:[%s15860_s1 + $0x18] sm:$0xff]  }
   0x7   :  { %v285_v24 = vrot.slane %v283_v18, 1  ;;  %v292_v26 = vrot.slane %v290_v19, 1  ;;  %9305 = vmatprep.subr.bf16.mxu0 %v9400_v23  ;;  %v8739_v34 = vcombine.low %v10583_v32, %v57_v27  ;;  %v10591_v36 = vld [vmem:[%s15859_s0 + $0x28] sm:$0xf]  ;;  %v59_v37 = vld [vmem:[%s15859_s0 + $0x2c] sm:$0x1]  ;;  %v8770_v39 = vcombine.low %v10583_v32, %v10583_v32 }
   0x8   :  { %v300_v28 = vor.u32 %v299_v20, %v295_v13  ;;  %v306_v29 = vrot.slane %v304_v22, 1  ;;  %v8740_v41 = vcombine.low %v10591_v36, %v59_v37  ;;  %v10609_v43 = vld [vmem:[%s15859_s0 + $0x38] sm:$0xf]  ;;  %v63_v44 = vld [vmem:[%s15859_s0 + $0x3c] sm:$0x1]  ;;  %v9408_v53 = vld [vmem:[%s15860_s1 + $0x10] sm:$0xff]   ;;  %v8771_v12 = vcombine.low %v10591_v36, %v10591_v36 }
   0x9   :  { %v286_v31 = vor.u32 %v285_v24, %v281_v17  ;;  %v293_v35 = vor.u32 %v292_v26, %v288_v25  ;;  %v311_v40 = vshll.u32 %v8739_v34, 16  ;;  %v10617_v45 = vld [vmem:[%s15859_s0 + $0x30] sm:$0xf]  ;;  %v61_v46 = vld [vmem:[%s15859_s0 + $0x34] sm:$0x1]  ;;  %v309_v48 = vshrl.u32 %v8739_v34, 16 }
   0xa   :  { %508 = vrot.lane.b32.xlu1 %v300_v28, %s10446_s24  ;;  %v307_v33 = vor.u32 %v306_v29, %v302_v21  ;;  %9306 = vmatpush3.bf16.msra.mxu0 %v9400_v23  ;;  %v318_v50 = vshll.u32 %v8740_v41, 16  ;;  %v8742_v51 = vcombine.low %v10609_v43, %v63_v44  ;;  %v8741_v52 = vcombine.low %v10617_v45, %v61_v46  ;;  %v9411_v59 = vld [vmem:[%s15860_s1 + $0x8] sm:$0xff]   ;;  %v9415_v3 = vld [vmem:[%s15860_s1] sm:$0xff]   ;;  %v10659_v13 = vld [vmem:[%s15859_s0 + $0x50] sm:$0xf] }
   0xb   :  { %504 = vrot.lane.b32.xlu0 %v286_v31, %s10446_s24  ;;  %9307 = vmatprep.subr.bf16.mxu0 %v9401_v30  ;;  %v313_v49 = vrot.slane %v311_v40, 1  ;;  %v316_v55 = vshrl.u32 %v8740_v41, 16  ;;  %v65_v6 = vld [vmem:[%s15859_s0 + $0x44] sm:$0x1]  ;;  %v64_v8 = vld [vmem:[%s15859_s0 + $0x40] sm:$0xf]  ;;  %v8772_v9 = vcombine.low %v10617_v45, %v10617_v45  ;;  %v8773_v20 = vcombine.low %v10609_v43, %v10609_v43 }
   0xc   :  { %v320_v56 = vrot.slane %v318_v50, 1  ;;  %v332_v57 = vshll.u32 %v8742_v51, 16  ;;  %v325_v58 = vshll.u32 %v8741_v52, 16  ;;  %v330_v61 = vshrl.u32 %v8742_v51, 16  ;;  %v69_v14 = vld [vmem:[%s15859_s0 + $0x54] sm:$0x1] }
   0xd   :  { %v314_v54 = vor.u32 %v313_v49, %v309_v48  ;;  %v323_v63 = vshrl.u32 %v8741_v52, 16  ;;  %v8799_v10 = vcombine.low %v64_v8, %v65_v6  ;;  %v10667_v15 = vld [vmem:[%s15859_s0 + $0x48] sm:$0xf]  ;;  %v67_v16 = vld [vmem:[%s15859_s0 + $0x4c] sm:$0x1]  ;;  %v8774_v17 = vcombine.low %v64_v8, %v64_v8 }
   0xe   :  { %510 = vrot.lane.b32.xlu1 %v307_v33, %s10446_s24  ;;  %9308 = vmatpush3.bf16.msra.mxu0 %v9401_v30  ;;  %v321_v60 = vor.u32 %v320_v56, %v316_v55  ;;  %v334_v62 = vrot.slane %v332_v57, 1  ;;  %v327_v1 = vrot.slane %v325_v58, 1  ;;  %v8744_v19 = vcombine.low %v10659_v13, %v69_v14  ;;  %v10681_v22 = vld [vmem:[%s15859_s0 + $0x60] sm:$0xf]  ;;  %v73_v23 = vld [vmem:[%s15859_s0 + $0x64] sm:$0x1] }
   0xf   :  { %506 = vrot.lane.b32.xlu0 %v293_v35, %s10446_s24  ;;  %9309 = vmatprep.subr.bf16.mxu0 %v9403_v38  ;;  %v687_v18 = vshll.u32 %v8799_v10, 16  ;;  %v8743_v21 = vcombine.low %v10667_v15, %v67_v16  ;;  %v10689_v24 = vld [vmem:[%s15859_s0 + $0x58] sm:$0xf]  ;;  %v71_v25 = vld [vmem:[%s15859_s0 + $0x5c] sm:$0x1]  ;;  %v685_v26 = vshrl.u32 %v8799_v10, 16  ;;  %v8746_v29 = vcombine.low %v10681_v22, %v73_v23 }
  0x10   :  { %v335_v4 = vor.u32 %v334_v62, %v330_v61  ;;  %v328_v5 = vor.u32 %v327_v1, %v323_v63  ;;  %v8745_v31 = vcombine.low %v10689_v24, %v71_v25  ;;  %v344_v34 = vshrl.u32 %v8744_v19, 16  ;;  %v75_v51 = vld [vmem:[%s15859_s0 + $0x6c] sm:$0x1]  ;;  %v10710_v52 = vld [vmem:[%s15859_s0 + $0x68] sm:$0xf] }
  0x11   :  { %v689_v27 = vrot.slane %v687_v18, 1  ;;  %v339_v30 = vshll.u32 %v8743_v21, 16  ;;  %v360_v37 = vshll.u32 %v8746_v29, 16  ;;  %v8775_v55 = vcombine.low %v10659_v13, %v10659_v13  ;;  %v10722_v56 = vld [vmem:[%s15859_s0 + $0x70] sm:$0xf] }
  0x12   :  { %614 = vrot.lane.b32.xlu1 %v8770_v39, %s10445_s29  ;;  %9310 = vmatpush3.bf16.msra.mxu0 %v9403_v38  ;;  %v337_v38 = vshrl.u32 %v8743_v21, 16  ;;  %v353_v40 = vshll.u32 %v8745_v31, 16  ;;  %v77_v57 = vld [vmem:[%s15859_s0 + $0x74] sm:$0x1]  ;;  %v8778_v58 = vcombine.low %v10710_v52, %v10710_v52  ;;  %v8777_v61 = vcombine.low %v10681_v22, %v10681_v22  ;;  %v10737_v62 = vld [vmem:[%s15859_s0 + $0x80] sm:$0xf] }
  0x13   :  { %612 = vrot.lane.b32.xlu0 %v8769_v42, %s10445_s29  ;;  %9311 = vmatprep.subr.bf16.mxu0 %v9405_v47  ;;  %v341_v39 = vrot.slane %v339_v30, 1  ;;  %v358_v42 = vshrl.u32 %v8746_v29, 16  ;;  %v362_v44 = vrot.slane %v360_v37, 1  ;;  %v81_v63 = vld [vmem:[%s15859_s0 + $0x84] sm:$0x1]  ;;  %vm3019_vm4 = vcmask 1046528  }
  0x14   :  { %v355_v48 = vrot.slane %v353_v40, 1  ;;  %v10745_v1 = vld [vmem:[%s15859_s0 + $0x78] sm:$0xf]  ;;  %v8750_v8 = vcombine.low %v10737_v62, %v81_v63  ;;  %v85_v37 = vld [vmem:[%s15859_s0 + $0x94] sm:$0x1]  ;;  %vm3555_vm5 = vcmask 1045504  }
  0x15   :  { %v342_v46 = vor.u32 %v341_v39, %v337_v38  ;;  %v363_v49 = vor.u32 %v362_v44, %v358_v42  ;;  %v8780_v29 = vcombine.low %v10745_v1, %v10745_v1  ;;  %v10797_v44 = vld [vmem:[%s15859_s0 + $0xa8] sm:$0xf]  ;;  %vm7014_vm6 = vcmask 1041409  }
  0x16   :  { %714 = vrot.lane.b32.xlu1 %v300_v28, %s10447_s30  ;;  %9312 = vmatpush3.bf16.msra.mxu0 %v9405_v47  ;;  %v346_v28 = vshll.u32 %v8744_v19, 16  ;;  %v351_v47 = vshrl.u32 %v8745_v31, 16  ;;  %v388_v16 = vshll.u32 %v8750_v8, 16  ;;  %v386_v19 = vshrl.u32 %v8750_v8, 16 }
  0x17   :  { %712 = vrot.lane.b32.xlu0 %v293_v35, %s10447_s30  ;;  %9313 = vmatprep.subr.bf16.mxu0 %v9408_v53  ;;  %v8779_v31 = vcombine.low %v10722_v56, %v10722_v56  ;;  %vm7016_vm7 = vcmask 1042434   ;;  %vm7018_vm8 = vcmask 1043459   ;;  %vm8715_vm9 = vcmask 1045509  }
  0x18   :  { %v348_v35 = vrot.slane %v346_v28, 1  ;;  %v356_v50 = vor.u32 %v355_v48, %v351_v47  ;;  %v82_v28 = vld [vmem:[%s15859_s0 + $0x88] sm:$0xf]  ;;  %v10805_v47 = vld [vmem:[%s15859_s0 + $0xa0] sm:$0xf]  ;;  %vm8719_vm10 = vcmask 1046534  }
  0x19   :  { %v8782_v38 = vcombine.low %v82_v28, %v82_v28  ;;  %v89_v48 = vld [vmem:[%s15859_s0 + $0xa4] sm:$0x1]  ;;  %vm8723_vm11 = vcmask 1047559  }
  0x1a   :  { %718 = vrot.lane.b32.xlu1 %v314_v54, %s10447_s30  ;;  %9314 = vmatpush3.bf16.msra.mxu0 %v9408_v53  ;;  %v349_v41 = vor.u32 %v348_v35, %v344_v34  ;;  %v8776_v53 = vcombine.low %v10689_v24, %v10689_v24  ;;  %v87_v34 = vld [vmem:[%s15859_s0 + $0x9c] sm:$0x1]  ;;  %v10783_v35 = vld [vmem:[%s15859_s0 + $0x90] sm:$0xf] }
  0x1b   :  { %716 = vrot.lane.b32.xlu0 %v307_v33, %s10447_s30  ;;  %9315 = vmatprep.subr.bf16.mxu0 %v9411_v59  ;;  %v690_v33 = vor.u32 %v689_v27, %v685_v26  ;;  %v83_v27 = vld [vmem:[%s15859_s0 + $0x8c] sm:$0x1]  ;;  %v8751_v42 = vcombine.low %v10783_v35, %v85_v37 }
  0x1c   :  { %v8800_v30 = vcombine.low %v82_v28, %v83_v27  ;;  %v8785_v28 = vcombine.low %v10797_v44, %v10797_v44 }
  0x1e   :  { %514 = vrot.lane.b32.xlu1 %v321_v60, %s10446_s24  ;;  %9316 = vmatpush3.bf16.msra.mxu0 %v9411_v59  ;;  %v694_v39 = vshll.u32 %v8800_v30, 16 }
  0x1f   :  { %512 = vrot.lane.b32.xlu0 %v314_v54, %s10446_s24  ;;  %9317 = vmatprep.subr.bf16.mxu0 %v9415_v3  ;;  %v8747_v54 = vcombine.low %v10710_v52, %v75_v51 }
  0x21   :  { %v367_v59 = vshll.u32 %v8747_v54, 16 }
  0x22   :  { %518 = vrot.lane.b32.xlu1 %v335_v4, %s10446_s24  ;;  %9318 = vmatpush3.bf16.msra.mxu0 %v9415_v3  ;;  %v79_v3 = vld [vmem:[%s15859_s0 + $0x7c] sm:$0x1] }
  0x23   :  { %516 = vrot.lane.b32.xlu0 %v328_v5, %s10446_s24 }
  0x26   :  { %618 = vrot.lane.b32.xlu1 %v8772_v9, %s10445_s29  ;;  %v8749_v9 = vcombine.low %v10745_v1, %v79_v3 }
  0x27   :  { %616 = vrot.lane.b32.xlu0 %v8771_v12, %s10445_s29 }
  0x28   :  { %v379_v21 = vshrl.u32 %v8749_v9, 16 }
  0x2a   :  { %622 = vrot.lane.b32.xlu1 %v8774_v17, %s10445_s29  ;;  %v381_v17 = vshll.u32 %v8749_v9, 16 }
  0x2b   :  { %620 = vrot.lane.b32.xlu0 %v8773_v20, %s10445_s29  ;;  %v390_v20 = vrot.slane %v388_v16, 1  ;;  %v93_v16 = vld [vmem:[%s15859_s0 + $0xb4] sm:$0x1] }
  0x2c   :  { %v383_v23 = vrot.slane %v381_v17, 1  ;;  %v10826_v17 = vld [vmem:[%s15859_s0 + $0xb0] sm:$0xf] }
  0x2d   :  { %v391_v25 = vor.u32 %v390_v20, %v386_v19  ;;  %v8755_v19 = vcombine.low %v10826_v17, %v93_v16  ;;  %v105_v16 = vld [vmem:[%s15859_s0 + $0xe4] sm:$0x1] }
  0x2e   :  { %722 = vrot.lane.b32.xlu1 %v328_v5, %s10447_s30  ;;  %v369_v5 = vrot.slane %v367_v59, 1  ;;  %v384_v26 = vor.u32 %v383_v23, %v379_v21  ;;  %v10838_v21 = vld [vmem:[%s15859_s0 + $0xb8] sm:$0xf]  ;;  %v95_v23 = vld [vmem:[%s15859_s0 + $0xbc] sm:$0x1] }
  0x2f   :  { %720 = vrot.lane.b32.xlu0 %v321_v60, %s10447_s30  ;;  %v8748_v60 = vcombine.low %v10722_v56, %v77_v57  ;;  %v8756_v27 = vcombine.low %v10838_v21, %v95_v23  ;;  %v421_v37 = vshrl.u32 %v8755_v19, 16 }
  0x31   :  { %v374_v6 = vshll.u32 %v8748_v60, 16  ;;  %v372_v12 = vshrl.u32 %v8748_v60, 16 }
  0x32   :  { %726 = vrot.lane.b32.xlu1 %v690_v33, %s10447_s30  ;;  %v10775_v33 = vld [vmem:[%s15859_s0 + $0x98] sm:$0xf] }
  0x33   :  { %724 = vrot.lane.b32.xlu0 %v335_v4, %s10447_s30  ;;  %v365_v4 = vshrl.u32 %v8747_v54, 16  ;;  %v376_v14 = vrot.slane %v374_v6, 1  ;;  %v8752_v40 = vcombine.low %v10775_v33, %v87_v34  ;;  %v395_v54 = vshll.u32 %v8751_v42, 16  ;;  %v97_v34 = vld [vmem:[%s15859_s0 + $0xc4] sm:$0x1] }
  0x34   :  { %v8783_v20 = vcombine.low %v10775_v33, %v10775_v33 }
  0x35   :  { %v370_v10 = vor.u32 %v369_v5, %v365_v4  ;;  %v377_v18 = vor.u32 %v376_v14, %v372_v12  ;;  %v402_v51 = vshll.u32 %v8752_v40, 16  ;;  %v397_v63 = vrot.slane %v395_v54, 1 }
  0x36   :  { %522 = vrot.lane.b32.xlu1 %v349_v41, %s10446_s24 }
  0x37   :  { %520 = vrot.lane.b32.xlu0 %v342_v46, %s10446_s24  ;;  %v91_v46 = vld [vmem:[%s15859_s0 + $0xac] sm:$0x1]  ;;  %v404_v59 = vrot.slane %v402_v51, 1 }
  0x3a   :  { %526 = vrot.lane.b32.xlu1 %v363_v49, %s10446_s24 }
  0x3b   :  { %524 = vrot.lane.b32.xlu0 %v356_v50, %s10446_s24 }
  0x3e   :  { %626 = vrot.lane.b32.xlu1 %v8776_v53, %s10445_s29  ;;  %v8754_v53 = vcombine.low %v10797_v44, %v91_v46 }
  0x3f   :  { %624 = vrot.lane.b32.xlu0 %v8775_v55, %s10445_s29  ;;  %v8753_v55 = vcombine.low %v10805_v47, %v89_v48  ;;  %v428_v48 = vshrl.u32 %v8756_v27, 16 }
  0x40   :  { %v416_v60 = vshll.u32 %v8754_v53, 16  ;;  %v414_v5 = vshrl.u32 %v8754_v53, 16 }
  0x41   :  { %v409_v3 = vshll.u32 %v8753_v55, 16  ;;  %v407_v9 = vshrl.u32 %v8753_v55, 16 }
  0x42   :  { %630 = vrot.lane.b32.xlu1 %v8778_v58, %s10445_s29  ;;  %v400_v58 = vshrl.u32 %v8752_v40, 16  ;;  %v418_v6 = vrot.slane %v416_v60, 1 }
  0x43   :  { %628 = vrot.lane.b32.xlu0 %v8777_v61, %s10445_s29  ;;  %v393_v61 = vshrl.u32 %v8751_v42, 16 }
  0x44   :  { %v405_v4 = vor.u32 %v404_v59, %v400_v58  ;;  %v419_v12 = vor.u32 %v418_v6, %v414_v5 }
  0x45   :  { %v398_v8 = vor.u32 %v397_v63, %v393_v61 }
  0x46   :  { %730 = vrot.lane.b32.xlu1 %v356_v50, %s10447_s30  ;;  %v696_v50 = vrot.slane %v694_v39, 1  ;;  %v430_v39 = vshll.u32 %v8756_v27, 16 }
  0x47   :  { %728 = vrot.lane.b32.xlu0 %v349_v41, %s10447_s30  ;;  %v8781_v41 = vcombine.low %v10737_v62, %v10737_v62 }
  0x4a   :  { %734 = vrot.lane.b32.xlu1 %v370_v10, %s10447_s30 }
  0x4b   :  { %732 = vrot.lane.b32.xlu0 %v363_v49, %s10447_s30  ;;  %v692_v49 = vshrl.u32 %v8800_v30, 16  ;;  %v99_v30 = vld [vmem:[%s15859_s0 + $0xcc] sm:$0x1] }
  0x4d   :  { %v697_v57 = vor.u32 %v696_v50, %v692_v49  ;;  %v432_v49 = vrot.slane %v430_v39, 1 }
  0x4e   :  { %530 = vrot.lane.b32.xlu1 %v377_v18, %s10446_s24 }
  0x4f   :  { %528 = vrot.lane.b32.xlu0 %v370_v10, %s10446_s24  ;;  %v411_v10 = vrot.slane %v409_v3, 1  ;;  %v10873_v54 = vor.u32 %v432_v49, %v428_v48 }
  0x51   :  { %v412_v14 = vor.u32 %v411_v10, %v407_v9 }
  0x52   :  { %534 = vrot.lane.b32.xlu1 %v391_v25, %s10446_s24 }
  0x53   :  { %532 = vrot.lane.b32.xlu0 %v384_v26, %s10446_s24 }
  0x56   :  { %634 = vrot.lane.b32.xlu1 %v8780_v29, %s10445_s29  ;;  %v10853_v29 = vld [vmem:[%s15859_s0 + $0xc8] sm:$0xf] }
  0x57   :  { %632 = vrot.lane.b32.xlu0 %v8779_v31, %s10445_s29  ;;  %v10861_v31 = vld [vmem:[%s15859_s0 + $0xc0] sm:$0xf]  ;;  %v8758_v40 = vcombine.low %v10853_v29, %v99_v30 }
  0x58   :  { %v8788_v9 = vcombine.low %v10861_v31, %v10861_v31 }
  0x59   :  { %v444_v50 = vshll.u32 %v8758_v40, 16  ;;  %v442_v55 = vshrl.u32 %v8758_v40, 16  ;;  %v10932_v40 = vld [vmem:[%s15859_s0 + $0xe8] sm:$0xf] }
  0x5a   :  { %638 = vrot.lane.b32.xlu1 %v8782_v38, %s10445_s29 }
  0x5b   :  { %636 = vrot.lane.b32.xlu0 %v8781_v41, %s10445_s29  ;;  %v8757_v41 = vcombine.low %v10861_v31, %v97_v34  ;;  %v8789_v34 = vcombine.low %v10853_v29, %v10853_v29 }
  0x5d   :  { %v437_v53 = vshll.u32 %v8757_v41, 16  ;;  %v435_v58 = vshrl.u32 %v8757_v41, 16  ;;  %v107_v41 = vld [vmem:[%s15859_s0 + $0xec] sm:$0x1] }
  0x5e   :  { %738 = vrot.lane.b32.xlu1 %v384_v26, %s10447_s30  ;;  %v423_v26 = vshll.u32 %v8755_v19, 16  ;;  %v10905_v19 = vld [vmem:[%s15859_s0 + $0xd8] sm:$0xf] }
  0x5f   :  { %736 = vrot.lane.b32.xlu0 %v377_v18, %s10447_s30  ;;  %v8784_v18 = vcombine.low %v10805_v47, %v10805_v47  ;;  %v439_v59 = vrot.slane %v437_v53, 1 }
  0x60   :  { %v425_v38 = vrot.slane %v423_v26, 1 }
  0x61   :  { %v440_v3 = vor.u32 %v439_v59, %v435_v58 }
  0x62   :  { %742 = vrot.lane.b32.xlu1 %v697_v57, %s10447_s30  ;;  %v426_v46 = vor.u32 %v425_v38, %v421_v37  ;;  %v446_v57 = vrot.slane %v444_v50, 1 }
  0x63   :  { %740 = vrot.lane.b32.xlu0 %v391_v25, %s10447_s30  ;;  %v8786_v25 = vcombine.low %v10826_v17, %v10826_v17 }
  0x64   :  { %v10878_v63 = vor.u32 %v446_v57, %v442_v55 }
  0x66   :  { %538 = vrot.lane.b32.xlu1 %v405_v4, %s10446_s24 }
  0x67   :  { %536 = vrot.lane.b32.xlu0 %v398_v8, %s10446_s24  ;;  %v100_v8 = vld [vmem:[%s15859_s0 + $0xd0] sm:$0xf] }
  0x68   :  { %v8790_v27 = vcombine.low %v100_v8, %v100_v8 }
  0x6a   :  { %542 = vrot.lane.b32.xlu1 %v419_v12, %s10446_s24 }
  0x6b   :  { %540 = vrot.lane.b32.xlu0 %v412_v14, %s10446_s24 }
  0x6e   :  { %642 = vrot.lane.b32.xlu1 %v8784_v18, %s10445_s29 }
  0x6f   :  { %640 = vrot.lane.b32.xlu0 %v8783_v20, %s10445_s29  ;;  %v103_v20 = vld [vmem:[%s15859_s0 + $0xdc] sm:$0x1] }
  0x70   :  { %v8759_v37 = vcombine.low %v10905_v19, %v103_v20 }
  0x72   :  { %646 = vrot.lane.b32.xlu1 %v8786_v25, %s10445_s29 }
  0x73   :  { %644 = vrot.lane.b32.xlu0 %v8785_v28, %s10445_s29 }
  0x76   :  { %746 = vrot.lane.b32.xlu1 %v412_v14, %s10447_s30  ;;  %v611_v42 = vpop.permute.xlu1 %610  ;;  %v609_v51 = vpop.permute.xlu0 %608  ;;  %v10897_v14 = vld [vmem:[%s15859_s0 + $0xe0] sm:$0xf] }
  0x77   :  { %744 = vrot.lane.b32.xlu0 %v405_v4, %s10447_s30  ;;  %v101_v4 = vld [vmem:[%s15859_s0 + $0xd4] sm:$0x1]  ;;  %v8760_v30 = vcombine.low %v10897_v14, %v105_v16 }
  0x78   :  { %v8801_v10 = vcombine.low %v100_v8, %v101_v4 }
  0x79   :  { %v458_v55 = vshll.u32 %v8760_v30, 16  ;;  %v456_v16 = vshrl.u32 %v8760_v30, 16 }
  0x7a   :  { %750 = vrot.lane.b32.xlu1 %v426_v46, %s10447_s30  ;;  %v701_v28 = vshll.u32 %v8801_v10, 16  ;;  %v699_v50 = vshrl.u32 %v8801_v10, 16 }
  0x7b   :  { %748 = vrot.lane.b32.xlu0 %v419_v12, %s10447_s30  ;;  %v8787_v12 = vcombine.low %v10838_v21, %v10838_v21  ;;  %v460_v20 = vrot.slane %v458_v55, 1  ;;  %v10984_v55 = vld [vmem:[%s15859_s0 + $0x100] sm:$0xf] }
  0x7c   :  { %v509_v60 = vpop.permute.xlu1 %508 }
  0x7d   :  { %v505_v61 = vpop.permute.xlu0 %504  ;;  %v785_v4 = vsel %vm776_vm0, %v10529_v0, %v509_v60  ;;  %v449_v0 = vshrl.u32 %v8759_v37, 16 }
  0x7e   :  { %546 = vrot.lane.b32.xlu1 %v10873_v54, %s10446_s24  ;;  %v779_v26 = vsel %vm776_vm0, %v10550_v7, %v505_v61  ;;  %v109_v7 = vld [vmem:[%s15859_s0 + $0xf4] sm:$0x1]  ;;  %v451_v61 = vshll.u32 %v8759_v37, 16 }
  0x7f   :  { %544 = vrot.lane.b32.xlu0 %v426_v46, %s10446_s24  ;;  %v875_v48 = vsel %vm873_vm1, %v779_v26, %v609_v51  ;;  %v8761_v51 = vcombine.low %v10932_v40, %v107_v41 }
  0x80   :  { %v511_v5 = vpop.permute.xlu1 %510  ;;  %v453_v60 = vrot.slane %v451_v61, 1 }
  0x81   :  { %v507_v6 = vpop.permute.xlu0 %506  ;;  %v788_v58 = vsel %vm776_vm0, %v10560_v11, %v511_v5 }
  0x82   :  { %550 = vrot.lane.b32.xlu1 %v10878_v63, %s10446_s24  ;;  %v782_v23 = vsel %vm776_vm0, %v10537_v2, %v507_v6  ;;  %v10923_v2 = vld [vmem:[%s15859_s0 + $0xf0] sm:$0xf] }
  0x83   :  { %548 = vrot.lane.b32.xlu0 %v440_v3, %s10446_s24  ;;  %v877_v39 = vsel %vm873_vm1, %v782_v23, %v611_v42  ;;  %v703_v42 = vrot.slane %v701_v28, 1  ;;  %v8762_v57 = vcombine.low %v10923_v2, %v109_v7  ;;  %v10956_v28 = vor.u32 %v460_v20, %v456_v16 }
  0x84   :  { %v615_v18 = vpop.permute.xlu1 %614  ;;  %v463_v7 = vshrl.u32 %v8761_v51, 16 }
  0x85   :  { %v613_v25 = vpop.permute.xlu0 %612  ;;  %v881_v6 = vsel %vm873_vm1, %v788_v58, %v615_v18  ;;  %v704_v5 = vor.u32 %v703_v42, %v699_v50  ;;  %v472_v23 = vshll.u32 %v8762_v57, 16  ;;  %v465_v18 = vshll.u32 %v8761_v51, 16 }
  0x86   :  { %650 = vrot.lane.b32.xlu1 %v8788_v9, %s10445_s29  ;;  %v879_v9 = vsel %vm873_vm1, %v785_v4, %v613_v25  ;;  %v470_v30 = vshrl.u32 %v8762_v57, 16  ;;  %v8792_v50 = vcombine.low %v10932_v40, %v10932_v40  ;;  %v8791_v42 = vcombine.low %v10897_v14, %v10897_v14  ;;  %v113_v57 = vld [vmem:[%s15859_s0 + $0x104] sm:$0x1] }
  0x87   :  { %648 = vrot.lane.b32.xlu0 %v8787_v12, %s10445_s29  ;;  %v8764_v4 = vcombine.low %v10984_v55, %v113_v57 }
  0x88   :  { %v715_v38 = vpop.permute.xlu1 %714 }
  0x89   :  { %v713_v46 = vpop.permute.xlu0 %712  ;;  %v942_v49 = vsel %vm938_vm2, %v877_v39, %v715_v38  ;;  %v467_v38 = vrot.slane %v465_v18, 1 }
  0x8a   :  { %654 = vrot.lane.b32.xlu1 %v8790_v27, %s10445_s29  ;;  %v940_v53 = vsel %vm938_vm2, %v875_v48, %v713_v46  ;;  %v111_v46 = vld [vmem:[%s15859_s0 + $0xfc] sm:$0x1] }
  0x8b   :  { %652 = vrot.lane.b32.xlu0 %v8789_v34, %s10445_s29  ;;  %v8804_v59 = vcombine.low %v940_v53, %v942_v49  ;;  %v474_v34 = vrot.slane %v472_v23, 1  ;;  %v468_v41 = vor.u32 %v467_v38, %v463_v7 }
  0x8c   :  { %v719_v8 = vpop.permute.xlu1 %718 }
  0x8d   :  { %v946_v10 = vsel %vm938_vm2, %v881_v6, %v719_v8  ;;  %9319 = vmatprep.mubr.bf16.mxu0 %v8804_v59  ;;  %v717_v12 = vpop.permute.xlu0 %716  ;;  %v10962_v37 = vor.u32 %v474_v34, %v470_v30  ;;  %v10996_v6 = vld [vmem:[%s15859_s0 + $0x110] sm:$0xf]  ;;  %v117_v8 = vld [vmem:[%s15859_s0 + $0x114] sm:$0x1] }
  0x8e   :  { %v944_v11 = vsel %vm938_vm2, %v879_v9, %v717_v12  ;;  %754 = vrot.lane.b32.xlu1 %v440_v3, %s10447_s30  ;;  %v454_v3 = vor.u32 %v453_v60, %v449_v0  ;;  %v8766_v0 = vcombine.low %v10996_v6, %v117_v8 }
  0x8f   :  { %v8805_v26 = vcombine.low %v944_v11, %v946_v10  ;;  %752 = vrot.lane.b32.xlu0 %v10873_v54, %s10447_s30  ;;  %v8793_v10 = vcombine.low %v10923_v2, %v10923_v2 }
  0x90   :  { %v515_v25 = vpop.permute.xlu1 %514 }
  0x91   :  { %9320 = vmatmul.mubr.bf16.vlgmr.msra.gmra.mxu0 %v8805_v26  ;;  %v513_v27 = vpop.permute.xlu0 %512  ;;  %v794_v9 = vsel %vm776_vm0, %v10591_v36, %v515_v25  ;;  %v115_v36 = vld [vmem:[%s15859_s0 + $0x10c] sm:$0x1]  ;;  %v486_v25 = vshll.u32 %v8764_v4, 16 }
  0x92   :  { %758 = vrot.lane.b32.xlu1 %v704_v5, %s10447_s30  ;;  %v791_v12 = vsel %vm776_vm0, %v10583_v32, %v513_v27  ;;  %v11012_v5 = vld [vmem:[%s15859_s0 + $0x108] sm:$0xf] }
  0x93   :  { %756 = vrot.lane.b32.xlu0 %v10878_v63, %s10447_s30  ;;  %v10971_v63 = vld [vmem:[%s15859_s0 + $0xf8] sm:$0xf]  ;;  %v8765_v34 = vcombine.low %v11012_v5, %v115_v36  ;;  %v8796_v36 = vcombine.low %v11012_v5, %v11012_v5 }
  0x94   :  { %v519_v39 = vpop.permute.xlu1 %518  ;;  %v8763_v53 = vcombine.low %v10971_v63, %v111_v46  ;;  %v8794_v61 = vcombine.low %v10971_v63, %v10971_v63 }
  0x95   :  { %v517_v54 = vpop.permute.xlu0 %516  ;;  %v800_v27 = vsel %vm776_vm0, %v10609_v43, %v519_v39 }
  0x96   :  { %554 = vrot.lane.b32.xlu1 %v10956_v28, %s10446_s24  ;;  %v479_v51 = vshll.u32 %v8763_v53, 16  ;;  %v477_v60 = vshrl.u32 %v8763_v53, 16  ;;  %v488_v53 = vrot.slane %v486_v25, 1  ;;  %v8797_v25 = vcombine.low %v10996_v6, %v10996_v6 }
  0x97   :  { %552 = vrot.lane.b32.xlu0 %v454_v3, %s10446_s24  ;;  %v797_v3 = vsel %vm776_vm0, %v10617_v45, %v517_v54  ;;  %v493_v45 = vshll.u32 %v8765_v34, 16 }
  0x98   :  { %v619_v48 = vpop.permute.xlu1 %618  ;;  %v481_v18 = vrot.slane %v479_v51, 1 }
  0x99   :  { %v617_v49 = vpop.permute.xlu0 %616  ;;  %v885_v16 = vsel %vm873_vm1, %v794_v9, %v619_v48 }
  0x9a   :  { %558 = vrot.lane.b32.xlu1 %v10962_v37, %s10446_s24  ;;  %v883_v20 = vsel %vm873_vm1, %v791_v12, %v617_v49  ;;  %v482_v39 = vor.u32 %v481_v18, %v477_v60  ;;  %v119_v12 = vld [vmem:[%s15859_s0 + $0x11c] sm:$0x1] }
  0x9b   :  { %556 = vrot.lane.b32.xlu0 %v468_v41, %s10446_s24 }
  0x9c   :  { %v623_v58 = vpop.permute.xlu1 %622 }
  0x9d   :  { %v621_v59 = vpop.permute.xlu0 %620  ;;  %v889_v7 = vsel %vm873_vm1, %v800_v27, %v623_v58 }
  0x9e   :  { %658 = vrot.lane.b32.xlu1 %v8792_v50, %s10445_s29  ;;  %v887_v46 = vsel %vm873_vm1, %v797_v3, %v621_v59  ;;  %v484_v50 = vshrl.u32 %v8764_v4, 16  ;;  %v495_v4 = vrot.slane %v493_v45, 1 }
  0x9f   :  { %656 = vrot.lane.b32.xlu0 %v8791_v42, %s10445_s29  ;;  %v500_v42 = vshll.u32 %v8766_v0, 16 }
  0xa0   :  { %v723_v11 = vpop.permute.xlu1 %722  ;;  %v489_v59 = vor.u32 %v488_v53, %v484_v50 }
  0xa1   :  { %v950_v23 = vsel %vm938_vm2, %v885_v16, %v723_v11  ;;  %v721_v26 = vpop.permute.xlu0 %720  ;;  %v502_v51 = vrot.slane %v500_v42, 1 }
  0xa2   :  { %v948_v32 = vsel %vm938_vm2, %v883_v20, %v721_v26  ;;  %662 = vrot.lane.b32.xlu1 %v8794_v61, %s10445_s29  ;;  %v498_v61 = vshrl.u32 %v8766_v0, 16 }
  0xa3   :  { %v8806_v30 = vcombine.low %v948_v32, %v950_v23  ;;  %660 = vrot.lane.b32.xlu0 %v8793_v10, %s10445_s29  ;;  %v8795_v23 = vcombine.low %v10984_v55, %v10984_v55 }
  0xa4   :  { %v727_v38 = vpop.permute.xlu1 %726  ;;  %v503_v10 = vor.u32 %v502_v51, %v498_v61 }
  0xa5   :  { %v954_v48 = vsel %vm938_vm2, %v889_v7, %v727_v38  ;;  %9323 = vmatprep.mubr.bf16.mxu0 %v8806_v30  ;;  %v725_v49 = vpop.permute.xlu0 %724 }
  0xa6   :  { %v952_v43 = vsel %vm938_vm2, %v887_v46, %v725_v49  ;;  %762 = vrot.lane.b32.xlu1 %v468_v41, %s10447_s30  ;;  %v491_v41 = vshrl.u32 %v8765_v34, 16 }
  0xa7   :  { %v8807_v57 = vcombine.low %v952_v43, %v954_v48  ;;  %760 = vrot.lane.b32.xlu0 %v10956_v28, %s10447_s30 }
  0xa8   :  { %v523_v54 = vpop.permute.xlu1 %522  ;;  %v496_v28 = vor.u32 %v495_v4, %v491_v41 }
  0xa9   :  { %9324 = vmatmul.mubr.bf16.gmra.mxu0 %v8807_v57  ;;  %v521_v58 = vpop.permute.xlu0 %520  ;;  %v806_v18 = vsel %vm776_vm0, %v10659_v13, %v523_v54 }
  0xaa   :  { %766 = vrot.lane.b32.xlu1 %v482_v39, %s10447_s30  ;;  %v803_v27 = vsel %vm776_vm0, %v10667_v15, %v521_v58 }
  0xab   :  { %764 = vrot.lane.b32.xlu0 %v10962_v37, %s10447_s30  ;;  %v118_v37 = vld [vmem:[%s15859_s0 + $0x118] sm:$0xf] }
  0xac   :  { %v527_v8 = vpop.permute.xlu1 %526  ;;  %v8802_v20 = vcombine.low %v118_v37, %v119_v12  ;;  %v8798_v32 = vcombine.low %v118_v37, %v118_v37 }
  0xad   :  { %v525_v9 = vpop.permute.xlu0 %524  ;;  %v812_v49 = vsel %vm776_vm0, %v10681_v22, %v527_v8 }
  0xae   :  { %562 = vrot.lane.b32.xlu1 %v489_v59, %s10446_s24  ;;  %v708_v60 = vshll.u32 %v8802_v20, 16  ;;  %v706_v13 = vshrl.u32 %v8802_v20, 16  ;;  %v809_v15 = vsel %vm776_vm0, %v10689_v24, %v525_v9 }
  0xaf   :  { %560 = vrot.lane.b32.xlu0 %v482_v39, %s10446_s24 }
  0xb0   :  { %v627_v16 = vpop.permute.xlu1 %626  ;;  %v710_v48 = vrot.slane %v708_v60, 1 }
  0xb1   :  { %v625_v11 = vpop.permute.xlu0 %624  ;;  %v893_v30 = vsel %vm873_vm1, %v806_v18, %v627_v16 }
  0xb2   :  { %566 = vrot.lane.b32.xlu1 %v503_v10, %s10446_s24  ;;  %v891_v3 = vsel %vm873_vm1, %v803_v27, %v625_v11  ;;  %v711_v22 = vor.u32 %v710_v48, %v706_v13  ;;  %v9438_v13 = vld [vmem:[%s15861_s3 + $0x60] ss:$8 sps:$4 sm:$0xff]  }
  0xb3   :  { %564 = vrot.lane.b32.xlu0 %v496_v28, %s10446_s24 }
  0xb4   :  { %v631_v26 = vpop.permute.xlu1 %630 }
  0xb5   :  { %v629_v0 = vpop.permute.xlu0 %628  ;;  %v897_v43 = vsel %vm873_vm1, %v812_v49, %v631_v26  ;;  %v9439_v49 = vld [vmem:[%s15861_s3 + $0x54] ss:$8 sps:$4 sm:$0xff]  }
  0xb6   :  { %666 = vrot.lane.b32.xlu1 %v8796_v36, %s10445_s29  ;;  %v895_v53 = vsel %vm873_vm1, %v809_v15, %v629_v0  ;;  %v9441_v15 = vld [vmem:[%s15861_s3 + $0x50] ss:$8 sps:$4 sm:$0xff]  }
  0xb7   :  { %664 = vrot.lane.b32.xlu0 %v8795_v23, %s10445_s29 }
  0xb8   :  { %v731_v34 = vpop.permute.xlu1 %730 }
  0xb9   :  { %v958_v7 = vsel %vm938_vm2, %v893_v30, %v731_v34  ;;  %v729_v38 = vpop.permute.xlu0 %728 }
  0xba   :  { %v956_v46 = vsel %vm938_vm2, %v891_v3, %v729_v38  ;;  %670 = vrot.lane.b32.xlu1 %v8798_v32, %s10445_s29  ;;  %v9435_v3 = vld [vmem:[%s15861_s3 + $0x70] ss:$8 sps:$4 sm:$0xff]   ;;  %v9436_v38 = vld [vmem:[%s15861_s3 + $0x64] ss:$8 sps:$4 sm:$0xff]  }
  0xbb   :  { %v8808_v50 = vcombine.low %v956_v46, %v958_v7  ;;  %668 = vrot.lane.b32.xlu0 %v8797_v25, %s10445_s29 }
  0xbc   :  { %v735_v39 = vpop.permute.xlu1 %734 }
  0xbd   :  { %v962_v42 = vsel %vm938_vm2, %v897_v43, %v735_v39  ;;  %9327 = vmatprep.mubr.bf16.mxu0 %v8808_v50  ;;  %v733_v57 = vpop.permute.xlu0 %732 }
  0xbe   :  { %v960_v45 = vsel %vm938_vm2, %v895_v53, %v733_v57  ;;  %770 = vrot.lane.b32.xlu1 %v496_v28, %s10447_s30  ;;  %v9442_v57 = vld [vmem:[%s15861_s3 + $0x44] ss:$8 sps:$4 sm:$0xff]  }
  0xbf   :  { %v8809_v54 = vcombine.low %v960_v45, %v962_v42  ;;  %768 = vrot.lane.b32.xlu0 %v489_v59, %s10447_s30 }
  0xc0   :  { %v531_v58 = vpop.permute.xlu1 %530 }
  0xc1   :  { %9328 = vmatmul.mubr.bf16.gmra.mxu0 %v8809_v54  ;;  %v529_v24 = vpop.permute.xlu0 %528  ;;  %v818_v28 = vsel %vm776_vm0, %v10722_v56, %v531_v58 }
  0xc2   :  { %774 = vrot.lane.b32.xlu1 %v711_v22, %s10447_s30  ;;  %v815_v12 = vsel %vm776_vm0, %v10710_v52, %v529_v24 }
  0xc3   :  { %772 = vrot.lane.b32.xlu0 %v503_v10, %s10447_s30 }
  0xc4   :  { %v535_v61 = vpop.permute.xlu1 %534 }
  0xc5   :  { %v533_v51 = vpop.permute.xlu0 %532  ;;  %v824_v20 = vsel %vm776_vm0, %v10737_v62, %v535_v61 }
  0xc6   :  { %v821_v56 = vsel %vm776_vm0, %v10745_v1, %v533_v51  ;;  %v9433_v1 = vld [vmem:[%s15861_s3 + $0x74] ss:$8 sps:$4 sm:$0xff]  }
  0xc7   :  { %1679 = vmatprep.subr.bf16.mxu1 %v9433_v1 }
  0xc8   :  { %v635_v41 = vpop.permute.xlu1 %634  ;;  %1680 = vmatpush1.bf16.msra.mxu1 %v9435_v3 }
  0xc9   :  { %v633_v4 = vpop.permute.xlu0 %632  ;;  %v901_v59 = vsel %vm873_vm1, %v818_v28, %v635_v41  ;;  %1681 = vmatprep.subr.bf16.mxu1 %v9436_v38 }
  0xca   :  { %v899_v11 = vsel %vm873_vm1, %v815_v12, %v633_v4  ;;  %v9445_v4 = vld [vmem:[%s15861_s3 + $0x34] ss:$8 sps:$4 sm:$0xff]  }
  0xcc   :  { %v639_v8 = vpop.permute.xlu1 %638  ;;  %1682 = vmatpush1.bf16.msra.mxu1 %v9438_v13 }
  0xcd   :  { %v637_v9 = vpop.permute.xlu0 %636  ;;  %v905_v26 = vsel %vm873_vm1, %v824_v20, %v639_v8  ;;  %1683 = vmatprep.subr.bf16.mxu1 %v9439_v49 }
  0xce   :  { %v903_v0 = vsel %vm873_vm1, %v821_v56, %v637_v9 }
  0xd0   :  { %v739_v16 = vpop.permute.xlu1 %738  ;;  %1684 = vmatpush1.bf16.msra.mxu1 %v9441_v15 }
  0xd1   :  { %v966_v37 = vsel %vm938_vm2, %v901_v59, %v739_v16  ;;  %v737_v10 = vpop.permute.xlu0 %736  ;;  %1685 = vmatprep.subr.bf16.mxu1 %v9442_v57  ;;  %v9448_v16 = vld [vmem:[%s15861_s3 + $0x24] ss:$8 sps:$4 sm:$0xff]  }
  0xd2   :  { %v964_v36 = vsel %vm938_vm2, %v899_v11, %v737_v10 }
  0xd3   :  { %v8810_v23 = vcombine.low %v964_v36, %v966_v37  ;;  %v9450_v37 = vld [vmem:[%s15861_s3 + $0x20] ss:$8 sps:$4 sm:$0xff]   ;;  %v9451_v36 = vld [vmem:[%s15861_s3 + $0x14] ss:$8 sps:$4 sm:$0xff]  }
  0xd4   :  { %v743_v52 = vpop.permute.xlu1 %742 }
  0xd5   :  { %v970_v32 = vsel %vm938_vm2, %v905_v26, %v743_v52  ;;  %9331 = vmatprep.mubr.bf16.mxu0 %v8810_v23  ;;  %v741_v60 = vpop.permute.xlu0 %740  ;;  %v9453_v23 = vld [vmem:[%s15861_s3 + $0x10] ss:$8 sps:$4 sm:$0xff]   ;;  %v9454_v26 = vld [vmem:[%s15861_s3 + $0x4] ss:$8 sps:$4 sm:$0xff]  }
  0xd6   :  { %v968_v18 = vsel %vm938_vm2, %v903_v0, %v741_v60  ;;  %v9456_v0 = vld [vmem:[%s15861_s3] ss:$8 sps:$4 sm:$0xff]  }
  0xd7   :  { %v8811_v25 = vcombine.low %v968_v18, %v970_v32  ;;  %v15874_v18 = vmov 0  }
  0xd8   :  { %v539_v27 = vpop.permute.xlu1 %538  ;;  %1711 = vmatprep.mubr.bf16.mxu1 %v15874_v18 }
  0xd9   :  { %9332 = vmatmul.mubr.bf16.gmra.mxu0 %v8811_v25  ;;  %v537_v30 = vpop.permute.xlu0 %536  ;;  %v830_v43 = vsel %vm776_vm0, %v10775_v33, %v539_v27  ;;  %v9444_v33 = vld [vmem:[%s15861_s3 + $0x40] ss:$8 sps:$4 sm:$0xff]  }
  0xda   :  { %v827_v39 = vsel %vm776_vm0, %v10783_v35, %v537_v30  ;;  %1686 = vmatpush1.bf16.msra.mxu1 %v9444_v33 }
  0xdb   :  { %1687 = vmatprep.subr.bf16.mxu1 %v9445_v4 }
  0xdc   :  { %v543_v62 = vpop.permute.xlu1 %542 }
  0xdd   :  { %v541_v34 = vpop.permute.xlu0 %540  ;;  %v836_v35 = vsel %vm776_vm0, %v10797_v44, %v543_v62  ;;  %v9447_v44 = vld [vmem:[%s15861_s3 + $0x30] ss:$8 sps:$4 sm:$0xff]  }
  0xde   :  { %v833_v61 = vsel %vm776_vm0, %v10805_v47, %v541_v34  ;;  %1688 = vmatpush1.bf16.msra.mxu1 %v9447_v44 }
  0xdf   :  { %1689 = vmatprep.subr.bf16.mxu1 %v9448_v16 }
  0xe0   :  { %v643_v7 = vpop.permute.xlu1 %642 }
  0xe1   :  { %v641_v46 = vpop.permute.xlu0 %640  ;;  %v909_v53 = vsel %vm873_vm1, %v830_v43, %v643_v7 }
  0xe2   :  { %v907_v45 = vsel %vm873_vm1, %v827_v39, %v641_v46  ;;  %1690 = vmatpush1.bf16.msra.mxu1 %v9450_v37 }
  0xe3   :  { %1691 = vmatprep.subr.bf16.mxu1 %v9451_v36 }
  0xe4   :  { %v647_v48 = vpop.permute.xlu1 %646 }
  0xe5   :  { %v645_v50 = vpop.permute.xlu0 %644  ;;  %v913_v51 = vsel %vm873_vm1, %v836_v35, %v647_v48 }
  0xe6   :  { %v911_v8 = vsel %vm873_vm1, %v833_v61, %v645_v50  ;;  %1692 = vmatpush1.bf16.msra.mxu1 %v9453_v23 }
  0xe7   :  { %1693 = vmatprep.subr.bf16.mxu1 %v9454_v26 }
  0xe8   :  { %v747_v42 = vpop.permute.xlu1 %746 }
  0xe9   :  { %v974_v22 = vsel %vm938_vm2, %v909_v53, %v747_v42  ;;  %v745_v54 = vpop.permute.xlu0 %744 }
  0xea   :  { %v972_v58 = vsel %vm938_vm2, %v907_v45, %v745_v54  ;;  %1694 = vmatpush1.bf16.msra.mxu1 %v9456_v0 }
  0xeb   :  { %v8812_v24 = vcombine.low %v972_v58, %v974_v22 }
  0xec   :  { %v751_v41 = vpop.permute.xlu1 %750 }
  0xed   :  { %v978_v9 = vsel %vm938_vm2, %v913_v51, %v751_v41  ;;  %9335 = vmatprep.mubr.bf16.mxu0 %v8812_v24  ;;  %v749_v28 = vpop.permute.xlu0 %748 }
  0xee   :  { %v976_v12 = vsel %vm938_vm2, %v911_v8, %v749_v28 }
  0xef   :  { %v8813_v47 = vcombine.low %v976_v12, %v978_v9 }
  0xf0   :  { %v547_v59 = vpop.permute.xlu1 %546 }
  0xf1   :  { %9336 = vmatmul.mubr.bf16.gmra.mxu0 %v8813_v47  ;;  %v545_v11 = vpop.permute.xlu0 %544  ;;  %v842_v25 = vsel %vm776_vm0, %v10838_v21, %v547_v59 }
  0xf2   :  { %v839_v27 = vsel %vm776_vm0, %v10826_v17, %v545_v11 }
  0xf4   :  { %v551_v10 = vpop.permute.xlu1 %550 }
  0xf5   :  { %v549_v20 = vpop.permute.xlu0 %548  ;;  %v848_v38 = vsel %vm776_vm0, %v10853_v29, %v551_v10 }
  0xf6   :  { %v845_v21 = vsel %vm776_vm0, %v10861_v31, %v549_v20 }
  0xf8   :  { %v651_v56 = vpop.permute.xlu1 %650 }
  0xf9   :  { %v649_v52 = vpop.permute.xlu0 %648  ;;  %v917_v30 = vsel %vm873_vm1, %v842_v25, %v651_v56 }
  0xfa   :  { %v915_v1 = vsel %vm873_vm1, %v839_v27, %v649_v52 }
  0xfc   :  { %v655_v32 = vpop.permute.xlu1 %654 }
  0xfd   :  { %v653_v60 = vpop.permute.xlu0 %652  ;;  %v921_v13 = vsel %vm873_vm1, %v848_v38, %v655_v32 }
  0xfe   :  { %v919_v48 = vsel %vm873_vm1, %v845_v21, %v653_v60 }
 0x100   :  { %v755_v62 = vpop.permute.xlu1 %754 }
 0x101   :  { %v982_v34 = vsel %vm938_vm2, %v917_v30, %v755_v62  ;;  %v753_v3 = vpop.permute.xlu0 %752 }
 0x102   :  { %v980_v7 = vsel %vm938_vm2, %v915_v1, %v753_v3 }
 0x103   :  { %v8814_v46 = vcombine.low %v980_v7, %v982_v34 }
 0x104   :  { %v759_v17 = vpop.permute.xlu1 %758 }
 0x105   :  { %v986_v49 = vsel %vm938_vm2, %v921_v13, %v759_v17  ;;  %9339 = vmatprep.mubr.bf16.mxu0 %v8814_v46  ;;  %v757_v50 = vpop.permute.xlu0 %756 }
 0x106   :  { %v984_v15 = vsel %vm938_vm2, %v919_v48, %v757_v50 }
 0x107   :  { %v8815_v43 = vcombine.low %v984_v15, %v986_v49 }
 0x108   :  { %v555_v39 = vpop.permute.xlu1 %554 }
 0x109   :  { %9340 = vmatmul.mubr.bf16.gmra.mxu0 %v8815_v43  ;;  %v553_v53 = vpop.permute.xlu0 %552  ;;  %v854_v54 = vsel %vm776_vm0, %v10897_v14, %v555_v39 }
 0x10a   :  { %v851_v33 = vsel %vm776_vm0, %v10905_v19, %v553_v53 }
 0x10c   :  { %v559_v29 = vpop.permute.xlu1 %558 }
 0x10d   :  { %v557_v42 = vpop.permute.xlu0 %556  ;;  %v860_v4 = vsel %vm776_vm0, %v10923_v2, %v559_v29 }
 0x10e   :  { %v857_v14 = vsel %vm776_vm0, %v10932_v40, %v557_v42 }
 0x110   :  { %v659_v57 = vpop.permute.xlu1 %658 }
 0x111   :  { %v657_v45 = vpop.permute.xlu0 %656  ;;  %v925_v58 = vsel %vm873_vm1, %v854_v54, %v659_v57 }
 0x112   :  { %v923_v24 = vsel %vm873_vm1, %v851_v33, %v657_v45 }
 0x114   :  { %v663_v31 = vpop.permute.xlu1 %662 }
 0x115   :  { %v661_v22 = vpop.permute.xlu0 %660  ;;  %v929_v9 = vsel %vm873_vm1, %v860_v4, %v663_v31 }
 0x116   :  { %v927_v28 = vsel %vm873_vm1, %v857_v14, %v661_v22 }
 0x118   :  { %v763_v35 = vpop.permute.xlu1 %762 }
 0x119   :  { %v990_v61 = vsel %vm938_vm2, %v925_v58, %v763_v35  ;;  %v761_v51 = vpop.permute.xlu0 %760 }
 0x11a   :  { %v988_v41 = vsel %vm938_vm2, %v923_v24, %v761_v51 }
 0x11b   :  { %v8816_v8 = vcombine.low %v988_v41, %v990_v61 }
 0x11c   :  { %v767_v19 = vpop.permute.xlu1 %766 }
 0x11d   :  { %v994_v44 = vsel %vm938_vm2, %v929_v9, %v767_v19  ;;  %9343 = vmatprep.mubr.bf16.mxu0 %v8816_v8  ;;  %v765_v12 = vpop.permute.xlu0 %764 }
 0x11e   :  { %v992_v47 = vsel %vm938_vm2, %v927_v28, %v765_v12 }
 0x11f   :  { %v8817_v59 = vcombine.low %v992_v47, %v994_v44 }
 0x120   :  { %v563_v16 = vpop.permute.xlu1 %562 }
 0x121   :  { %9344 = vmatmul.mubr.bf16.gmra.mxu0 %v8817_v59  ;;  %v561_v11 = vpop.permute.xlu0 %560  ;;  %v866_v23 = vsel %vm776_vm0, %v10984_v55, %v563_v16 }
 0x122   :  { %v863_v56 = vsel %vm776_vm0, %v10971_v63, %v561_v11 }
 0x124   :  { %v567_v2 = vpop.permute.xlu1 %566 }
 0x125   :  { %v565_v37 = vpop.permute.xlu0 %564  ;;  %v872_v27 = vsel %vm776_vm0, %v10996_v6, %v567_v2  ;;  %v11210_v6 = vld [vmem:[%s15862_s2] ss:$0 sm:$0xff] }
 0x126   :  { %v869_v55 = vsel %vm776_vm0, %v11012_v5, %v565_v37 }
 0x128   :  { %v667_v10 = vpop.permute.xlu1 %666 }
 0x129   :  { %v665_v36 = vpop.permute.xlu0 %664  ;;  %v933_v26 = vsel %vm873_vm1, %v866_v23, %v667_v10 }
 0x12a   :  { %v931_v0 = vsel %vm873_vm1, %v863_v56, %v665_v36 }
 0x12c   :  { %v671_v40 = vpop.permute.xlu1 %670 }
 0x12d   :  { %v669_v20 = vpop.permute.xlu0 %668  ;;  %v937_v62 = vsel %vm873_vm1, %v872_v27, %v671_v40 }
 0x12e   :  { %v935_v1 = vsel %vm873_vm1, %v869_v55, %v669_v20 }
 0x130   :  { %v771_v52 = vpop.permute.xlu1 %770 }
 0x131   :  { %v998_v32 = vsel %vm938_vm2, %v933_v26, %v771_v52  ;;  %v769_v60 = vpop.permute.xlu0 %768 }
 0x132   :  { %v996_v25 = vsel %vm938_vm2, %v931_v0, %v769_v60 }
 0x133   :  { %v8818_v30 = vcombine.low %v996_v25, %v998_v32 }
 0x134   :  { %v775_v63 = vpop.permute.xlu1 %774 }
 0x135   :  { %v1002_v34 = vsel %vm938_vm2, %v937_v62, %v775_v63  ;;  %9347 = vmatprep.mubr.bf16.mxu0 %v8818_v30  ;;  %v773_v3 = vpop.permute.xlu0 %772 }
 0x136   :  { %v1000_v7 = vsel %vm938_vm2, %v935_v1, %v773_v3 }
 0x137   :  { %v8819_v38 = vcombine.low %v1000_v7, %v1002_v34 }
 0x139   :  { %9348 = vmatmul.mubr.bf16.gmra.mxu0 %v8819_v38 }
 0x151   :  { %v9321_v46 = vpop.f32.mrf.mxu0 }
 0x152   :  { %v1213_v17 = vadd.f32 %v9321_v46, %v11210_v6 }
 0x153   :  { %v1204_v5 = vpop.f32.mrf.mxu0 }
 0x154   :  { %v1205_v21 = vadd.f32 %v11210_v6, %v1204_v5  ;;  %v8830_v39 = vmul.f32 -1.442695, %v1213_v17 }
 0x155   :  { %v9322_v13 = vpop.f32.mrf.mxu0 }
 0x156   :  { %v8828_v48 = vmul.f32 -1.442695, %v1205_v21  ;;  %v1216_v49 = vadd.f32 %v9322_v13, %v11210_v6 }
 0x157   :  { %v1207_v50 = vpop.f32.mrf.mxu0 }
 0x158   :  { %9537 = vpow2.f32 %v8828_v48  ;;  %v8831_v15 = vmul.f32 -1.442695, %v1216_v49  ;;  %v1208_v43 = vadd.f32 %v11210_v6, %v1207_v50 }
 0x15a   :  { %v8829_v53 = vmul.f32 -1.442695, %v1208_v43  ;;  %9539 = vpow2.f32 %v8831_v15 }
 0x15c   :  { %9541 = vpow2.f32 %v8829_v53 }
 0x15d   :  { %9543 = vpow2.f32 %v8830_v39 }
 0x165   :  { %v9538_v29 = vpop.eup %9537 }
 0x166   :  { %v1427_v42 = vadd.f32 1.0, %v9538_v29 }
 0x167   :  { %v9540_v57 = vpop.eup %9539 }
 0x168   :  { %9545 = vrcp.f32 %v1427_v42  ;;  %v1430_v33 = vadd.f32 1.0, %v9540_v57 }
 0x169   :  { %v9542_v45 = vpop.eup %9541  ;;  %v9325_v31 = vpop.f32.mrf.mxu0 }
 0x16a   :  { %v1428_v22 = vadd.f32 1.0, %v9542_v45  ;;  %v9544_v54 = vpop.eup %9543  ;;  %v11218_v51 = vadd.f32 %v9325_v31, %v11210_v6 }
 0x16b   :  { %v1220_v58 = vpop.f32.mrf.mxu0  ;;  %v1429_v61 = vadd.f32 1.0, %v9544_v54 }
 0x16c   :  { %9547 = vrcp.f32 %v1428_v22  ;;  %v1221_v35 = vadd.f32 %v11210_v6, %v1220_v58  ;;  %v8834_v19 = vmul.f32 -1.442695, %v11218_v51 }
 0x16d   :  { %v9326_v24 = vpop.f32.mrf.mxu0  ;;  %9549 = vrcp.f32 %v1430_v33 }
 0x16e   :  { %v8832_v41 = vmul.f32 -1.442695, %v1221_v35  ;;  %v11221_v4 = vadd.f32 %v9326_v24, %v11210_v6 }
 0x16f   :  { %v1223_v8 = vpop.f32.mrf.mxu0 }
 0x170   :  { %9551 = vpow2.f32 %v8832_v41  ;;  %v8835_v14 = vmul.f32 -1.442695, %v11221_v4  ;;  %v1224_v9 = vadd.f32 %v11210_v6, %v1223_v8 }
 0x171   :  { %9553 = vrcp.f32 %v1429_v61 }
 0x172   :  { %v8833_v28 = vmul.f32 -1.442695, %v1224_v9  ;;  %9555 = vpow2.f32 %v8835_v14 }
 0x174   :  { %9557 = vpow2.f32 %v8833_v28 }
 0x175   :  { %9559 = vpow2.f32 %v8834_v19  ;;  %v9546_v44 = vpop.eup %9545 }
 0x176   :  { %v11226_v47 = vmul.f32 %v9546_v44, %v1205_v21 }
 0x178   :  { %16090 = vst [vmem:[#allocation2_spill] sm:$0xff] %v11226_v47 }
 0x179   :  { %v9548_v12 = vpop.eup %9547 }
 0x17a   :  { %v11228_v59 = vmul.f32 %v9548_v12, %v1208_v43  ;;  %v9550_v16 = vpop.eup %9549 }
 0x17b   :  { %v11233_v40 = vmul.f32 %v9550_v16, %v1216_v49 }
 0x17c   :  { %16091 = vst [vmem:[#allocation3_spill] sm:$0xff] %v11228_v59  ;;  %v1555_v11 = vpack.c.bf16 %v11228_v59, %v11226_v47 }
 0x17d   :  { %v9552_v2 = vpop.eup %9551  ;;  %16092 = vst [vmem:[#allocation4_spill] sm:$0xff] %v11233_v40 }
 0x17e   :  { %v1431_v37 = vadd.f32 1.0, %v9552_v2  ;;  %1712 = vmatmul.mubr.bf16.vlgmr.msra.gmra.mxu1 %v1555_v11  ;;  %v9554_v10 = vpop.eup %9553 }
 0x17f   :  { %1721 = vmatprep.mubr.bf16.mxu1 %v15874_v18  ;;  %v9556_v36 = vpop.eup %9555  ;;  %v11235_v56 = vmul.f32 %v9554_v10, %v1213_v17 }
 0x180   :  { %9561 = vrcp.f32 %v1431_v37  ;;  %v1434_v0 = vadd.f32 1.0, %v9556_v36 }
 0x181   :  { %v9558_v20 = vpop.eup %9557  ;;  %v9329_v23 = vpop.f32.mrf.mxu0  ;;  %16093 = vst [vmem:[#allocation5_spill] sm:$0xff] %v11235_v56  ;;  %v1556_v25 = vpack.c.bf16 %v11233_v40, %v11235_v56 }
 0x182   :  { %v1432_v26 = vadd.f32 1.0, %v9558_v20  ;;  %v9560_v52 = vpop.eup %9559  ;;  %v11243_v55 = vadd.f32 %v9329_v23, %v11210_v6 }
 0x183   :  { %v1236_v32 = vpop.f32.mrf.mxu0  ;;  %v1433_v30 = vadd.f32 1.0, %v9560_v52 }
 0x184   :  { %9563 = vrcp.f32 %v1432_v26  ;;  %v11238_v60 = vadd.f32 %v11210_v6, %v1236_v32  ;;  %v8838_v7 = vmul.f32 -1.442695, %v11243_v55 }
 0x185   :  { %v9330_v27 = vpop.f32.mrf.mxu0  ;;  %9565 = vrcp.f32 %v1434_v0 }
 0x186   :  { %v8836_v62 = vmul.f32 -1.442695, %v11238_v60  ;;  %v11247_v63 = vadd.f32 %v9330_v27, %v11210_v6  ;;  %1722 = vmatmul.mubr.bf16.gmra.mxu1 %v1556_v25 }
 0x187   :  { %v1239_v1 = vpop.f32.mrf.mxu0  ;;  %1731 = vmatprep.mubr.bf16.mxu1 %v15874_v18 }
 0x188   :  { %9567 = vpow2.f32 %v8836_v62  ;;  %v8839_v34 = vmul.f32 -1.442695, %v11247_v63  ;;  %v1240_v3 = vadd.f32 %v11210_v6, %v1239_v1 }
 0x189   :  { %9569 = vrcp.f32 %v1433_v30 }
 0x18a   :  { %v8837_v38 = vmul.f32 -1.442695, %v1240_v3  ;;  %9571 = vpow2.f32 %v8839_v34 }
 0x18c   :  { %9573 = vpow2.f32 %v8837_v38 }
 0x18d   :  { %9575 = vpow2.f32 %v8838_v7  ;;  %v9562_v46 = vpop.eup %9561 }
 0x18e   :  { %v11253_v21 = vmul.f32 %v9562_v46, %v1221_v35 }
 0x190   :  { %16094 = vst [vmem:[#allocation6_spill] sm:$0xff] %v11253_v21 }
 0x191   :  { %v9564_v5 = vpop.eup %9563 }
 0x192   :  { %v11255_v13 = vmul.f32 %v9564_v5, %v1224_v9  ;;  %v9566_v17 = vpop.eup %9565 }
 0x193   :  { %v11261_v39 = vmul.f32 %v9566_v17, %v11221_v4 }
 0x194   :  { %16095 = vst [vmem:[#allocation7_spill] sm:$0xff] %v11255_v13  ;;  %v1557_v48 = vpack.c.bf16 %v11255_v13, %v11253_v21 }
 0x195   :  { %v9568_v49 = vpop.eup %9567  ;;  %16096 = vst [vmem:[#allocation8_spill] sm:$0xff] %v11261_v39 }
 0x196   :  { %v1435_v50 = vadd.f32 1.0, %v9568_v49  ;;  %1732 = vmatmul.mubr.bf16.gmra.mxu1 %v1557_v48  ;;  %v9570_v15 = vpop.eup %9569 }
 0x197   :  { %1741 = vmatprep.mubr.bf16.mxu1 %v15874_v18  ;;  %v9572_v43 = vpop.eup %9571  ;;  %v11264_v42 = vmul.f32 %v9570_v15, %v11218_v51 }
 0x198   :  { %9577 = vrcp.f32 %v1435_v50  ;;  %v1438_v31 = vadd.f32 1.0, %v9572_v43 }
 0x199   :  { %v9574_v53 = vpop.eup %9573  ;;  %v9333_v29 = vpop.f32.mrf.mxu0  ;;  %16097 = vst [vmem:[#allocation9_spill] sm:$0xff] %v11264_v42  ;;  %v1558_v33 = vpack.c.bf16 %v11261_v39, %v11264_v42 }
 0x19a   :  { %v1436_v57 = vadd.f32 1.0, %v9574_v53  ;;  %v9576_v45 = vpop.eup %9575  ;;  %v11272_v24 = vadd.f32 %v9333_v29, %v11210_v6 }
 0x19b   :  { %v1252_v22 = vpop.f32.mrf.mxu0  ;;  %v1437_v35 = vadd.f32 1.0, %v9576_v45 }
 0x19c   :  { %9579 = vrcp.f32 %v1436_v57  ;;  %v11267_v54 = vadd.f32 %v11210_v6, %v1252_v22  ;;  %v8842_v14 = vmul.f32 -1.442695, %v11272_v24 }
 0x19d   :  { %v9334_v58 = vpop.f32.mrf.mxu0  ;;  %9581 = vrcp.f32 %v1438_v31 }
 0x19e   :  { %v8840_v61 = vmul.f32 -1.442695, %v11267_v54  ;;  %v11276_v51 = vadd.f32 %v9334_v58, %v11210_v6  ;;  %1742 = vmatmul.mubr.bf16.gmra.mxu1 %v1558_v33 }
 0x19f   :  { %v1255_v41 = vpop.f32.mrf.mxu0  ;;  %1751 = vmatprep.mubr.bf16.mxu1 %v15874_v18 }
 0x1a0   :  { %9583 = vpow2.f32 %v8840_v61  ;;  %v8843_v4 = vmul.f32 -1.442695, %v11276_v51  ;;  %v1256_v8 = vadd.f32 %v11210_v6, %v1255_v41 }
 0x1a1   :  { %9585 = vrcp.f32 %v1437_v35 }
 0x1a2   :  { %v8841_v9 = vmul.f32 -1.442695, %v1256_v8  ;;  %9587 = vpow2.f32 %v8843_v4 }
 0x1a4   :  { %9589 = vpow2.f32 %v8841_v9 }
 0x1a5   :  { %9591 = vpow2.f32 %v8842_v14  ;;  %v9578_v19 = vpop.eup %9577 }
 0x1a6   :  { %v11283_v44 = vmul.f32 %v9578_v19, %v11238_v60 }
 0x1a8   :  { %16098 = vst [vmem:[#allocation10_spill] sm:$0xff] %v11283_v44 }
 0x1a9   :  { %v9580_v28 = vpop.eup %9579 }
 0x1aa   :  { %v11285_v12 = vmul.f32 %v9580_v28, %v1240_v3  ;;  %v9582_v16 = vpop.eup %9581 }
 0x1ab   :  { %v11291_v20 = vmul.f32 %v9582_v16, %v11247_v63 }
 0x1ac   :  { %16099 = vst [vmem:[#allocation11_spill] sm:$0xff] %v11285_v12  ;;  %v1559_v11 = vpack.c.bf16 %v11285_v12, %v11283_v44 }
 0x1ad   :  { %v9584_v2 = vpop.eup %9583  ;;  %16100 = vst [vmem:[#allocation12_spill] sm:$0xff] %v11291_v20 }
 0x1ae   :  { %v1439_v37 = vadd.f32 1.0, %v9584_v2  ;;  %1752 = vmatmul.mubr.bf16.gmra.mxu1 %v1559_v11  ;;  %v9586_v10 = vpop.eup %9585 }
 0x1af   :  { %1761 = vmatprep.mubr.bf16.mxu1 %v15874_v18  ;;  %v9588_v36 = vpop.eup %9587  ;;  %v11294_v52 = vmul.f32 %v9586_v10, %v11243_v55 }
 0x1b0   :  { %9593 = vrcp.f32 %v1439_v37  ;;  %v1442_v60 = vadd.f32 1.0, %v9588_v36 }
 0x1b1   :  { %v9590_v23 = vpop.eup %9589  ;;  %v9337_v26 = vpop.f32.mrf.mxu0  ;;  %16101 = vst [vmem:[#allocation13_spill] sm:$0xff] %v11294_v52  ;;  %v1560_v30 = vpack.c.bf16 %v11291_v20, %v11294_v52 }
 0x1b2   :  { %v1440_v0 = vadd.f32 1.0, %v9590_v23  ;;  %v9592_v32 = vpop.eup %9591  ;;  %v11302_v1 = vadd.f32 %v9337_v26, %v11210_v6 }
 0x1b3   :  { %v1268_v25 = vpop.f32.mrf.mxu0  ;;  %v1441_v63 = vadd.f32 1.0, %v9592_v32 }
 0x1b4   :  { %9595 = vrcp.f32 %v1440_v0  ;;  %v11297_v27 = vadd.f32 %v11210_v6, %v1268_v25  ;;  %v8846_v46 = vmul.f32 -1.442695, %v11302_v1 }
 0x1b5   :  { %v9338_v62 = vpop.f32.mrf.mxu0  ;;  %9597 = vrcp.f32 %v1442_v60 }
 0x1b6   :  { %v8844_v55 = vmul.f32 -1.442695, %v11297_v27  ;;  %v11306_v34 = vadd.f32 %v9338_v62, %v11210_v6  ;;  %1762 = vmatmul.mubr.bf16.gmra.mxu1 %v1560_v30 }
 0x1b7   :  { %v1271_v3 = vpop.f32.mrf.mxu0  ;;  %1771 = vmatprep.mubr.bf16.mxu1 %v15874_v18 }
 0x1b8   :  { %9599 = vpow2.f32 %v8844_v55  ;;  %v8847_v7 = vmul.f32 -1.442695, %v11306_v34  ;;  %v1272_v38 = vadd.f32 %v11210_v6, %v1271_v3 }
 0x1b9   :  { %9601 = vrcp.f32 %v1441_v63 }
 0x1ba   :  { %v8845_v5 = vmul.f32 -1.442695, %v1272_v38  ;;  %9603 = vpow2.f32 %v8847_v7 }
 0x1bc   :  { %9605 = vpow2.f32 %v8845_v5 }
 0x1bd   :  { %9607 = vpow2.f32 %v8846_v46  ;;  %v9594_v17 = vpop.eup %9593 }
 0x1be   :  { %v11313_v49 = vmul.f32 %v9594_v17, %v11267_v54 }
 0x1c0   :  { %16102 = vst [vmem:[#allocation14_spill] sm:$0xff] %v11313_v49 }
 0x1c1   :  { %v9596_v48 = vpop.eup %9595 }
 0x1c2   :  { %v11315_v50 = vmul.f32 %v9596_v48, %v1256_v8  ;;  %v9598_v15 = vpop.eup %9597 }
 0x1c3   :  { %v11321_v31 = vmul.f32 %v9598_v15, %v11276_v51 }
 0x1c4   :  { %16103 = vst [vmem:[#allocation15_spill] sm:$0xff] %v11315_v50  ;;  %v1561_v43 = vpack.c.bf16 %v11315_v50, %v11313_v49 }
 0x1c5   :  { %v9600_v53 = vpop.eup %9599  ;;  %16104 = vst [vmem:[#allocation16_spill] sm:$0xff] %v11321_v31 }
 0x1c6   :  { %v1443_v29 = vadd.f32 1.0, %v9600_v53  ;;  %1772 = vmatmul.mubr.bf16.gmra.mxu1 %v1561_v43  ;;  %v9602_v57 = vpop.eup %9601 }
 0x1c7   :  { %1781 = vmatprep.mubr.bf16.mxu1 %v15874_v18  ;;  %v9604_v45 = vpop.eup %9603  ;;  %v11324_v54 = vmul.f32 %v9602_v57, %v11272_v24 }
 0x1c8   :  { %9609 = vrcp.f32 %v1443_v29  ;;  %v1446_v61 = vadd.f32 1.0, %v9604_v45 }
 0x1c9   :  { %v9606_v22 = vpop.eup %9605  ;;  %v9341_v33 = vpop.f32.mrf.mxu0  ;;  %16105 = vst [vmem:[#allocation17_spill] sm:$0xff] %v11324_v54  ;;  %v1562_v8 = vpack.c.bf16 %v11321_v31, %v11324_v54 }
 0x1ca   :  { %v1444_v58 = vadd.f32 1.0, %v9606_v22  ;;  %v9608_v35 = vpop.eup %9607  ;;  %v11332_v9 = vadd.f32 %v9341_v33, %v11210_v6 }
 0x1cb   :  { %v1284_v41 = vpop.f32.mrf.mxu0  ;;  %v1445_v51 = vadd.f32 1.0, %v9608_v35 }
 0x1cc   :  { %9611 = vrcp.f32 %v1444_v58  ;;  %v11327_v4 = vadd.f32 %v11210_v6, %v1284_v41  ;;  %v8850_v2 = vmul.f32 -1.442695, %v11332_v9 }
 0x1cd   :  { %v9342_v14 = vpop.f32.mrf.mxu0  ;;  %9613 = vrcp.f32 %v1446_v61 }
 0x1ce   :  { %v8848_v24 = vmul.f32 -1.442695, %v11327_v4  ;;  %v11336_v19 = vadd.f32 %v9342_v14, %v11210_v6  ;;  %1782 = vmatmul.mubr.bf16.gmra.mxu1 %v1562_v8 }
 0x1cf   :  { %v1287_v28 = vpop.f32.mrf.mxu0  ;;  %1791 = vmatprep.mubr.bf16.mxu1 %v15874_v18 }
 0x1d0   :  { %9615 = vpow2.f32 %v8848_v24  ;;  %v8851_v16 = vmul.f32 -1.442695, %v11336_v19  ;;  %v1288_v11 = vadd.f32 %v11210_v6, %v1287_v28 }
 0x1d1   :  { %9617 = vrcp.f32 %v1445_v51 }
 0x1d2   :  { %v8849_v37 = vmul.f32 -1.442695, %v1288_v11  ;;  %9619 = vpow2.f32 %v8851_v16 }
 0x1d4   :  { %9621 = vpow2.f32 %v8849_v37 }
 0x1d5   :  { %9623 = vpow2.f32 %v8850_v2  ;;  %v9610_v10 = vpop.eup %9609 }
 0x1d6   :  { %v11343_v23 = vmul.f32 %v9610_v10, %v11297_v27 }
 0x1d8   :  { %16106 = vst [vmem:[#allocation18_spill] sm:$0xff] %v11343_v23 }
 0x1d9   :  { %v9612_v36 = vpop.eup %9611 }
 0x1da   :  { %v11345_v26 = vmul.f32 %v9612_v36, %v1272_v38  ;;  %v9614_v0 = vpop.eup %9613 }
 0x1db   :  { %v11351_v63 = vmul.f32 %v9614_v0, %v11306_v34 }
 0x1dc   :  { %16107 = vst [vmem:[#allocation19_spill] sm:$0xff] %v11345_v26  ;;  %v1563_v32 = vpack.c.bf16 %v11345_v26, %v11343_v23 }
 0x1dd   :  { %v9616_v60 = vpop.eup %9615  ;;  %16108 = vst [vmem:[#allocation20_spill] sm:$0xff] %v11351_v63 }
 0x1de   :  { %v1447_v25 = vadd.f32 1.0, %v9616_v60  ;;  %1792 = vmatmul.mubr.bf16.gmra.mxu1 %v1563_v32  ;;  %v9618_v30 = vpop.eup %9617 }
 0x1df   :  { %1801 = vmatprep.mubr.bf16.mxu1 %v15874_v18  ;;  %v9620_v62 = vpop.eup %9619  ;;  %v11354_v27 = vmul.f32 %v9618_v30, %v11302_v1 }
 0x1e0   :  { %9625 = vrcp.f32 %v1447_v25  ;;  %v1450_v46 = vadd.f32 1.0, %v9620_v62 }
 0x1e1   :  { %v9622_v55 = vpop.eup %9621  ;;  %v9345_v3 = vpop.f32.mrf.mxu0  ;;  %16109 = vst [vmem:[#allocation21_spill] sm:$0xff] %v11354_v27  ;;  %v1564_v48 = vpack.c.bf16 %v11351_v63, %v11354_v27 }
 0x1e2   :  { %v1448_v7 = vadd.f32 1.0, %v9622_v55  ;;  %v9624_v38 = vpop.eup %9623  ;;  %v11362_v43 = vadd.f32 %v9345_v3, %v11210_v6 }
 0x1e3   :  { %v1300_v5 = vpop.f32.mrf.mxu0  ;;  %v1449_v34 = vadd.f32 1.0, %v9624_v38 }
 0x1e4   :  { %9627 = vrcp.f32 %v1448_v7  ;;  %v11357_v17 = vadd.f32 %v11210_v6, %v1300_v5  ;;  %v8854_v22 = vmul.f32 -1.442695, %v11362_v43 }
 0x1e5   :  { %v9346_v15 = vpop.f32.mrf.mxu0  ;;  %9629 = vrcp.f32 %v1450_v46 }
 0x1e6   :  { %v8852_v1 = vmul.f32 -1.442695, %v11357_v17  ;;  %v11366_v53 = vadd.f32 %v9346_v15, %v11210_v6  ;;  %1802 = vmatmul.mubr.bf16.gmra.mxu1 %v1564_v48 }
 0x1e7   :  { %v1303_v29 = vpop.f32.mrf.mxu0  ;;  %1811 = vmatprep.mubr.bf16.mxu1 %v15874_v18 }
 0x1e8   :  { %9631 = vpow2.f32 %v8852_v1  ;;  %v8855_v57 = vmul.f32 -1.442695, %v11366_v53  ;;  %v1304_v45 = vadd.f32 %v11210_v6, %v1303_v29 }
 0x1e9   :  { %9633 = vrcp.f32 %v1449_v34 }
 0x1ea   :  { %v8853_v33 = vmul.f32 -1.442695, %v1304_v45  ;;  %9635 = vpow2.f32 %v8855_v57 }
 0x1ec   :  { %9637 = vpow2.f32 %v8853_v33 }
 0x1ed   :  { %9639 = vpow2.f32 %v8854_v22  ;;  %v9626_v58 = vpop.eup %9625 }
 0x1ee   :  { %v11373_v61 = vmul.f32 %v9626_v58, %v11327_v4 }
 0x1f0   :  { %16110 = vst [vmem:[#allocation22_spill] sm:$0xff] %v11373_v61 }
 0x1f1   :  { %v9628_v35 = vpop.eup %9627 }
 0x1f2   :  { %v11375_v41 = vmul.f32 %v9628_v35, %v1288_v11  ;;  %v9630_v8 = vpop.eup %9629 }
 0x1f3   :  { %v11381_v2 = vmul.f32 %v9630_v8, %v11336_v19 }
 0x1f4   :  { %16111 = vst [vmem:[#allocation23_spill] sm:$0xff] %v11375_v41  ;;  %v1565_v14 = vpack.c.bf16 %v11375_v41, %v11373_v61 }
 0x1f5   :  { %v9632_v51 = vpop.eup %9631  ;;  %16112 = vst [vmem:[#allocation24_spill] sm:$0xff] %v11381_v2 }
 0x1f6   :  { %v1451_v24 = vadd.f32 1.0, %v9632_v51  ;;  %1812 = vmatmul.mubr.bf16.gmra.mxu1 %v1565_v14  ;;  %v9634_v28 = vpop.eup %9633 }
 0x1f7   :  { %1821 = vmatprep.mubr.bf16.mxu1 %v15874_v18  ;;  %v9636_v16 = vpop.eup %9635  ;;  %v11384_v4 = vmul.f32 %v9634_v28, %v11332_v9 }
 0x1f8   :  { %9641 = vrcp.f32 %v1451_v24  ;;  %v1454_v0 = vadd.f32 1.0, %v9636_v16 }
 0x1f9   :  { %v9638_v37 = vpop.eup %9637  ;;  %v9349_v10 = vpop.f32.mrf.mxu0  ;;  %16113 = vst [vmem:[#allocation25_spill] sm:$0xff] %v11384_v4  ;;  %v1566_v25 = vpack.c.bf16 %v11381_v2, %v11384_v4 }
 0x1fa   :  { %v1452_v11 = vadd.f32 1.0, %v9638_v37  ;;  %v9640_v36 = vpop.eup %9639  ;;  %v1325_v19 = vadd.f32 %v9349_v10, %v11210_v6 }
 0x1fb   :  { %v1316_v32 = vpop.f32.mrf.mxu0  ;;  %v1453_v62 = vadd.f32 1.0, %v9640_v36 }
 0x1fc   :  { %9643 = vrcp.f32 %v1452_v11  ;;  %v1317_v60 = vadd.f32 %v11210_v6, %v1316_v32  ;;  %v8858_v46 = vmul.f32 -1.442695, %v1325_v19 }
 0x1fd   :  { %v9350_v30 = vpop.f32.mrf.mxu0  ;;  %9645 = vrcp.f32 %v1454_v0 }
 0x1fe   :  { %v8856_v55 = vmul.f32 -1.442695, %v1317_v60  ;;  %v1328_v3 = vadd.f32 %v9350_v30, %v11210_v6  ;;  %1822 = vmatmul.mubr.bf16.gmra.mxu1 %v1566_v25 }
 0x1ff   :  { %v1319_v9 = vpop.f32.mrf.mxu0  ;;  %1831 = vmatprep.mubr.bf16.mxu1 %v15874_v18 }
 0x200   :  { %9647 = vpow2.f32 %v8856_v55  ;;  %v8859_v7 = vmul.f32 -1.442695, %v1328_v3  ;;  %v1320_v38 = vadd.f32 %v11210_v6, %v1319_v9  ;;  %v1587_v55 = vld [vmem:[%s15863_s4] sm:$0x3] }
 0x201   :  { %9649 = vrcp.f32 %v1453_v62 }
 0x202   :  { %v8857_v5 = vmul.f32 -1.442695, %v1320_v38  ;;  %9651 = vpow2.f32 %v8859_v7 }
 0x204   :  { %9653 = vpow2.f32 %v8857_v5 }
 0x205   :  { %9655 = vpow2.f32 %v8858_v46  ;;  %v9642_v48 = vpop.eup %9641 }
 0x206   :  { %v11394_v34 = vmul.f32 %v9642_v48, %v11357_v17 }
 0x208   :  { %16114 = vst [vmem:[#allocation26_spill] sm:$0xff] %v11394_v34 }
 0x209   :  { %v9644_v15 = vpop.eup %9643 }
 0x20a   :  { %v11396_v1 = vmul.f32 %v9644_v15, %v1304_v45  ;;  %v9646_v29 = vpop.eup %9645 }
 0x20b   :  { %v11402_v35 = vmul.f32 %v9646_v29, %v11366_v53 }
 0x20c   :  { %16115 = vst [vmem:[#allocation27_spill] sm:$0xff] %v11396_v1  ;;  %v1567_v57 = vpack.c.bf16 %v11396_v1, %v11394_v34 }
 0x20d   :  { %v9648_v22 = vpop.eup %9647  ;;  %16116 = vst [vmem:[#allocation28_spill] sm:$0xff] %v11402_v35 }
 0x20e   :  { %v1455_v33 = vadd.f32 1.0, %v9648_v22  ;;  %1832 = vmatmul.mubr.bf16.gmra.mxu1 %v1567_v57  ;;  %v9650_v6 = vpop.eup %9649 }
 0x20f   :  { %1841 = vmatprep.mubr.bf16.mxu1 %v15874_v18  ;;  %v9652_v58 = vpop.eup %9651  ;;  %v11405_v17 = vmul.f32 %v9650_v6, %v11362_v43 }
 0x210   :  { %9657 = vrcp.f32 %v1455_v33  ;;  %v1458_v51 = vadd.f32 1.0, %v9652_v58 }
 0x211   :  { %v9654_v8 = vpop.eup %9653  ;;  %16117 = vst [vmem:[#allocation29_spill] sm:$0xff] %v11405_v17  ;;  %v1568_v24 = vpack.c.bf16 %v11402_v35, %v11405_v17 }
 0x212   :  { %v1456_v45 = vadd.f32 1.0, %v9654_v8  ;;  %v9656_v14 = vpop.eup %9655 }
 0x213   :  { %v1457_v28 = vadd.f32 1.0, %v9656_v14 }
 0x214   :  { %9659 = vrcp.f32 %v1456_v45 }
 0x215   :  { %9661 = vrcp.f32 %v1458_v51  ;;  %v10449_v51 = vmov 0.0  }
 0x216   :  { %1842 = vmatmul.mubr.bf16.gmra.mxu1 %v1568_v24  ;;  %9663 = vrcp.f32 %v1457_v28  ;;  %v2385_v24 = vrot.slane %v10449_v51, 7  ;;  %v11459_v28 = vld [vmem:[%s15864_s5 + $0x1] ss:$4 sm:$0x3] }
 0x217   :  { %1851 = vmatprep.mubr.bf16.mxu1 %v15874_v18 }
 0x21d   :  { %v9658_v53 = vpop.eup %9657 }
 0x21e   :  { %v11410_v37 = vmul.f32 %v9658_v53, %v1317_v60  ;;  %v1589_v60 = vlaneseq }
 0x220   :  { %16118 = vst [vmem:[#allocation30_spill] sm:$0xff] %v11410_v37  ;;  %v11424_v30 = vshrl.u32 %v1589_v60, 7  ;;  %v11471_v60 = vsel %vm2515_vm3, %v2385_v24, 0.0 }
 0x221   :  { %v9660_v16 = vpop.eup %9659  ;;  %16129 = vst [vmem:[#allocation41_spill] sm:$0xff] %v11471_v60 }
 0x222   :  { %v11412_v43 = vmul.f32 %v9660_v16, %v1320_v38  ;;  %v9662_v11 = vpop.eup %9661  ;;  %16122 = vst [vmem:[#allocation34_spill] sm:$0xff] %v11424_v30  ;;  %v11427_v62 = vsub.s32 0, %v11424_v30 }
 0x223   :  { %v9664_v36 = vpop.eup %9663  ;;  %v11417_v0 = vmul.f32 %v9662_v11, %v1328_v3  ;;  %v11433_v3 = vsub.s32 1, %v11424_v30 }
 0x224   :  { %16119 = vst [vmem:[#allocation31_spill] sm:$0xff] %v11412_v43  ;;  %v1569_v10 = vpack.c.bf16 %v11412_v43, %v11410_v37  ;;  %v11419_v32 = vmul.f32 %v9664_v36, %v1325_v19  ;;  %16123 = vst [vmem:[#allocation35_spill] sm:$0xff] %v11427_v62  ;;  %v11436_v19 = vrot.slane %v1587_v55, %v11427_v62 }
 0x225   :  { %16120 = vst [vmem:[#allocation32_spill] sm:$0xff] %v11417_v0  ;;  %16124 = vst [vmem:[#allocation36_spill] sm:$0xff] %v11433_v3  ;;  %v11439_v7 = vrot.slane %v1587_v55, %v11433_v3  ;;  %v11464_v11 = vrot.slane %v11459_v28, %v11427_v62  ;;  %v11476_v55 = vld [vmem:[%s15864_s5 + $0x2] ss:$4 sm:$0x3] }
 0x226   :  { %1852 = vmatmul.mubr.bf16.gmra.mxu1 %v1569_v10  ;;  %16121 = vst [vmem:[#allocation33_spill] sm:$0xff] %v11419_v32  ;;  %v1570_v25 = vpack.c.bf16 %v11417_v0, %v11419_v32  ;;  %16125 = vst [vmem:[#allocation37_spill] sm:$0xff] %v11436_v19 }
 0x227   :  { %1861 = vmatprep.mubr.bf16.mxu1 %v15874_v18  ;;  %16126 = vst [vmem:[#allocation38_spill] sm:$0xff] %v11439_v7  ;;  %16127 = vst [vmem:[#allocation39_spill] sm:$0xff] %v11464_v11 }
 0x22e   :  { %1862 = vmatmul.mubr.bf16.gmra.mxu1 %v1570_v25  ;;  %v11468_v25 = vsel %vm2515_vm3, 0.0, %v2385_v24 }
 0x22f   :  { %7979 = vmatprep.mubr.bf16.mxu1 %v15874_v18  ;;  %16128 = vst [vmem:[#allocation40_spill] sm:$0xff] %v11468_v25 }
 0x23e   :  { %v1713_v9 = vpop.f32.mrf.mxu1 }
 0x23f   :  { %v1714_v38 = vadd.f32 %v1713_v9, %v11436_v19 }
 0x240   :  { %v1715_v46 = vpop.f32.mrf.mxu1 }
 0x241   :  { %v8876_v5 = vmul.f32 -1.442695, %v1714_v38  ;;  %v11443_v48 = vadd.f32 %v1715_v46, %v11439_v7 }
 0x242   :  { %v1717_v15 = vpop.f32.mrf.mxu1 }
 0x243   :  { %9665 = vpow2.f32 %v8876_v5  ;;  %v11446_v29 = vadd.f32 %v1717_v15, %v11436_v19  ;;  %v8877_v22 = vmul.f32 -1.442695, %v11443_v48  ;;  %v11481_v5 = vld [vmem:[%s15864_s5] ss:$4 sm:$0x3]  ;;  %v2787_v15 = vmul.f32 %v11464_v11, %v11468_v25 }
 0x244   :  { %v1719_v33 = vpop.f32.mrf.mxu1 }
 0x245   :  { %v8878_v57 = vmul.f32 -1.442695, %v11446_v29  ;;  %v11451_v45 = vadd.f32 %v1719_v33, %v11439_v7  ;;  %v3020_v51 = vrot.slane %v2787_v15, 1 }
 0x246   :  { %v1723_v8 = vpop.f32.mrf.mxu1 }
 0x247   :  { %9667 = vpow2.f32 %v8878_v57  ;;  %v11454_v14 = vadd.f32 %v1723_v8, %v11436_v19  ;;  %v8879_v10 = vmul.f32 -1.442695, %v11451_v45  ;;  %v2789_v57 = vmul.f32 %v11464_v11, %v11471_v60 }
 0x248   :  { %9669 = vpow2.f32 %v8877_v22  ;;  %v11489_v22 = vrot.slane %v11476_v55, %v11427_v62  ;;  %v1725_v33 = vpop.f32.mrf.mxu1 }
 0x249   :  { %v8880_v36 = vmul.f32 -1.442695, %v11454_v14  ;;  %v3021_v24 = vrot.slane %v2789_v57, 1 }
 0x24a   :  { %16130 = vst [vmem:[#allocation42_spill] sm:$0xff] %v11489_v22  ;;  %v1727_v27 = vpop.f32.mrf.mxu1 }
 0x24b   :  { %v3022_v57 = vsel %vm3019_vm4, %v3020_v51, %v3021_v24 }
 0x24c   :  { %v1729_v40 = vpop.f32.mrf.mxu1 }
 0x250   :  { %v9666_v6 = vpop.eup %9665 }
 0x251   :  { %v2064_v58 = vadd.f32 1.0, %v9666_v6  ;;  %v11493_v6 = vrot.slane %v11481_v5, %v11427_v62 }
 0x253   :  { %9671 = vrcp.f32 %v2064_v58  ;;  %16131 = vst [vmem:[#allocation43_spill] sm:$0xff] %v11493_v6  ;;  %v11496_v58 = vadd.f32 %v1725_v33, %v11439_v7 }
 0x254   :  { %v9668_v53 = vpop.eup %9667  ;;  %9673 = vpow2.f32 %v8879_v10 }
 0x255   :  { %v9670_v16 = vpop.eup %9669  ;;  %v2066_v9 = vadd.f32 1.0, %v9668_v53  ;;  %9675 = vpow2.f32 %v8880_v36  ;;  %v3323_v53 = vmul.f32 %v11489_v22, %v11468_v25  ;;  %v11505_v36 = vld [vmem:[%s15864_s5 + $0x9] ss:$4 sm:$0x3]  ;;  %v8881_v15 = vmul.f32 -1.442695, %v11496_v58 }
 0x256   :  { %v2065_v46 = vadd.f32 1.0, %v9670_v16  ;;  %v3325_v16 = vmul.f32 %v11489_v22, %v11471_v60 }
 0x257   :  { %9677 = vrcp.f32 %v2066_v9  ;;  %v3556_v33 = vrot.slane %v3323_v53, 2 }
 0x258   :  { %9679 = vrcp.f32 %v2065_v46  ;;  %v2658_v46 = vmul.f32 %v11493_v6, %v11468_v25  ;;  %v3557_v18 = vrot.slane %v3325_v16, 2  ;;  %v11531_v16 = vld [vmem:[%s15864_s5 + $0xa] ss:$4 sm:$0x3] }
 0x259   :  { %9681 = vpow2.f32 %v8881_v15  ;;  %v11538_v34 = vrot.slane %v11531_v16, %v11427_v62 }
 0x25a   :  { %v3252_v24 = vadd.f32 %v3022_v57, %v2658_v46  ;;  %v3558_v37 = vsel %vm3555_vm5, %v3556_v33, %v3557_v18 }
 0x25b   :  { %16133 = vst [vmem:[#allocation45_spill] sm:$0xff] %v11538_v34 }
 0x25c   :  { %v11542_v41 = vadd.f32 %v3558_v37, %v3252_v24 }
 0x25e   :  { %16134 = vst [vmem:[#allocation46_spill] sm:$0xff] %v11542_v41 }
 0x260   :  { %v9672_v8 = vpop.eup %9671 }
 0x261   :  { %v2256_v10 = vmul.f32 %v9672_v8, %v1714_v38  ;;  %v11514_v38 = vld [vmem:[%s15864_s5 + $0x8] ss:$4 sm:$0x3]  ;;  %v11518_v8 = vrot.slane %v11505_v36, %v11427_v62  ;;  %v9674_v43 = vpop.eup %9673 }
 0x262   :  { %v11526_v53 = vrot.slane %v11514_v38, %v11427_v62  ;;  %v9676_v17 = vpop.eup %9675  ;;  %v2067_v63 = vadd.f32 1.0, %v9674_v43 }
 0x263   :  { %v2386_v9 = vrot.slane %v2256_v10, 7  ;;  %v2068_v26 = vadd.f32 1.0, %v9676_v17  ;;  %v11559_v17 = vld [vmem:[%s15864_s5 + $0x10] ss:$4 sm:$0x3] }
 0x264   :  { %16132 = vst [vmem:[#allocation44_spill] sm:$0xff] %v11526_v53  ;;  %v9678_v57 = vpop.eup %9677  ;;  %9683 = vrcp.f32 %v2067_v63 }
 0x265   :  { %v2517_v10 = vsel %vm2515_vm3, 0.0, %v2386_v9  ;;  %v2582_v0 = vsel %vm2515_vm3, %v2386_v9, 0.0  ;;  %v9680_v2 = vpop.eup %9679  ;;  %9685 = vrcp.f32 %v2068_v26 }
 0x266   :  { %v2791_v32 = vmul.f32 %v11464_v11, %v2517_v10  ;;  %v2793_v51 = vmul.f32 %v11464_v11, %v2582_v0  ;;  %v4000_v9 = vmul.f32 %v11518_v8, %v2517_v10  ;;  %v4002_v35 = vmul.f32 %v11518_v8, %v2582_v0 }
 0x267   :  { %v3327_v4 = vmul.f32 %v11489_v22, %v2517_v10  ;;  %v3329_v15 = vmul.f32 %v11489_v22, %v2582_v0  ;;  %v3859_v18 = vmul.f32 %v11526_v53, %v2517_v10  ;;  %v2660_v23 = vmul.f32 %v11493_v6, %v2517_v10 }
 0x268   :  { %v3026_v1 = vrot.slane %v2791_v32, 1  ;;  %v3027_v46 = vrot.slane %v2793_v51, 1  ;;  %v4256_v33 = vrot.slane %v4000_v9, 1  ;;  %v4257_v61 = vrot.slane %v4002_v35, 1 }
 0x269   :  { %v2258_v51 = vmul.f32 %v9678_v57, %v11446_v29  ;;  %v4589_v31 = vmul.f32 %v11538_v34, %v2517_v10  ;;  %v4591_v54 = vmul.f32 %v11538_v34, %v2582_v0  ;;  %v2257_v37 = vmul.f32 %v9680_v2, %v11443_v48  ;;  %v11564_v2 = vld [vmem:[%s15864_s5 + $0x11] ss:$4 sm:$0x3] }
 0x26a   :  { %v3028_v32 = vsel %vm3019_vm4, %v3026_v1, %v3027_v46  ;;  %v3562_v24 = vrot.slane %v3327_v4, 2  ;;  %v3563_v50 = vrot.slane %v3329_v15, 2  ;;  %v3923_v9 = vadd.f32 %v3859_v18, %v11542_v41  ;;  %v9682_v46 = vpop.eup %9681 }
 0x26b   :  { %v11553_v35 = vadd.f32 %v1727_v27, %v11436_v19  ;;  %v3254_v43 = vadd.f32 %v3028_v32, %v2660_v23  ;;  %v4258_v1 = vsel %vm3019_vm4, %v4256_v33, %v4257_v61  ;;  %v2388_v29 = vrot.slane %v2258_v51, 7  ;;  %v11569_v23 = vld [vmem:[%s15864_s5 + $0x12] ss:$4 sm:$0x3] }
 0x26c   :  { %v4845_v4 = vrot.slane %v4589_v31, 2  ;;  %v4846_v0 = vrot.slane %v4591_v54, 2  ;;  %v2387_v27 = vrot.slane %v2257_v37, 7  ;;  %v3564_v61 = vsel %vm3555_vm5, %v3562_v24, %v3563_v50 }
 0x26d   :  { %v4512_v48 = vadd.f32 %v4258_v1, %v3923_v9  ;;  %v11573_v63 = vsel %vm2515_vm3, 0.0, %v2388_v29  ;;  %v8882_v10 = vmul.f32 -1.442695, %v11553_v35  ;;  %v3790_v57 = vadd.f32 %v3564_v61, %v3254_v43 }
 0x26e   :  { %v2584_v26 = vsel %vm2515_vm3, %v2388_v29, 0.0  ;;  %v11579_v31 = vrot.slane %v11459_v28, %v11433_v3  ;;  %v11583_v54 = vrot.slane %v11559_v17, %v11427_v62  ;;  %v11587_v50 = vrot.slane %v11564_v2, %v11427_v62 }
 0x26f   :  { %v11591_v15 = vrot.slane %v11569_v23, %v11427_v62  ;;  %v4847_v18 = vsel %vm3555_vm5, %v4845_v4, %v4846_v0  ;;  %v11595_v33 = vsel %vm2515_vm3, 0.0, %v2387_v27  ;;  %v3861_v28 = vmul.f32 %v11526_v53, %v11573_v63 }
 0x270   :  { %16135 = vst [vmem:[#allocation47_spill] sm:$0xff] %v11579_v31  ;;  %16136 = vst [vmem:[#allocation48_spill] sm:$0xff] %v11583_v54  ;;  %v4004_v32 = vmul.f32 %v11518_v8, %v11573_v63  ;;  %v5101_v51 = vadd.f32 %v4847_v18, %v4512_v48  ;;  %v4006_v37 = vmul.f32 %v11518_v8, %v2584_v26  ;;  %v2069_v24 = vadd.f32 1.0, %v9682_v46 }
 0x271   :  { %16137 = vst [vmem:[#allocation49_spill] sm:$0xff] %v11591_v15  ;;  %9687 = vpow2.f32 %v8882_v10  ;;  %v11603_v9 = vsel %vm2515_vm3, %v2387_v27, 0.0  ;;  %v3925_v43 = vadd.f32 %v3861_v28, %v3790_v57  ;;  %v4593_v29 = vmul.f32 %v11538_v34, %v11573_v63  ;;  %v9684_v44 = vpop.eup %9683 }
 0x272   :  { %v4262_v1 = vrot.slane %v4004_v32, 1  ;;  %v2792_v4 = vmul.f32 %v11579_v31, %v11595_v33  ;;  %v4263_v0 = vrot.slane %v4006_v37, 1  ;;  %v4595_v61 = vmul.f32 %v11538_v34, %v2584_v26  ;;  %v9686_v13 = vpop.eup %9685 }
 0x273   :  { %v5178_v48 = vmul.f32 %v11583_v54, %v11573_v63  ;;  %v2795_v10 = vmul.f32 %v11464_v11, %v11573_v63  ;;  %v2797_v27 = vmul.f32 %v11464_v11, %v2584_v26  ;;  %v4851_v46 = vrot.slane %v4593_v29, 2 }
 0x274   :  { %v5313_v57 = vmul.f32 %v11587_v50, %v11573_v63  ;;  %v4264_v18 = vsel %vm3019_vm4, %v4262_v1, %v4263_v0  ;;  %v4852_v28 = vrot.slane %v4595_v61, 2  ;;  %v5315_v37 = vmul.f32 %v11587_v50, %v2584_v26 }
 0x275   :  { %v5236_v32 = vadd.f32 %v5178_v48, %v5101_v51  ;;  %v2794_v49 = vmul.f32 %v11579_v31, %v11603_v9  ;;  %v4514_v20 = vadd.f32 %v4264_v18, %v3925_v43  ;;  %v5854_v12 = vmul.f32 %v11591_v15, %v11573_v63 }
 0x276   :  { %v5545_v52 = vrot.slane %v5313_v57, 1  ;;  %v4853_v29 = vsel %vm3555_vm5, %v4851_v46, %v4852_v28  ;;  %v5546_v39 = vrot.slane %v5315_v37, 1  ;;  %v5856_v42 = vmul.f32 %v11591_v15, %v2584_v26 }
 0x277   :  { %v11627_v51 = vrot.slane %v11476_v55, %v11433_v3  ;;  %v11629_v1 = vadd.f32 %v4853_v29, %v4514_v20  ;;  %v6086_v0 = vrot.slane %v5854_v12, 2  ;;  %9689 = vrcp.f32 %v2069_v24 }
 0x278   :  { %v3032_v43 = vrot.slane %v2795_v10, 1  ;;  %v3033_v61 = vrot.slane %v2797_v27, 1  ;;  %v5547_v48 = vsel %vm3019_vm4, %v5545_v52, %v5546_v39  ;;  %v6087_v57 = vrot.slane %v5856_v42, 2 }
 0x279   :  { %v3029_v18 = vrot.slane %v2792_v4, 1  ;;  %v3030_v21 = vrot.slane %v2794_v49, 1  ;;  %v5777_v46 = vadd.f32 %v5547_v48, %v5236_v32  ;;  %v2259_v28 = vmul.f32 %v9684_v44, %v11451_v45 }
 0x27a   :  { %v3331_v37 = vmul.f32 %v11489_v22, %v11573_v63  ;;  %v3333_v55 = vmul.f32 %v11489_v22, %v2584_v26  ;;  %v6088_v20 = vsel %vm3555_vm5, %v6086_v0, %v6087_v57  ;;  %v2260_v12 = vmul.f32 %v9686_v13, %v11454_v14 }
 0x27b   :  { %v11638_v24 = vadd.f32 %v6088_v20, %v5777_v46  ;;  %v3328_v39 = vmul.f32 %v11627_v51, %v11595_v33  ;;  %v3330_v42 = vmul.f32 %v11627_v51, %v11603_v9  ;;  %v3034_v52 = vsel %vm3019_vm4, %v3032_v43, %v3033_v61 }
 0x27c   :  { %v11647_v49 = vrot.slane %v11481_v5, %v11433_v3  ;;  %v3031_v45 = vsel %vm3019_vm4, %v3029_v18, %v3030_v21  ;;  %v2662_v13 = vmul.f32 %v11493_v6, %v11573_v63  ;;  %v3568_v14 = vrot.slane %v3331_v37, 2 }
 0x27d   :  { %16138 = vst [vmem:[#allocation50_spill] sm:$0xff] %v11638_v24  ;;  %v3569_v26 = vrot.slane %v3333_v55, 2  ;;  %v2389_v4 = vrot.slane %v2259_v28, 7  ;;  %v2390_v10 = vrot.slane %v2260_v12, 7  ;;  %v3565_v29 = vrot.slane %v3328_v39, 2 }
 0x27e   :  { %v9688_v44 = vpop.eup %9687  ;;  %v2661_v27 = vmul.f32 %v11647_v49, %v11595_v33  ;;  %v3256_v32 = vadd.f32 %v3034_v52, %v2662_v13  ;;  %v3566_v0 = vrot.slane %v3330_v42, 2  ;;  %v11663_v48 = vrot.slane %v11505_v36, %v11433_v3 }
 0x27f   :  { %v3570_v61 = vsel %vm3555_vm5, %v3568_v14, %v3569_v26  ;;  %v11656_v5 = vsel %vm2515_vm3, 0.0, %v2389_v4  ;;  %v11659_v21 = vsel %vm2515_vm3, 0.0, %v2390_v10  ;;  %v2070_v63 = vadd.f32 1.0, %v9688_v44 }
 0x280   :  { %v3255_v43 = vadd.f32 %v3031_v45, %v2661_v27  ;;  %16139 = vst [vmem:[#allocation51_spill] sm:$0xff] %v11663_v48  ;;  %v3792_v57 = vadd.f32 %v3570_v61, %v3256_v32  ;;  %v3567_v46 = vsel %vm3555_vm5, %v3565_v29, %v3566_v0  ;;  %v11668_v28 = vrot.slane %v11514_v38, %v11433_v3 }
 0x281   :  { %v11672_v37 = vrot.slane %v11531_v16, %v11433_v3  ;;  %v11675_v55 = vsel %vm2515_vm3, %v2389_v4, 0.0  ;;  %v4005_v36 = vmul.f32 %v11663_v48, %v11656_v5  ;;  %v2586_v12 = vsel %vm2515_vm3, %v2390_v10, 0.0 }
 0x282   :  { %16140 = vst [vmem:[#allocation52_spill] sm:$0xff] %v11668_v28  ;;  %v3791_v20 = vadd.f32 %v3567_v46, %v3255_v43  ;;  %v3863_v39 = vmul.f32 %v11526_v53, %v11659_v21  ;;  %v4008_v38 = vmul.f32 %v11518_v8, %v11659_v21  ;;  %9691 = vrcp.f32 %v2070_v63 }
 0x283   :  { %v3862_v16 = vmul.f32 %v11668_v28, %v11656_v5  ;;  %v4007_v42 = vmul.f32 %v11663_v48, %v11675_v55  ;;  %v4594_v52 = vmul.f32 %v11672_v37, %v11656_v5  ;;  %v4010_v45 = vmul.f32 %v11518_v8, %v2586_v12 }
 0x284   :  { %v9690_v18 = vpop.eup %9689  ;;  %v3927_v44 = vadd.f32 %v3863_v39, %v3792_v57  ;;  %v4268_v13 = vrot.slane %v4008_v38, 1  ;;  %v4597_v14 = vmul.f32 %v11538_v34, %v11659_v21  ;;  %v4265_v10 = vrot.slane %v4005_v36, 1 }
 0x285   :  { %v2261_v26 = vmul.f32 %v9690_v18, %v11496_v58  ;;  %v3926_v4 = vadd.f32 %v3862_v16, %v3791_v20  ;;  %v4596_v27 = vmul.f32 %v11672_v37, %v11675_v55  ;;  %v4599_v32 = vmul.f32 %v11538_v34, %v2586_v12 }
 0x286   :  { %v4269_v29 = vrot.slane %v4010_v45, 1  ;;  %v4857_v0 = vrot.slane %v4597_v14, 2  ;;  %v5180_v43 = vmul.f32 %v11583_v54, %v11659_v21  ;;  %v5317_v61 = vmul.f32 %v11587_v50, %v11659_v21 }
 0x287   :  { %v4266_v63 = vrot.slane %v4007_v42, 1  ;;  %v4854_v57 = vrot.slane %v4594_v52, 2  ;;  %v4858_v46 = vrot.slane %v4599_v32, 2  ;;  %v5319_v58 = vmul.f32 %v11587_v50, %v2586_v12 }
 0x288   :  { %v4270_v18 = vsel %vm3019_vm4, %v4268_v13, %v4269_v29  ;;  %v5238_v20 = vadd.f32 %v5180_v43, %v11629_v1  ;;  %v5551_v36 = vrot.slane %v5317_v61, 1  ;;  %v5858_v39 = vmul.f32 %v11591_v15, %v11659_v21 }
 0x289   :  { %v4855_v38 = vrot.slane %v4596_v27, 2  ;;  %v2799_v16 = vmul.f32 %v11464_v11, %v11659_v21  ;;  %v4516_v45 = vadd.f32 %v4270_v18, %v3927_v44  ;;  %v5552_v14 = vrot.slane %v5319_v58, 1 }
 0x28a   :  { %v2801_v42 = vmul.f32 %v11464_v11, %v2586_v12  ;;  %v4859_v52 = vsel %vm3555_vm5, %v4857_v0, %v4858_v46  ;;  %v5860_v32 = vmul.f32 %v11591_v15, %v2586_v12  ;;  %v6092_v13 = vrot.slane %v5858_v39, 2 }
 0x28b   :  { %v4267_v1 = vsel %vm3019_vm4, %v4265_v10, %v4266_v63  ;;  %v11712_v29 = vadd.f32 %v4859_v52, %v4516_v45  ;;  %v5553_v43 = vsel %vm3019_vm4, %v5551_v36, %v5552_v14  ;;  %v2391_v27 = vrot.slane %v2261_v26, 7 }
 0x28c   :  { %v4515_v61 = vadd.f32 %v4267_v1, %v3926_v4  ;;  %v5779_v56 = vadd.f32 %v5553_v43, %v5238_v20  ;;  %v6093_v59 = vrot.slane %v5860_v32, 2  ;;  %v11716_v44 = vadd.f32 %v1729_v40, %v11439_v7  ;;  %v1733_v4 = vpop.f32.mrf.mxu1 }
 0x28d   :  { %v4856_v58 = vsel %vm3555_vm5, %v4854_v57, %v4855_v38  ;;  %v3038_v18 = vrot.slane %v2799_v16, 1  ;;  %v3039_v0 = vrot.slane %v2801_v42, 1  ;;  %v3335_v10 = vmul.f32 %v11489_v22, %v11659_v21 }
 0x28e   :  { %v6094_v46 = vsel %vm3555_vm5, %v6092_v13, %v6093_v59  ;;  %v3337_v63 = vmul.f32 %v11489_v22, %v2586_v12  ;;  %v11726_v26 = vsel %vm2515_vm3, 0.0, %v2391_v27  ;;  %v5104_v40 = vadd.f32 %v4856_v58, %v4515_v61 }
 0x28f   :  { %v9692_v39 = vpop.eup %9691  ;;  %v11723_v36 = vadd.f32 %v6094_v46, %v5779_v56  ;;  %v11730_v57 = vrot.slane %v11559_v17, %v11433_v3  ;;  %v8883_v20 = vmul.f32 -1.442695, %v11716_v44  ;;  %v11735_v59 = vrot.slane %v11564_v2, %v11433_v3 }
 0x290   :  { %v11738_v38 = vsel %vm2515_vm3, %v2391_v27, 0.0  ;;  %v3040_v56 = vsel %vm3019_vm4, %v3038_v18, %v3039_v0  ;;  %v2262_v16 = vmul.f32 %v9692_v39, %v11553_v35  ;;  %v11745_v45 = vadd.f32 %v1733_v4, %v11436_v19 }
 0x291   :  { %16141 = vst [vmem:[#allocation53_spill] sm:$0xff] %v11723_v36  ;;  %16142 = vst [vmem:[#allocation54_spill] sm:$0xff] %v11730_v57  ;;  %v5181_v12 = vmul.f32 %v11730_v57, %v11726_v26  ;;  %v2664_v17 = vmul.f32 %v11493_v6, %v11659_v21  ;;  %v3574_v14 = vrot.slane %v3335_v10, 2  ;;  %v3575_v42 = vrot.slane %v3337_v63, 2  ;;  %v1735_v10 = vpop.f32.mrf.mxu1 }
 0x292   :  { %v5318_v2 = vmul.f32 %v11735_v59, %v11726_v26  ;;  %v11753_v52 = vrot.slane %v11569_v23, %v11433_v3  ;;  %v5320_v13 = vmul.f32 %v11735_v59, %v11738_v38  ;;  %9693 = vpow2.f32 %v8883_v20 }
 0x293   :  { %v5239_v32 = vadd.f32 %v5181_v12, %v5104_v40  ;;  %v3258_v35 = vadd.f32 %v3040_v56, %v2664_v17  ;;  %v2392_v61 = vrot.slane %v2262_v16, 7  ;;  %v3576_v58 = vsel %vm3555_vm5, %v3574_v14, %v3575_v42 }
 0x294   :  { %16143 = vst [vmem:[#allocation55_spill] sm:$0xff] %v11753_v52  ;;  %v5554_v1 = vrot.slane %v5318_v2, 1  ;;  %v5555_v43 = vrot.slane %v5320_v13, 1  ;;  %v5859_v21 = vmul.f32 %v11753_v52, %v11726_v26  ;;  %v5861_v27 = vmul.f32 %v11753_v52, %v11738_v38 }
 0x295   :  { %v8884_v23 = vmul.f32 -1.442695, %v11745_v45  ;;  %v11765_v39 = vsel %vm2515_vm3, 0.0, %v2392_v61  ;;  %v3794_v63 = vadd.f32 %v3576_v58, %v3258_v35  ;;  %v11768_v40 = vsel %vm2515_vm3, %v2392_v61, 0.0 }
 0x296   :  { %v5556_v18 = vsel %vm3019_vm4, %v5554_v1, %v5555_v43  ;;  %v6095_v0 = vrot.slane %v5859_v21, 2  ;;  %v6096_v46 = vrot.slane %v5861_v27, 2  ;;  %v3865_v12 = vmul.f32 %v11526_v53, %v11765_v39 }
 0x297   :  { %v5780_v4 = vadd.f32 %v5556_v18, %v5239_v32  ;;  %v4012_v16 = vmul.f32 %v11518_v8, %v11765_v39  ;;  %v11778_v17 = vadd.f32 %v1735_v10, %v11439_v7  ;;  %v4014_v14 = vmul.f32 %v11518_v8, %v11768_v40 }
 0x298   :  { %v6097_v20 = vsel %vm3555_vm5, %v6095_v0, %v6096_v46  ;;  %9695 = vpow2.f32 %v8884_v23  ;;  %v2788_v42 = vmul.f32 %v11579_v31, %v11468_v25  ;;  %v2790_v2 = vmul.f32 %v11579_v31, %v11471_v60 }
 0x299   :  { %v11771_v56 = vadd.f32 %v6097_v20, %v5780_v4  ;;  %v3929_v32 = vadd.f32 %v3865_v12, %v3794_v63  ;;  %v4274_v13 = vrot.slane %v4012_v16, 1  ;;  %v4275_v35 = vrot.slane %v4014_v14, 1 }
 0x29a   :  { %v4601_v1 = vmul.f32 %v11538_v34, %v11765_v39  ;;  %v4603_v43 = vmul.f32 %v11538_v34, %v11768_v40  ;;  %v5182_v21 = vmul.f32 %v11583_v54, %v11765_v39  ;;  %v8885_v27 = vmul.f32 -1.442695, %v11778_v17 }
 0x29b   :  { %16144 = vst [vmem:[#allocation56_spill] sm:$0xff] %v11771_v56  ;;  %v4276_v61 = vsel %vm3019_vm4, %v4274_v13, %v4275_v35  ;;  %v5321_v18 = vmul.f32 %v11587_v50, %v11765_v39  ;;  %v3023_v46 = vrot.slane %v2788_v42, 1  ;;  %v3024_v10 = vrot.slane %v2790_v2, 1 }
 0x29c   :  { %v4863_v58 = vrot.slane %v4601_v1, 2  ;;  %v4864_v23 = vrot.slane %v4603_v43, 2  ;;  %v4518_v63 = vadd.f32 %v4276_v61, %v3929_v32  ;;  %v5240_v4 = vadd.f32 %v5182_v21, %v11712_v29  ;;  %v1737_v43 = vpop.f32.mrf.mxu1 }
 0x29d   :  { %v5323_v12 = vmul.f32 %v11587_v50, %v11768_v40  ;;  %v5557_v16 = vrot.slane %v5321_v18, 1  ;;  %v5862_v14 = vmul.f32 %v11591_v15, %v11765_v39  ;;  %v3324_v13 = vmul.f32 %v11627_v51, %v11468_v25 }
 0x29e   :  { %v4865_v20 = vsel %vm3555_vm5, %v4863_v58, %v4864_v23  ;;  %v3326_v35 = vmul.f32 %v11627_v51, %v11471_v60  ;;  %v5864_v29 = vmul.f32 %v11591_v15, %v11768_v40  ;;  %9697 = vpow2.f32 %v8885_v27 }
 0x29f   :  { %v9694_v0 = vpop.eup %9693  ;;  %v11806_v42 = vadd.f32 %v4865_v20, %v4518_v63  ;;  %v5558_v2 = vrot.slane %v5323_v12, 1  ;;  %v6098_v32 = vrot.slane %v5862_v14, 2  ;;  %v2659_v58 = vmul.f32 %v11647_v49, %v11468_v25 }
 0x2a0   :  { %v2071_v1 = vadd.f32 1.0, %v9694_v0  ;;  %v6099_v21 = vrot.slane %v5864_v29, 2  ;;  %v3025_v23 = vsel %vm3019_vm4, %v3023_v46, %v3024_v10  ;;  %v11815_v63 = vadd.f32 %v1737_v43, %v11436_v19 }
 0x2a1   :  { %v5559_v61 = vsel %vm3019_vm4, %v5557_v16, %v5558_v2  ;;  %v3559_v20 = vrot.slane %v3324_v13, 2  ;;  %v3560_v47 = vrot.slane %v3326_v35, 2  ;;  %v3253_v14 = vadd.f32 %v3025_v23, %v2659_v58  ;;  %v1739_v13 = vpop.f32.mrf.mxu1 }
 0x2a2   :  { %v5781_v18 = vadd.f32 %v5559_v61, %v5240_v4  ;;  %v6100_v12 = vsel %vm3555_vm5, %v6098_v32, %v6099_v21  ;;  %9699 = vrcp.f32 %v2071_v1  ;;  %v8886_v16 = vmul.f32 -1.442695, %v11815_v63 }
 0x2a3   :  { %v3561_v29 = vsel %vm3555_vm5, %v3559_v20, %v3560_v47  ;;  %v4001_v46 = vmul.f32 %v11663_v48, %v11595_v33  ;;  %v4003_v10 = vmul.f32 %v11663_v48, %v11603_v9  ;;  %v3860_v2 = vmul.f32 %v11668_v28, %v11595_v33  ;;  %v1743_v43 = vpop.f32.mrf.mxu1 }
 0x2a4   :  { %v11818_v27 = vadd.f32 %v6100_v12, %v5781_v18  ;;  %v11826_v35 = vadd.f32 %v3561_v29, %v3253_v14  ;;  %9701 = vpow2.f32 %v8886_v16  ;;  %v11831_v47 = vadd.f32 %v1739_v13, %v11439_v7 }
 0x2a5   :  { %v9696_v0 = vpop.eup %9695  ;;  %v4259_v32 = vrot.slane %v4001_v46, 1  ;;  %v4260_v1 = vrot.slane %v4003_v10, 1  ;;  %v4590_v58 = vmul.f32 %v11672_v37, %v11595_v33  ;;  %v4592_v23 = vmul.f32 %v11672_v37, %v11603_v9 }
 0x2a6   :  { %16145 = vst [vmem:[#allocation57_spill] sm:$0xff] %v11818_v27  ;;  %v2072_v4 = vadd.f32 1.0, %v9696_v0  ;;  %16146 = vst [vmem:[#allocation58_spill] sm:$0xff] %v11826_v35  ;;  %v3924_v61 = vadd.f32 %v3860_v2, %v11826_v35  ;;  %v11839_v18 = vadd.f32 %v1743_v43, %v11436_v19  ;;  %v2803_v12 = vmul.f32 %v11464_v11, %v11765_v39 }
 0x2a7   :  { %16147 = vst [vmem:[#allocation59_spill] sm:$0xff] %v11831_v47  ;;  %v4261_v20 = vsel %vm3019_vm4, %v4259_v32, %v4260_v1  ;;  %v2805_v0 = vmul.f32 %v11464_v11, %v11768_v40  ;;  %v8887_v29 = vmul.f32 -1.442695, %v11831_v47  ;;  %v2800_v33 = vmul.f32 %v11579_v31, %v11726_v26 }
 0x2a8   :  { %9703 = vrcp.f32 %v2072_v4  ;;  %16148 = vst [vmem:[#allocation60_spill] sm:$0xff] %v11839_v18  ;;  %v2802_v9 = vmul.f32 %v11579_v31, %v11738_v38  ;;  %v4513_v46 = vadd.f32 %v4261_v20, %v3924_v61  ;;  %v4848_v10 = vrot.slane %v4590_v58, 2 }
 0x2a9   :  { %v4849_v4 = vrot.slane %v4592_v23, 2  ;;  %v8888_v13 = vmul.f32 -1.442695, %v11839_v18  ;;  %v3044_v2 = vrot.slane %v2803_v12, 1  ;;  %v3045_v32 = vrot.slane %v2805_v0, 1 }
 0x2aa   :  { %v3041_v43 = vrot.slane %v2800_v33, 1  ;;  %v3339_v30 = vmul.f32 %v11489_v22, %v11765_v39  ;;  %v3341_v3 = vmul.f32 %v11489_v22, %v11768_v40  ;;  %v3336_v58 = vmul.f32 %v11627_v51, %v11726_v26 }
 0x2ab   :  { %v9698_v21 = vpop.eup %9697  ;;  %v4850_v61 = vsel %vm3555_vm5, %v4848_v10, %v4849_v4  ;;  %v3338_v23 = vmul.f32 %v11627_v51, %v11738_v38  ;;  %v11864_v12 = vmul.f32 %v11735_v59, %v11656_v5  ;;  %v3046_v0 = vsel %vm3019_vm4, %v3044_v2, %v3045_v32 }
 0x2ac   :  { %v2073_v14 = vadd.f32 1.0, %v9698_v21  ;;  %v3042_v21 = vrot.slane %v2802_v9, 1  ;;  %v5102_v20 = vadd.f32 %v4850_v61, %v4513_v46  ;;  %v5179_v40 = vmul.f32 %v11730_v57, %v11656_v5 }
 0x2ad   :  { %v2665_v33 = vmul.f32 %v11647_v49, %v11726_v26  ;;  %v2666_v9 = vmul.f32 %v11493_v6, %v11765_v39  ;;  %v3580_v10 = vrot.slane %v3339_v30, 2  ;;  %v3581_v4 = vrot.slane %v3341_v3, 2 }
 0x2ae   :  { %9705 = vrcp.f32 %v2073_v14  ;;  %v3043_v46 = vsel %vm3019_vm4, %v3041_v43, %v3042_v21  ;;  %v3577_v2 = vrot.slane %v3336_v58, 2  ;;  %v3578_v32 = vrot.slane %v3338_v23, 2 }
 0x2af   :  { %v9700_v16 = vpop.eup %9699  ;;  %9707 = vpow2.f32 %v8887_v29  ;;  %v11871_v29 = vmul.f32 %v11735_v59, %v11675_v55  ;;  %v5237_v62 = vadd.f32 %v5179_v40, %v5102_v20  ;;  %v5548_v35 = vrot.slane %v11864_v12, 1 }
 0x2b0   :  { %v2263_v1 = vmul.f32 %v9700_v16, %v11716_v44  ;;  %9709 = vpow2.f32 %v8888_v13  ;;  %v11885_v39 = vmul.f32 %v11753_v52, %v11656_v5  ;;  %v11889_v30 = vmul.f32 %v11753_v52, %v11675_v55 }
 0x2b1   :  { %v9702_v44 = vpop.eup %9701  ;;  %v3259_v3 = vadd.f32 %v3043_v46, %v2665_v33  ;;  %v5549_v43 = vrot.slane %v11871_v29, 1  ;;  %v3582_v21 = vsel %vm3555_vm5, %v3580_v10, %v3581_v4 }
 0x2b2   :  { %v2393_v14 = vrot.slane %v2263_v1, 7  ;;  %v3260_v1 = vadd.f32 %v3046_v0, %v2666_v9  ;;  %v2074_v61 = vadd.f32 1.0, %v9702_v44  ;;  %v3579_v44 = vsel %vm3555_vm5, %v3577_v2, %v3578_v32 }
 0x2b3   :  { %v6089_v29 = vrot.slane %v11885_v39, 2  ;;  %v6090_v33 = vrot.slane %v11889_v30, 2  ;;  %v3795_v9 = vadd.f32 %v3579_v44, %v3259_v3 }
 0x2b4   :  { %v11881_v41 = vsel %vm2515_vm3, 0.0, %v2393_v14  ;;  %v3796_v20 = vadd.f32 %v3582_v21, %v3260_v1  ;;  %9711 = vrcp.f32 %v2074_v61 }
 0x2b5   :  { %v9704_v16 = vpop.eup %9703  ;;  %16149 = vst [vmem:[#allocation61_spill] sm:$0xff] %v11881_v41  ;;  %v4013_v12 = vmul.f32 %v11663_v48, %v11881_v41  ;;  %v3866_v4 = vmul.f32 %v11668_v28, %v11881_v41 }
 0x2b6   :  { %v2264_v13 = vmul.f32 %v9704_v16, %v11745_v45  ;;  %v11892_v45 = vsel %vm2515_vm3, %v2393_v14, 0.0 }
 0x2b7   :  { %16150 = vst [vmem:[#allocation62_spill] sm:$0xff] %v11892_v45  ;;  %v4015_v0 = vmul.f32 %v11663_v48, %v11892_v45  ;;  %v4277_v1 = vrot.slane %v4013_v12, 1  ;;  %v4604_v44 = vmul.f32 %v11672_v37, %v11892_v45 }
 0x2b8   :  { %v2394_v60 = vrot.slane %v2264_v13, 7  ;;  %v4602_v13 = vmul.f32 %v11672_v37, %v11881_v41  ;;  %v6091_v41 = vsel %vm3555_vm5, %v6089_v29, %v6090_v33 }
 0x2b9   :  { %v4278_v21 = vrot.slane %v4015_v0, 1 }
 0x2ba   :  { %v11897_v58 = vsel %vm2515_vm3, 0.0, %v2394_v60  ;;  %v11900_v23 = vsel %vm2515_vm3, %v2394_v60, 0.0  ;;  %v4866_v45 = vrot.slane %v4602_v13, 2 }
 0x2bb   :  { %v3867_v14 = vmul.f32 %v11526_v53, %v11897_v58  ;;  %v4016_v16 = vmul.f32 %v11518_v8, %v11897_v58  ;;  %v4018_v60 = vmul.f32 %v11518_v8, %v11900_v23  ;;  %v9706_v40 = vpop.eup %9705  ;;  %v4605_v46 = vmul.f32 %v11538_v34, %v11897_v58 }
 0x2bc   :  { %v11917_v10 = vpop.eup %9707  ;;  %v4607_v39 = vmul.f32 %v11538_v34, %v11900_v23  ;;  %v5184_v25 = vmul.f32 %v11583_v54, %v11897_v58  ;;  %v2265_v47 = vmul.f32 %v9706_v40, %v11778_v17  ;;  %v5325_v12 = vmul.f32 %v11587_v50, %v11897_v58 }
 0x2bd   :  { %v3931_v2 = vadd.f32 %v3867_v14, %v3796_v20  ;;  %v4280_v32 = vrot.slane %v4016_v16, 1  ;;  %v4281_v61 = vrot.slane %v4018_v60, 1  ;;  %v4869_v30 = vrot.slane %v4605_v46, 2  ;;  %v11925_v3 = vpop.eup %9709 }
 0x2be   :  { %v4870_v14 = vrot.slane %v4607_v39, 2  ;;  %v5327_v16 = vmul.f32 %v11587_v50, %v11900_v23  ;;  %v2807_v0 = vmul.f32 %v11464_v11, %v11897_v58  ;;  %v5242_v46 = vadd.f32 %v5184_v25, %v11806_v42 }
 0x2bf   :  { %v4282_v20 = vsel %vm3019_vm4, %v4280_v32, %v4281_v61  ;;  %v5866_v27 = vmul.f32 %v11591_v15, %v11897_v58  ;;  %v2809_v17 = vmul.f32 %v11464_v11, %v11900_v23  ;;  %v5563_v32 = vrot.slane %v5325_v12, 1 }
 0x2c0   :  { %v4520_v60 = vadd.f32 %v4282_v20, %v3931_v2  ;;  %v4871_v40 = vsel %vm3555_vm5, %v4869_v30, %v4870_v14  ;;  %v5564_v61 = vrot.slane %v5327_v16, 1  ;;  %v3930_v39 = vadd.f32 %v3866_v4, %v3795_v9 }
 0x2c1   :  { %v5868_v18 = vmul.f32 %v11591_v15, %v11900_v23  ;;  %v6104_v36 = vrot.slane %v5866_v27, 2  ;;  %v2796_v25 = vmul.f32 %v11579_v31, %v11656_v5  ;;  %v5550_v42 = vsel %vm3019_vm4, %v5548_v35, %v5549_v43 }
 0x2c2   :  { %v11945_v56 = vadd.f32 %v4871_v40, %v4520_v60  ;;  %v5565_v2 = vsel %vm3019_vm4, %v5563_v32, %v5564_v61  ;;  %v2395_v20 = vrot.slane %v2265_v47, 7  ;;  %v5778_v11 = vadd.f32 %v5550_v42, %v5237_v62  ;;  %v1745_v60 = vpop.f32.mrf.mxu1  ;;  %v9712_v40 = vpop.eup %9711 }
 0x2c3   :  { %v5783_v30 = vadd.f32 %v5565_v2, %v5242_v46  ;;  %v6105_v14 = vrot.slane %v5868_v18, 2  ;;  %v4279_v9 = vsel %vm3019_vm4, %v4277_v1, %v4278_v21  ;;  %v4867_v4 = vrot.slane %v4604_v44, 2 }
 0x2c4   :  { %v3050_v12 = vrot.slane %v2807_v0, 1  ;;  %v3051_v16 = vrot.slane %v2809_v17, 1  ;;  %v2798_v27 = vmul.f32 %v11579_v31, %v11675_v55  ;;  %v4519_v35 = vadd.f32 %v4279_v9, %v3930_v39 }
 0x2c5   :  { %v6106_v43 = vsel %vm3555_vm5, %v6104_v36, %v6105_v14  ;;  %v3343_v62 = vmul.f32 %v11489_v22, %v11897_v58  ;;  %v3345_v47 = vmul.f32 %v11489_v22, %v11900_v23  ;;  %v11965_v13 = vsel %vm2515_vm3, 0.0, %v2395_v20 }
 0x2c6   :  { %v11962_v18 = vadd.f32 %v6106_v43, %v5783_v30  ;;  %v8948_v1 = vmul.f32 -1.442695, %v11638_v24  ;;  %v3332_v21 = vmul.f32 %v11627_v51, %v11656_v5  ;;  %v11970_v29 = vadd.f32 %v6091_v41, %v5778_v11 }
 0x2c7   :  { %v11973_v36 = vadd.f32 %v1745_v60, %v11439_v7  ;;  %v4868_v33 = vsel %vm3555_vm5, %v4866_v45, %v4867_v4  ;;  %v3052_v44 = vsel %vm3019_vm4, %v3050_v12, %v3051_v16  ;;  %v11978_v23 = vsel %vm2515_vm3, %v2395_v20, 0.0 }
 0x2c8   :  { %16151 = vst [vmem:[#allocation63_spill] sm:$0xff] %v11962_v18  ;;  %16152 = vst [vmem:[#allocation64_spill] sm:$0xff] %v11970_v29  ;;  %v2266_v0 = vmul.f32 %v9712_v40, %v11815_v63  ;;  %v5108_v46 = vadd.f32 %v4868_v33, %v4519_v35  ;;  %v2668_v17 = vmul.f32 %v11493_v6, %v11897_v58  ;;  %v3035_v32 = vrot.slane %v2796_v25, 1 }
 0x2c9   :  { %v5185_v41 = vmul.f32 %v11730_v57, %v11965_v13  ;;  %v5326_v11 = vmul.f32 %v11735_v59, %v11965_v13  ;;  %v3036_v61 = vrot.slane %v2798_v27, 1  ;;  %v3586_v45 = vrot.slane %v3343_v62, 2 }
 0x2ca   :  { %v3587_v39 = vrot.slane %v3345_v47, 2  ;;  %v3262_v42 = vadd.f32 %v3052_v44, %v2668_v17  ;;  %v5328_v20 = vmul.f32 %v11735_v59, %v11978_v23  ;;  %v3334_v30 = vmul.f32 %v11627_v51, %v11675_v55  ;;  %v1747_v17 = vpop.f32.mrf.mxu1 }
 0x2cb   :  { %v5243_v2 = vadd.f32 %v5185_v41, %v5108_v46  ;;  %v5566_v63 = vrot.slane %v5326_v11, 1  ;;  %v5867_v58 = vmul.f32 %v11753_v52, %v11965_v13  ;;  %v5869_v14 = vmul.f32 %v11753_v52, %v11978_v23 }
 0x2cc   :  { %v2396_v9 = vrot.slane %v2266_v0, 7  ;;  %9713 = vpow2.f32 %v8948_v1  ;;  %v8949_v25 = vmul.f32 -1.442695, %v11970_v29  ;;  %v5567_v4 = vrot.slane %v5328_v20, 1 }
 0x2cd   :  { %v2076_v12 = vadd.f32 1.0, %v11925_v3  ;;  %v3588_v16 = vsel %vm3555_vm5, %v3586_v45, %v3587_v39  ;;  %v6107_v60 = vrot.slane %v5867_v58, 2  ;;  %v6108_v40 = vrot.slane %v5869_v14, 2 }
 0x2ce   :  { %v11999_v27 = vsel %vm2515_vm3, 0.0, %v2396_v9  ;;  %v3037_v55 = vsel %vm3019_vm4, %v3035_v32, %v3036_v61  ;;  %v3798_v35 = vadd.f32 %v3588_v16, %v3262_v42  ;;  %v5568_v43 = vsel %vm3019_vm4, %v5566_v63, %v5567_v4 }
 0x2cf   :  { %v12004_v62 = vsel %vm2515_vm3, %v2396_v9, 0.0  ;;  %v2663_v47 = vmul.f32 %v11647_v49, %v11656_v5  ;;  %v3571_v1 = vrot.slane %v3332_v21, 2  ;;  %v3572_v3 = vrot.slane %v3334_v30, 2 }
 0x2d0   :  { %v5784_v33 = vadd.f32 %v5568_v43, %v5243_v2  ;;  %v6109_v44 = vsel %vm3555_vm5, %v6107_v60, %v6108_v40  ;;  %v3869_v0 = vmul.f32 %v11526_v53, %v11999_v27  ;;  %v4020_v46 = vmul.f32 %v11518_v8, %v11999_v27 }
 0x2d1   :  { %9715 = vrcp.f32 %v2076_v12  ;;  %v3257_v41 = vadd.f32 %v3037_v55, %v2663_v47  ;;  %v4022_v5 = vmul.f32 %v11518_v8, %v12004_v62  ;;  %v4609_v61 = vmul.f32 %v11538_v34, %v11999_v27 }
 0x2d2   :  { %9717 = vpow2.f32 %v8949_v25  ;;  %v12013_v11 = vadd.f32 %v6109_v44, %v5784_v33  ;;  %v3933_v21 = vadd.f32 %v3869_v0, %v3798_v35  ;;  %v4286_v32 = vrot.slane %v4020_v46, 1 }
 0x2d3   :  { %v3573_v45 = vsel %vm3555_vm5, %v3571_v1, %v3572_v3  ;;  %v4287_v39 = vrot.slane %v4022_v5, 1  ;;  %v8889_v42 = vmul.f32 -1.442695, %v11973_v36  ;;  %v12022_v2 = vadd.f32 %v1747_v17, %v11436_v19 }
 0x2d4   :  { %16153 = vst [vmem:[#allocation65_spill] sm:$0xff] %v12013_v11  ;;  %v4611_v20 = vmul.f32 %v11538_v34, %v12004_v62  ;;  %v4875_v63 = vrot.slane %v4609_v61, 2  ;;  %v5186_v30 = vmul.f32 %v11583_v54, %v11999_v27  ;;  %v5329_v58 = vmul.f32 %v11587_v50, %v11999_v27 }
 0x2d5   :  { %v3793_v14 = vadd.f32 %v3573_v45, %v3257_v41  ;;  %v4288_v9 = vsel %vm3019_vm4, %v4286_v32, %v4287_v39  ;;  %v5331_v25 = vmul.f32 %v11587_v50, %v12004_v62  ;;  %v2075_v4 = vadd.f32 1.0, %v11917_v10  ;;  %v16154_v32 = vld [vmem:[#allocation61_spill] sm:$0xff]  ;;  %v16155_v45 = vld [vmem:[#allocation62_spill] sm:$0xff] }
 0x2d6   :  { %v4522_v12 = vadd.f32 %v4288_v9, %v3933_v21  ;;  %v4876_v16 = vrot.slane %v4611_v20, 2  ;;  %v5244_v60 = vadd.f32 %v5186_v30, %v11945_v56  ;;  %v5569_v40 = vrot.slane %v5329_v58, 1 }
 0x2d7   :  { %v4009_v55 = vmul.f32 %v11663_v48, %v11726_v26  ;;  %v5570_v35 = vrot.slane %v5331_v25, 1  ;;  %v5870_v43 = vmul.f32 %v11591_v15, %v11999_v27  ;;  %v5872_v47 = vmul.f32 %v11591_v15, %v12004_v62 }
 0x2d8   :  { %v4011_v1 = vmul.f32 %v11663_v48, %v11738_v38  ;;  %v4598_v10 = vmul.f32 %v11672_v37, %v11726_v26  ;;  %v4877_v3 = vsel %vm3555_vm5, %v4875_v63, %v4876_v16  ;;  %v8890_v56 = vmul.f32 -1.442695, %v12022_v2 }
 0x2d9   :  { %v9714_v33 = vpop.eup %9713  ;;  %v12047_v44 = vadd.f32 %v4877_v3, %v4522_v12  ;;  %v5571_v0 = vsel %vm3019_vm4, %v5569_v40, %v5570_v35  ;;  %v6110_v46 = vrot.slane %v5870_v43, 2  ;;  %9719 = vrcp.f32 %v2075_v4  ;;  %v16158_v43 = vld [vmem:[#allocation39_spill] sm:$0xff]  ;;  %v16159_v3 = vld [vmem:[#allocation60_spill] sm:$0xff] }
 0x2da   :  { %v4600_v17 = vmul.f32 %v11672_v37, %v11738_v38  ;;  %v5785_v41 = vadd.f32 %v5571_v0, %v5244_v60  ;;  %v6111_v5 = vrot.slane %v5872_v47, 2  ;;  %9721 = vpow2.f32 %v8889_v42  ;;  %v16156_v38 = vld [vmem:[#allocation53_spill] sm:$0xff] }
 0x2db   :  { %v3864_v21 = vmul.f32 %v11668_v28, %v11726_v26  ;;  %v2804_v61 = vmul.f32 %v11579_v31, %v16154_v32  ;;  %v2806_v39 = vmul.f32 %v11579_v31, %v16155_v45  ;;  %v4271_v20 = vrot.slane %v4009_v55, 1 }
 0x2dc   :  { %v4272_v63 = vrot.slane %v4011_v1, 1  ;;  %v6112_v30 = vsel %vm3555_vm5, %v6110_v46, %v6111_v5  ;;  %9723 = vpow2.f32 %v8890_v56  ;;  %v6574_v9 = vadd.f32 1.0, %v9714_v33 }
 0x2dd   :  { %v8950_v25 = vmul.f32 -1.442695, %v16156_v38  ;;  %v3928_v4 = vadd.f32 %v3864_v21, %v3793_v14  ;;  %v12060_v42 = vadd.f32 %v6112_v30, %v5785_v41  ;;  %v4860_v26 = vrot.slane %v4598_v10, 2  ;;  %v12072_v10 = vpop.f32.mrf.mxu1 }
 0x2de   :  { %v9716_v58 = vpop.eup %9715  ;;  %v4861_v16 = vrot.slane %v4600_v17, 2  ;;  %v3340_v60 = vmul.f32 %v11627_v51, %v16154_v32  ;;  %v3342_v40 = vmul.f32 %v11627_v51, %v16155_v45  ;;  %v3047_v55 = vrot.slane %v2804_v61, 1  ;;  %v16160_v17 = vld [vmem:[#allocation56_spill] sm:$0xff] }
 0x2df   :  { %16157 = vst [vmem:[#allocation61_spill] sm:$0xff] %v12060_v42  ;;  %v9718_v12 = vpop.eup %9717  ;;  %v3048_v35 = vrot.slane %v2806_v39, 1  ;;  %v2811_v47 = vmul.f32 %v16158_v43, %v11999_v27  ;;  %v2813_v1 = vmul.f32 %v16158_v43, %v12004_v62  ;;  %v4273_v14 = vsel %vm3019_vm4, %v4271_v20, %v4272_v63  ;;  %v1753_v21 = vpop.f32.mrf.mxu1 }
 0x2e0   :  { %v2268_v56 = vmul.f32 %v9716_v58, %v16159_v3  ;;  %9725 = vrcp.f32 %v6574_v9  ;;  %v6575_v33 = vadd.f32 1.0, %v9718_v12  ;;  %v4517_v0 = vadd.f32 %v4273_v14, %v3928_v4 }
 0x2e1   :  { %9727 = vpow2.f32 %v8950_v25  ;;  %v4862_v46 = vsel %vm3555_vm5, %v4860_v26, %v4861_v16  ;;  %v8951_v41 = vmul.f32 -1.442695, %v16160_v17  ;;  %v3583_v5 = vrot.slane %v3340_v60, 2 }
 0x2e2   :  { %v3049_v61 = vsel %vm3019_vm4, %v3047_v55, %v3048_v35  ;;  %v3584_v39 = vrot.slane %v3342_v40, 2  ;;  %v3056_v30 = vrot.slane %v2811_v47, 1  ;;  %v3057_v29 = vrot.slane %v2813_v1, 1  ;;  %v1755_v40 = vpop.f32.mrf.mxu1 }
 0x2e3   :  { %v2667_v20 = vmul.f32 %v11647_v49, %v16154_v32  ;;  %v3347_v63 = vmul.f32 %v11489_v22, %v11999_v27  ;;  %v3349_v58 = vmul.f32 %v11489_v22, %v12004_v62  ;;  %v2398_v9 = vrot.slane %v2268_v56, 7  ;;  %v16162_v62 = vld [vmem:[#allocation57_spill] sm:$0xff] }
 0x2e4   :  { %9729 = vrcp.f32 %v6575_v33  ;;  %v12083_v25 = vadd.f32 %v4862_v46, %v4517_v0  ;;  %v12086_v4 = vadd.f32 %v1753_v21, %v11436_v19  ;;  %v2808_v16 = vmul.f32 %v11579_v31, %v11965_v13 }
 0x2e5   :  { %9731 = vpow2.f32 %v8951_v41  ;;  %v12088_v26 = vadd.f32 %v3049_v61, %v2667_v20  ;;  %v2810_v60 = vmul.f32 %v11579_v31, %v11978_v23  ;;  %v12095_v35 = vmul.f32 -1.442695, %v16162_v62 }
 0x2e6   :  { %16161 = vst [vmem:[#allocation62_spill] sm:$0xff] %v12086_v4  ;;  %v9720_v12 = vpop.eup %9719  ;;  %v12098_v47 = vsel %vm3555_vm5, %v3583_v5, %v3584_v39  ;;  %v2670_v1 = vmul.f32 %v11493_v6, %v11999_v27  ;;  %v3058_v14 = vsel %vm3019_vm4, %v3056_v30, %v3057_v29  ;;  %v3592_v3 = vrot.slane %v3347_v63, 2  ;;  %v16163_v5 = vld [vmem:[#allocation59_spill] sm:$0xff] }
 0x2e7   :  { %v9722_v55 = vpop.eup %9721  ;;  %v3593_v56 = vrot.slane %v3349_v58, 2  ;;  %v12104_v33 = vsel %vm2515_vm3, 0.0, %v2398_v9  ;;  %v12107_v0 = vsel %vm2515_vm3, %v2398_v9, 0.0  ;;  %v12111_v41 = vmul.f32 %v11627_v51, %v11965_v13 }
 0x2e8   :  { %v2267_v21 = vmul.f32 %v9720_v12, %v16163_v5  ;;  %v8892_v61 = vmul.f32 -1.442695, %v12086_v4  ;;  %v12116_v27 = vadd.f32 %v1755_v40, %v11439_v7  ;;  %v3053_v29 = vrot.slane %v2808_v16, 1 }
 0x2e9   :  { %v9724_v46 = vpop.eup %9723  ;;  %v3054_v39 = vrot.slane %v2810_v60, 1  ;;  %v3264_v30 = vadd.f32 %v3058_v14, %v2670_v1  ;;  %v2077_v20 = vadd.f32 1.0, %v9722_v55  ;;  %v4024_v63 = vmul.f32 %v11518_v8, %v12104_v33 }
 0x2ea   :  { %v4026_v58 = vmul.f32 %v11518_v8, %v12107_v0  ;;  %v5188_v9 = vmul.f32 %v11583_v54, %v12104_v33  ;;  %v5333_v12 = vmul.f32 %v11587_v50, %v12104_v33  ;;  %v3594_v5 = vsel %vm3555_vm5, %v3592_v3, %v3593_v56 }
 0x2eb   :  { %v5335_v16 = vmul.f32 %v11587_v50, %v12107_v0  ;;  %v5874_v60 = vmul.f32 %v11591_v15, %v12104_v33  ;;  %v2078_v40 = vadd.f32 1.0, %v9724_v46  ;;  %v4615_v55 = vmul.f32 %v11538_v34, %v12107_v0 }
 0x2ec   :  { %v5246_v1 = vadd.f32 %v5188_v9, %v12047_v44  ;;  %v5575_v14 = vrot.slane %v5333_v12, 1  ;;  %v5876_v62 = vmul.f32 %v11591_v15, %v12107_v0  ;;  %v3800_v24 = vadd.f32 %v3594_v5, %v3264_v30 }
 0x2ed   :  { %v12136_v17 = vpop.eup %9725  ;;  %v5576_v3 = vrot.slane %v5335_v16, 1  ;;  %v6116_v56 = vrot.slane %v5874_v60, 2  ;;  %9733 = vrcp.f32 %v2077_v20  ;;  %v3346_v42 = vmul.f32 %v11627_v51, %v11978_v23 }
 0x2ee   :  { %16164 = vst [vmem:[#allocation60_spill] sm:$0xff] %v12136_v17  ;;  %v9728_v38 = vpop.eup %9727  ;;  %v4292_v46 = vrot.slane %v4024_v63, 1  ;;  %v4293_v11 = vrot.slane %v4026_v58, 1  ;;  %v6117_v18 = vrot.slane %v5876_v62, 2  ;;  %v2397_v4 = vrot.slane %v2267_v21, 7 }
 0x2ef   :  { %v5577_v44 = vsel %vm3019_vm4, %v5575_v14, %v5576_v3  ;;  %v3871_v9 = vmul.f32 %v11526_v53, %v12104_v33  ;;  %v4613_v12 = vmul.f32 %v11538_v34, %v12104_v33  ;;  %v3055_v30 = vsel %vm3019_vm4, %v3053_v29, %v3054_v39 }
 0x2f0   :  { %v4882_v5 = vrot.slane %v4615_v55, 2  ;;  %v5787_v20 = vadd.f32 %v5577_v44, %v5246_v1  ;;  %9735 = vrcp.f32 %v2078_v40  ;;  %v2669_v63 = vmul.f32 %v11647_v49, %v11965_v13 }
 0x2f1   :  { %v12146_v16 = vpop.eup %9729  ;;  %v6118_v62 = vsel %vm3555_vm5, %v6116_v56, %v6117_v18  ;;  %v3935_v21 = vadd.f32 %v3871_v9, %v3800_v24  ;;  %v4881_v58 = vrot.slane %v4613_v12, 2  ;;  %v3589_v14 = vrot.slane %v12111_v41, 2 }
 0x2f2   :  { %16165 = vst [vmem:[#allocation59_spill] sm:$0xff] %v12146_v16  ;;  %v12151_v60 = vpop.eup %9731  ;;  %v3590_v3 = vrot.slane %v3346_v42, 2  ;;  %v4294_v17 = vsel %vm3019_vm4, %v4292_v46, %v4293_v11  ;;  %v12155_v29 = vadd.f32 %v6118_v62, %v5787_v20  ;;  %v3263_v39 = vadd.f32 %v3055_v30, %v2669_v63 }
 0x2f3   :  { %v12158_v40 = vsel %vm2515_vm3, 0.0, %v2397_v4  ;;  %v12161_v55 = vsel %vm2515_vm3, %v2397_v4, 0.0  ;;  %v4524_v1 = vadd.f32 %v4294_v17, %v3935_v21  ;;  %v5322_v24 = vmul.f32 %v11735_v59, %v16154_v32  ;;  %v1757_v17 = vpop.f32.mrf.mxu1 }
 0x2f4   :  { %16166 = vst [vmem:[#allocation66_spill] sm:$0xff] %v12155_v29  ;;  %v5324_v18 = vmul.f32 %v11735_v59, %v16155_v45  ;;  %v4883_v42 = vsel %vm3555_vm5, %v4881_v58, %v4882_v5  ;;  %v8893_v11 = vmul.f32 -1.442695, %v12116_v27  ;;  %v12169_v41 = vadd.f32 1.0, %v9728_v38 }
 0x2f5   :  { %v3797_v56 = vadd.f32 %v12098_v47, %v12088_v26  ;;  %v5183_v4 = vmul.f32 %v11730_v57, %v16154_v32  ;;  %v12175_v46 = vadd.f32 %v4883_v42, %v4524_v1  ;;  %v3591_v44 = vsel %vm3555_vm5, %v3589_v14, %v3590_v3  ;;  %v1759_v21 = vpop.f32.mrf.mxu1 }
 0x2f6   :  { %v4021_v9 = vmul.f32 %v11663_v48, %v12158_v40  ;;  %v4023_v12 = vmul.f32 %v11663_v48, %v12161_v55  ;;  %9737 = vpow2.f32 %v8892_v61  ;;  %v3799_v38 = vadd.f32 %v3591_v44, %v3263_v39 }
 0x2f7   :  { %9739 = vpow2.f32 %v12095_v35  ;;  %v2815_v26 = vmul.f32 %v16158_v43, %v12104_v33  ;;  %v2817_v47 = vmul.f32 %v16158_v43, %v12107_v0  ;;  %v5241_v30 = vadd.f32 %v5183_v4, %v12083_v25 }
 0x2f8   :  { %v5560_v5 = vrot.slane %v5322_v24, 1  ;;  %v5561_v20 = vrot.slane %v5324_v18, 1  ;;  %9741 = vpow2.f32 %v8893_v11  ;;  %v4017_v63 = vmul.f32 %v11663_v48, %v11965_v13 }
 0x2f9   :  { %v4019_v61 = vmul.f32 %v11663_v48, %v11978_v23  ;;  %v3870_v35 = vmul.f32 %v11668_v28, %v12158_v40  ;;  %v12195_v62 = vadd.f32 %v1757_v17, %v11436_v19  ;;  %v4289_v14 = vrot.slane %v4021_v9, 1 }
 0x2fa   :  { %v9734_v58 = vpop.eup %9733  ;;  %v4290_v3 = vrot.slane %v4023_v12, 1  ;;  %v4610_v25 = vmul.f32 %v11672_v37, %v12158_v40  ;;  %v4612_v39 = vmul.f32 %v11672_v37, %v12161_v55  ;;  %v3062_v24 = vrot.slane %v2815_v26, 1 }
 0x2fb   :  { %v3934_v1 = vadd.f32 %v3870_v35, %v3799_v38  ;;  %v3063_v18 = vrot.slane %v2817_v47, 1  ;;  %v2269_v42 = vmul.f32 %v9734_v58, %v11973_v36  ;;  %v5562_v11 = vsel %vm3019_vm4, %v5560_v5, %v5561_v20 }
 0x2fc   :  { %v12205_v4 = vmul.f32 %v11753_v52, %v16154_v32  ;;  %v12209_v17 = vmul.f32 %v11753_v52, %v16155_v45  ;;  %v12212_v44 = vadd.f32 %v1759_v21, %v11439_v7  ;;  %v3868_v12 = vmul.f32 %v11668_v28, %v11965_v13 }
 0x2fd   :  { %v9736_v9 = vpop.eup %9735  ;;  %v3353_v36 = vmul.f32 %v11489_v22, %v12107_v0  ;;  %v3351_v38 = vmul.f32 %v11489_v22, %v12104_v33  ;;  %v8894_v32 = vmul.f32 -1.442695, %v12195_v62  ;;  %v4291_v26 = vsel %vm3019_vm4, %v4289_v14, %v4290_v3 }
 0x2fe   :  { %v4878_v47 = vrot.slane %v4610_v25, 2  ;;  %v4879_v45 = vrot.slane %v4612_v39, 2  ;;  %v2399_v5 = vrot.slane %v2269_v42, 7  ;;  %v4283_v20 = vrot.slane %v4017_v63, 1 }
 0x2ff   :  { %v4284_v35 = vrot.slane %v4019_v61, 1  ;;  %v4523_v21 = vadd.f32 %v4291_v26, %v3934_v1  ;;  %v3064_v58 = vsel %vm3019_vm4, %v3062_v24, %v3063_v18  ;;  %v12223_v16 = vadd.f32 %v5562_v11, %v5241_v30 }
 0x300   :  { %v2270_v29 = vmul.f32 %v9736_v9, %v12022_v2  ;;  %v2672_v0 = vmul.f32 %v11493_v6, %v12104_v33  ;;  %v8895_v28 = vmul.f32 -1.442695, %v12212_v44  ;;  %v12232_v14 = vmul.f32 %v11672_v37, %v11965_v13 }
 0x301   :  { %v3599_v63 = vrot.slane %v3353_v36, 2  ;;  %v3598_v61 = vrot.slane %v3351_v38, 2  ;;  %v3932_v3 = vadd.f32 %v3868_v12, %v3797_v56  ;;  %v4880_v25 = vsel %vm3555_vm5, %v4878_v47, %v4879_v45 }
 0x302   :  { %v12236_v30 = vsel %vm2515_vm3, 0.0, %v2399_v5  ;;  %v3266_v2 = vadd.f32 %v3064_v58, %v2672_v0  ;;  %v6102_v33 = vrot.slane %v12209_v17, 2  ;;  %v4285_v1 = vsel %vm3019_vm4, %v4283_v20, %v4284_v35 }
 0x303   :  { %v9738_v39 = vpop.eup %9737  ;;  %v5112_v24 = vadd.f32 %v4880_v25, %v4523_v21  ;;  %9743 = vpow2.f32 %v8894_v32  ;;  %v12243_v13 = vsel %vm2515_vm3, %v2399_v5, 0.0  ;;  %v2400_v42 = vrot.slane %v2270_v29, 7 }
 0x304   :  { %v12240_v18 = vpop.eup %9739  ;;  %v12247_v56 = vadd.f32 %v12072_v10, %v11439_v7  ;;  %9745 = vpow2.f32 %v8895_v28  ;;  %v4608_v9 = vmul.f32 %v11672_v37, %v11978_v23  ;;  %v4872_v12 = vrot.slane %v12232_v14, 2 }
 0x305   :  { %v9742_v11 = vpop.eup %9741  ;;  %v5189_v36 = vmul.f32 %v11730_v57, %v12236_v30  ;;  %v3600_v38 = vsel %vm3555_vm5, %v3598_v61, %v3599_v63  ;;  %v4521_v32 = vadd.f32 %v4285_v1, %v3932_v3  ;;  %v5334_v29 = vmul.f32 %v11735_v59, %v12236_v30 }
 0x306   :  { %v3802_v26 = vadd.f32 %v3600_v38, %v3266_v2  ;;  %v2080_v47 = vadd.f32 1.0, %v9738_v39  ;;  %v5336_v28 = vmul.f32 %v11735_v59, %v12243_v13  ;;  %v5875_v23 = vmul.f32 %v11753_v52, %v12236_v30 }
 0x307   :  { %v5247_v10 = vadd.f32 %v5189_v36, %v5112_v24  ;;  %v5877_v45 = vmul.f32 %v11753_v52, %v12243_v13  ;;  %v5578_v5 = vrot.slane %v5334_v29, 1  ;;  %v2531_v20 = vsel %vm2515_vm3, 0.0, %v2400_v42 }
 0x308   :  { %v2596_v35 = vsel %vm2515_vm3, %v2400_v42, 0.0  ;;  %v2081_v21 = vadd.f32 1.0, %v9742_v11  ;;  %v5579_v58 = vrot.slane %v5336_v28, 1  ;;  %v6119_v0 = vrot.slane %v5875_v23, 2 }
 0x309   :  { %v6120_v14 = vrot.slane %v5877_v45, 2  ;;  %v3873_v63 = vmul.f32 %v11526_v53, %v2531_v20  ;;  %v4028_v61 = vmul.f32 %v11518_v8, %v2531_v20  ;;  %v4030_v3 = vmul.f32 %v11518_v8, %v2596_v35 }
 0x30a   :  { %v4617_v25 = vmul.f32 %v11538_v34, %v2531_v20  ;;  %9747 = vrcp.f32 %v2080_v47  ;;  %v5580_v2 = vsel %vm3019_vm4, %v5578_v5, %v5579_v58  ;;  %v4619_v24 = vmul.f32 %v11538_v34, %v2596_v35 }
 0x30b   :  { %v6121_v39 = vsel %vm3555_vm5, %v6119_v0, %v6120_v14  ;;  %v3937_v1 = vadd.f32 %v3873_v63, %v3802_v26  ;;  %v5788_v42 = vadd.f32 %v5580_v2, %v5247_v10  ;;  %v4298_v11 = vrot.slane %v4028_v61, 1 }
 0x30c   :  { %v4299_v36 = vrot.slane %v4030_v3, 1  ;;  %v4887_v38 = vrot.slane %v4617_v25, 2  ;;  %v4888_v29 = vrot.slane %v4619_v24, 2  ;;  %v5190_v28 = vmul.f32 %v11583_v54, %v2531_v20 }
 0x30d   :  { %v5337_v23 = vmul.f32 %v11587_v50, %v2531_v20  ;;  %v5339_v45 = vmul.f32 %v11587_v50, %v2596_v35  ;;  %v12275_v48 = vadd.f32 %v6121_v39, %v5788_v42  ;;  %v5878_v5 = vmul.f32 %v11591_v15, %v2531_v20 }
 0x30e   :  { %v4300_v47 = vsel %vm3019_vm4, %v4298_v11, %v4299_v36  ;;  %v5880_v26 = vmul.f32 %v11591_v15, %v2596_v35  ;;  %v4873_v58 = vrot.slane %v4608_v9, 2  ;;  %v5248_v0 = vadd.f32 %v5190_v28, %v12175_v46 }
 0x30f   :  { %16167 = vst [vmem:[#allocation67_spill] sm:$0xff] %v12275_v48  ;;  %v4526_v10 = vadd.f32 %v4300_v47, %v3937_v1  ;;  %v5581_v14 = vrot.slane %v5337_v23, 1  ;;  %v4889_v61 = vsel %vm3555_vm5, %v4887_v38, %v4888_v29  ;;  %v5582_v3 = vrot.slane %v5339_v45, 1  ;;  %v16171_v38 = vld [vmem:[#allocation40_spill] sm:$0xff] }
 0x310   :  { %v9744_v63 = vpop.eup %9743  ;;  %v6122_v25 = vrot.slane %v5878_v5, 2  ;;  %v6123_v2 = vrot.slane %v5880_v26, 2  ;;  %v6577_v39 = vadd.f32 1.0, %v12151_v60  ;;  %9749 = vrcp.f32 %v2081_v21 }
 0x311   :  { %v9746_v24 = vpop.eup %9745  ;;  %v12283_v42 = vadd.f32 %v4889_v61, %v4526_v10  ;;  %9751 = vrcp.f32 %v12169_v41  ;;  %v16169_v9 = vrot.slane %v12205_v4, 2  ;;  %v5583_v20 = vsel %vm3019_vm4, %v5581_v14, %v5582_v3  ;;  %v1763_v41 = vpop.f32.mrf.mxu1 }
 0x312   :  { %v8891_v35 = vmul.f32 -1.442695, %v12247_v56  ;;  %v4874_v1 = vsel %vm3555_vm5, %v4872_v12, %v4873_v58  ;;  %v5330_v60 = vmul.f32 %v11735_v59, %v12158_v40  ;;  %v5332_v21 = vmul.f32 %v11735_v59, %v12161_v55  ;;  %v16172_v12 = vld [vmem:[#allocation41_spill] sm:$0xff] }
 0x313   :  { %16168 = vst [vmem:[#allocation68_spill] sm:$0xff] %v12283_v42  ;;  %v6103_v46 = vsel %vm3555_vm5, %v16169_v9, %v6102_v33  ;;  %v5789_v11 = vadd.f32 %v5583_v20, %v5248_v0  ;;  %v5110_v4 = vadd.f32 %v4874_v1, %v4521_v32  ;;  %v6124_v33 = vsel %vm3555_vm5, %v6122_v25, %v6123_v2  ;;  %v1765_v0 = vpop.f32.mrf.mxu1 }
 0x314   :  { %v12299_v17 = vadd.f32 %v6103_v46, %v12223_v16  ;;  %v2082_v36 = vadd.f32 1.0, %v9744_v63  ;;  %9753 = vrcp.f32 %v6577_v39  ;;  %v5341_v29 = vmul.f32 %v11587_v50, %v16171_v38 }
 0x315   :  { %v5343_v28 = vmul.f32 %v11587_v50, %v16172_v12  ;;  %v12306_v23 = vadd.f32 %v6124_v33, %v5789_v11  ;;  %v5187_v45 = vmul.f32 %v11730_v57, %v12158_v40  ;;  %v5882_v16 = vmul.f32 %v11591_v15, %v16171_v38 }
 0x316   :  { %16170 = vst [vmem:[#allocation69_spill] sm:$0xff] %v12299_v17  ;;  %v5884_v32 = vmul.f32 %v11591_v15, %v16172_v12  ;;  %9755 = vpow2.f32 %v8891_v35  ;;  %v5572_v5 = vrot.slane %v5330_v60, 1  ;;  %v5573_v26 = vrot.slane %v5332_v21, 1 }
 0x317   :  { %16173 = vst [vmem:[#allocation40_spill] sm:$0xff] %v12306_v23  ;;  %v9748_v47 = vpop.eup %9747  ;;  %v5871_v58 = vmul.f32 %v11753_v52, %v12158_v40  ;;  %v5873_v10 = vmul.f32 %v11753_v52, %v12161_v55  ;;  %v8953_v14 = vmul.f32 -1.442695, %v12299_v17  ;;  %v5245_v63 = vadd.f32 %v5187_v45, %v5110_v4 }
 0x318   :  { %v12321_v61 = vmul.f32 %v11583_v54, %v16171_v38  ;;  %9757 = vrcp.f32 %v2082_v36  ;;  %v2812_v3 = vmul.f32 %v11579_v31, %v12158_v40  ;;  %v2814_v25 = vmul.f32 %v11579_v31, %v12161_v55  ;;  %v16176_v36 = vld [vmem:[#allocation62_spill] sm:$0xff] }
 0x319   :  { %v5587_v2 = vrot.slane %v5341_v29, 1  ;;  %v12328_v39 = vadd.f32 %v1763_v41, %v11436_v19  ;;  %v5588_v9 = vrot.slane %v5343_v28, 1  ;;  %v6128_v46 = vrot.slane %v5882_v16, 2 }
 0x31a   :  { %16174 = vst [vmem:[#allocation70_spill] sm:$0xff] %v12321_v61  ;;  %v6129_v20 = vrot.slane %v5884_v32, 2  ;;  %v12331_v35 = vadd.f32 %v1765_v0, %v11439_v7  ;;  %v5574_v1 = vsel %vm3019_vm4, %v5572_v5, %v5573_v26  ;;  %v6113_v60 = vrot.slane %v5871_v58, 2 }
 0x31b   :  { %v6114_v21 = vrot.slane %v5873_v10, 2  ;;  %v2083_v11 = vadd.f32 1.0, %v9746_v24  ;;  %9759 = vpow2.f32 %v8953_v14  ;;  %v5786_v4 = vadd.f32 %v5574_v1, %v5245_v63  ;;  %v16180_v63 = vld [vmem:[#allocation63_spill] sm:$0xff] }
 0x31c   :  { %v12336_v33 = vmul.f32 %v11730_v57, %v16171_v38  ;;  %v2272_v41 = vmul.f32 %v9748_v47, %v16176_v36  ;;  %v3059_v29 = vrot.slane %v2812_v3, 1  ;;  %v3060_v28 = vrot.slane %v2814_v25, 1 }
 0x31d   :  { %v12341_v45 = vmul.f32 %v11735_v59, %v16171_v38  ;;  %v8896_v16 = vmul.f32 -1.442695, %v12328_v39  ;;  %v9750_v32 = vpop.eup %9749  ;;  %v6578_v5 = vadd.f32 1.0, %v12240_v18  ;;  %v12346_v24 = vsel %vm3019_vm4, %v5587_v2, %v5588_v9  ;;  %v16182_v9 = vld [vmem:[#allocation65_spill] sm:$0xff] }
 0x31e   :  { %16175 = vst [vmem:[#allocation71_spill] sm:$0xff] %v12336_v33  ;;  %16178 = vst [vmem:[#allocation72_spill] sm:$0xff] %v12346_v24  ;;  %v2402_v26 = vrot.slane %v2272_v41, 7  ;;  %v8897_v58 = vmul.f32 -1.442695, %v12331_v35  ;;  %v12349_v10 = vpop.eup %9751  ;;  %v3348_v47 = vmul.f32 %v11627_v51, %v12158_v40  ;;  %v3350_v0 = vmul.f32 %v11627_v51, %v12161_v55  ;;  %v16191_v33 = vld [vmem:[#allocation46_spill] sm:$0xff] }
 0x31f   :  { %16177 = vst [vmem:[#allocation62_spill] sm:$0xff] %v12341_v45  ;;  %16179 = vst [vmem:[#allocation73_spill] sm:$0xff] %v12349_v10  ;;  %v6115_v14 = vsel %vm3555_vm5, %v6113_v60, %v6114_v21  ;;  %9761 = vrcp.f32 %v2083_v11  ;;  %v8954_v3 = vmul.f32 -1.442695, %v16180_v63  ;;  %v8955_v1 = vmul.f32 -1.442695, %v16182_v9 }
 0x320   :  { %v12357_v18 = vadd.f32 %v6115_v14, %v5786_v4  ;;  %v2533_v25 = vsel %vm2515_vm3, 0.0, %v2402_v26  ;;  %v2598_v2 = vsel %vm2515_vm3, %v2402_v26, 0.0  ;;  %v3061_v36 = vsel %vm3019_vm4, %v3059_v29, %v3060_v28  ;;  %v16184_v4 = vld [vmem:[#allocation61_spill] sm:$0xff] }
 0x321   :  { %v2273_v41 = vmul.f32 %v9750_v32, %v12116_v27  ;;  %9763 = vpow2.f32 %v8896_v16  ;;  %v12364_v17 = vpop.eup %9753  ;;  %v2671_v55 = vmul.f32 %v11647_v49, %v12158_v40  ;;  %v2819_v60 = vmul.f32 %v16158_v43, %v2533_v25  ;;  %v1767_v27 = vpop.f32.mrf.mxu1 }
 0x322   :  { %16181 = vst [vmem:[#allocation74_spill] sm:$0xff] %v12357_v18  ;;  %16183 = vst [vmem:[#allocation75_spill] sm:$0xff] %v12364_v17  ;;  %v2821_v21 = vmul.f32 %v16158_v43, %v2598_v2  ;;  %9765 = vpow2.f32 %v8897_v58  ;;  %v8956_v26 = vmul.f32 -1.442695, %v16184_v4  ;;  %v3595_v14 = vrot.slane %v3348_v47, 2 }
 0x323   :  { %v9756_v11 = vpop.eup %9755  ;;  %v3596_v9 = vrot.slane %v3350_v0, 2  ;;  %v12372_v29 = vsel %vm3555_vm5, %v6128_v46, %v6129_v20  ;;  %9767 = vrcp.f32 %v6578_v5  ;;  %v3265_v28 = vadd.f32 %v3061_v36, %v2671_v55 }
 0x324   :  { %16185 = vst [vmem:[#allocation76_spill] sm:$0xff] %v12372_v29  ;;  %v8957_v16 = vmul.f32 -1.442695, %v12357_v18  ;;  %v12377_v40 = vmul.f32 %v11735_v59, %v16172_v12  ;;  %9769 = vpow2.f32 %v8954_v3  ;;  %v12382_v47 = vmul.f32 %v11753_v52, %v16171_v38  ;;  %v1769_v18 = vpop.f32.mrf.mxu1 }
 0x325   :  { %v9758_v32 = vpop.eup %9757  ;;  %v2403_v0 = vrot.slane %v2273_v41, 7  ;;  %9771 = vpow2.f32 %v8955_v1  ;;  %v3068_v46 = vrot.slane %v2819_v60, 1  ;;  %v3069_v20 = vrot.slane %v2821_v21, 1 }
 0x326   :  { %16186 = vst [vmem:[#allocation77_spill] sm:$0xff] %v12377_v40  ;;  %16187 = vst [vmem:[#allocation78_spill] sm:$0xff] %v12382_v47  ;;  %v12385_v5 = vadd.f32 %v1767_v27, %v11436_v19  ;;  %9773 = vpow2.f32 %v8956_v26  ;;  %v3597_v36 = vsel %vm3555_vm5, %v3595_v14, %v3596_v9  ;;  %v4032_v55 = vmul.f32 %v11518_v8, %v2533_v25 }
 0x327   :  { %v4034_v3 = vmul.f32 %v11518_v8, %v2598_v2  ;;  %v12390_v58 = vadd.f32 %v3597_v36, %v3265_v28  ;;  %9775 = vpow2.f32 %v8957_v16  ;;  %v2079_v38 = vadd.f32 1.0, %v9756_v11 }
 0x328   :  { %v2274_v41 = vmul.f32 %v9758_v32, %v12195_v62  ;;  %v12393_v1 = vpop.eup %9759  ;;  %v3355_v60 = vmul.f32 %v11489_v22, %v2533_v25  ;;  %v3357_v21 = vmul.f32 %v11489_v22, %v2598_v2  ;;  %v2534_v26 = vsel %vm2515_vm3, 0.0, %v2403_v0  ;;  %v1773_v62 = vpop.f32.mrf.mxu1 }
 0x329   :  { %16188 = vst [vmem:[#allocation79_spill] sm:$0xff] %v12390_v58  ;;  %16189 = vst [vmem:[#allocation80_spill] sm:$0xff] %v12393_v1  ;;  %v12399_v9 = vsel %vm2515_vm3, %v2403_v0, 0.0  ;;  %v3070_v14 = vsel %vm3019_vm4, %v3068_v46, %v3069_v20  ;;  %v3875_v27 = vmul.f32 %v11526_v53, %v2533_v25  ;;  %v8898_v28 = vmul.f32 -1.442695, %v12385_v5 }
 0x32a   :  { %v12405_v11 = vadd.f32 %v1769_v18, %v11439_v7  ;;  %v4304_v16 = vrot.slane %v4032_v55, 1  ;;  %v4305_v32 = vrot.slane %v4034_v3, 1  ;;  %v4621_v36 = vmul.f32 %v11538_v34, %v2533_v25 }
 0x32b   :  { %v4623_v4 = vmul.f32 %v11538_v34, %v2598_v2  ;;  %9777 = vrcp.f32 %v2079_v38  ;;  %v2674_v0 = vmul.f32 %v11493_v6, %v2533_v25  ;;  %v2820_v46 = vmul.f32 %v11579_v31, %v2534_v26 }
 0x32c   :  { %16190 = vst [vmem:[#allocation81_spill] sm:$0xff] %v12405_v11  ;;  %v9762_v63 = vpop.eup %9761  ;;  %v2822_v20 = vmul.f32 %v11579_v31, %v12399_v9  ;;  %v3604_v17 = vrot.slane %v3355_v60, 2  ;;  %v3605_v10 = vrot.slane %v3357_v21, 2  ;;  %v2404_v18 = vrot.slane %v2274_v41, 7 }
 0x32d   :  { %v12414_v45 = vadd.f32 %v1773_v62, %v11436_v19  ;;  %v3268_v3 = vadd.f32 %v3070_v14, %v2674_v0  ;;  %v3939_v47 = vadd.f32 %v3875_v27, %v16191_v33  ;;  %9779 = vpow2.f32 %v8898_v28  ;;  %v16193_v0 = vld [vmem:[#allocation51_spill] sm:$0xff] }
 0x32e   :  { %v9764_v55 = vpop.eup %9763  ;;  %v12418_v2 = vmul.f32 -1.442695, %v12405_v11  ;;  %v4306_v38 = vsel %vm3019_vm4, %v4304_v16, %v4305_v32  ;;  %v4893_v40 = vrot.slane %v4621_v36, 2  ;;  %v4894_v12 = vrot.slane %v4623_v4, 2 }
 0x32f   :  { %v9766_v25 = vpop.eup %9765  ;;  %v12422_v60 = vmul.f32 %v9762_v63, %v12212_v44  ;;  %v3071_v41 = vrot.slane %v2820_v46, 1  ;;  %v3072_v21 = vrot.slane %v2822_v20, 1  ;;  %v3356_v62 = vmul.f32 %v11627_v51, %v2534_v26 }
 0x330   :  { %v3358_v14 = vmul.f32 %v11627_v51, %v12399_v9  ;;  %v12427_v27 = vpop.eup %9767  ;;  %v3606_v28 = vsel %vm3555_vm5, %v3604_v17, %v3605_v10  ;;  %v4033_v33 = vmul.f32 %v16193_v0, %v2534_v26  ;;  %v4035_v16 = vmul.f32 %v16193_v0, %v12399_v9  ;;  %v16196_v10 = vld [vmem:[#allocation52_spill] sm:$0xff] }
 0x331   :  { %16192 = vst [vmem:[#allocation82_spill] sm:$0xff] %v12427_v27  ;;  %v12434_v4 = vsel %vm2515_vm3, 0.0, %v2404_v18  ;;  %v12436_v44 = vpop.eup %9769  ;;  %v3804_v63 = vadd.f32 %v3606_v28, %v3268_v3  ;;  %v4528_v32 = vadd.f32 %v4306_v38, %v3939_v47  ;;  %v2084_v36 = vadd.f32 1.0, %v9764_v55 }
 0x332   :  { %16194 = vst [vmem:[#allocation51_spill] sm:$0xff] %v12436_v44  ;;  %v12438_v46 = vadd.f32 1.0, %v9766_v25  ;;  %v12440_v20 = vpop.eup %9771  ;;  %v4895_v27 = vsel %vm3555_vm5, %v4893_v40, %v4894_v12  ;;  %v2675_v17 = vmul.f32 %v11647_v49, %v2534_v26  ;;  %v3876_v23 = vmul.f32 %v16196_v10, %v2534_v26 }
 0x333   :  { %16195 = vst [vmem:[#allocation83_spill] sm:$0xff] %v12440_v20  ;;  %v2600_v29 = vsel %vm2515_vm3, %v2404_v18, 0.0  ;;  %v12446_v24 = vpop.eup %9773  ;;  %v3073_v1 = vsel %vm3019_vm4, %v3071_v41, %v3072_v21  ;;  %v3607_v44 = vrot.slane %v3356_v62, 2  ;;  %v3608_v3 = vrot.slane %v3358_v14, 2  ;;  %v16199_v21 = vld [vmem:[#allocation58_spill] sm:$0xff] }
 0x334   :  { %16197 = vst [vmem:[#allocation52_spill] sm:$0xff] %v12446_v24  ;;  %v3877_v47 = vmul.f32 %v11526_v53, %v12434_v4  ;;  %v12451_v55 = vpop.eup %9775  ;;  %v4307_v25 = vrot.slane %v4033_v33, 1  ;;  %v4308_v38 = vrot.slane %v4035_v16, 1  ;;  %v4622_v12 = vmul.f32 %v11672_v37, %v2534_v26 }
 0x335   :  { %16198 = vst [vmem:[#allocation84_spill] sm:$0xff] %v12451_v55  ;;  %v4036_v40 = vmul.f32 %v11518_v8, %v12434_v4  ;;  %v5117_v28 = vadd.f32 %v4895_v27, %v4528_v32  ;;  %v4038_v24 = vmul.f32 %v11518_v8, %v2600_v29  ;;  %v4625_v41 = vmul.f32 %v11538_v34, %v12434_v4 }
 0x336   :  { %v3941_v18 = vadd.f32 %v3877_v47, %v3804_v63  ;;  %v3940_v62 = vadd.f32 %v3876_v23, %v16199_v21  ;;  %v4624_v14 = vmul.f32 %v11672_v37, %v12399_v9  ;;  %v4627_v33 = vmul.f32 %v11538_v34, %v2600_v29 }
 0x337   :  { %v4310_v55 = vrot.slane %v4036_v40, 1  ;;  %v3269_v16 = vadd.f32 %v3073_v1, %v2675_v17  ;;  %v3609_v26 = vsel %vm3555_vm5, %v3607_v44, %v3608_v3  ;;  %v4311_v20 = vrot.slane %v4038_v24, 1 }
 0x338   :  { %v4899_v61 = vrot.slane %v4625_v41, 2  ;;  %v12464_v27 = vpop.eup %9777  ;;  %v4309_v63 = vsel %vm3019_vm4, %v4307_v25, %v4308_v38  ;;  %v4896_v32 = vrot.slane %v4622_v12, 2  ;;  %v4900_v47 = vrot.slane %v4627_v33, 2  ;;  %v1775_v12 = vpop.f32.mrf.mxu1 }
 0x339   :  { %v5194_v23 = vmul.f32 %v11583_v54, %v12434_v4  ;;  %v2823_v9 = vmul.f32 %v16158_v43, %v12434_v4  ;;  %v4312_v40 = vsel %vm3019_vm4, %v4310_v55, %v4311_v20  ;;  %v5345_v1 = vmul.f32 %v11587_v50, %v12434_v4 }
 0x33a   :  { %v5347_v24 = vmul.f32 %v11587_v50, %v2600_v29  ;;  %v12475_v44 = vpop.eup %9779  ;;  %v2825_v17 = vmul.f32 %v16158_v43, %v2600_v29  ;;  %v4530_v3 = vadd.f32 %v4312_v40, %v3941_v18  ;;  %v4901_v25 = vsel %vm3555_vm5, %v4899_v61, %v4900_v47 }
 0x33b   :  { %v5252_v38 = vadd.f32 %v5194_v23, %v5117_v28  ;;  %v5593_v41 = vrot.slane %v5345_v1, 1  ;;  %v5886_v21 = vmul.f32 %v11591_v15, %v12434_v4  ;;  %v5888_v20 = vmul.f32 %v11591_v15, %v2600_v29 }
 0x33c   :  { %v5594_v33 = vrot.slane %v5347_v24, 1  ;;  %v4897_v55 = vrot.slane %v4624_v14, 2  ;;  %v12482_v42 = vadd.f32 %v4901_v25, %v4530_v3  ;;  %v2405_v48 = vrot.slane %v12422_v60, 7  ;;  %v1777_v24 = vpop.f32.mrf.mxu1 }
 0x33d   :  { %9781 = vrcp.f32 %v2084_v36  ;;  %v3805_v58 = vadd.f32 %v3609_v26, %v3269_v16  ;;  %v6134_v40 = vrot.slane %v5886_v21, 2  ;;  %v6135_v61 = vrot.slane %v5888_v20, 2 }
 0x33e   :  { %v5595_v18 = vsel %vm3019_vm4, %v5593_v41, %v5594_v33  ;;  %v4529_v28 = vadd.f32 %v4309_v63, %v3940_v62  ;;  %v3074_v47 = vrot.slane %v2823_v9, 1  ;;  %v12487_v1 = vsel %vm2515_vm3, 0.0, %v2405_v48 }
 0x33f   :  { %v5793_v23 = vadd.f32 %v5595_v18, %v5252_v38  ;;  %v3075_v11 = vrot.slane %v2825_v17, 1  ;;  %v3359_v14 = vmul.f32 %v11489_v22, %v12434_v4  ;;  %v3361_v3 = vmul.f32 %v11489_v22, %v2600_v29 }
 0x340   :  { %v6136_v60 = vsel %vm3555_vm5, %v6134_v40, %v6135_v61  ;;  %v2601_v21 = vsel %vm2515_vm3, %v2405_v48, 0.0  ;;  %v3878_v62 = vmul.f32 %v16196_v10, %v12487_v1  ;;  %9783 = vrcp.f32 %v12438_v46 }
 0x341   :  { %v12493_v36 = vadd.f32 %v6136_v60, %v5793_v23  ;;  %v4037_v16 = vmul.f32 %v16193_v0, %v12487_v1  ;;  %v8900_v26 = vmul.f32 -1.442695, %v12414_v45  ;;  %v12503_v63 = vadd.f32 %v1775_v12, %v11439_v7 }
 0x342   :  { %v12506_v29 = vadd.f32 %v1777_v24, %v11436_v19  ;;  %v4898_v9 = vsel %vm3555_vm5, %v4896_v32, %v4897_v55  ;;  %v2676_v48 = vmul.f32 %v11493_v6, %v12434_v4  ;;  %v3942_v17 = vadd.f32 %v3878_v62, %v3805_v58 }
 0x343   :  { %16200 = vst [vmem:[#allocation85_spill] sm:$0xff] %v12493_v36  ;;  %9785 = vpow2.f32 %v12418_v2  ;;  %v5118_v46 = vadd.f32 %v4898_v9, %v4529_v28  ;;  %v3610_v25 = vrot.slane %v3359_v14, 2  ;;  %v4039_v38 = vmul.f32 %v16193_v0, %v2601_v21 }
 0x344   :  { %16201 = vst [vmem:[#allocation86_spill] sm:$0xff] %v12506_v29  ;;  %v4313_v41 = vrot.slane %v4037_v16, 1  ;;  %v3076_v33 = vsel %vm3019_vm4, %v3074_v47, %v3075_v11  ;;  %v3611_v12 = vrot.slane %v3361_v3, 2  ;;  %v2824_v20 = vmul.f32 %v11579_v31, %v12487_v1 }
 0x345   :  { %v4626_v32 = vmul.f32 %v11672_v37, %v12487_v1  ;;  %v4314_v55 = vrot.slane %v4039_v38, 1  ;;  %v4628_v4 = vmul.f32 %v11672_v37, %v2601_v21  ;;  %v5195_v58 = vmul.f32 %v11730_v57, %v12487_v1 }
 0x346   :  { %v5346_v2 = vmul.f32 %v11735_v59, %v12487_v1  ;;  %v2826_v18 = vmul.f32 %v11579_v31, %v2601_v21  ;;  %v5348_v11 = vmul.f32 %v11735_v59, %v2601_v21  ;;  %v5887_v61 = vmul.f32 %v11753_v52, %v12487_v1 }
 0x347   :  { %v4902_v40 = vrot.slane %v4626_v32, 2  ;;  %v4315_v28 = vsel %vm3019_vm4, %v4313_v41, %v4314_v55  ;;  %v4903_v47 = vrot.slane %v4628_v4, 2  ;;  %v5253_v23 = vadd.f32 %v5195_v58, %v5118_v46 }
 0x348   :  { %v5596_v24 = vrot.slane %v5346_v2, 1  ;;  %v4531_v14 = vadd.f32 %v4315_v28, %v3942_v17  ;;  %v5597_v3 = vrot.slane %v5348_v11, 1  ;;  %v5889_v60 = vmul.f32 %v11753_v52, %v2601_v21  ;;  %v16202_v2 = vld [vmem:[#allocation66_spill] sm:$0xff] }
 0x349   :  { %v6137_v62 = vrot.slane %v5887_v61, 2  ;;  %v3270_v9 = vadd.f32 %v3076_v33, %v2676_v48  ;;  %v4904_v38 = vsel %vm3555_vm5, %v4902_v40, %v4903_v47  ;;  %9787 = vpow2.f32 %v8900_v26 }
 0x34a   :  { %v9782_v16 = vpop.eup %9781  ;;  %v8901_v32 = vmul.f32 -1.442695, %v12503_v63  ;;  %v12531_v36 = vadd.f32 %v4904_v38, %v4531_v14  ;;  %v5598_v19 = vsel %vm3019_vm4, %v5596_v24, %v5597_v3  ;;  %v6138_v41 = vrot.slane %v5889_v60, 2 }
 0x34b   :  { %v2276_v46 = vmul.f32 %v9782_v16, %v12328_v39  ;;  %v3077_v55 = vrot.slane %v2824_v20, 1  ;;  %v3078_v17 = vrot.slane %v2826_v18, 1  ;;  %v5794_v4 = vadd.f32 %v5598_v19, %v5253_v23 }
 0x34c   :  { %v8902_v58 = vmul.f32 -1.442695, %v12506_v29  ;;  %v12537_v11 = vmul.f32 -1.442695, %v16202_v2  ;;  %v3612_v48 = vsel %vm3555_vm5, %v3610_v25, %v3611_v12  ;;  %v6139_v26 = vsel %vm3555_vm5, %v6137_v62, %v6138_v41 }
 0x34d   :  { %v2406_v33 = vrot.slane %v2276_v46, 7  ;;  %v9784_v40 = vpop.eup %9783  ;;  %v12543_v61 = vmul.f32 %v12464_v27, %v12247_v56  ;;  %v3806_v28 = vadd.f32 %v3612_v48, %v3270_v9  ;;  %v12545_v39 = vadd.f32 %v6139_v26, %v5794_v4 }
 0x34e   :  { %16203 = vst [vmem:[#allocation87_spill] sm:$0xff] %v12537_v11  ;;  %9789 = vpow2.f32 %v8901_v32  ;;  %v3360_v19 = vmul.f32 %v11627_v51, %v12487_v1  ;;  %v3362_v20 = vmul.f32 %v11627_v51, %v2601_v21  ;;  %v12556_v47 = vmul.f32 %v11647_v49, %v12236_v30 }
 0x34f   :  { %16204 = vst [vmem:[#allocation88_spill] sm:$0xff] %v12545_v39  ;;  %v12551_v18 = vsel %vm2515_vm3, 0.0, %v2406_v33  ;;  %v2602_v25 = vsel %vm2515_vm3, %v2406_v33, 0.0  ;;  %v2677_v56 = vmul.f32 %v11647_v49, %v12487_v1  ;;  %v3079_v27 = vsel %vm3019_vm4, %v3077_v55, %v3078_v17 }
 0x350   :  { %v9786_v12 = vpop.eup %9785  ;;  %9791 = vpow2.f32 %v8902_v58  ;;  %v3879_v23 = vmul.f32 %v11526_v53, %v12551_v18  ;;  %v4040_v21 = vmul.f32 %v11518_v8, %v12551_v18  ;;  %v2277_v24 = vmul.f32 %v9784_v40, %v12331_v35 }
 0x351   :  { %v2086_v14 = vadd.f32 1.0, %v12475_v44  ;;  %v12569_v3 = vmul.f32 %v11579_v31, %v12236_v30  ;;  %v12573_v1 = vmul.f32 %v11579_v31, %v12243_v13  ;;  %v12577_v60 = vmul.f32 %v11627_v51, %v12236_v30 }
 0x352   :  { %v4042_v62 = vmul.f32 %v11518_v8, %v2602_v25  ;;  %v3271_v16 = vadd.f32 %v3079_v27, %v2677_v56  ;;  %v3613_v9 = vrot.slane %v3360_v19, 2  ;;  %v3614_v38 = vrot.slane %v3362_v20, 2 }
 0x353   :  { %v3943_v35 = vadd.f32 %v3879_v23, %v3806_v28  ;;  %v4316_v32 = vrot.slane %v4040_v21, 1  ;;  %v4629_v41 = vmul.f32 %v11538_v34, %v12551_v18  ;;  %v2087_v46 = vadd.f32 1.0, %v9786_v12 }
 0x354   :  { %v4317_v44 = vrot.slane %v4042_v62, 1  ;;  %v2827_v55 = vmul.f32 %v16158_v43, %v12551_v18  ;;  %v4631_v17 = vmul.f32 %v11538_v34, %v2602_v25  ;;  %v2407_v4 = vrot.slane %v2277_v24, 7 }
 0x355   :  { %9793 = vrcp.f32 %v2086_v14  ;;  %v4905_v48 = vrot.slane %v4629_v41, 2  ;;  %v5196_v26 = vmul.f32 %v11583_v54, %v12551_v18  ;;  %v5349_v33 = vmul.f32 %v11587_v50, %v12551_v18 }
 0x356   :  { %v4318_v58 = vsel %vm3019_vm4, %v4316_v32, %v4317_v44  ;;  %v9788_v40 = vpop.eup %9787  ;;  %v2829_v28 = vmul.f32 %v16158_v43, %v2602_v25  ;;  %v4906_v20 = vrot.slane %v4631_v17, 2  ;;  %v5351_v12 = vmul.f32 %v11587_v50, %v2602_v25 }
 0x357   :  { %v4532_v19 = vadd.f32 %v4318_v58, %v3943_v35  ;;  %v5254_v56 = vadd.f32 %v5196_v26, %v12482_v42  ;;  %v5599_v27 = vrot.slane %v5349_v33, 1  ;;  %v5890_v23 = vmul.f32 %v11591_v15, %v12551_v18 }
 0x358   :  { %v5892_v21 = vmul.f32 %v11591_v15, %v2602_v25  ;;  %v3615_v24 = vsel %vm3555_vm5, %v3613_v9, %v3614_v38  ;;  %v4907_v14 = vsel %vm3555_vm5, %v4905_v48, %v4906_v20  ;;  %v5600_v62 = vrot.slane %v5351_v12, 1 }
 0x359   :  { %v12599_v32 = vsel %vm2515_vm3, 0.0, %v2407_v4  ;;  %v3807_v35 = vadd.f32 %v3615_v24, %v3271_v16  ;;  %v12601_v44 = vadd.f32 %v4907_v14, %v4532_v19  ;;  %v6140_v41 = vrot.slane %v5890_v23, 2 }
 0x35a   :  { %v6141_v17 = vrot.slane %v5892_v21, 2  ;;  %v5601_v58 = vsel %vm3019_vm4, %v5599_v27, %v5600_v62  ;;  %v12607_v26 = vsel %vm2515_vm3, %v2407_v4, 0.0  ;;  %9795 = vrcp.f32 %v2087_v46 }
 0x35b   :  { %v12603_v42 = vpop.eup %9789  ;;  %v2088_v9 = vadd.f32 1.0, %v9788_v40  ;;  %v3080_v38 = vrot.slane %v2827_v55, 1  ;;  %v3081_v48 = vrot.slane %v2829_v28, 1  ;;  %v5795_v33 = vadd.f32 %v5601_v58, %v5254_v56 }
 0x35c   :  { %v3880_v20 = vmul.f32 %v16196_v10, %v12599_v32  ;;  %v12615_v19 = vmul.f32 %v11627_v51, %v12243_v13  ;;  %v3363_v12 = vmul.f32 %v11489_v22, %v12551_v18  ;;  %v6142_v4 = vsel %vm3555_vm5, %v6140_v41, %v6141_v17 }
 0x35d   :  { %v12611_v16 = vpop.eup %9791  ;;  %v4041_v46 = vmul.f32 %v16193_v0, %v12599_v32  ;;  %v3365_v55 = vmul.f32 %v11489_v22, %v2602_v25  ;;  %v12623_v40 = vadd.f32 %v6142_v4, %v5795_v33  ;;  %v4043_v56 = vmul.f32 %v16193_v0, %v12607_v26 }
 0x35e   :  { %v3944_v28 = vadd.f32 %v3880_v20, %v3807_v35  ;;  %v3872_v27 = vmul.f32 %v16196_v10, %v12236_v30  ;;  %v4630_v21 = vmul.f32 %v11672_v37, %v12599_v32  ;;  %v4632_v24 = vmul.f32 %v11672_v37, %v12607_v26 }
 0x35f   :  { %16205 = vst [vmem:[#allocation89_spill] sm:$0xff] %v12623_v40  ;;  %v4319_v23 = vrot.slane %v4041_v46, 1  ;;  %v12635_v14 = vmul.f32 %v16193_v0, %v12236_v30  ;;  %v2678_v25 = vmul.f32 %v11493_v6, %v12551_v18  ;;  %v3082_v62 = vsel %vm3019_vm4, %v3080_v38, %v3081_v48 }
 0x360   :  { %9797 = vrcp.f32 %v2088_v9  ;;  %v3616_v35 = vrot.slane %v3363_v12, 2  ;;  %v4320_v41 = vrot.slane %v4043_v56, 1  ;;  %v4908_v17 = vrot.slane %v4630_v21, 2 }
 0x361   :  { %v4909_v58 = vrot.slane %v4632_v24, 2  ;;  %v3617_v20 = vrot.slane %v3365_v55, 2  ;;  %v5197_v4 = vmul.f32 %v11730_v57, %v12599_v32  ;;  %v5350_v46 = vmul.f32 %v11735_v59, %v12599_v32 }
 0x362   :  { %v9794_v33 = vpop.eup %9793  ;;  %v5352_v2 = vmul.f32 %v11735_v59, %v12607_v26  ;;  %v3272_v40 = vadd.f32 %v3082_v62, %v2678_v25  ;;  %v2828_v18 = vmul.f32 %v11579_v31, %v12599_v32  ;;  %v2830_v9 = vmul.f32 %v11579_v31, %v12607_v26 }
 0x363   :  { %v4321_v38 = vsel %vm3019_vm4, %v4319_v23, %v4320_v41  ;;  %v5255_v12 = vadd.f32 %v5197_v4, %v12531_v36  ;;  %v5602_v55 = vrot.slane %v5350_v46, 1  ;;  %v4910_v21 = vsel %vm3555_vm5, %v4908_v17, %v4909_v58 }
 0x364   :  { %v4533_v48 = vadd.f32 %v4321_v38, %v3944_v28  ;;  %v5603_v56 = vrot.slane %v5352_v2, 1  ;;  %v5891_v24 = vmul.f32 %v11753_v52, %v12599_v32  ;;  %v5893_v25 = vmul.f32 %v11753_v52, %v12607_v26 }
 0x365   :  { %v2278_v62 = vmul.f32 %v9794_v33, %v12385_v5  ;;  %v12661_v23 = vmul.f32 %v16193_v0, %v12243_v13  ;;  %v3066_v46 = vrot.slane %v12573_v1, 1  ;;  %v3618_v38 = vsel %vm3555_vm5, %v3616_v35, %v3617_v20 }
 0x366   :  { %v12663_v28 = vadd.f32 %v4910_v21, %v4533_v48  ;;  %v5604_v36 = vsel %vm3019_vm4, %v5602_v55, %v5603_v56  ;;  %v6143_v41 = vrot.slane %v5891_v24, 2  ;;  %v6144_v17 = vrot.slane %v5893_v25, 2 }
 0x367   :  { %v5796_v2 = vadd.f32 %v5604_v36, %v5255_v12  ;;  %v2408_v58 = vrot.slane %v2278_v62, 7  ;;  %v9796_v4 = vpop.eup %9795  ;;  %v3083_v5 = vrot.slane %v2828_v18, 1  ;;  %v3084_v33 = vrot.slane %v2830_v9, 1  ;;  %v16207_v18 = vld [vmem:[#allocation81_spill] sm:$0xff] }
 0x368   :  { %v3808_v39 = vadd.f32 %v3618_v38, %v3272_v40  ;;  %v6145_v11 = vsel %vm3555_vm5, %v6143_v41, %v6144_v17  ;;  %v3364_v55 = vmul.f32 %v11627_v51, %v12599_v32  ;;  %v2089_v1 = vadd.f32 1.0, %v12603_v42 }
 0x369   :  { %v12670_v29 = vsel %vm2515_vm3, 0.0, %v2408_v58  ;;  %v2604_v48 = vsel %vm2515_vm3, %v2408_v58, 0.0  ;;  %v12676_v56 = vadd.f32 %v6145_v11, %v5796_v2  ;;  %v3366_v35 = vmul.f32 %v11627_v51, %v12607_v26  ;;  %v16208_v26 = vld [vmem:[#allocation79_spill] sm:$0xff] }
 0x36a   :  { %v3881_v40 = vmul.f32 %v11526_v53, %v12670_v29  ;;  %v4044_v20 = vmul.f32 %v11518_v8, %v12670_v29  ;;  %v2279_v9 = vmul.f32 %v9796_v4, %v16207_v18  ;;  %v12689_v24 = vmul.f32 %v11672_v37, %v12236_v30 }
 0x36b   :  { %16206 = vst [vmem:[#allocation90_spill] sm:$0xff] %v12676_v56  ;;  %v3085_v11 = vsel %vm3019_vm4, %v3083_v5, %v3084_v33  ;;  %v4046_v42 = vmul.f32 %v11518_v8, %v2604_v48  ;;  %v12694_v62 = vadd.f32 %v3872_v27, %v16208_v26  ;;  %v2679_v36 = vmul.f32 %v11647_v49, %v12599_v32 }
 0x36c   :  { %v3945_v2 = vadd.f32 %v3881_v40, %v3808_v39  ;;  %v4322_v41 = vrot.slane %v4044_v20, 1  ;;  %v3619_v17 = vrot.slane %v3364_v55, 2  ;;  %v4633_v4 = vmul.f32 %v11538_v34, %v12670_v29 }
 0x36d   :  { %v9798_v25 = vpop.eup %9797  ;;  %v4323_v58 = vrot.slane %v4046_v42, 1  ;;  %9799 = vrcp.f32 %v2089_v1  ;;  %v3273_v30 = vadd.f32 %v3085_v11, %v2679_v36  ;;  %v3620_v38 = vrot.slane %v3366_v35, 2 }
 0x36e   :  { %v4635_v5 = vmul.f32 %v11538_v34, %v2604_v48  ;;  %v2409_v33 = vrot.slane %v2279_v9, 7  ;;  %v4911_v27 = vrot.slane %v4633_v4, 2  ;;  %v5198_v26 = vmul.f32 %v11583_v54, %v12670_v29 }
 0x36f   :  { %v4324_v18 = vsel %vm3019_vm4, %v4322_v41, %v4323_v58  ;;  %v5353_v39 = vmul.f32 %v11587_v50, %v12670_v29  ;;  %v2831_v32 = vmul.f32 %v16158_v43, %v12670_v29  ;;  %v2833_v55 = vmul.f32 %v16158_v43, %v2604_v48 }
 0x370   :  { %v4534_v1 = vadd.f32 %v4324_v18, %v3945_v2  ;;  %v4912_v40 = vrot.slane %v4635_v5, 2  ;;  %v5256_v35 = vadd.f32 %v5198_v26, %v12601_v44  ;;  %v5355_v20 = vmul.f32 %v11587_v50, %v2604_v48 }
 0x371   :  { %v5605_v9 = vrot.slane %v5353_v39, 1  ;;  %v5894_v11 = vmul.f32 %v11591_v15, %v12670_v29  ;;  %v3621_v42 = vsel %vm3555_vm5, %v3619_v17, %v3620_v38  ;;  %v5896_v41 = vmul.f32 %v11591_v15, %v2604_v48 }
 0x372   :  { %v4913_v36 = vsel %vm3555_vm5, %v4911_v27, %v4912_v40  ;;  %v12717_v58 = vsel %vm2515_vm3, 0.0, %v2409_v33  ;;  %v3809_v4 = vadd.f32 %v3621_v42, %v3273_v30  ;;  %v5606_v5 = vrot.slane %v5355_v20, 1 }
 0x373   :  { %v12719_v2 = vadd.f32 %v4913_v36, %v4534_v1  ;;  %v6146_v44 = vrot.slane %v5894_v11, 2  ;;  %v4295_v18 = vrot.slane %v12635_v14, 1  ;;  %v3086_v26 = vrot.slane %v2831_v32, 1 }
 0x374   :  { %v6147_v39 = vrot.slane %v5896_v41, 2  ;;  %v2280_v12 = vmul.f32 %v9798_v25, %v12414_v45  ;;  %v3087_v21 = vrot.slane %v2833_v55, 1  ;;  %v5607_v17 = vsel %vm3019_vm4, %v5605_v9, %v5606_v5 }
 0x375   :  { %v2605_v38 = vsel %vm2515_vm3, %v2409_v33, 0.0  ;;  %v3882_v27 = vmul.f32 %v16196_v10, %v12717_v58  ;;  %v16209_v30 = vrot.slane %v12569_v3, 1  ;;  %v4296_v40 = vrot.slane %v12661_v23, 1 }
 0x376   :  { %v3367_v14 = vmul.f32 %v11489_v22, %v12670_v29  ;;  %v5797_v32 = vadd.f32 %v5607_v17, %v5256_v35  ;;  %v3369_v45 = vmul.f32 %v11489_v22, %v2604_v48  ;;  %v6148_v25 = vsel %vm3555_vm5, %v6146_v44, %v6147_v39 }
 0x377   :  { %v12730_v1 = vsel %vm3019_vm4, %v16209_v30, %v3066_v46  ;;  %v3946_v55 = vadd.f32 %v3882_v27, %v3809_v4  ;;  %v4045_v33 = vmul.f32 %v16193_v0, %v12717_v58  ;;  %v12741_v3 = vmul.f32 %v11672_v37, %v12243_v13 }
 0x378   :  { %v12743_v46 = vadd.f32 %v6148_v25, %v5797_v32  ;;  %v4047_v23 = vmul.f32 %v16193_v0, %v2605_v38  ;;  %v4634_v20 = vmul.f32 %v11672_v37, %v12717_v58  ;;  %v3088_v35 = vsel %vm3019_vm4, %v3086_v26, %v3087_v21 }
 0x379   :  { %v4325_v48 = vrot.slane %v4045_v33, 1  ;;  %v4636_v9 = vmul.f32 %v11672_v37, %v2605_v38  ;;  %v2410_v11 = vrot.slane %v2280_v12, 7  ;;  %v2680_v36 = vmul.f32 %v11493_v6, %v12670_v29 }
 0x37a   :  { %16210 = vst [vmem:[#allocation81_spill] sm:$0xff] %v12743_v46  ;;  %v9800_v42 = vpop.eup %9799  ;;  %v4326_v41 = vrot.slane %v4047_v23, 1  ;;  %v4914_v13 = vrot.slane %v4634_v20, 2  ;;  %v5199_v4 = vmul.f32 %v11730_v57, %v12717_v58  ;;  %v3622_v5 = vrot.slane %v3367_v14, 2 }
 0x37b   :  { %v3623_v44 = vrot.slane %v3369_v45, 2  ;;  %v4915_v39 = vrot.slane %v4636_v9, 2  ;;  %v5354_v17 = vmul.f32 %v11735_v59, %v12717_v58  ;;  %v3274_v21 = vadd.f32 %v3088_v35, %v2680_v36 }
 0x37c   :  { %v4327_v26 = vsel %vm3019_vm4, %v4325_v48, %v4326_v41  ;;  %v5257_v12 = vadd.f32 %v5199_v4, %v12663_v28  ;;  %v5356_v27 = vmul.f32 %v11735_v59, %v2605_v38  ;;  %v2832_v29 = vmul.f32 %v11579_v31, %v12717_v58 }
 0x37d   :  { %v2834_v30 = vmul.f32 %v11579_v31, %v2605_v38  ;;  %v4535_v32 = vadd.f32 %v4327_v26, %v3946_v55  ;;  %v5608_v25 = vrot.slane %v5354_v17, 1  ;;  %v4916_v14 = vsel %vm3555_vm5, %v4914_v13, %v4915_v39 }
 0x37e   :  { %v5609_v45 = vrot.slane %v5356_v27, 1  ;;  %v5895_v33 = vmul.f32 %v11753_v52, %v12717_v58  ;;  %v5897_v23 = vmul.f32 %v11753_v52, %v2605_v38  ;;  %v12770_v35 = vsel %vm2515_vm3, 0.0, %v2410_v11 }
 0x37f   :  { %v12767_v28 = vadd.f32 %v4916_v14, %v4535_v32  ;;  %v2090_v48 = vadd.f32 1.0, %v12611_v16  ;;  %v3624_v55 = vsel %vm3555_vm5, %v3622_v5, %v3623_v44  ;;  %v12776_v39 = vsel %vm2515_vm3, %v2410_v11, 0.0 }
 0x380   :  { %v5610_v9 = vsel %vm3019_vm4, %v5608_v25, %v5609_v45  ;;  %v6149_v36 = vrot.slane %v5895_v33, 2  ;;  %v6150_v41 = vrot.slane %v5897_v23, 2  ;;  %v3810_v13 = vadd.f32 %v3624_v55, %v3274_v21 }
 0x381   :  { %v5798_v4 = vadd.f32 %v5610_v9, %v5257_v12  ;;  %v2281_v17 = vmul.f32 %v9800_v42, %v12503_v63  ;;  %v3089_v26 = vrot.slane %v2832_v29, 1  ;;  %v3090_v27 = vrot.slane %v2834_v30, 1 }
 0x382   :  { %v6151_v32 = vsel %vm3555_vm5, %v6149_v36, %v6150_v41  ;;  %v3883_v16 = vmul.f32 %v11526_v53, %v12770_v35  ;;  %v4297_v5 = vsel %vm3019_vm4, %v4295_v18, %v4296_v40  ;;  %v3368_v44 = vmul.f32 %v11627_v51, %v12717_v58 }
 0x383   :  { %v12785_v25 = vadd.f32 %v6151_v32, %v5798_v4  ;;  %v4048_v11 = vmul.f32 %v11518_v8, %v12770_v35  ;;  %v3370_v21 = vmul.f32 %v11627_v51, %v2605_v38  ;;  %v4050_v42 = vmul.f32 %v11518_v8, %v12776_v39 }
 0x384   :  { %v3947_v63 = vadd.f32 %v3883_v16, %v3810_v13  ;;  %v4637_v12 = vmul.f32 %v11538_v34, %v12770_v35  ;;  %v4639_v18 = vmul.f32 %v11538_v34, %v12776_v39  ;;  %v2411_v40 = vrot.slane %v2281_v17, 7 }
 0x385   :  { %16211 = vst [vmem:[#allocation79_spill] sm:$0xff] %v12785_v25  ;;  %v4328_v29 = vrot.slane %v4048_v11, 1  ;;  %9801 = vrcp.f32 %v2090_v48  ;;  %v2681_v30 = vmul.f32 %v11647_v49, %v12717_v58  ;;  %v3091_v14 = vsel %vm3019_vm4, %v3089_v26, %v3090_v27  ;;  %v1779_v11 = vpop.f32.mrf.mxu1 }
 0x386   :  { %v4329_v45 = vrot.slane %v4050_v42, 1  ;;  %v4917_v38 = vrot.slane %v4637_v12, 2  ;;  %v3625_v33 = vrot.slane %v3368_v44, 2  ;;  %v4918_v23 = vrot.slane %v4639_v18, 2 }
 0x387   :  { %v5200_v55 = vmul.f32 %v11583_v54, %v12770_v35  ;;  %v5357_v9 = vmul.f32 %v11587_v50, %v12770_v35  ;;  %v3626_v36 = vrot.slane %v3370_v21, 2  ;;  %v5359_v48 = vmul.f32 %v11587_v50, %v12776_v39 }
 0x388   :  { %v4330_v41 = vsel %vm3019_vm4, %v4328_v29, %v4329_v45  ;;  %v5898_v58 = vmul.f32 %v11591_v15, %v12770_v35  ;;  %v3275_v13 = vadd.f32 %v3091_v14, %v2681_v30  ;;  %v4919_v27 = vsel %vm3555_vm5, %v4917_v38, %v4918_v23 }
 0x389   :  { %v4536_v4 = vadd.f32 %v4330_v41, %v3947_v63  ;;  %v5258_v17 = vadd.f32 %v5200_v55, %v12719_v2  ;;  %v5611_v26 = vrot.slane %v5357_v9, 1  ;;  %v5612_v32 = vrot.slane %v5359_v48, 1  ;;  %v1783_v55 = vpop.f32.mrf.mxu1 }
 0x38a   :  { %v5900_v16 = vmul.f32 %v11591_v15, %v12776_v39  ;;  %v6152_v44 = vrot.slane %v5898_v58, 2  ;;  %v12814_v21 = vadd.f32 %v12730_v1, %v12556_v47  ;;  %v12817_v42 = vadd.f32 %v4297_v5, %v12694_v62 }
 0x38b   :  { %v12819_v12 = vadd.f32 %v4919_v27, %v4536_v4  ;;  %v12822_v2 = vsel %vm2515_vm3, 0.0, %v2411_v40  ;;  %v2835_v63 = vmul.f32 %v16158_v43, %v12770_v35  ;;  %v2837_v29 = vmul.f32 %v16158_v43, %v12776_v39 }
 0x38c   :  { %v5613_v18 = vsel %vm3019_vm4, %v5611_v26, %v5612_v32  ;;  %v6153_v30 = vrot.slane %v5900_v16, 2  ;;  %v3627_v1 = vsel %vm3555_vm5, %v3625_v33, %v3626_v36  ;;  %v12832_v5 = vsel %vm2515_vm3, %v2411_v40, 0.0  ;;  %v16213_v26 = vld [vmem:[#allocation37_spill] sm:$0xff] }
 0x38d   :  { %v5799_v62 = vadd.f32 %v5613_v18, %v5258_v17  ;;  %v3811_v14 = vadd.f32 %v3627_v1, %v3275_v13  ;;  %v3884_v38 = vmul.f32 %v16196_v10, %v12822_v2  ;;  %v12838_v23 = vadd.f32 %v1779_v11, %v11439_v7 }
 0x38e   :  { %v6154_v45 = vsel %vm3555_vm5, %v6152_v44, %v6153_v30  ;;  %v2401_v9 = vrot.slane %v12543_v61, 7  ;;  %v3371_v41 = vmul.f32 %v11489_v22, %v12770_v35  ;;  %v4049_v40 = vmul.f32 %v16193_v0, %v12822_v2 }
 0x38f   :  { %v12843_v33 = vadd.f32 %v6154_v45, %v5799_v62  ;;  %v3092_v36 = vrot.slane %v2835_v63, 1  ;;  %v3093_v48 = vrot.slane %v2837_v29, 1  ;;  %v3948_v58 = vadd.f32 %v3884_v38, %v3811_v14 }
 0x390   :  { %v4051_v13 = vmul.f32 %v16193_v0, %v12832_v5  ;;  %v3373_v4 = vmul.f32 %v11489_v22, %v12776_v39  ;;  %v4331_v17 = vrot.slane %v4049_v40, 1  ;;  %v4638_v61 = vmul.f32 %v11672_v37, %v12822_v2 }
 0x391   :  { %16212 = vst [vmem:[#allocation91_spill] sm:$0xff] %v12843_v33  ;;  %v12854_v27 = vadd.f32 %v1783_v55, %v16213_v26  ;;  %v2682_v16 = vmul.f32 %v11493_v6, %v12770_v35  ;;  %v4640_v11 = vmul.f32 %v11672_v37, %v12832_v5  ;;  %v8903_v63 = vmul.f32 -1.442695, %v12838_v23 }
 0x392   :  { %v9802_v32 = vpop.eup %9801  ;;  %v4332_v44 = vrot.slane %v4051_v13, 1  ;;  %v3628_v29 = vrot.slane %v3371_v41, 2  ;;  %v4920_v18 = vrot.slane %v4638_v61, 2  ;;  %v5201_v39 = vmul.f32 %v11730_v57, %v12822_v2 }
 0x393   :  { %v5358_v30 = vmul.f32 %v11735_v59, %v12822_v2  ;;  %v3094_v1 = vsel %vm3019_vm4, %v3092_v36, %v3093_v48  ;;  %v4921_v14 = vrot.slane %v4640_v11, 2  ;;  %v5360_v35 = vmul.f32 %v11735_v59, %v12832_v5 }
 0x394   :  { %v4333_v62 = vsel %vm3019_vm4, %v4331_v17, %v4332_v44  ;;  %v3629_v45 = vrot.slane %v3373_v4, 2  ;;  %v5259_v55 = vadd.f32 %v5201_v39, %v12767_v28  ;;  %v5899_v61 = vmul.f32 %v11753_v52, %v12822_v2  ;;  %v16214_v44 = vld [vmem:[#allocation86_spill] sm:$0xff] }
 0x395   :  { %v4537_v38 = vadd.f32 %v4333_v62, %v3948_v58  ;;  %v5614_v41 = vrot.slane %v5358_v30, 1  ;;  %v4922_v40 = vsel %vm3555_vm5, %v4920_v18, %v4921_v14  ;;  %v5615_v13 = vrot.slane %v5360_v35, 1  ;;  %v16215_v18 = vld [vmem:[#allocation67_spill] sm:$0xff]  ;;  %v16216_v62 = vld [vmem:[#allocation68_spill] sm:$0xff]  ;;  %v16217_v14 = vld [vmem:[#allocation70_spill] sm:$0xff] }
 0x396   :  { %v5901_v36 = vmul.f32 %v11753_v52, %v12832_v5  ;;  %v3276_v48 = vadd.f32 %v3094_v1, %v2682_v16  ;;  %v2282_v11 = vmul.f32 %v9802_v32, %v16214_v44  ;;  %v8904_v4 = vmul.f32 -1.442695, %v12854_v27 }
 0x397   :  { %v12875_v17 = vadd.f32 %v4922_v40, %v4537_v38  ;;  %v5616_v58 = vsel %vm3019_vm4, %v5614_v41, %v5615_v13  ;;  %v6155_v28 = vrot.slane %v5899_v61, 2  ;;  %9803 = vpow2.f32 %v8903_v63  ;;  %v16219_v13 = vld [vmem:[#allocation80_spill] sm:$0xff] }
 0x398   :  { %v6156_v39 = vrot.slane %v5901_v36, 2  ;;  %v8959_v30 = vmul.f32 -1.442695, %v16215_v18  ;;  %v5250_v35 = vadd.f32 %v16217_v14, %v16216_v62  ;;  %v5800_v20 = vadd.f32 %v5616_v58, %v5259_v55  ;;  %v16220_v55 = vld [vmem:[#allocation87_spill] sm:$0xff] }
 0x399   :  { %v2412_v47 = vrot.slane %v2282_v11, 7  ;;  %v2532_v16 = vsel %vm2515_vm3, 0.0, %v2401_v9  ;;  %v3630_v1 = vsel %vm3555_vm5, %v3628_v29, %v3629_v45  ;;  %9805 = vpow2.f32 %v8904_v4 }
 0x39a   :  { %v6157_v32 = vsel %vm3555_vm5, %v6155_v28, %v6156_v39  ;;  %v3812_v38 = vadd.f32 %v3630_v1, %v3276_v48  ;;  %v12895_v61 = vadd.f32 1.0, %v16219_v13  ;;  %9807 = vpow2.f32 %v16220_v55 }
 0x39b   :  { %v12886_v40 = vadd.f32 %v6157_v32, %v5800_v20  ;;  %v12889_v41 = vsel %vm2515_vm3, 0.0, %v2412_v47  ;;  %v12892_v63 = vsel %vm2515_vm3, %v2412_v47, 0.0  ;;  %v16221_v36 = vrot.slane %v12615_v19, 2 }
 0x39c   :  { %v16222_v29 = vrot.slane %v12577_v60, 2  ;;  %v2597_v20 = vsel %vm2515_vm3, %v2401_v9, 0.0  ;;  %v16223_v48 = vrot.slane %v12741_v3, 2  ;;  %v16224_v44 = vrot.slane %v12689_v24, 2  ;;  %v16225_v9 = vld [vmem:[#allocation72_spill] sm:$0xff] }
 0x39d   :  { %16218 = vst [vmem:[#allocation86_spill] sm:$0xff] %v12886_v40  ;;  %v4029_v4 = vmul.f32 %v16193_v0, %v2532_v16  ;;  %v3885_v58 = vmul.f32 %v11526_v53, %v12889_v41  ;;  %9809 = vpow2.f32 %v8959_v30  ;;  %v4052_v19 = vmul.f32 %v11518_v8, %v12889_v41 }
 0x39e   :  { %v3603_v45 = vsel %vm3555_vm5, %v16222_v29, %v16221_v36  ;;  %v4886_v47 = vsel %vm3555_vm5, %v16224_v44, %v16223_v48  ;;  %v4054_v3 = vmul.f32 %v11518_v8, %v12892_v63  ;;  %v5791_v24 = vadd.f32 %v16225_v9, %v5250_v35 }
 0x39f   :  { %v3803_v11 = vadd.f32 %v3603_v45, %v12814_v21  ;;  %v5114_v60 = vadd.f32 %v4886_v47, %v12817_v42  ;;  %v3874_v28 = vmul.f32 %v16196_v10, %v2532_v16  ;;  %v4031_v21 = vmul.f32 %v16193_v0, %v2597_v20 }
 0x3a0   :  { %v3949_v39 = vadd.f32 %v3885_v58, %v3812_v38  ;;  %v12922_v62 = vmul.f32 %v11672_v37, %v2532_v16  ;;  %v4334_v1 = vrot.slane %v4052_v19, 1  ;;  %v4335_v30 = vrot.slane %v4054_v3, 1 }
 0x3a1   :  { %v4641_v42 = vmul.f32 %v11538_v34, %v12889_v41  ;;  %v3938_v32 = vadd.f32 %v3874_v28, %v3803_v11  ;;  %v4301_v13 = vrot.slane %v4029_v4, 1  ;;  %v4620_v55 = vmul.f32 %v11672_v37, %v2597_v20 }
 0x3a2   :  { %v4643_v35 = vmul.f32 %v11538_v34, %v12892_v63  ;;  %v4336_v36 = vsel %vm3019_vm4, %v4334_v1, %v4335_v30  ;;  %v5202_v38 = vmul.f32 %v11583_v54, %v12889_v41  ;;  %v5361_v45 = vmul.f32 %v11587_v50, %v12889_v41  ;;  %v16226_v1 = vld [vmem:[#allocation76_spill] sm:$0xff] }
 0x3a3   :  { %v4923_v29 = vrot.slane %v4641_v42, 2  ;;  %v5338_v48 = vmul.f32 %v11735_v59, %v2532_v16  ;;  %v5340_v44 = vmul.f32 %v11735_v59, %v2597_v20  ;;  %v4538_v47 = vadd.f32 %v4336_v36, %v3949_v39 }
 0x3a4   :  { %v4924_v11 = vrot.slane %v4643_v35, 2  ;;  %v5260_v4 = vadd.f32 %v5202_v38, %v12819_v12  ;;  %v5363_v58 = vmul.f32 %v11587_v50, %v12892_v63  ;;  %v5617_v19 = vrot.slane %v5361_v45, 1  ;;  %v9804_v28 = vpop.eup %9803 }
 0x3a5   :  { %v5902_v3 = vmul.f32 %v11591_v15, %v12889_v41  ;;  %v12942_v30 = vadd.f32 %v16226_v1, %v5791_v24  ;;  %v4302_v42 = vrot.slane %v4031_v21, 1  ;;  %v5904_v39 = vmul.f32 %v11591_v15, %v12892_v63  ;;  %v16228_v1 = vld [vmem:[#allocation40_spill] sm:$0xff] }
 0x3a6   :  { %v4925_v18 = vsel %vm3555_vm5, %v4923_v29, %v4924_v11  ;;  %v5618_v12 = vrot.slane %v5363_v58, 1  ;;  %v2091_v38 = vadd.f32 1.0, %v9804_v28  ;;  %v9806_v9 = vpop.eup %9805  ;;  %v5191_v45 = vmul.f32 %v11730_v57, %v2532_v16 }
 0x3a7   :  { %16227 = vst [vmem:[#allocation68_spill] sm:$0xff] %v12942_v30  ;;  %v12947_v35 = vadd.f32 %v4925_v18, %v4538_v47  ;;  %v6158_v36 = vrot.slane %v5902_v3, 2  ;;  %v5584_v14 = vrot.slane %v5338_v48, 1  ;;  %v5585_v53 = vrot.slane %v5340_v44, 1  ;;  %v9808_v11 = vpop.eup %9807 }
 0x3a8   :  { %v6159_v34 = vrot.slane %v5904_v39, 2  ;;  %v5879_v24 = vmul.f32 %v11753_v52, %v2532_v16  ;;  %v5881_v21 = vmul.f32 %v11753_v52, %v2597_v20  ;;  %v5619_v29 = vsel %vm3019_vm4, %v5617_v19, %v5618_v12 }
 0x3a9   :  { %9811 = vrcp.f32 %v2091_v38  ;;  %v8960_v18 = vmul.f32 -1.442695, %v16228_v1  ;;  %v4890_v47 = vrot.slane %v12922_v62, 2  ;;  %v5249_v58 = vadd.f32 %v5191_v45, %v5114_v60  ;;  %v1785_v38 = vpop.f32.mrf.mxu1 }
 0x3aa   :  { %v5801_v3 = vadd.f32 %v5619_v29, %v5260_v4  ;;  %v4303_v28 = vsel %vm3019_vm4, %v4301_v13, %v4302_v42  ;;  %v4891_v40 = vrot.slane %v4620_v55, 2  ;;  %v6160_v48 = vsel %vm3555_vm5, %v6158_v36, %v6159_v34  ;;  %v9810_v39 = vpop.eup %9809  ;;  %v16230_v34 = vld [vmem:[#allocation51_spill] sm:$0xff]  ;;  %v16231_v4 = vld [vmem:[#allocation41_spill] sm:$0xff] }
 0x3ab   :  { %v2092_v44 = vadd.f32 1.0, %v9806_v9  ;;  %v4527_v16 = vadd.f32 %v4303_v28, %v3938_v32  ;;  %v2836_v20 = vmul.f32 %v11579_v31, %v12822_v2  ;;  %v2838_v19 = vmul.f32 %v11579_v31, %v12832_v5  ;;  %v16232_v36 = vld [vmem:[#allocation83_spill] sm:$0xff]  ;;  %v16234_v28 = vld [vmem:[#allocation77_spill] sm:$0xff] }
 0x3ac   :  { %v12961_v12 = vadd.f32 %v6160_v48, %v5801_v3  ;;  %v8962_v60 = vmul.f32 -1.442695, %v12942_v30  ;;  %v5586_v62 = vsel %vm3019_vm4, %v5584_v14, %v5585_v53  ;;  %v6125_v13 = vrot.slane %v5879_v24, 2 }
 0x3ad   :  { %v6126_v55 = vrot.slane %v5881_v21, 2  ;;  %9813 = vrcp.f32 %v12895_v61  ;;  %v6580_v9 = vadd.f32 1.0, %v16230_v34  ;;  %v5790_v32 = vadd.f32 %v5586_v62, %v5249_v58  ;;  %v16233_v21 = vld [vmem:[#allocation52_spill] sm:$0xff] }
 0x3ae   :  { %16229 = vst [vmem:[#allocation80_spill] sm:$0xff] %v12961_v12  ;;  %v5885_v42 = vmul.f32 %v11753_v52, %v16231_v4  ;;  %v6581_v45 = vadd.f32 1.0, %v16232_v36  ;;  %v4892_v29 = vsel %vm3555_vm5, %v4890_v47, %v4891_v40  ;;  %9815 = vrcp.f32 %v2092_v44  ;;  %v16235_v62 = vld [vmem:[#allocation84_spill] sm:$0xff]  ;;  %v16237_v47 = vld [vmem:[#allocation78_spill] sm:$0xff] }
 0x3af   :  { %v12972_v3 = vadd.f32 %v1785_v38, %v11439_v7  ;;  %9817 = vpow2.f32 %v8960_v18  ;;  %v5116_v53 = vadd.f32 %v4892_v29, %v4527_v16  ;;  %v3095_v14 = vrot.slane %v2836_v20, 1  ;;  %v16238_v38 = vld [vmem:[#allocation71_spill] sm:$0xff]  ;;  %v16239_v36 = vld [vmem:[#allocation62_spill] sm:$0xff] }
 0x3b0   :  { %v3096_v24 = vrot.slane %v2838_v19, 1  ;;  %v6582_v61 = vadd.f32 1.0, %v16233_v21  ;;  %9819 = vpow2.f32 %v8962_v60  ;;  %v5591_v58 = vrot.slane %v16234_v28, 1 }
 0x3b1   :  { %v6127_v48 = vsel %vm3555_vm5, %v6125_v13, %v6126_v55  ;;  %v6583_v34 = vadd.f32 1.0, %v16235_v62  ;;  %v3372_v40 = vmul.f32 %v11627_v51, %v12822_v2  ;;  %v3374_v18 = vmul.f32 %v11627_v51, %v12832_v5  ;;  %v1787_v55 = vpop.f32.mrf.mxu1  ;;  %v16245_v62 = vld [vmem:[#allocation73_spill] sm:$0xff] }
 0x3b2   :  { %v12978_v4 = vadd.f32 %v6127_v48, %v5790_v32  ;;  %9821 = vrcp.f32 %v6580_v9  ;;  %v6131_v44 = vrot.slane %v16237_v47, 2  ;;  %v6132_v16 = vrot.slane %v5885_v42, 2  ;;  %v16244_v48 = vld [vmem:[#allocation53_spill] sm:$0xff] }
 0x3b3   :  { %v8905_v20 = vmul.f32 -1.442695, %v12972_v3  ;;  %9823 = vrcp.f32 %v6581_v45  ;;  %v6584_v19 = vadd.f32 1.0, %v9808_v11  ;;  %v5251_v60 = vadd.f32 %v16238_v38, %v5116_v53 }
 0x3b4   :  { %16236 = vst [vmem:[#allocation87_spill] sm:$0xff] %v12978_v4  ;;  %v3097_v13 = vsel %vm3019_vm4, %v3095_v14, %v3096_v24  ;;  %9825 = vrcp.f32 %v6582_v61  ;;  %v6585_v32 = vadd.f32 1.0, %v9810_v39  ;;  %v16240_v29 = vrot.slane %v16239_v36, 1  ;;  %v16242_v61 = vld [vmem:[#allocation85_spill] sm:$0xff] }
 0x3b5   :  { %v2683_v5 = vmul.f32 %v11647_v49, %v12822_v2  ;;  %9827 = vrcp.f32 %v6583_v34  ;;  %v8961_v42 = vmul.f32 -1.442695, %v12978_v4  ;;  %v3631_v11 = vrot.slane %v3372_v40, 2 }
 0x3b6   :  { %v12991_v21 = vsel %vm3019_vm4, %v16240_v29, %v5591_v58  ;;  %v9812_v9 = vpop.eup %9811  ;;  %v3632_v45 = vrot.slane %v3374_v18, 2  ;;  %9829 = vpow2.f32 %v8905_v20  ;;  %v12998_v39 = vadd.f32 %v1787_v55, %v16213_v26  ;;  %v16249_v55 = vld [vmem:[#allocation60_spill] sm:$0xff]  ;;  %v16252_v29 = vld [vmem:[#allocation89_spill] sm:$0xff] }
 0x3b7   :  { %16241 = vst [vmem:[#allocation51_spill] sm:$0xff] %v12991_v21  ;;  %v3277_v53 = vadd.f32 %v3097_v13, %v2683_v5  ;;  %v2283_v14 = vmul.f32 %v9812_v9, %v12838_v23  ;;  %9831 = vrcp.f32 %v6584_v19  ;;  %v5792_v24 = vadd.f32 %v12991_v21, %v5251_v60  ;;  %v16247_v23 = vld [vmem:[#allocation88_spill] sm:$0xff]  ;;  %v16248_v13 = vld [vmem:[#allocation50_spill] sm:$0xff] }
 0x3b8   :  { %v8964_v28 = vmul.f32 -1.442695, %v16242_v61  ;;  %9833 = vrcp.f32 %v6585_v32  ;;  %v13003_v2 = vsel %vm3555_vm5, %v6131_v44, %v6132_v16  ;;  %v13007_v34 = vmul.f32 %v16245_v62, %v16244_v48  ;;  %v16254_v48 = vld [vmem:[#allocation59_spill] sm:$0xff]  ;;  %v16256_v62 = vld [vmem:[#allocation56_spill] sm:$0xff] }
 0x3b9   :  { %16243 = vst [vmem:[#allocation41_spill] sm:$0xff] %v13003_v2  ;;  %v2413_v58 = vrot.slane %v2283_v14, 7  ;;  %9835 = vpow2.f32 %v8961_v42  ;;  %v8965_v40 = vmul.f32 -1.442695, %v16247_v23  ;;  %v3633_v18 = vsel %vm3555_vm5, %v3631_v11, %v3632_v45 }
 0x3ba   :  { %16246 = vst [vmem:[#allocation83_spill] sm:$0xff] %v13007_v34  ;;  %v13011_v47 = vpop.eup %9813  ;;  %v3813_v20 = vadd.f32 %v3633_v18, %v3277_v53  ;;  %v8906_v44 = vmul.f32 -1.442695, %v12998_v39  ;;  %v13022_v32 = vmul.f32 %v16249_v55, %v16248_v13  ;;  %v13025_v36 = vadd.f32 %v13003_v2, %v5792_v24  ;;  %v16257_v18 = vld [vmem:[#allocation75_spill] sm:$0xff] }
 0x3bb   :  { %v13014_v19 = vsel %vm2515_vm3, 0.0, %v2413_v58  ;;  %v13017_v60 = vsel %vm2515_vm3, %v2413_v58, 0.0  ;;  %v9816_v16 = vpop.eup %9815  ;;  %9837 = vpow2.f32 %v8964_v28  ;;  %v8966_v5 = vmul.f32 -1.442695, %v16252_v29  ;;  %v16253_v58 = vld [vmem:[#allocation64_spill] sm:$0xff] }
 0x3bc   :  { %16250 = vst [vmem:[#allocation52_spill] sm:$0xff] %v13022_v32  ;;  %16251 = vst [vmem:[#allocation77_spill] sm:$0xff] %v13025_v36  ;;  %v9818_v9 = vpop.eup %9817  ;;  %v8967_v42 = vmul.f32 -1.442695, %v12676_v56  ;;  %v3886_v11 = vmul.f32 %v16196_v10, %v13014_v19  ;;  %v4053_v45 = vmul.f32 %v16193_v0, %v13014_v19  ;;  %v4055_v53 = vmul.f32 %v16193_v0, %v13017_v60 }
 0x3bd   :  { %v9820_v14 = vpop.eup %9819  ;;  %v13037_v24 = vmul.f32 %v16254_v48, %v16253_v58  ;;  %v13041_v28 = vadd.f32 %v13007_v34, %v13022_v32  ;;  %v13045_v13 = vmul.f32 %v16257_v18, %v16256_v62  ;;  %9839 = vpow2.f32 %v8965_v40 }
 0x3be   :  { %v3950_v55 = vadd.f32 %v3886_v11, %v3813_v20  ;;  %v4337_v4 = vrot.slane %v4053_v45, 1  ;;  %v2284_v2 = vmul.f32 %v9816_v16, %v12854_v27  ;;  %9841 = vpow2.f32 %v8906_v44 }
 0x3bf   :  { %16255 = vst [vmem:[#allocation84_spill] sm:$0xff] %v13037_v24  ;;  %16258 = vst [vmem:[#allocation78_spill] sm:$0xff] %v13045_v13  ;;  %v13048_v21 = vpop.eup %9821  ;;  %v8963_v56 = vmul.f32 -1.442695, %v13025_v36  ;;  %9843 = vpow2.f32 %v8966_v5  ;;  %v4338_v58 = vrot.slane %v4055_v53, 1  ;;  %v4642_v48 = vmul.f32 %v11672_v37, %v13014_v19 }
 0x3c0   :  { %v13053_v34 = vpop.eup %9823  ;;  %v6586_v32 = vadd.f32 1.0, %v9818_v9  ;;  %v6588_v62 = vadd.f32 1.0, %v9820_v14  ;;  %9845 = vpow2.f32 %v8967_v42  ;;  %v4644_v40 = vmul.f32 %v11672_v37, %v13017_v60  ;;  %v1789_v14 = vpop.f32.mrf.mxu1 }
 0x3c1   :  { %16259 = vst [vmem:[#allocation62_spill] sm:$0xff] %v13053_v34  ;;  %v13057_v20 = vpop.eup %9825  ;;  %v4339_v27 = vsel %vm3019_vm4, %v4337_v4, %v4338_v58  ;;  %v4926_v44 = vrot.slane %v4642_v48, 2  ;;  %v5203_v16 = vmul.f32 %v11730_v57, %v13014_v19  ;;  %v5362_v5 = vmul.f32 %v11735_v59, %v13014_v19 }
 0x3c2   :  { %16260 = vst [vmem:[#allocation53_spill] sm:$0xff] %v13057_v20  ;;  %v13064_v11 = vpop.eup %9827  ;;  %v4539_v45 = vadd.f32 %v4339_v27, %v3950_v55  ;;  %v4927_v9 = vrot.slane %v4644_v40, 2  ;;  %v5364_v42 = vmul.f32 %v11735_v59, %v13017_v60  ;;  %v2414_v53 = vrot.slane %v2284_v2, 7  ;;  %v1793_v61 = vpop.f32.mrf.mxu1 }
 0x3c3   :  { %16261 = vst [vmem:[#allocation73_spill] sm:$0xff] %v13064_v11  ;;  %v9830_v18 = vpop.eup %9829  ;;  %v5261_v36 = vadd.f32 %v5203_v16, %v12875_v17  ;;  %v5620_v4 = vrot.slane %v5362_v5, 1  ;;  %v5903_v58 = vmul.f32 %v11753_v52, %v13014_v19  ;;  %v5905_v48 = vmul.f32 %v11753_v52, %v13017_v60 }
 0x3c4   :  { %v13073_v23 = vpop.eup %9831  ;;  %v2839_v55 = vmul.f32 %v16158_v43, %v12889_v41  ;;  %v2841_v40 = vmul.f32 %v16158_v43, %v12892_v63  ;;  %v4928_v2 = vsel %vm3555_vm5, %v4926_v44, %v4927_v9  ;;  %v5621_v27 = vrot.slane %v5364_v42, 1 }
 0x3c5   :  { %16262 = vst [vmem:[#allocation50_spill] sm:$0xff] %v13073_v23  ;;  %v13080_v17 = vpop.eup %9833  ;;  %v13082_v16 = vadd.f32 %v4928_v2, %v4539_v45  ;;  %v6161_v5 = vrot.slane %v5903_v58, 2  ;;  %v6162_v30 = vrot.slane %v5905_v48, 2  ;;  %v13085_v38 = vadd.f32 %v1789_v14, %v11439_v7  ;;  %v1795_v2 = vpop.f32.mrf.mxu1 }
 0x3c6   :  { %16263 = vst [vmem:[#allocation60_spill] sm:$0xff] %v13080_v17  ;;  %v13087_v29 = vpop.eup %9835  ;;  %9847 = vpow2.f32 %v8963_v56  ;;  %v5622_v1 = vsel %vm3019_vm4, %v5620_v4, %v5621_v27  ;;  %v13091_v23 = vsel %vm2515_vm3, 0.0, %v2414_v53  ;;  %v2093_v44 = vadd.f32 1.0, %v9830_v18 }
 0x3c7   :  { %16264 = vst [vmem:[#allocation64_spill] sm:$0xff] %v13087_v29  ;;  %v6837_v9 = vadd.f32 %v13045_v13, %v13037_v24  ;;  %9849 = vrcp.f32 %v6586_v32  ;;  %v5802_v45 = vadd.f32 %v5622_v1, %v5261_v36  ;;  %v13096_v42 = vsel %vm2515_vm3, %v2414_v53, 0.0  ;;  %v16266_v36 = vld [vmem:[#allocation57_spill] sm:$0xff]  ;;  %v16267_v53 = vld [vmem:[#allocation82_spill] sm:$0xff]  ;;  %v1797_v29 = vpop.f32.mrf.mxu1 }
 0x3c8   :  { %v9838_v58 = vpop.eup %9837  ;;  %9851 = vrcp.f32 %v6588_v62  ;;  %v3098_v14 = vrot.slane %v2839_v55, 1  ;;  %v3099_v48 = vrot.slane %v2841_v40, 1  ;;  %v6163_v56 = vsel %vm3555_vm5, %v6161_v5, %v6162_v30 }
 0x3c9   :  { %v13099_v4 = vadd.f32 %v6163_v56, %v5802_v45  ;;  %v5204_v18 = vmul.f32 %v11583_v54, %v13091_v23  ;;  %v5365_v27 = vmul.f32 %v11587_v50, %v13091_v23  ;;  %v8907_v1 = vmul.f32 -1.442695, %v13085_v38 }
 0x3ca   :  { %v9840_v32 = vpop.eup %9839  ;;  %v13108_v13 = vmul.f32 %v16267_v53, %v16266_v36  ;;  %v5367_v62 = vmul.f32 %v11587_v50, %v13096_v42  ;;  %v5906_v30 = vmul.f32 %v11591_v15, %v13091_v23  ;;  %9853 = vrcp.f32 %v2093_v44  ;;  %v16269_v44 = vld [vmem:[#allocation69_spill] sm:$0xff] }
 0x3cb   :  { %16265 = vst [vmem:[#allocation59_spill] sm:$0xff] %v13099_v4  ;;  %v9842_v55 = vpop.eup %9841  ;;  %v6590_v40 = vadd.f32 1.0, %v9838_v58  ;;  %v3375_v5 = vmul.f32 %v11489_v22, %v12889_v41  ;;  %v5262_v45 = vadd.f32 %v5204_v18, %v12947_v35  ;;  %v5623_v56 = vrot.slane %v5365_v27, 1 }
 0x3cc   :  { %16268 = vst [vmem:[#allocation56_spill] sm:$0xff] %v13108_v13  ;;  %v9844_v24 = vpop.eup %9843  ;;  %v3377_v36 = vmul.f32 %v11489_v22, %v12892_v63  ;;  %v5624_v53 = vrot.slane %v5367_v62, 1  ;;  %v5908_v17 = vmul.f32 %v11591_v15, %v13096_v42  ;;  %v6164_v11 = vrot.slane %v5906_v30, 2 }
 0x3cd   :  { %v9846_v20 = vpop.eup %9845  ;;  %v13123_v58 = vmul.f32 %v13011_v47, %v16269_v44  ;;  %v6591_v34 = vadd.f32 1.0, %v9840_v32  ;;  %v3100_v54 = vsel %vm3019_vm4, %v3098_v14, %v3099_v48  ;;  %9855 = vpow2.f32 %v8907_v1  ;;  %v1799_v48 = vpop.f32.mrf.mxu1 }
 0x3ce   :  { %v5625_v35 = vsel %vm3019_vm4, %v5623_v56, %v5624_v53  ;;  %v6165_v18 = vrot.slane %v5908_v17, 2  ;;  %v2094_v27 = vadd.f32 1.0, %v9842_v55  ;;  %v13128_v63 = vadd.f32 %v1793_v61, %v16213_v26 }
 0x3cf   :  { %16270 = vst [vmem:[#allocation75_spill] sm:$0xff] %v13123_v58  ;;  %9857 = vrcp.f32 %v6590_v40  ;;  %v6592_v62 = vadd.f32 1.0, %v9844_v24  ;;  %v2684_v30 = vmul.f32 %v11493_v6, %v12889_v41  ;;  %v5803_v15 = vadd.f32 %v5625_v35, %v5262_v45 }
 0x3d0   :  { %v8968_v47 = vmul.f32 -1.442695, %v12743_v46  ;;  %v3634_v44 = vrot.slane %v3375_v5, 2  ;;  %v3635_v32 = vrot.slane %v3377_v36, 2  ;;  %v6166_v14 = vsel %vm3555_vm5, %v6164_v11, %v6165_v18  ;;  %v1803_v36 = vpop.f32.mrf.mxu1 }
 0x3d1   :  { %9859 = vrcp.f32 %v6591_v34  ;;  %v6593_v1 = vadd.f32 1.0, %v9846_v20  ;;  %v3278_v17 = vadd.f32 %v3100_v54, %v2684_v30  ;;  %v13134_v55 = vadd.f32 %v6166_v14, %v5803_v15  ;;  %v16272_v20 = vld [vmem:[#allocation63_spill] sm:$0xff] }
 0x3d2   :  { %v4056_v61 = vmul.f32 %v11518_v8, %v13091_v23  ;;  %v4058_v24 = vmul.f32 %v11518_v8, %v13096_v42  ;;  %9861 = vrcp.f32 %v2094_v27  ;;  %v8908_v41 = vmul.f32 -1.442695, %v13128_v63 }
 0x3d3   :  { %16271 = vst [vmem:[#allocation57_spill] sm:$0xff] %v13134_v55  ;;  %v13141_v40 = vpop.eup %9847  ;;  %v6831_v11 = vadd.f32 %v13041_v28, %v13108_v13  ;;  %v13146_v34 = vadd.f32 %v6837_v9, %v13123_v58  ;;  %9863 = vrcp.f32 %v6592_v62  ;;  %v8969_v54 = vmul.f32 -1.442695, %v12785_v25  ;;  %v16275_v28 = vld [vmem:[#allocation86_spill] sm:$0xff] }
 0x3d4   :  { %v13149_v15 = vpop.eup %9849  ;;  %v13153_v5 = vmul.f32 %v13048_v21, %v16272_v20  ;;  %9865 = vpow2.f32 %v8968_v47  ;;  %v8970_v45 = vmul.f32 -1.442695, %v12843_v33  ;;  %v3636_v56 = vsel %vm3555_vm5, %v3634_v44, %v3635_v32  ;;  %v16277_v21 = vld [vmem:[#allocation45_spill] sm:$0xff]  ;;  %v16278_v44 = vld [vmem:[#allocation44_spill] sm:$0xff] }
 0x3d5   :  { %v13157_v53 = vpop.eup %9851  ;;  %9867 = vrcp.f32 %v6593_v1  ;;  %v8971_v9 = vmul.f32 -1.442695, %v16275_v28  ;;  %v3814_v35 = vadd.f32 %v3636_v56, %v3278_v17  ;;  %v13161_v18 = vadd.f32 %v1795_v2, %v11439_v7 }
 0x3d6   :  { %16273 = vst [vmem:[#allocation82_spill] sm:$0xff] %v13153_v5  ;;  %16274 = vst [vmem:[#allocation69_spill] sm:$0xff] %v13157_v53  ;;  %v4340_v27 = vrot.slane %v4056_v61, 1  ;;  %v4341_v62 = vrot.slane %v4058_v24, 1  ;;  %v4647_v30 = vmul.f32 %v16277_v21, %v13096_v42  ;;  %9869 = vpow2.f32 %v8908_v41  ;;  %v1805_v24 = vpop.f32.mrf.mxu1 }
 0x3d7   :  { %16276 = vst [vmem:[#allocation63_spill] sm:$0xff] %v13161_v18  ;;  %v9854_v47 = vpop.eup %9853  ;;  %9871 = vpow2.f32 %v8969_v54  ;;  %v3887_v32 = vmul.f32 %v16278_v44, %v13091_v23  ;;  %v13168_v14 = vadd.f32 %v1797_v29, %v16213_v26  ;;  %v13171_v1 = vadd.f32 %v1799_v48, %v11439_v7 }
 0x3d8   :  { %v13174_v2 = vadd.f32 %v6831_v11, %v13153_v5  ;;  %9873 = vpow2.f32 %v8970_v45  ;;  %v2840_v17 = vmul.f32 %v11579_v31, %v13014_v19  ;;  %v2842_v61 = vmul.f32 %v11579_v31, %v13017_v60 }
 0x3d9   :  { %16279 = vst [vmem:[#allocation45_spill] sm:$0xff] %v13168_v14  ;;  %16280 = vst [vmem:[#allocation44_spill] sm:$0xff] %v13171_v1  ;;  %9875 = vpow2.f32 %v8971_v9  ;;  %v3951_v41 = vadd.f32 %v3887_v32, %v3814_v35  ;;  %v8909_v54 = vmul.f32 -1.442695, %v13161_v18  ;;  %v13182_v29 = vadd.f32 %v1803_v36, %v16213_v26 }
 0x3da   :  { %v9856_v48 = vpop.eup %9855  ;;  %v4342_v20 = vsel %vm3019_vm4, %v4340_v27, %v4341_v62  ;;  %v4930_v11 = vrot.slane %v4647_v30, 2  ;;  %v2285_v45 = vmul.f32 %v9854_v47, %v12972_v3  ;;  %v4645_v56 = vmul.f32 %v16277_v21, %v13091_v23  ;;  %v1807_v30 = vpop.f32.mrf.mxu1 }
 0x3db   :  { %16281 = vst [vmem:[#allocation92_spill] sm:$0xff] %v13182_v29  ;;  %v4540_v5 = vadd.f32 %v4342_v20, %v3951_v41  ;;  %v8910_v13 = vmul.f32 -1.442695, %v13168_v14  ;;  %v8911_v9 = vmul.f32 -1.442695, %v13171_v1  ;;  %v13191_v35 = vadd.f32 %v1805_v24, %v11439_v7 }
 0x3dc   :  { %v13193_v32 = vpop.eup %9857  ;;  %v8972_v36 = vmul.f32 -1.442695, %v12961_v12  ;;  %v3101_v58 = vrot.slane %v2840_v17, 1  ;;  %v3102_v27 = vrot.slane %v2842_v61, 1  ;;  %v4929_v62 = vrot.slane %v4645_v56, 2 }
 0x3dd   :  { %16282 = vst [vmem:[#allocation93_spill] sm:$0xff] %v13191_v35  ;;  %16283 = vst [vmem:[#allocation94_spill] sm:$0xff] %v13193_v32  ;;  %v3376_v3 = vmul.f32 %v11627_v51, %v13014_v19  ;;  %v2843_v47 = vmul.f32 %v16158_v43, %v13091_v23  ;;  %v2845_v41 = vmul.f32 %v16158_v43, %v13096_v42  ;;  %v2095_v20 = vadd.f32 1.0, %v9856_v48 }
 0x3de   :  { %v13202_v24 = vpop.eup %9859  ;;  %v3378_v28 = vmul.f32 %v11627_v51, %v13017_v60  ;;  %v2415_v12 = vrot.slane %v2285_v45, 7  ;;  %v4931_v17 = vsel %vm3555_vm5, %v4929_v62, %v4930_v11  ;;  %9877 = vpow2.f32 %v8909_v54  ;;  %v1809_v54 = vpop.f32.mrf.mxu1 }
 0x3df   :  { %16284 = vst [vmem:[#allocation95_spill] sm:$0xff] %v13202_v24  ;;  %v9862_v61 = vpop.eup %9861  ;;  %v13207_v56 = vadd.f32 %v4931_v17, %v4540_v5  ;;  %9879 = vpow2.f32 %v8910_v13  ;;  %v8912_v33 = vmul.f32 -1.442695, %v13182_v29  ;;  %v8913_v25 = vmul.f32 -1.442695, %v13191_v35 }
 0x3e0   :  { %v13211_v46 = vpop.eup %9863  ;;  %9881 = vpow2.f32 %v8972_v36  ;;  %v2685_v48 = vmul.f32 %v11647_v49, %v13014_v19  ;;  %v3103_v60 = vsel %vm3019_vm4, %v3101_v58, %v3102_v27  ;;  %v13217_v45 = vadd.f32 %v1807_v30, %v16213_v26 }
 0x3e1   :  { %16285 = vst [vmem:[#allocation96_spill] sm:$0xff] %v13211_v46  ;;  %v13219_v11 = vpop.eup %9865  ;;  %v3637_v5 = vrot.slane %v3376_v3, 2  ;;  %v3104_v13 = vrot.slane %v2843_v47, 1  ;;  %v3105_v62 = vrot.slane %v2845_v41, 1  ;;  %9883 = vrcp.f32 %v2095_v20 }
 0x3e2   :  { %16286 = vst [vmem:[#allocation97_spill] sm:$0xff] %v13217_v45  ;;  %v13221_v17 = vpop.eup %9867  ;;  %v3638_v35 = vrot.slane %v3378_v28, 2  ;;  %v13224_v36 = vsel %vm2515_vm3, 0.0, %v2415_v12  ;;  %v2611_v19 = vsel %vm2515_vm3, %v2415_v12, 0.0  ;;  %v2286_v58 = vmul.f32 %v9862_v61, %v12998_v39 }
 0x3e3   :  { %16287 = vst [vmem:[#allocation98_spill] sm:$0xff] %v13221_v17  ;;  %v9870_v27 = vpop.eup %9869  ;;  %v3279_v30 = vadd.f32 %v3103_v60, %v2685_v48  ;;  %v3381_v29 = vmul.f32 %v11489_v22, %v13096_v42  ;;  %9885 = vpow2.f32 %v8911_v9  ;;  %v13231_v3 = vadd.f32 %v1809_v54, %v11439_v7 }
 0x3e4   :  { %v13233_v47 = vpop.eup %9871  ;;  %v8973_v28 = vmul.f32 -1.442695, %v13099_v4  ;;  %v3379_v41 = vmul.f32 %v11489_v22, %v13091_v23  ;;  %9887 = vpow2.f32 %v8912_v33  ;;  %v13239_v12 = vmul.f32 -1.442695, %v13217_v45 }
 0x3e5   :  { %v13241_v39 = vpop.eup %9873  ;;  %v3106_v20 = vsel %vm3019_vm4, %v3104_v13, %v3105_v62  ;;  %v4057_v42 = vmul.f32 %v16193_v0, %v13224_v36  ;;  %v4059_v9 = vmul.f32 %v16193_v0, %v2611_v19  ;;  %9889 = vpow2.f32 %v8913_v25 }
 0x3e6   :  { %v13247_v61 = vpop.eup %9875  ;;  %v3639_v48 = vsel %vm3555_vm5, %v3637_v5, %v3638_v35  ;;  %v2416_v60 = vrot.slane %v2286_v58, 7  ;;  %v2686_v33 = vmul.f32 %v11493_v6, %v13091_v23  ;;  %v13252_v54 = vadd.f32 1.0, %v9870_v27 }
 0x3e7   :  { %v3815_v4 = vadd.f32 %v3639_v48, %v3279_v30  ;;  %v3641_v45 = vrot.slane %v3381_v29, 2  ;;  %v5366_v13 = vmul.f32 %v11735_v59, %v13224_v36  ;;  %v5368_v62 = vmul.f32 %v11735_v59, %v2611_v19 }
 0x3e8   :  { %9891 = vpow2.f32 %v8973_v28  ;;  %v4648_v25 = vmul.f32 %v11672_v37, %v2611_v19  ;;  %v3280_v1 = vadd.f32 %v3106_v20, %v2686_v33  ;;  %v3640_v22 = vrot.slane %v3379_v41, 2 }
 0x3e9   :  { %v4343_v14 = vrot.slane %v4057_v42, 1  ;;  %v4344_v35 = vrot.slane %v4059_v9, 1  ;;  %v5205_v5 = vmul.f32 %v11730_v57, %v13224_v36  ;;  %v3888_v23 = vmul.f32 %v16196_v10, %v13224_v36 }
 0x3ea   :  { %v5907_v29 = vmul.f32 %v11753_v52, %v13224_v36  ;;  %v5909_v58 = vmul.f32 %v11753_v52, %v2611_v19  ;;  %v13266_v27 = vsel %vm2515_vm3, 0.0, %v2416_v60  ;;  %v4646_v30 = vmul.f32 %v11672_v37, %v13224_v36 }
 0x3eb   :  { %v13270_v28 = vpop.eup %9877  ;;  %v5626_v41 = vrot.slane %v5366_v13, 1  ;;  %v5627_v20 = vrot.slane %v5368_v62, 1  ;;  %v13273_v42 = vsel %vm2515_vm3, %v2416_v60, 0.0  ;;  %v3952_v9 = vadd.f32 %v3888_v23, %v3815_v4 }
 0x3ec   :  { %v13275_v48 = vpop.eup %9879  ;;  %v2844_v33 = vmul.f32 %v11579_v31, %v13224_v36  ;;  %v2846_v6 = vmul.f32 %v11579_v31, %v2611_v19  ;;  %v13281_v43 = vmul.f32 %v11627_v51, %v2611_v19  ;;  %v5263_v7 = vadd.f32 %v5205_v5, %v13082_v16 }
 0x3ed   :  { %v13284_v26 = vpop.eup %9881  ;;  %v8974_v13 = vmul.f32 -1.442695, %v13134_v55  ;;  %v4345_v60 = vsel %vm3019_vm4, %v4343_v14, %v4344_v35  ;;  %v4933_v62 = vrot.slane %v4648_v25, 2  ;;  %v4060_v4 = vmul.f32 %v11518_v8, %v13266_v27 }
 0x3ee   :  { %v9884_v23 = vpop.eup %9883  ;;  %v6167_v17 = vrot.slane %v5907_v29, 2  ;;  %v3642_v18 = vsel %vm3555_vm5, %v3640_v22, %v3641_v45  ;;  %v4062_v19 = vmul.f32 %v11518_v8, %v13273_v42  ;;  %v4932_v31 = vrot.slane %v4646_v30, 2 }
 0x3ef   :  { %v5628_v16 = vsel %vm3019_vm4, %v5626_v41, %v5627_v20  ;;  %v6168_v5 = vrot.slane %v5909_v58, 2  ;;  %v2287_v24 = vmul.f32 %v9884_v23, %v13085_v38  ;;  %v4541_v55 = vadd.f32 %v4345_v60, %v3952_v9 }
 0x3f0   :  { %v13295_v32 = vpop.eup %9885  ;;  %v3107_v14 = vrot.slane %v2844_v33, 1  ;;  %v3108_v25 = vrot.slane %v2846_v6, 1  ;;  %v5804_v35 = vadd.f32 %v5628_v16, %v5263_v7  ;;  %v3816_v53 = vadd.f32 %v3642_v18, %v3280_v1 }
 0x3f1   :  { %v13297_v46 = vpop.eup %9887  ;;  %v3644_v22 = vrot.slane %v13281_v43, 2  ;;  %v3889_v45 = vmul.f32 %v16278_v44, %v13266_v27  ;;  %v4346_v29 = vrot.slane %v4060_v4, 1  ;;  %v2417_v30 = vrot.slane %v2287_v24, 7 }
 0x3f2   :  { %v13302_v41 = vpop.eup %9889  ;;  %v4347_v58 = vrot.slane %v4062_v19, 1  ;;  %v4649_v38 = vmul.f32 %v16277_v21, %v13266_v27  ;;  %v4651_v6 = vmul.f32 %v16277_v21, %v13273_v42  ;;  %v4934_v7 = vsel %vm3555_vm5, %v4932_v31, %v4933_v62 }
 0x3f3   :  { %9893 = vpow2.f32 %v8974_v13  ;;  %v6169_v18 = vsel %vm3555_vm5, %v6167_v17, %v6168_v5  ;;  %v2548_v43 = vsel %vm2515_vm3, 0.0, %v2417_v30  ;;  %v5130_v1 = vadd.f32 %v4934_v7, %v4541_v55 }
 0x3f4   :  { %v3109_v20 = vsel %vm3019_vm4, %v3107_v14, %v3108_v25  ;;  %v13312_v24 = vadd.f32 %v6169_v18, %v5804_v35  ;;  %v3953_v9 = vadd.f32 %v3889_v45, %v3816_v53  ;;  %v2613_v33 = vsel %vm2515_vm3, %v2417_v30, 0.0  ;;  %v16289_v53 = vld [vmem:[#allocation48_spill] sm:$0xff] }
 0x3f5   :  { %v13315_v60 = vpop.eup %9891  ;;  %v5369_v4 = vmul.f32 %v11587_v50, %v13266_v27  ;;  %v3380_v31 = vmul.f32 %v11627_v51, %v13224_v36  ;;  %v5207_v17 = vmul.f32 %v11730_v57, %v2548_v43  ;;  %v5370_v13 = vmul.f32 %v11735_v59, %v2548_v43 }
 0x3f6   :  { %16288 = vst [vmem:[#allocation99_spill] sm:$0xff] %v13312_v24  ;;  %v4348_v55 = vsel %vm3019_vm4, %v4346_v29, %v4347_v58  ;;  %v4935_v62 = vrot.slane %v4649_v38, 2  ;;  %v4936_v23 = vrot.slane %v4651_v6, 2  ;;  %v5206_v19 = vmul.f32 %v16289_v53, %v13266_v27  ;;  %v16290_v38 = vld [vmem:[#allocation49_spill] sm:$0xff] }
 0x3f7   :  { %v5371_v16 = vmul.f32 %v11587_v50, %v13273_v42  ;;  %v5265_v5 = vadd.f32 %v5207_v17, %v5130_v1  ;;  %v5372_v14 = vmul.f32 %v11735_v59, %v2613_v33  ;;  %v5632_v25 = vrot.slane %v5370_v13, 1 }
 0x3f8   :  { %v4542_v35 = vadd.f32 %v4348_v55, %v3953_v9  ;;  %v2687_v45 = vmul.f32 %v11647_v49, %v13224_v36  ;;  %v5911_v30 = vmul.f32 %v11753_v52, %v2548_v43  ;;  %v5913_v29 = vmul.f32 %v11753_v52, %v2613_v33 }
 0x3f9   :  { %v5629_v58 = vrot.slane %v5369_v4, 1  ;;  %v5910_v6 = vmul.f32 %v16290_v38, %v13266_v27  ;;  %v3643_v7 = vrot.slane %v3380_v31, 2  ;;  %v5633_v18 = vrot.slane %v5372_v14, 1  ;;  %v16292_v14 = vld [vmem:[#allocation70_spill] sm:$0xff] }
 0x3fa   :  { %v3281_v57 = vadd.f32 %v3109_v20, %v2687_v45  ;;  %v6173_v53 = vrot.slane %v5911_v30, 2  ;;  %v6174_v1 = vrot.slane %v5913_v29, 2  ;;  %9895 = vrcp.f32 %v13252_v54  ;;  %v16293_v30 = vld [vmem:[#allocation65_spill] sm:$0xff]  ;;  %v16294_v29 = vld [vmem:[#allocation62_spill] sm:$0xff] }
 0x3fb   :  { %v4937_v9 = vsel %vm3555_vm5, %v4935_v62, %v4936_v23  ;;  %v5630_v17 = vrot.slane %v5371_v16, 1  ;;  %v5912_v36 = vmul.f32 %v16290_v38, %v13273_v42  ;;  %v5634_v13 = vsel %vm3019_vm4, %v5632_v25, %v5633_v18 }
 0x3fc   :  { %v5131_v55 = vadd.f32 %v4937_v9, %v4542_v35  ;;  %v5264_v4 = vadd.f32 %v5206_v19, %v13207_v56  ;;  %v5806_v52 = vadd.f32 %v5634_v13, %v5265_v5  ;;  %v2097_v27 = vadd.f32 1.0, %v13270_v28  ;;  %v16301_v13 = vld [vmem:[#allocation73_spill] sm:$0xff] }
 0x3fd   :  { %v3645_v20 = vsel %vm3555_vm5, %v3643_v7, %v3644_v22  ;;  %v4061_v31 = vmul.f32 %v16193_v0, %v2548_v43  ;;  %v4063_v54 = vmul.f32 %v16193_v0, %v2613_v33  ;;  %v6175_v62 = vsel %vm3555_vm5, %v6173_v53, %v6174_v1  ;;  %v16299_v1 = vld [vmem:[#allocation64_spill] sm:$0xff] }
 0x3fe   :  { %v3817_v23 = vadd.f32 %v3645_v20, %v3281_v57  ;;  %v13346_v16 = vadd.f32 %v6175_v62, %v5806_v52  ;;  %9897 = vpow2.f32 %v13239_v12  ;;  %v8915_v42 = vmul.f32 -1.442695, %v13231_v3 }
 0x3ff   :  { %v8975_v56 = vmul.f32 -1.442695, %v13312_v24  ;;  %v5631_v19 = vsel %vm3019_vm4, %v5629_v58, %v5630_v17  ;;  %v6170_v28 = vrot.slane %v5910_v6, 2  ;;  %v6171_v5 = vrot.slane %v5912_v36, 2  ;;  %v16296_v58 = vld [vmem:[#allocation61_spill] sm:$0xff]  ;;  %v16300_v36 = vld [vmem:[#allocation74_spill] sm:$0xff] }
 0x400   :  { %16291 = vst [vmem:[#allocation49_spill] sm:$0xff] %v13346_v16  ;;  %v9894_v22 = vpop.eup %9893  ;;  %v5266_v25 = vadd.f32 %v16292_v14, %v5131_v55  ;;  %v5805_v35 = vadd.f32 %v5631_v19, %v5264_v4  ;;  %v3890_v45 = vmul.f32 %v16196_v10, %v2548_v43  ;;  %9899 = vrcp.f32 %v2097_v27  ;;  %v16297_v6 = vld [vmem:[#allocation53_spill] sm:$0xff]  ;;  %v16303_v27 = vld [vmem:[#allocation72_spill] sm:$0xff] }
 0x401   :  { %v4349_v57 = vrot.slane %v4061_v31, 1  ;;  %v4350_v52 = vrot.slane %v4063_v54, 1  ;;  %v4650_v53 = vmul.f32 %v11672_v37, %v2548_v43  ;;  %v4652_v12 = vmul.f32 %v11672_v37, %v2613_v33 }
 0x402   :  { %v13358_v7 = vmul.f32 %v16294_v29, %v16293_v30  ;;  %v13362_v18 = vmul.f32 %v16297_v6, %v16296_v58  ;;  %v6587_v9 = vadd.f32 1.0, %v16299_v1  ;;  %v3954_v17 = vadd.f32 %v3890_v45, %v3817_v23 }
 0x403   :  { %v13367_v55 = vmul.f32 %v16301_v13, %v16300_v36  ;;  %v6589_v4 = vadd.f32 1.0, %v13141_v40  ;;  %9901 = vpow2.f32 %v8975_v56  ;;  %v6172_v43 = vsel %vm3555_vm5, %v6170_v28, %v6171_v5  ;;  %v16306_v5 = vld [vmem:[#allocation50_spill] sm:$0xff] }
 0x404   :  { %16295 = vst [vmem:[#allocation65_spill] sm:$0xff] %v13358_v7  ;;  %16298 = vst [vmem:[#allocation62_spill] sm:$0xff] %v13362_v18  ;;  %v6594_v33 = vadd.f32 1.0, %v13219_v11  ;;  %v5807_v20 = vadd.f32 %v16303_v27, %v5266_v25  ;;  %v13373_v31 = vadd.f32 %v6172_v43, %v5805_v35  ;;  %9903 = vpow2.f32 %v8915_v42  ;;  %v16305_v11 = vld [vmem:[#allocation66_spill] sm:$0xff]  ;;  %v16315_v43 = vld [vmem:[#allocation40_spill] sm:$0xff] }
 0x405   :  { %16302 = vst [vmem:[#allocation61_spill] sm:$0xff] %v13367_v55  ;;  %v4351_v54 = vsel %vm3019_vm4, %v4349_v57, %v4350_v52  ;;  %v4938_v62 = vrot.slane %v4650_v53, 2  ;;  %v4939_v23 = vrot.slane %v4652_v12, 2  ;;  %v2098_v19 = vadd.f32 1.0, %v13275_v48  ;;  %v16308_v57 = vld [vmem:[#allocation67_spill] sm:$0xff]  ;;  %v16309_v48 = vld [vmem:[#allocation60_spill] sm:$0xff]  ;;  %v1813_v12 = vpop.f32.mrf.mxu1 }
 0x406   :  { %16304 = vst [vmem:[#allocation53_spill] sm:$0xff] %v13373_v31  ;;  %v6839_v45 = vadd.f32 %v13146_v34, %v13358_v7  ;;  %9905 = vrcp.f32 %v6587_v9  ;;  %v6595_v40 = vadd.f32 1.0, %v13233_v47  ;;  %v4543_v56 = vadd.f32 %v4351_v54, %v3954_v17  ;;  %v16311_v34 = vld [vmem:[#allocation76_spill] sm:$0xff]  ;;  %v16320_v54 = vld [vmem:[#allocation71_spill] sm:$0xff] }
 0x407   :  { %v9896_v28 = vpop.eup %9895  ;;  %v13382_v25 = vmul.f32 %v16306_v5, %v16305_v11  ;;  %v6833_v42 = vadd.f32 %v13174_v2, %v13362_v18  ;;  %9907 = vrcp.f32 %v6589_v4  ;;  %v6596_v35 = vadd.f32 1.0, %v13241_v39  ;;  %v1815_v13 = vpop.f32.mrf.mxu1  ;;  %v16325_v11 = vld [vmem:[#allocation94_spill] sm:$0xff]  ;;  %v16351_v18 = vld [vmem:[#allocation45_spill] sm:$0xff]  ;;  %v16364_v27 = vld [vmem:[#allocation44_spill] sm:$0xff] }
 0x408   :  { %v13389_v52 = vmul.f32 %v16309_v48, %v16308_v57  ;;  %9909 = vrcp.f32 %v6594_v33  ;;  %v13392_v53 = vadd.f32 %v16311_v34, %v5807_v20  ;;  %v8976_v47 = vmul.f32 -1.442695, %v13373_v31  ;;  %v16318_v33 = vld [vmem:[#allocation96_spill] sm:$0xff]  ;;  %v16330_v48 = vld [vmem:[#allocation63_spill] sm:$0xff] }
 0x409   :  { %16307 = vst [vmem:[#allocation64_spill] sm:$0xff] %v13382_v25  ;;  %v6840_v30 = vadd.f32 %v6839_v45, %v13367_v55  ;;  %v6597_v29 = vadd.f32 1.0, %v13247_v61  ;;  %v4940_v2 = vsel %vm3555_vm5, %v4938_v62, %v4939_v23  ;;  %9911 = vrcp.f32 %v2098_v19  ;;  %v16321_v45 = vld [vmem:[#allocation68_spill] sm:$0xff] }
 0x40a   :  { %16310 = vst [vmem:[#allocation74_spill] sm:$0xff] %v13389_v52  ;;  %16312 = vst [vmem:[#allocation73_spill] sm:$0xff] %v13392_v53  ;;  %9913 = vrcp.f32 %v6595_v40  ;;  %v6598_v39 = vadd.f32 1.0, %v13284_v26  ;;  %v5132_v58 = vadd.f32 %v4940_v2, %v4543_v56  ;;  %v2288_v6 = vmul.f32 %v9896_v28, %v13128_v63  ;;  %v16317_v63 = vld [vmem:[#allocation89_spill] sm:$0xff]  ;;  %v16331_v2 = vld [vmem:[#allocation90_spill] sm:$0xff] }
 0x40b   :  { %v9898_v1 = vpop.eup %9897  ;;  %9915 = vrcp.f32 %v6596_v35  ;;  %v6599_v9 = vadd.f32 1.0, %v13315_v60  ;;  %v13402_v17 = vadd.f32 %v6833_v42, %v13382_v25  ;;  %v13405_v36 = vadd.f32 %v6840_v30, %v13389_v52  ;;  %v16322_v40 = vld [vmem:[#allocation69_spill] sm:$0xff]  ;;  %v16327_v35 = vld [vmem:[#allocation88_spill] sm:$0xff]  ;;  %v1817_v30 = vpop.f32.mrf.mxu1 }
 0x40c   :  { %9917 = vpow2.f32 %v8976_v47  ;;  %v8978_v61 = vmul.f32 -1.442695, %v13392_v53  ;;  %v13410_v26 = vmul.f32 %v13149_v15, %v16315_v43  ;;  %v13414_v20 = vmul.f32 %v16318_v33, %v16317_v63  ;;  %v16324_v28 = vld [vmem:[#allocation85_spill] sm:$0xff] }
 0x40d   :  { %16313 = vst [vmem:[#allocation66_spill] sm:$0xff] %v13402_v17  ;;  %16314 = vst [vmem:[#allocation50_spill] sm:$0xff] %v13405_v36  ;;  %v9900_v4 = vpop.eup %9899  ;;  %9919 = vrcp.f32 %v6597_v29  ;;  %v6600_v60 = vadd.f32 1.0, %v9894_v22  ;;  %v5267_v62 = vadd.f32 %v16320_v54, %v5132_v58  ;;  %v2418_v23 = vrot.slane %v2288_v6, 7  ;;  %v16328_v22 = vld [vmem:[#allocation95_spill] sm:$0xff] }
 0x40e   :  { %16316 = vst [vmem:[#allocation67_spill] sm:$0xff] %v13410_v26  ;;  %16319 = vst [vmem:[#allocation60_spill] sm:$0xff] %v13414_v20  ;;  %9921 = vrcp.f32 %v6598_v39  ;;  %v2099_v19 = vadd.f32 1.0, %v13295_v32  ;;  %v13420_v56 = vmul.f32 %v16322_v40, %v16321_v45  ;;  %v13424_v15 = vmul.f32 %v16325_v11, %v16324_v28  ;;  %v16332_v39 = vld [vmem:[#allocation98_spill] sm:$0xff] }
 0x40f   :  { %9923 = vrcp.f32 %v6599_v9  ;;  %v2100_v5 = vadd.f32 1.0, %v13297_v46  ;;  %v13429_v57 = vmul.f32 %v16328_v22, %v16327_v35  ;;  %v2289_v47 = vmul.f32 %v9900_v4, %v16330_v48  ;;  %v16334_v9 = vld [vmem:[#allocation37_spill] sm:$0xff] }
 0x410   :  { %16323 = vst [vmem:[#allocation40_spill] sm:$0xff] %v13420_v56  ;;  %16326 = vst [vmem:[#allocation89_spill] sm:$0xff] %v13424_v15  ;;  %v9902_v42 = vpop.eup %9901  ;;  %9925 = vpow2.f32 %v8978_v61  ;;  %v2101_v32 = vadd.f32 1.0, %v13302_v41  ;;  %v13435_v58 = vmul.f32 %v16332_v39, %v16331_v2  ;;  %v2102_v6 = vadd.f32 1.0, %v9898_v1  ;;  %v16337_v61 = vld [vmem:[#allocation51_spill] sm:$0xff]  ;;  %v16346_v22 = vld [vmem:[#allocation41_spill] sm:$0xff] }
 0x411   :  { %16329 = vst [vmem:[#allocation96_spill] sm:$0xff] %v13429_v57  ;;  %v9904_v29 = vpop.eup %9903  ;;  %9927 = vrcp.f32 %v6600_v60  ;;  %v13438_v46 = vadd.f32 %v1813_v12, %v16334_v9  ;;  %v13442_v43 = vadd.f32 %v13414_v20, %v13424_v15  ;;  %v5808_v63 = vadd.f32 %v16337_v61, %v5267_v62  ;;  %v16339_v60 = vld [vmem:[#allocation38_spill] sm:$0xff]  ;;  %v1819_v62 = vpop.f32.mrf.mxu1 }
 0x412   :  { %16333 = vst [vmem:[#allocation68_spill] sm:$0xff] %v13435_v58  ;;  %v2549_v4 = vsel %vm2515_vm3, 0.0, %v2418_v23  ;;  %9929 = vrcp.f32 %v2099_v19  ;;  %v6601_v33 = vadd.f32 1.0, %v9902_v42  ;;  %v2614_v45 = vsel %vm2515_vm3, %v2418_v23, 0.0  ;;  %v16345_v23 = vld [vmem:[#allocation39_spill] sm:$0xff] }
 0x413   :  { %16335 = vst [vmem:[#allocation69_spill] sm:$0xff] %v13438_v46  ;;  %16336 = vst [vmem:[#allocation85_spill] sm:$0xff] %v13442_v43  ;;  %v13446_v41 = vpop.eup %9905  ;;  %9931 = vrcp.f32 %v2100_v5  ;;  %v13450_v1 = vadd.f32 %v1815_v13, %v16339_v60  ;;  %v2419_v40 = vrot.slane %v2289_v47, 7  ;;  %v2103_v28 = vadd.f32 1.0, %v9904_v29 }
 0x414   :  { %16338 = vst [vmem:[#allocation94_spill] sm:$0xff] %v13446_v41  ;;  %v13452_v12 = vpop.eup %9907  ;;  %9933 = vrcp.f32 %v2101_v32  ;;  %v13455_v11 = vadd.f32 %v1817_v30, %v16334_v9  ;;  %v13461_v19 = vadd.f32 %v13435_v58, %v13429_v57  ;;  %v2847_v5 = vmul.f32 %v16345_v23, %v2549_v4 }
 0x415   :  { %16340 = vst [vmem:[#allocation88_spill] sm:$0xff] %v13450_v1  ;;  %16341 = vst [vmem:[#allocation95_spill] sm:$0xff] %v13452_v12  ;;  %v13457_v35 = vpop.eup %9909  ;;  %9935 = vrcp.f32 %v2102_v6  ;;  %v8916_v13 = vmul.f32 -1.442695, %v13438_v46  ;;  %v13466_v48 = vadd.f32 %v16346_v22, %v5808_v63  ;;  %v2849_v47 = vmul.f32 %v16345_v23, %v2614_v45 }
 0x416   :  { %16342 = vst [vmem:[#allocation63_spill] sm:$0xff] %v13455_v11  ;;  %16343 = vst [vmem:[#allocation90_spill] sm:$0xff] %v13457_v35  ;;  %v9912_v42 = vpop.eup %9911  ;;  %v4064_v32 = vmul.f32 %v11518_v8, %v2549_v4  ;;  %v4066_v30 = vmul.f32 %v11518_v8, %v2614_v45  ;;  %9937 = vrcp.f32 %v6601_v33  ;;  %v8977_v2 = vmul.f32 -1.442695, %v13346_v16  ;;  %v16363_v35 = vld [vmem:[#allocation48_spill] sm:$0xff] }
 0x417   :  { %16344 = vst [vmem:[#allocation98_spill] sm:$0xff] %v13461_v19  ;;  %16347 = vst [vmem:[#allocation39_spill] sm:$0xff] %v13466_v48  ;;  %v13471_v29 = vpop.eup %9913  ;;  %v8917_v39 = vmul.f32 -1.442695, %v13450_v1  ;;  %v13476_v6 = vadd.f32 %v1819_v62, %v16339_v60  ;;  %v2550_v63 = vsel %vm2515_vm3, 0.0, %v2419_v40  ;;  %v13482_v15 = vsel %vm2515_vm3, %v2419_v40, 0.0 }
 0x418   :  { %16348 = vst [vmem:[#allocation100_spill] sm:$0xff] %v13471_v29  ;;  %v13478_v20 = vpop.eup %9915  ;;  %9939 = vrcp.f32 %v2103_v28  ;;  %v13485_v58 = vmul.f32 -1.442695, %v13455_v11  ;;  %v3110_v33 = vrot.slane %v2847_v5, 1  ;;  %v3891_v25 = vmul.f32 %v16278_v44, %v2549_v4  ;;  %v16354_v28 = vld [vmem:[#allocation47_spill] sm:$0xff] }
 0x419   :  { %16349 = vst [vmem:[#allocation101_spill] sm:$0xff] %v13476_v6  ;;  %16350 = vst [vmem:[#allocation102_spill] sm:$0xff] %v13478_v20  ;;  %v9918_v57 = vpop.eup %9917  ;;  %v2290_v52 = vmul.f32 %v9912_v42, %v16351_v18  ;;  %9941 = vpow2.f32 %v8916_v13  ;;  %v8979_v55 = vmul.f32 -1.442695, %v13466_v48  ;;  %v3111_v7 = vrot.slane %v2849_v47, 1  ;;  %v16357_v42 = vld [vmem:[#allocation43_spill] sm:$0xff] }
 0x41a   :  { %v13489_v62 = vpop.eup %9919  ;;  %v4352_v56 = vrot.slane %v4064_v32, 1  ;;  %v4353_v36 = vrot.slane %v4066_v30, 1  ;;  %9943 = vpow2.f32 %v8977_v2  ;;  %v2848_v12 = vmul.f32 %v16354_v28, %v2550_v63  ;;  %v16358_v48 = vld [vmem:[#allocation42_spill] sm:$0xff] }
 0x41b   :  { %16352 = vst [vmem:[#allocation45_spill] sm:$0xff] %v13489_v62  ;;  %v13492_v40 = vpop.eup %9921  ;;  %v2850_v5 = vmul.f32 %v16354_v28, %v13482_v15  ;;  %v13498_v16 = vmul.f32 -1.442695, %v13476_v6  ;;  %v6602_v13 = vadd.f32 1.0, %v9918_v57  ;;  %v2688_v53 = vmul.f32 %v16357_v42, %v2549_v4  ;;  %v16359_v2 = vld [vmem:[#allocation46_spill] sm:$0xff] }
 0x41c   :  { %16353 = vst [vmem:[#allocation103_spill] sm:$0xff] %v13492_v40  ;;  %v13500_v18 = vpop.eup %9923  ;;  %v3383_v47 = vmul.f32 %v16358_v48, %v2549_v4  ;;  %9945 = vpow2.f32 %v8917_v39  ;;  %v3385_v30 = vmul.f32 %v16358_v48, %v2614_v45  ;;  %v3955_v31 = vadd.f32 %v3891_v25, %v16359_v2 }
 0x41d   :  { %16355 = vst [vmem:[#allocation104_spill] sm:$0xff] %v13498_v16  ;;  %16356 = vst [vmem:[#allocation105_spill] sm:$0xff] %v13500_v18  ;;  %v9926_v32 = vpop.eup %9925  ;;  %v4653_v24 = vmul.f32 %v16277_v21, %v2549_v4  ;;  %v4655_v41 = vmul.f32 %v16277_v21, %v2614_v45  ;;  %9947 = vpow2.f32 %v8979_v55  ;;  %v3112_v26 = vsel %vm3019_vm4, %v3110_v33, %v3111_v7 }
 0x41e   :  { %v13508_v17 = vpop.eup %9927  ;;  %v4354_v57 = vsel %vm3019_vm4, %v4352_v56, %v4353_v36  ;;  %v2420_v22 = vrot.slane %v2290_v52, 7  ;;  %v3113_v61 = vrot.slane %v2848_v12, 1  ;;  %v3114_v39 = vrot.slane %v2850_v5, 1 }
 0x41f   :  { %16360 = vst [vmem:[#allocation43_spill] sm:$0xff] %v13508_v17  ;;  %v9930_v18 = vpop.eup %9929  ;;  %v3384_v40 = vmul.f32 %v11627_v51, %v2550_v63  ;;  %v3386_v25 = vmul.f32 %v11627_v51, %v13482_v15  ;;  %v6604_v4 = vadd.f32 1.0, %v9926_v32  ;;  %v3646_v62 = vrot.slane %v3383_v47, 2 }
 0x420   :  { %v9932_v2 = vpop.eup %9931  ;;  %v4065_v45 = vmul.f32 %v16193_v0, %v2550_v63  ;;  %v4067_v55 = vmul.f32 %v16193_v0, %v13482_v15  ;;  %v3282_v36 = vadd.f32 %v3112_v26, %v2688_v53  ;;  %v3647_v52 = vrot.slane %v3385_v30, 2 }
 0x421   :  { %v13518_v7 = vpop.eup %9933  ;;  %v4941_v56 = vrot.slane %v4653_v24, 2  ;;  %v4942_v12 = vrot.slane %v4655_v41, 2  ;;  %v4544_v5 = vadd.f32 %v4354_v57, %v3955_v31  ;;  %v3892_v17 = vmul.f32 %v16196_v10, %v2550_v63 }
 0x422   :  { %v13520_v33 = vpop.eup %9935  ;;  %v2551_v19 = vsel %vm2515_vm3, 0.0, %v2420_v22  ;;  %v2616_v47 = vsel %vm2515_vm3, %v2420_v22, 0.0  ;;  %v3115_v32 = vsel %vm3019_vm4, %v3113_v61, %v3114_v39  ;;  %v3649_v43 = vrot.slane %v3384_v40, 2 }
 0x423   :  { %v3650_v54 = vrot.slane %v3386_v25, 2  ;;  %v4654_v20 = vmul.f32 %v11672_v37, %v2550_v63  ;;  %v13527_v29 = vpop.eup %9937  ;;  %9949 = vrcp.f32 %v6602_v13  ;;  %v2689_v24 = vmul.f32 %v11647_v49, %v2550_v63 }
 0x424   :  { %16361 = vst [vmem:[#allocation42_spill] sm:$0xff] %v13527_v29  ;;  %v4355_v53 = vrot.slane %v4065_v45, 1  ;;  %v4356_v26 = vrot.slane %v4067_v55, 1  ;;  %9951 = vrcp.f32 %v6604_v4  ;;  %v4943_v41 = vsel %vm3555_vm5, %v4941_v56, %v4942_v12  ;;  %v16362_v45 = vld [vmem:[#allocation58_spill] sm:$0xff] }
 0x425   :  { %v13530_v31 = vpop.eup %9939  ;;  %v5373_v22 = vmul.f32 %v11587_v50, %v2551_v19  ;;  %v5375_v61 = vmul.f32 %v11587_v50, %v2616_v47  ;;  %v3648_v30 = vsel %vm3555_vm5, %v3646_v62, %v3647_v52  ;;  %v5133_v57 = vadd.f32 %v4943_v41, %v4544_v5 }
 0x426   :  { %v13535_v40 = vpop.eup %9941  ;;  %v3283_v39 = vadd.f32 %v3115_v32, %v2689_v24  ;;  %v4656_v63 = vmul.f32 %v11672_v37, %v13482_v15  ;;  %v3818_v13 = vadd.f32 %v3648_v30, %v3282_v36  ;;  %v3651_v25 = vsel %vm3555_vm5, %v3649_v43, %v3650_v54 }
 0x427   :  { %v3956_v4 = vadd.f32 %v3892_v17, %v16362_v45  ;;  %v4944_v55 = vrot.slane %v4654_v20, 2  ;;  %v9944_v56 = vpop.eup %9943  ;;  %v4357_v12 = vsel %vm3019_vm4, %v4355_v53, %v4356_v26  ;;  %v2851_v29 = vmul.f32 %v16345_v23, %v2551_v19 }
 0x428   :  { %v5208_v34 = vmul.f32 %v16363_v35, %v2551_v19  ;;  %v2291_v62 = vmul.f32 %v9930_v18, %v16364_v27  ;;  %v5635_v5 = vrot.slane %v5373_v22, 1  ;;  %v5636_v32 = vrot.slane %v5375_v61, 1  ;;  %v16365_v27 = vld [vmem:[#allocation92_spill] sm:$0xff] }
 0x429   :  { %v13546_v52 = vpop.eup %9945  ;;  %v5914_v15 = vmul.f32 %v16290_v38, %v2551_v19  ;;  %v5916_v54 = vmul.f32 %v16290_v38, %v2616_v47  ;;  %v13550_v43 = vadd.f32 %v3651_v25, %v3283_v39  ;;  %v4945_v17 = vrot.slane %v4656_v63, 2 }
 0x42a   :  { %v2853_v20 = vmul.f32 %v16345_v23, %v2616_v47  ;;  %v5268_v36 = vadd.f32 %v5208_v34, %v5133_v57  ;;  %v9948_v24 = vpop.eup %9947  ;;  %v6603_v53 = vadd.f32 1.0, %v9944_v56  ;;  %v4545_v26 = vadd.f32 %v4357_v12, %v3956_v4 }
 0x42b   :  { %v3387_v41 = vmul.f32 %v16358_v48, %v2551_v19  ;;  %v2292_v18 = vmul.f32 %v9932_v2, %v16365_v27  ;;  %v3389_v22 = vmul.f32 %v16358_v48, %v2616_v47  ;;  %v4068_v61 = vmul.f32 %v11518_v8, %v2551_v19 }
 0x42c   :  { %v4070_v30 = vmul.f32 %v11518_v8, %v2616_v47  ;;  %v2421_v45 = vrot.slane %v2291_v62, 7  ;;  %v3116_v39 = vrot.slane %v2851_v29, 1  ;;  %v5637_v63 = vsel %vm3019_vm4, %v5635_v5, %v5636_v32 }
 0x42d   :  { %v6176_v25 = vrot.slane %v5914_v15, 2  ;;  %v6177_v14 = vrot.slane %v5916_v54, 2  ;;  %v3117_v34 = vrot.slane %v2853_v20, 1  ;;  %v4657_v57 = vmul.f32 %v16277_v21, %v2551_v19 }
 0x42e   :  { %v4659_v4 = vmul.f32 %v16277_v21, %v2616_v47  ;;  %v5809_v56 = vadd.f32 %v5637_v63, %v5268_v36  ;;  %v6605_v12 = vadd.f32 1.0, %v9948_v24  ;;  %v4946_v2 = vsel %vm3555_vm5, %v4944_v55, %v4945_v17 }
 0x42f   :  { %v2690_v27 = vmul.f32 %v16357_v42, %v2551_v19  ;;  %v3893_v6 = vmul.f32 %v16278_v44, %v2551_v19  ;;  %v4358_v11 = vrot.slane %v4068_v61, 1  ;;  %v4359_v62 = vrot.slane %v4070_v30, 1 }
 0x430   :  { %v2552_v29 = vsel %vm2515_vm3, 0.0, %v2421_v45  ;;  %v2617_v5 = vsel %vm2515_vm3, %v2421_v45, 0.0  ;;  %v13566_v32 = vpop.eup %9949  ;;  %v3652_v15 = vrot.slane %v3387_v41, 2  ;;  %v3653_v54 = vrot.slane %v3389_v22, 2 }
 0x431   :  { %16366 = vst [vmem:[#allocation48_spill] sm:$0xff] %v13566_v32  ;;  %v3957_v20 = vadd.f32 %v3893_v6, %v3818_v13  ;;  %v6178_v47 = vsel %vm3555_vm5, %v6176_v25, %v6177_v14  ;;  %v13569_v36 = vpop.eup %9951  ;;  %v3118_v55 = vsel %vm3019_vm4, %v3116_v39, %v3117_v34  ;;  %v4947_v17 = vrot.slane %v4657_v57, 2  ;;  %v16369_v34 = vld [vmem:[#allocation54_spill] sm:$0xff] }
 0x432   :  { %16367 = vst [vmem:[#allocation44_spill] sm:$0xff] %v13569_v36  ;;  %v4948_v24 = vrot.slane %v4659_v4, 2  ;;  %v13572_v19 = vadd.f32 %v6178_v47, %v5809_v56  ;;  %9953 = vrcp.f32 %v6603_v53  ;;  %v5134_v61 = vadd.f32 %v4946_v2, %v4545_v26 }
 0x433   :  { %v5374_v30 = vmul.f32 %v11735_v59, %v2552_v29  ;;  %v5376_v45 = vmul.f32 %v11735_v59, %v2617_v5  ;;  %9955 = vrcp.f32 %v6605_v12  ;;  %v4360_v41 = vsel %vm3019_vm4, %v4358_v11, %v4359_v62  ;;  %v16370_v11 = vld [vmem:[#allocation55_spill] sm:$0xff] }
 0x434   :  { %16368 = vst [vmem:[#allocation92_spill] sm:$0xff] %v13572_v19  ;;  %v2852_v6 = vmul.f32 %v16354_v28, %v2552_v29  ;;  %v2854_v14 = vmul.f32 %v16354_v28, %v2617_v5  ;;  %v3284_v13 = vadd.f32 %v3118_v55, %v2690_v27  ;;  %v3654_v22 = vsel %vm3555_vm5, %v3652_v15, %v3653_v54 }
 0x435   :  { %v4546_v39 = vadd.f32 %v4360_v41, %v3957_v20  ;;  %v2422_v63 = vrot.slane %v2292_v18, 7  ;;  %v4949_v25 = vsel %vm3555_vm5, %v4947_v17, %v4948_v24  ;;  %v8980_v53 = vmul.f32 -1.442695, %v13572_v19 }
 0x436   :  { %v3388_v26 = vmul.f32 %v11627_v51, %v2552_v29  ;;  %v5209_v57 = vmul.f32 %v16369_v34, %v2552_v29  ;;  %v5638_v4 = vrot.slane %v5374_v30, 1  ;;  %v5639_v56 = vrot.slane %v5376_v45, 1  ;;  %v16371_v30 = vld [vmem:[#allocation93_spill] sm:$0xff] }
 0x437   :  { %v5915_v12 = vmul.f32 %v16370_v11, %v2552_v29  ;;  %v5917_v2 = vmul.f32 %v16370_v11, %v2617_v5  ;;  %v3119_v62 = vrot.slane %v2852_v6, 1  ;;  %v3120_v27 = vrot.slane %v2854_v14, 1 }
 0x438   :  { %v3390_v15 = vmul.f32 %v11627_v51, %v2617_v5  ;;  %v5269_v54 = vadd.f32 %v5209_v57, %v5134_v61  ;;  %v4069_v18 = vmul.f32 %v16193_v0, %v2552_v29  ;;  %v4071_v20 = vmul.f32 %v16193_v0, %v2617_v5 }
 0x439   :  { %v2553_v47 = vsel %vm2515_vm3, 0.0, %v2422_v63  ;;  %v2618_v55 = vsel %vm2515_vm3, %v2422_v63, 0.0  ;;  %9957 = vpow2.f32 %v8980_v53  ;;  %v4658_v17 = vmul.f32 %v11672_v37, %v2552_v29 }
 0x43a   :  { %v4660_v24 = vmul.f32 %v11672_v37, %v2617_v5  ;;  %v2293_v45 = vmul.f32 %v13518_v7, %v16371_v30  ;;  %v3894_v41 = vmul.f32 %v16196_v10, %v2552_v29  ;;  %v5640_v61 = vsel %vm3019_vm4, %v5638_v4, %v5639_v56 }
 0x43b   :  { %v6179_v6 = vrot.slane %v5915_v12, 2  ;;  %v6180_v14 = vrot.slane %v5917_v2, 2  ;;  %v3655_v57 = vrot.slane %v3388_v26, 2  ;;  %v5810_v36 = vadd.f32 %v5640_v61, %v5269_v54  ;;  %v16372_v12 = vld [vmem:[#allocation97_spill] sm:$0xff] }
 0x43c   :  { %v2855_v32 = vmul.f32 %v16345_v23, %v2553_v47  ;;  %v2857_v63 = vmul.f32 %v16345_v23, %v2618_v55  ;;  %v3121_v53 = vsel %vm3019_vm4, %v3119_v62, %v3120_v27  ;;  %v3656_v19 = vrot.slane %v3390_v15, 2 }
 0x43d   :  { %v4361_v1 = vrot.slane %v4069_v18, 1  ;;  %v4362_v5 = vrot.slane %v4071_v20, 1  ;;  %v2691_v46 = vmul.f32 %v11647_v49, %v2552_v29  ;;  %v3958_v7 = vadd.f32 %v3894_v41, %v13550_v43 }
 0x43e   :  { %v4950_v30 = vrot.slane %v4658_v17, 2  ;;  %v4951_v60 = vrot.slane %v4660_v24, 2  ;;  %v3820_v4 = vadd.f32 %v3654_v22, %v3284_v13  ;;  %v5135_v56 = vadd.f32 %v4949_v25, %v4546_v39 }
 0x43f   :  { %v6181_v26 = vsel %vm3555_vm5, %v6179_v6, %v6180_v14  ;;  %v13605_v2 = vmul.f32 %v13520_v33, %v16372_v12  ;;  %v13607_v54 = vpop.eup %9953  ;;  %v3285_v62 = vadd.f32 %v3121_v53, %v2691_v46  ;;  %v3122_v15 = vrot.slane %v2855_v32, 1 }
 0x440   :  { %16373 = vst [vmem:[#allocation54_spill] sm:$0xff] %v13607_v54  ;;  %v13609_v27 = vadd.f32 %v6181_v26, %v5810_v36  ;;  %v3123_v18 = vrot.slane %v2857_v63, 1  ;;  %v13611_v29 = vpop.eup %9955  ;;  %v3657_v43 = vsel %vm3555_vm5, %v3655_v57, %v3656_v19  ;;  %v4363_v13 = vsel %vm3019_vm4, %v4361_v1, %v4362_v5 }
 0x441   :  { %16375 = vst [vmem:[#allocation93_spill] sm:$0xff] %v13611_v29  ;;  %v5377_v22 = vmul.f32 %v11587_v50, %v2553_v47  ;;  %v5379_v39 = vmul.f32 %v11587_v50, %v2618_v55  ;;  %v4547_v25 = vadd.f32 %v4363_v13, %v3958_v7  ;;  %v4952_v33 = vsel %vm3555_vm5, %v4950_v30, %v4951_v60 }
 0x442   :  { %16374 = vst [vmem:[#allocation55_spill] sm:$0xff] %v13609_v27  ;;  %v2692_v20 = vmul.f32 %v16357_v42, %v2553_v47  ;;  %v2423_v46 = vrot.slane %v2293_v45, 7  ;;  %v3391_v36 = vmul.f32 %v16358_v48, %v2553_v47  ;;  %v3393_v32 = vmul.f32 %v16358_v48, %v2618_v55 }
 0x443   :  { %v3895_v17 = vmul.f32 %v16278_v44, %v2553_v47  ;;  %v4072_v19 = vmul.f32 %v11518_v8, %v2553_v47  ;;  %v8981_v1 = vmul.f32 -1.442695, %v13609_v27  ;;  %v3124_v24 = vsel %vm3019_vm4, %v3122_v15, %v3123_v18 }
 0x444   :  { %v4074_v41 = vmul.f32 %v11518_v8, %v2618_v55  ;;  %v4661_v61 = vmul.f32 %v16277_v21, %v2553_v47  ;;  %v4663_v60 = vmul.f32 %v16277_v21, %v2618_v55  ;;  %v5210_v45 = vmul.f32 %v16363_v35, %v2553_v47 }
 0x445   :  { %v5641_v6 = vrot.slane %v5377_v22, 1  ;;  %v5642_v14 = vrot.slane %v5379_v39, 1  ;;  %v5918_v57 = vmul.f32 %v16290_v38, %v2553_v47  ;;  %v5920_v63 = vmul.f32 %v16290_v38, %v2618_v55 }
 0x446   :  { %v2554_v53 = vsel %vm2515_vm3, 0.0, %v2423_v46  ;;  %v2619_v5 = vsel %vm2515_vm3, %v2423_v46, 0.0  ;;  %v9958_v7 = vpop.eup %9957  ;;  %v3658_v30 = vrot.slane %v3391_v36, 2  ;;  %v3659_v26 = vrot.slane %v3393_v32, 2 }
 0x447   :  { %v3959_v12 = vadd.f32 %v3895_v17, %v3820_v4  ;;  %v5270_v15 = vadd.f32 %v5210_v45, %v5135_v56  ;;  %v3286_v18 = vadd.f32 %v3124_v24, %v2692_v20  ;;  %v4364_v13 = vrot.slane %v4072_v19, 1 }
 0x448   :  { %v4365_v29 = vrot.slane %v4074_v41, 1  ;;  %v4953_v54 = vrot.slane %v4661_v61, 2  ;;  %9959 = vpow2.f32 %v8981_v1  ;;  %v4954_v22 = vrot.slane %v4663_v60, 2 }
 0x449   :  { %v2856_v39 = vmul.f32 %v16354_v28, %v2554_v53  ;;  %v2858_v47 = vmul.f32 %v16354_v28, %v2619_v5  ;;  %v6606_v55 = vadd.f32 1.0, %v9958_v7  ;;  %v5643_v27 = vsel %vm3019_vm4, %v5641_v6, %v5642_v14 }
 0x44a   :  { %v6182_v16 = vrot.slane %v5918_v57, 2  ;;  %v6183_v46 = vrot.slane %v5920_v63, 2  ;;  %v3821_v9 = vadd.f32 %v3657_v43, %v3285_v62  ;;  %v5136_v36 = vadd.f32 %v4952_v33, %v4547_v25 }
 0x44b   :  { %v3660_v4 = vsel %vm3555_vm5, %v3658_v30, %v3659_v26  ;;  %v5811_v56 = vadd.f32 %v5643_v27, %v5270_v15  ;;  %v4366_v32 = vsel %vm3019_vm4, %v4364_v13, %v4365_v29  ;;  %v5378_v17 = vmul.f32 %v11735_v59, %v2554_v53 }
 0x44c   :  { %v13637_v20 = vadd.f32 %v3660_v4, %v3286_v18  ;;  %v5380_v19 = vmul.f32 %v11735_v59, %v2619_v5  ;;  %v4548_v1 = vadd.f32 %v4366_v32, %v3959_v12  ;;  %v4955_v24 = vsel %vm3555_vm5, %v4953_v54, %v4954_v22 }
 0x44d   :  { %v3125_v41 = vrot.slane %v2856_v39, 1  ;;  %v3126_v61 = vrot.slane %v2858_v47, 1  ;;  %9961 = vrcp.f32 %v6606_v55  ;;  %v6184_v62 = vsel %vm3555_vm5, %v6182_v16, %v6183_v46 }
 0x44e   :  { %v3392_v43 = vmul.f32 %v11627_v51, %v2554_v53  ;;  %v2424_v27 = vrot.slane %v13605_v2, 7  ;;  %v13646_v25 = vadd.f32 %v6184_v62, %v5811_v56  ;;  %v2693_v29 = vmul.f32 %v11647_v49, %v2554_v53 }
 0x44f   :  { %v3394_v33 = vmul.f32 %v11627_v51, %v2619_v5  ;;  %v5211_v60 = vmul.f32 %v16369_v34, %v2554_v53  ;;  %v5644_v45 = vrot.slane %v5378_v17, 1  ;;  %v5645_v6 = vrot.slane %v5380_v19, 1  ;;  %v13665_v17 = vpop.f32.mrf.mxu1 }
 0x450   :  { %16376 = vst [vmem:[#allocation97_spill] sm:$0xff] %v13646_v25  ;;  %v5919_v54 = vmul.f32 %v16370_v11, %v2554_v53  ;;  %v5921_v14 = vmul.f32 %v16370_v11, %v2619_v5  ;;  %v3127_v16 = vsel %vm3019_vm4, %v3125_v41, %v3126_v61  ;;  %v3896_v57 = vmul.f32 %v16196_v10, %v2554_v53 }
 0x451   :  { %v4073_v2 = vmul.f32 %v16193_v0, %v2554_v53  ;;  %v5271_v63 = vadd.f32 %v5211_v60, %v5136_v36  ;;  %v3661_v7 = vrot.slane %v3392_v43, 2  ;;  %v4075_v30 = vmul.f32 %v16193_v0, %v2619_v5 }
 0x452   :  { %v2555_v26 = vsel %vm2515_vm3, 0.0, %v2424_v27  ;;  %v2620_v12 = vsel %vm2515_vm3, %v2424_v27, 0.0  ;;  %v8982_v15 = vmul.f32 -1.442695, %v13646_v25  ;;  %v3662_v18 = vrot.slane %v3394_v33, 2 }
 0x453   :  { %v4662_v13 = vmul.f32 %v11672_v37, %v2554_v53  ;;  %v4664_v22 = vmul.f32 %v11672_v37, %v2619_v5  ;;  %v3287_v39 = vadd.f32 %v3127_v16, %v2693_v29  ;;  %v5646_v47 = vsel %vm3019_vm4, %v5644_v45, %v5645_v6 }
 0x454   :  { %v6185_v55 = vrot.slane %v5919_v54, 2  ;;  %v6186_v46 = vrot.slane %v5921_v14, 2  ;;  %v5137_v36 = vadd.f32 %v4955_v24, %v4548_v1  ;;  %v5812_v4 = vadd.f32 %v5646_v47, %v5271_v63 }
 0x455   :  { %v2859_v56 = vmul.f32 %v16345_v23, %v2555_v26  ;;  %v2861_v32 = vmul.f32 %v16345_v23, %v2620_v12  ;;  %v9960_v19 = vpop.eup %9959  ;;  %v3960_v41 = vadd.f32 %v3896_v57, %v3821_v9  ;;  %v4367_v61 = vrot.slane %v4073_v2, 1 }
 0x456   :  { %v4368_v62 = vrot.slane %v4075_v30, 1  ;;  %v2295_v53 = vmul.f32 %v13530_v31, %v13231_v3  ;;  %9963 = vpow2.f32 %v8982_v15  ;;  %v3663_v5 = vsel %vm3555_vm5, %v3661_v7, %v3662_v18  ;;  %v13678_v3 = vpop.f32.mrf.mxu1 }
 0x457   :  { %v4956_v43 = vrot.slane %v4662_v13, 2  ;;  %v4957_v27 = vrot.slane %v4664_v22, 2  ;;  %v13670_v1 = vadd.f32 %v3663_v5, %v3287_v39  ;;  %v6187_v24 = vsel %vm3555_vm5, %v6185_v55, %v6186_v46 }
 0x458   :  { %v3395_v29 = vmul.f32 %v16358_v48, %v2555_v26  ;;  %v3397_v33 = vmul.f32 %v16358_v48, %v2620_v12  ;;  %v13675_v60 = vadd.f32 %v6187_v24, %v5812_v4  ;;  %v3128_v9 = vrot.slane %v2859_v56, 1  ;;  %v13694_v55 = vpop.f32.mrf.mxu1 }
 0x459   :  { %v3129_v45 = vrot.slane %v2861_v32, 1  ;;  %v2104_v6 = vadd.f32 1.0, %v13535_v40  ;;  %v13680_v31 = vadd.f32 1.0, %v9960_v19  ;;  %v4369_v54 = vsel %vm3019_vm4, %v4367_v61, %v4368_v62 }
 0x45a   :  { %16377 = vst [vmem:[#allocation106_spill] sm:$0xff] %v13675_v60  ;;  %v5381_v14 = vmul.f32 %v11587_v50, %v2555_v26  ;;  %v2425_v16 = vrot.slane %v2295_v53, 7  ;;  %v13684_v57 = vpop.eup %9961  ;;  %v4549_v2 = vadd.f32 %v4369_v54, %v3960_v41  ;;  %v4958_v63 = vsel %vm3555_vm5, %v4956_v43, %v4957_v27 }
 0x45b   :  { %16378 = vst [vmem:[#allocation107_spill] sm:$0xff] %v13680_v31  ;;  %16379 = vst [vmem:[#allocation108_spill] sm:$0xff] %v13684_v57  ;;  %v2694_v7 = vmul.f32 %v16357_v42, %v2555_v26  ;;  %v5383_v30 = vmul.f32 %v11587_v50, %v2620_v12  ;;  %v3664_v15 = vrot.slane %v3395_v29, 2  ;;  %v3665_v40 = vrot.slane %v3397_v33, 2  ;;  %v1829_v33 = vpop.f32.mrf.mxu1 }
 0x45c   :  { %v3897_v18 = vmul.f32 %v16278_v44, %v2555_v26  ;;  %v4076_v13 = vmul.f32 %v11518_v8, %v2555_v26  ;;  %v8983_v22 = vmul.f32 -1.442695, %v13675_v60  ;;  %v3130_v39 = vsel %vm3019_vm4, %v3128_v9, %v3129_v45 }
 0x45d   :  { %v4078_v47 = vmul.f32 %v11518_v8, %v2620_v12  ;;  %9965 = vrcp.f32 %v2104_v6  ;;  %v5212_v46 = vmul.f32 %v16363_v35, %v2555_v26  ;;  %v5647_v4 = vrot.slane %v5381_v14, 1  ;;  %v1833_v14 = vpop.f32.mrf.mxu1 }
 0x45e   :  { %v13698_v56 = vsel %vm2515_vm3, 0.0, %v2425_v16  ;;  %9967 = vpow2.f32 %v13485_v58  ;;  %v5648_v32 = vrot.slane %v5383_v30, 1  ;;  %v5922_v19 = vmul.f32 %v16290_v38, %v2555_v26 }
 0x45f   :  { %v5924_v41 = vmul.f32 %v16290_v38, %v2620_v12  ;;  %v13704_v61 = vsel %vm2515_vm3, %v2425_v16, 0.0  ;;  %v3288_v62 = vadd.f32 %v3130_v39, %v2694_v7  ;;  %v4665_v53 = vmul.f32 %v16277_v21, %v2555_v26 }
 0x460   :  { %v4667_v5 = vmul.f32 %v16277_v21, %v2620_v12  ;;  %v5272_v43 = vadd.f32 %v5212_v46, %v5137_v36  ;;  %v5138_v27 = vadd.f32 %v4958_v63, %v4549_v2  ;;  %v4370_v24 = vrot.slane %v4076_v13, 1 }
 0x461   :  { %v4371_v29 = vrot.slane %v4078_v47, 1  ;;  %v5382_v58 = vmul.f32 %v11735_v59, %v13698_v56  ;;  %v3666_v9 = vsel %vm3555_vm5, %v3664_v15, %v3665_v40  ;;  %v3961_v45 = vadd.f32 %v3897_v18, %v13637_v20 }
 0x462   :  { %v5384_v6 = vmul.f32 %v11735_v59, %v13704_v61  ;;  %v2105_v54 = vadd.f32 1.0, %v13546_v52  ;;  %9969 = vpow2.f32 %v8983_v22  ;;  %v5649_v26 = vsel %vm3019_vm4, %v5647_v4, %v5648_v32  ;;  %v16381_v52 = vld [vmem:[#allocation37_spill] sm:$0xff] }
 0x463   :  { %v6188_v12 = vrot.slane %v5922_v19, 2  ;;  %v6189_v36 = vrot.slane %v5924_v41, 2  ;;  %v13716_v16 = vpop.eup %9963  ;;  %v13718_v2 = vadd.f32 %v3666_v9, %v3288_v62  ;;  %v4959_v63 = vrot.slane %v4665_v53, 2  ;;  %v1835_v19 = vpop.f32.mrf.mxu1 }
 0x464   :  { %16380 = vst [vmem:[#allocation109_spill] sm:$0xff] %v13716_v16  ;;  %v4960_v7 = vrot.slane %v4667_v5, 2  ;;  %v5813_v30 = vadd.f32 %v5649_v26, %v5272_v43  ;;  %v4372_v20 = vsel %vm3019_vm4, %v4370_v24, %v4371_v29  ;;  %v5213_v15 = vmul.f32 %v16369_v34, %v13698_v56 }
 0x465   :  { %v5650_v40 = vrot.slane %v5382_v58, 1  ;;  %v13725_v18 = vadd.f32 %v13665_v17, %v16381_v52  ;;  %v5651_v13 = vrot.slane %v5384_v6, 1  ;;  %v5923_v22 = vmul.f32 %v16370_v11, %v13698_v56 }
 0x466   :  { %v5925_v39 = vmul.f32 %v16370_v11, %v13704_v61  ;;  %9971 = vrcp.f32 %v2105_v54  ;;  %v6190_v47 = vsel %vm3555_vm5, %v6188_v12, %v6189_v36  ;;  %v2860_v46 = vmul.f32 %v16354_v28, %v13698_v56 }
 0x467   :  { %v2862_v4 = vmul.f32 %v16354_v28, %v13704_v61  ;;  %v5273_v32 = vadd.f32 %v5213_v15, %v5138_v27  ;;  %v13736_v17 = vadd.f32 %v4372_v20, %v3961_v45  ;;  %v13739_v41 = vsel %vm3555_vm5, %v4959_v63, %v4960_v7  ;;  %v1837_v7 = vpop.f32.mrf.mxu1  ;;  %v16383_v15 = vld [vmem:[#allocation104_spill] sm:$0xff] }
 0x468   :  { %v13741_v62 = vadd.f32 %v6190_v47, %v5813_v30  ;;  %v3396_v53 = vmul.f32 %v11627_v51, %v13698_v56  ;;  %v2695_v5 = vmul.f32 %v11647_v49, %v13698_v56  ;;  %v3398_v43 = vmul.f32 %v11627_v51, %v13704_v61  ;;  %v16384_v47 = vld [vmem:[#allocation38_spill] sm:$0xff] }
 0x469   :  { %v3898_v27 = vmul.f32 %v16196_v10, %v13698_v56  ;;  %v8920_v24 = vmul.f32 -1.442695, %v13725_v18  ;;  %v4077_v58 = vmul.f32 %v16193_v0, %v13698_v56  ;;  %v5652_v9 = vsel %vm3019_vm4, %v5650_v40, %v5651_v13  ;;  %v16385_v13 = vld [vmem:[#allocation69_spill] sm:$0xff] }
 0x46a   :  { %16382 = vst [vmem:[#allocation110_spill] sm:$0xff] %v13741_v62  ;;  %v9966_v29 = vpop.eup %9965  ;;  %v6191_v45 = vrot.slane %v5923_v22, 2  ;;  %v6192_v6 = vrot.slane %v5925_v39, 2  ;;  %v3131_v26 = vrot.slane %v2860_v46, 1  ;;  %v3132_v12 = vrot.slane %v2862_v4, 1 }
 0x46b   :  { %v9968_v54 = vpop.eup %9967  ;;  %v4079_v36 = vmul.f32 %v16193_v0, %v13704_v61  ;;  %v5814_v63 = vadd.f32 %v5652_v9, %v5273_v32  ;;  %v8984_v30 = vmul.f32 -1.442695, %v13741_v62  ;;  %v3667_v20 = vrot.slane %v3396_v53, 2 }
 0x46c   :  { %9973 = vpow2.f32 %v16383_v15  ;;  %v13761_v60 = vadd.f32 %v13678_v3, %v16384_v47  ;;  %v3668_v40 = vrot.slane %v3398_v43, 2  ;;  %v2296_v22 = vmul.f32 %v9966_v29, %v16385_v13 }
 0x46d   :  { %9975 = vpow2.f32 %v8920_v24  ;;  %v13766_v39 = vadd.f32 %v13694_v55, %v16381_v52  ;;  %v4373_v46 = vrot.slane %v4077_v58, 1  ;;  %v6193_v4 = vsel %vm3555_vm5, %v6191_v45, %v6192_v6  ;;  %v1839_v24 = vpop.f32.mrf.mxu1 }
 0x46e   :  { %v2106_v32 = vadd.f32 1.0, %v9968_v54  ;;  %v13770_v53 = vadd.f32 %v1829_v33, %v16384_v47  ;;  %v3133_v9 = vsel %vm3019_vm4, %v3131_v26, %v3132_v12  ;;  %v4374_v15 = vrot.slane %v4079_v36, 1 }
 0x46f   :  { %v4666_v3 = vmul.f32 %v11672_v37, %v13698_v56  ;;  %v13775_v43 = vadd.f32 %v6193_v4, %v5814_v63  ;;  %v13777_v29 = vpop.eup %9969  ;;  %v3962_v55 = vadd.f32 %v3898_v27, %v13670_v1  ;;  %v4668_v58 = vmul.f32 %v11672_v37, %v13704_v61 }
 0x470   :  { %16387 = vst [vmem:[#allocation69_spill] sm:$0xff] %v13777_v29  ;;  %v8921_v45 = vmul.f32 -1.442695, %v13761_v60  ;;  %v13784_v33 = vadd.f32 %v1833_v14, %v16381_v52  ;;  %9977 = vpow2.f32 %v8984_v30  ;;  %v2426_v6 = vrot.slane %v2296_v22, 7  ;;  %v1843_v30 = vpop.f32.mrf.mxu1 }
 0x471   :  { %16386 = vst [vmem:[#allocation104_spill] sm:$0xff] %v13775_v43  ;;  %v8922_v54 = vmul.f32 -1.442695, %v13766_v39  ;;  %v13788_v56 = vadd.f32 %v1835_v19, %v16384_v47  ;;  %v3289_v26 = vadd.f32 %v3133_v9, %v2695_v5  ;;  %9979 = vrcp.f32 %v2106_v32  ;;  %v16392_v32 = vld [vmem:[#allocation88_spill] sm:$0xff] }
 0x472   :  { %16388 = vst [vmem:[#allocation111_spill] sm:$0xff] %v13784_v33  ;;  %v8923_v12 = vmul.f32 -1.442695, %v13770_v53  ;;  %v13792_v1 = vadd.f32 %v1837_v7, %v16381_v52  ;;  %v4375_v27 = vsel %vm3019_vm4, %v4373_v46, %v4374_v15  ;;  %v4962_v36 = vrot.slane %v4666_v3, 2 }
 0x473   :  { %16389 = vst [vmem:[#allocation112_spill] sm:$0xff] %v13788_v56  ;;  %v9972_v61 = vpop.eup %9971  ;;  %v8985_v14 = vmul.f32 -1.442695, %v13775_v43  ;;  %v13797_v63 = vadd.f32 %v1839_v24, %v16384_v47  ;;  %v4551_v13 = vadd.f32 %v4375_v27, %v3962_v55  ;;  %v4963_v19 = vrot.slane %v4668_v58, 2  ;;  %v1845_v58 = vpop.f32.mrf.mxu1 }
 0x474   :  { %16390 = vst [vmem:[#allocation113_spill] sm:$0xff] %v13792_v1  ;;  %9981 = vpow2.f32 %v8921_v45  ;;  %v8924_v5 = vmul.f32 -1.442695, %v13784_v33  ;;  %v2557_v22 = vsel %vm2515_vm3, 0.0, %v2426_v6  ;;  %v2622_v7 = vsel %vm2515_vm3, %v2426_v6, 0.0 }
 0x475   :  { %16391 = vst [vmem:[#allocation114_spill] sm:$0xff] %v13797_v63  ;;  %9983 = vpow2.f32 %v8922_v54  ;;  %v8925_v4 = vmul.f32 -1.442695, %v13788_v56  ;;  %v3669_v46 = vsel %vm3555_vm5, %v3667_v20, %v3668_v40  ;;  %v2297_v9 = vmul.f32 %v9972_v61, %v16392_v32 }
 0x476   :  { %9985 = vpow2.f32 %v8923_v12  ;;  %v8926_v15 = vmul.f32 -1.442695, %v13792_v1  ;;  %v5139_v3 = vadd.f32 %v13739_v41, %v13736_v17  ;;  %v13808_v24 = vadd.f32 %v3669_v46, %v3289_v26 }
 0x477   :  { %9987 = vpow2.f32 %v8985_v14  ;;  %v8927_v55 = vmul.f32 -1.442695, %v13797_v63  ;;  %v4964_v45 = vsel %vm3555_vm5, %v4962_v36, %v4963_v19  ;;  %v2863_v6 = vmul.f32 %v16345_v23, %v2557_v22 }
 0x478   :  { %v2865_v20 = vmul.f32 %v16345_v23, %v2622_v7  ;;  %9989 = vpow2.f32 %v8924_v5  ;;  %v13814_v54 = vadd.f32 %v4964_v45, %v4551_v13  ;;  %v5385_v12 = vmul.f32 %v11587_v50, %v2557_v22 }
 0x479   :  { %v9974_v40 = vpop.eup %9973  ;;  %v5387_v17 = vmul.f32 %v11587_v50, %v2622_v7  ;;  %9991 = vpow2.f32 %v8925_v4  ;;  %v2427_v26 = vrot.slane %v2297_v9, 7  ;;  %v13819_v61 = vadd.f32 %v1843_v30, %v16381_v52 }
 0x47a   :  { %v9976_v41 = vpop.eup %9975  ;;  %9993 = vpow2.f32 %v8926_v15  ;;  %v13822_v27 = vadd.f32 %v1845_v58, %v16384_v47  ;;  %v3399_v36 = vmul.f32 %v16358_v48, %v2557_v22  ;;  %v4080_v14 = vmul.f32 %v11518_v8, %v2557_v22 }
 0x47b   :  { %16393 = vst [vmem:[#allocation88_spill] sm:$0xff] %v13819_v61  ;;  %v4082_v13 = vmul.f32 %v11518_v8, %v2622_v7  ;;  %9995 = vpow2.f32 %v8927_v55  ;;  %v3134_v19 = vrot.slane %v2863_v6, 1  ;;  %v3135_v5 = vrot.slane %v2865_v20, 1 }
 0x47c   :  { %16394 = vst [vmem:[#allocation115_spill] sm:$0xff] %v13822_v27  ;;  %v3401_v4 = vmul.f32 %v16358_v48, %v2622_v7  ;;  %v5214_v46 = vmul.f32 %v16363_v35, %v2557_v22  ;;  %v5653_v32 = vrot.slane %v5385_v12, 1  ;;  %v5654_v9 = vrot.slane %v5387_v17, 1 }
 0x47d   :  { %v2107_v30 = vadd.f32 1.0, %v9974_v40  ;;  %v13829_v15 = vadd.f32 1.0, %v9976_v41  ;;  %v13831_v58 = vpop.eup %9977  ;;  %v3899_v45 = vmul.f32 %v16278_v44, %v2557_v22  ;;  %v13835_v43 = vmul.f32 %v16277_v21, %v2557_v22 }
 0x47e   :  { %16395 = vst [vmem:[#allocation116_spill] sm:$0xff] %v13831_v58  ;;  %v2558_v55 = vsel %vm2515_vm3, 0.0, %v2427_v26  ;;  %v2623_v6 = vsel %vm2515_vm3, %v2427_v26, 0.0  ;;  %v9980_v20 = vpop.eup %9979  ;;  %v4376_v62 = vrot.slane %v4080_v14, 1  ;;  %v4377_v63 = vrot.slane %v4082_v13, 1 }
 0x47f   :  { %v5926_v12 = vmul.f32 %v16290_v38, %v2557_v22  ;;  %v5928_v40 = vmul.f32 %v16290_v38, %v2622_v7  ;;  %v3136_v17 = vsel %vm3019_vm4, %v3134_v19, %v3135_v5  ;;  %v3670_v41 = vrot.slane %v3399_v36, 2  ;;  %v16396_v36 = vld [vmem:[#allocation63_spill] sm:$0xff] }
 0x480   :  { %v3671_v47 = vrot.slane %v3401_v4, 2  ;;  %v5274_v1 = vadd.f32 %v5214_v46, %v5139_v3  ;;  %v5655_v25 = vsel %vm3019_vm4, %v5653_v32, %v5654_v9  ;;  %v2864_v57 = vmul.f32 %v16354_v28, %v2558_v55 }
 0x481   :  { %v13842_v52 = vpop.eup %9981  ;;  %v2866_v26 = vmul.f32 %v16354_v28, %v2623_v6  ;;  %9997 = vrcp.f32 %v2107_v30  ;;  %v2696_v13 = vmul.f32 %v16357_v42, %v2557_v22  ;;  %v3963_v56 = vadd.f32 %v3899_v45, %v13718_v2 }
 0x482   :  { %v13847_v14 = vpop.eup %9983  ;;  %v4671_v19 = vmul.f32 %v16277_v21, %v2622_v7  ;;  %v2298_v5 = vmul.f32 %v9980_v20, %v16396_v36  ;;  %v4378_v4 = vsel %vm3019_vm4, %v4376_v62, %v4377_v63  ;;  %v4965_v46 = vrot.slane %v13835_v43, 2 }
 0x483   :  { %v13853_v3 = vpop.eup %9985  ;;  %v6194_v32 = vrot.slane %v5926_v12, 2  ;;  %v6195_v9 = vrot.slane %v5928_v40, 2  ;;  %v3290_v30 = vadd.f32 %v3136_v17, %v2696_v13  ;;  %v5815_v33 = vadd.f32 %v5655_v25, %v5274_v1 }
 0x484   :  { %v13857_v58 = vpop.eup %9987  ;;  %v5386_v22 = vmul.f32 %v11735_v59, %v2558_v55  ;;  %v5388_v2 = vmul.f32 %v11735_v59, %v2623_v6  ;;  %v3672_v7 = vsel %vm3555_vm5, %v3670_v41, %v3671_v47  ;;  %v3137_v20 = vrot.slane %v2864_v57, 1 }
 0x485   :  { %16397 = vst [vmem:[#allocation63_spill] sm:$0xff] %v13857_v58  ;;  %v13861_v45 = vpop.eup %9989  ;;  %v3138_v36 = vrot.slane %v2866_v26, 1  ;;  %v4081_v62 = vmul.f32 %v16193_v0, %v2558_v55  ;;  %v4552_v43 = vadd.f32 %v4378_v4, %v3963_v56  ;;  %v4966_v12 = vrot.slane %v4671_v19, 2 }
 0x486   :  { %v13865_v63 = vpop.eup %9991  ;;  %v2697_v40 = vmul.f32 %v11647_v49, %v2558_v55  ;;  %v2428_v17 = vrot.slane %v2298_v5, 7  ;;  %v6196_v1 = vsel %vm3555_vm5, %v6194_v32, %v6195_v9  ;;  %v3400_v13 = vmul.f32 %v11627_v51, %v2558_v55 }
 0x487   :  { %16398 = vst [vmem:[#allocation117_spill] sm:$0xff] %v13865_v63  ;;  %v13868_v25 = vpop.eup %9993  ;;  %v4083_v58 = vmul.f32 %v16193_v0, %v2623_v6  ;;  %v5215_v57 = vmul.f32 %v16369_v34, %v2558_v55  ;;  %v13876_v41 = vadd.f32 %v6196_v1, %v5815_v33  ;;  %v3402_v56 = vmul.f32 %v11627_v51, %v2623_v6 }
 0x488   :  { %16399 = vst [vmem:[#allocation118_spill] sm:$0xff] %v13868_v25  ;;  %v13874_v47 = vpop.eup %9995  ;;  %v5656_v26 = vrot.slane %v5386_v22, 1  ;;  %v5657_v19 = vrot.slane %v5388_v2, 1  ;;  %v3139_v5 = vsel %vm3019_vm4, %v3137_v20, %v3138_v36  ;;  %v3900_v4 = vmul.f32 %v16196_v10, %v2558_v55 }
 0x489   :  { %16400 = vst [vmem:[#allocation119_spill] sm:$0xff] %v13874_v47  ;;  %16401 = vst [vmem:[#allocation120_spill] sm:$0xff] %v13876_v41  ;;  %v4379_v25 = vrot.slane %v4081_v62, 1  ;;  %v4670_v32 = vmul.f32 %v11672_v37, %v2558_v55  ;;  %v5927_v9 = vmul.f32 %v16370_v11, %v2558_v55  ;;  %v5929_v29 = vmul.f32 %v16370_v11, %v2623_v6 }
 0x48a   :  { %v2559_v27 = vsel %vm2515_vm3, 0.0, %v2428_v17  ;;  %v2624_v33 = vsel %vm2515_vm3, %v2428_v17, 0.0  ;;  %v4380_v1 = vrot.slane %v4083_v58, 1  ;;  %v4672_v47 = vmul.f32 %v11672_v37, %v2623_v6 }
 0x48b   :  { %v5275_v22 = vadd.f32 %v5215_v57, %v13814_v54  ;;  %9999 = vrcp.f32 %v13829_v15  ;;  %v8986_v2 = vmul.f32 -1.442695, %v13876_v41  ;;  %v3673_v20 = vrot.slane %v3400_v13, 2 }
 0x48c   :  { %v3674_v36 = vrot.slane %v3402_v56, 2  ;;  %v5658_v62 = vsel %vm3019_vm4, %v5656_v26, %v5657_v19  ;;  %v3826_v55 = vadd.f32 %v3672_v7, %v3290_v30  ;;  %v3291_v31 = vadd.f32 %v3139_v5, %v2697_v40 }
 0x48d   :  { %v2867_v61 = vmul.f32 %v16345_v23, %v2559_v27  ;;  %v2869_v16 = vmul.f32 %v16345_v23, %v2624_v33  ;;  %v4967_v58 = vsel %vm3555_vm5, %v4965_v46, %v4966_v12  ;;  %v3964_v6 = vadd.f32 %v3900_v4, %v13808_v24  ;;  %v16402_v46 = vld [vmem:[#allocation101_spill] sm:$0xff] }
 0x48e   :  { %v9998_v17 = vpop.eup %9997  ;;  %v6197_v54 = vrot.slane %v5927_v9, 2  ;;  %v6198_v57 = vrot.slane %v5929_v29, 2  ;;  %v4381_v15 = vsel %vm3019_vm4, %v4379_v25, %v4380_v1  ;;  %v4968_v41 = vrot.slane %v4670_v32, 2 }
 0x48f   :  { %v4969_v13 = vrot.slane %v4672_v47, 2  ;;  %v5816_v56 = vadd.f32 %v5658_v62, %v5275_v22  ;;  %v5141_v63 = vadd.f32 %v4967_v58, %v4552_v43  ;;  %10001 = vpow2.f32 %v8986_v2 }
 0x490   :  { %v3675_v30 = vsel %vm3555_vm5, %v3673_v20, %v3674_v36  ;;  %v2109_v7 = vadd.f32 1.0, %v13842_v52  ;;  %v3140_v26 = vrot.slane %v2867_v61, 1  ;;  %v3141_v19 = vrot.slane %v2869_v16, 1 }
 0x491   :  { %v13898_v40 = vadd.f32 %v3675_v30, %v3291_v31  ;;  %v2299_v12 = vmul.f32 %v9998_v17, %v16402_v46  ;;  %v4553_v24 = vadd.f32 %v4381_v15, %v3964_v6  ;;  %v6199_v29 = vsel %vm3555_vm5, %v6197_v54, %v6198_v57 }
 0x492   :  { %v4084_v25 = vmul.f32 %v11518_v8, %v2559_v27  ;;  %v4086_v47 = vmul.f32 %v11518_v8, %v2624_v33  ;;  %v4970_v43 = vsel %vm3555_vm5, %v4968_v41, %v4969_v13  ;;  %v13905_v5 = vadd.f32 %v6199_v29, %v5816_v56 }
 0x493   :  { %v3403_v4 = vmul.f32 %v16358_v48, %v2559_v27  ;;  %v3405_v31 = vmul.f32 %v16358_v48, %v2624_v33  ;;  %v2698_v52 = vmul.f32 %v16357_v42, %v2559_v27  ;;  %v5389_v16 = vmul.f32 %v11587_v50, %v2559_v27 }
 0x494   :  { %16403 = vst [vmem:[#allocation101_spill] sm:$0xff] %v13905_v5  ;;  %10003 = vrcp.f32 %v2109_v7  ;;  %v2110_v61 = vadd.f32 1.0, %v13847_v14  ;;  %v3142_v32 = vsel %vm3019_vm4, %v3140_v26, %v3141_v19  ;;  %v3901_v9 = vmul.f32 %v16278_v44, %v2559_v27 }
 0x495   :  { %v5391_v1 = vmul.f32 %v11587_v50, %v2624_v33  ;;  %v2429_v41 = vrot.slane %v2299_v12, 7  ;;  %v4382_v22 = vrot.slane %v4084_v25, 1  ;;  %v4383_v2 = vrot.slane %v4086_v47, 1 }
 0x496   :  { %v4673_v20 = vmul.f32 %v16277_v21, %v2559_v27  ;;  %v4675_v36 = vmul.f32 %v16277_v21, %v2624_v33  ;;  %v8987_v62 = vmul.f32 -1.442695, %v13905_v5  ;;  %v3676_v17 = vrot.slane %v3403_v4, 2 }
 0x497   :  { %v3677_v58 = vrot.slane %v3405_v31, 2  ;;  %v3965_v6 = vadd.f32 %v3901_v9, %v3826_v55  ;;  %v3292_v14 = vadd.f32 %v3142_v32, %v2698_v52  ;;  %v5216_v57 = vmul.f32 %v16363_v35, %v2559_v27 }
 0x498   :  { %v10000_v54 = vpop.eup %9999  ;;  %v5659_v15 = vrot.slane %v5389_v16, 1  ;;  %v5930_v13 = vmul.f32 %v16290_v38, %v2559_v27  ;;  %v5660_v56 = vrot.slane %v5391_v1, 1  ;;  %v5932_v30 = vmul.f32 %v16290_v38, %v2624_v33 }
 0x499   :  { %v2560_v7 = vsel %vm2515_vm3, 0.0, %v2429_v41  ;;  %v2625_v26 = vsel %vm2515_vm3, %v2429_v41, 0.0  ;;  %v4384_v19 = vsel %vm3019_vm4, %v4382_v22, %v4383_v2  ;;  %v4971_v46 = vrot.slane %v4673_v20, 2 }
 0x49a   :  { %v4972_v12 = vrot.slane %v4675_v36, 2  ;;  %v5276_v29 = vadd.f32 %v5216_v57, %v5141_v63  ;;  %v5142_v55 = vadd.f32 %v4970_v43, %v4553_v24  ;;  %v4554_v25 = vadd.f32 %v4384_v19, %v3965_v6 }
 0x49b   :  { %v2300_v47 = vmul.f32 %v10000_v54, %v13725_v18  ;;  %10005 = vrcp.f32 %v2110_v61  ;;  %v2868_v4 = vmul.f32 %v16354_v28, %v2560_v7  ;;  %v2870_v27 = vmul.f32 %v16354_v28, %v2625_v26 }
 0x49c   :  { %v2111_v33 = vadd.f32 1.0, %v13853_v3  ;;  %v2112_v31 = vadd.f32 1.0, %v13861_v45  ;;  %v13929_v52 = vpop.eup %10001  ;;  %v3678_v16 = vsel %vm3555_vm5, %v3676_v17, %v3677_v58  ;;  %v5661_v32 = vsel %vm3019_vm4, %v5659_v15, %v5660_v56 }
 0x49d   :  { %v6200_v63 = vrot.slane %v5930_v13, 2  ;;  %v6201_v24 = vrot.slane %v5932_v30, 2  ;;  %10007 = vpow2.f32 %v8987_v62  ;;  %v13933_v43 = vadd.f32 %v3678_v16, %v3292_v14 }
 0x49e   :  { %v4973_v18 = vsel %vm3555_vm5, %v4971_v46, %v4972_v12  ;;  %v5817_v61 = vadd.f32 %v5661_v32, %v5276_v29  ;;  %v3404_v3 = vmul.f32 %v11627_v51, %v2560_v7  ;;  %v3406_v45 = vmul.f32 %v11627_v51, %v2625_v26 }
 0x49f   :  { %v13936_v9 = vadd.f32 %v4973_v18, %v4554_v25  ;;  %v2430_v1 = vrot.slane %v2300_v47, 7  ;;  %v3143_v41 = vrot.slane %v2868_v4, 1  ;;  %v3144_v22 = vrot.slane %v2870_v27, 1 }
 0x4a0   :  { %v4085_v2 = vmul.f32 %v16193_v0, %v2560_v7  ;;  %v4087_v20 = vmul.f32 %v16193_v0, %v2625_v26  ;;  %v6202_v62 = vsel %vm3555_vm5, %v6200_v63, %v6201_v24  ;;  %v3902_v17 = vmul.f32 %v16196_v10, %v2560_v7 }
 0x4a1   :  { %v10004_v36 = vpop.eup %10003  ;;  %v4674_v58 = vmul.f32 %v11672_v37, %v2560_v7  ;;  %v4676_v6 = vmul.f32 %v11672_v37, %v2625_v26  ;;  %v13946_v54 = vadd.f32 %v6202_v62, %v5817_v61  ;;  %v5390_v14 = vmul.f32 %v11735_v59, %v2560_v7 }
 0x4a2   :  { %v5392_v57 = vmul.f32 %v11735_v59, %v2625_v26  ;;  %10009 = vrcp.f32 %v2111_v33  ;;  %v2699_v15 = vmul.f32 %v11647_v49, %v2560_v7  ;;  %v3679_v13 = vrot.slane %v3404_v3, 2 }
 0x4a3   :  { %16404 = vst [vmem:[#allocation121_spill] sm:$0xff] %v13946_v54  ;;  %v3680_v56 = vrot.slane %v3406_v45, 2  ;;  %v3966_v30 = vadd.f32 %v3902_v17, %v13898_v40  ;;  %v3145_v19 = vsel %vm3019_vm4, %v3143_v41, %v3144_v22  ;;  %v4385_v46 = vrot.slane %v4085_v2, 1 }
 0x4a4   :  { %v4386_v12 = vrot.slane %v4087_v20, 1  ;;  %v13954_v29 = vsel %vm2515_vm3, 0.0, %v2430_v1  ;;  %v4974_v25 = vrot.slane %v4674_v58, 2  ;;  %v4975_v47 = vrot.slane %v4676_v6, 2 }
 0x4a5   :  { %v5217_v4 = vmul.f32 %v16369_v34, %v2560_v7  ;;  %v2626_v27 = vsel %vm2515_vm3, %v2430_v1, 0.0  ;;  %v5662_v33 = vrot.slane %v5390_v14, 1  ;;  %v5663_v16 = vrot.slane %v5392_v57, 1 }
 0x4a6   :  { %v5931_v32 = vmul.f32 %v16370_v11, %v2560_v7  ;;  %v5933_v63 = vmul.f32 %v16370_v11, %v2625_v26  ;;  %v2871_v24 = vmul.f32 %v16345_v23, %v13954_v29  ;;  %v2301_v18 = vmul.f32 %v10004_v36, %v13761_v60 }
 0x4a7   :  { %v5277_v40 = vadd.f32 %v5217_v4, %v5142_v55  ;;  %10011 = vrcp.f32 %v2112_v31  ;;  %v13964_v3 = vmul.f32 -1.442695, %v13946_v54  ;;  %v3293_v45 = vadd.f32 %v3145_v19, %v2699_v15 }
 0x4a8   :  { %v10006_v61 = vpop.eup %10005  ;;  %v4387_v1 = vsel %vm3019_vm4, %v4385_v46, %v4386_v12  ;;  %v2873_v41 = vmul.f32 %v16345_v23, %v2626_v27  ;;  %v3681_v7 = vsel %vm3555_vm5, %v3679_v13, %v3680_v56  ;;  %v5393_v26 = vmul.f32 %v11587_v50, %v13954_v29 }
 0x4a9   :  { %v4555_v22 = vadd.f32 %v4387_v1, %v3966_v30  ;;  %v5395_v55 = vmul.f32 %v11587_v50, %v2626_v27  ;;  %v4976_v60 = vsel %vm3555_vm5, %v4974_v25, %v4975_v47  ;;  %v5664_v31 = vsel %vm3019_vm4, %v5662_v33, %v5663_v16 }
 0x4aa   :  { %v6203_v2 = vrot.slane %v5931_v32, 2  ;;  %v6204_v20 = vrot.slane %v5933_v63, 2  ;;  %v13974_v36 = vpop.eup %10007  ;;  %v5818_v62 = vadd.f32 %v5664_v31, %v5277_v40  ;;  %v3146_v17 = vrot.slane %v2871_v24, 1 }
 0x4ab   :  { %v2431_v58 = vrot.slane %v2301_v18, 7  ;;  %v2302_v6 = vmul.f32 %v10006_v61, %v13766_v39  ;;  %v3147_v14 = vrot.slane %v2873_v41, 1  ;;  %v4088_v57 = vmul.f32 %v11518_v8, %v13954_v29 }
 0x4ac   :  { %v4090_v15 = vmul.f32 %v11518_v8, %v2626_v27  ;;  %v5218_v13 = vmul.f32 %v16363_v35, %v13954_v29  ;;  %v5665_v56 = vrot.slane %v5393_v26, 1  ;;  %v5666_v30 = vrot.slane %v5395_v55, 1 }
 0x4ad   :  { %v5934_v19 = vmul.f32 %v16290_v38, %v13954_v29  ;;  %v5936_v46 = vmul.f32 %v16290_v38, %v2626_v27  ;;  %v13985_v12 = vadd.f32 %v3681_v7, %v3293_v45  ;;  %v13987_v25 = vadd.f32 %v4976_v60, %v4555_v22 }
 0x4ae   :  { %v3409_v39 = vmul.f32 %v16358_v48, %v2626_v27  ;;  %v5278_v47 = vadd.f32 %v5218_v13, %v13936_v9  ;;  %v6205_v33 = vsel %vm3555_vm5, %v6203_v2, %v6204_v20  ;;  %v13993_v16 = vmul.f32 %v16277_v21, %v2626_v27 }
 0x4af   :  { %v10010_v4 = vpop.eup %10009  ;;  %v13996_v32 = vsel %vm2515_vm3, 0.0, %v2431_v58  ;;  %v2432_v63 = vrot.slane %v2302_v6, 7  ;;  %v13998_v40 = vadd.f32 %v6205_v33, %v5818_v62  ;;  %v4388_v24 = vrot.slane %v4088_v57, 1 }
 0x4b0   :  { %v4389_v18 = vrot.slane %v4090_v15, 1  ;;  %v3407_v61 = vmul.f32 %v16358_v48, %v13954_v29  ;;  %v3148_v45 = vsel %vm3019_vm4, %v3146_v17, %v3147_v14  ;;  %v5667_v9 = vsel %vm3019_vm4, %v5665_v56, %v5666_v30 }
 0x4b1   :  { %16405 = vst [vmem:[#allocation122_spill] sm:$0xff] %v13998_v40  ;;  %v6206_v1 = vrot.slane %v5934_v19, 2  ;;  %v6207_v41 = vrot.slane %v5936_v46, 2  ;;  %v5819_v7 = vadd.f32 %v5667_v9, %v5278_v47  ;;  %v2627_v27 = vsel %vm2515_vm3, %v2431_v58, 0.0 }
 0x4b2   :  { %v2872_v22 = vmul.f32 %v16354_v28, %v13996_v32  ;;  %v2700_v26 = vmul.f32 %v16357_v42, %v13954_v29  ;;  %v3683_v55 = vrot.slane %v3409_v39, 2  ;;  %v4978_v60 = vrot.slane %v13993_v16, 2 }
 0x4b3   :  { %v14011_v31 = vsel %vm2515_vm3, 0.0, %v2432_v63  ;;  %v3682_v2 = vrot.slane %v3407_v61, 2  ;;  %v14016_v62 = vmul.f32 -1.442695, %v13998_v40  ;;  %v4390_v17 = vsel %vm3019_vm4, %v4388_v24, %v4389_v18 }
 0x4b4   :  { %v14013_v20 = vpop.eup %10011  ;;  %v14020_v58 = vsel %vm2515_vm3, %v2432_v63, 0.0  ;;  %v3294_v6 = vadd.f32 %v3148_v45, %v2700_v26  ;;  %v6208_v14 = vsel %vm3555_vm5, %v6206_v1, %v6207_v41  ;;  %v2874_v57 = vmul.f32 %v16354_v28, %v2627_v27 }
 0x4b5   :  { %v14025_v15 = vmul.f32 %v11627_v51, %v2627_v27  ;;  %v14029_v13 = vmul.f32 %v16193_v0, %v13996_v32  ;;  %v14031_v56 = vadd.f32 %v6208_v14, %v5819_v7  ;;  %v3149_v30 = vrot.slane %v2872_v22, 1 }
 0x4b6   :  { %v14034_v19 = vmul.f32 %v16193_v0, %v2627_v27  ;;  %v4092_v46 = vmul.f32 %v11518_v8, %v14011_v31  ;;  %v14039_v39 = vmul.f32 %v11672_v37, %v2627_v27  ;;  %v5219_v47 = vmul.f32 %v16369_v34, %v13996_v32 }
 0x4b7   :  { %16406 = vst [vmem:[#allocation123_spill] sm:$0xff] %v14031_v56  ;;  %v3684_v33 = vsel %vm3555_vm5, %v3682_v2, %v3683_v55  ;;  %v4094_v16 = vmul.f32 %v11518_v8, %v14020_v58  ;;  %v5394_v63 = vmul.f32 %v11735_v59, %v13996_v32  ;;  %v5396_v24 = vmul.f32 %v11735_v59, %v2627_v27 }
 0x4b8   :  { %v3830_v18 = vadd.f32 %v3684_v33, %v3294_v6  ;;  %v3903_v61 = vmul.f32 %v16278_v44, %v13954_v29  ;;  %v3150_v45 = vrot.slane %v2874_v57, 1  ;;  %v3686_v9 = vrot.slane %v14025_v15, 2 }
 0x4b9   :  { %v5935_v1 = vmul.f32 %v16370_v11, %v13996_v32  ;;  %v4677_v41 = vmul.f32 %v16277_v21, %v13954_v29  ;;  %v5937_v7 = vmul.f32 %v16370_v11, %v2627_v27  ;;  %v3905_v22 = vmul.f32 %v16278_v44, %v14011_v31 }
 0x4ba   :  { %v3967_v26 = vadd.f32 %v3903_v61, %v13933_v43  ;;  %v4394_v55 = vrot.slane %v4092_v46, 1  ;;  %v4395_v2 = vrot.slane %v4094_v16, 1  ;;  %v4681_v6 = vmul.f32 %v16277_v21, %v14011_v31 }
 0x4bb   :  { %v4683_v14 = vmul.f32 %v16277_v21, %v14020_v58  ;;  %v2303_v57 = vmul.f32 %v10010_v4, %v13770_v53  ;;  %v4391_v15 = vrot.slane %v14029_v13, 1  ;;  %v5668_v29 = vrot.slane %v5394_v63, 1 }
 0x4bc   :  { %v5669_v33 = vrot.slane %v5396_v24, 1  ;;  %v3969_v27 = vadd.f32 %v3905_v22, %v3830_v18  ;;  %v3151_v40 = vsel %vm3019_vm4, %v3149_v30, %v3150_v45  ;;  %v4392_v54 = vrot.slane %v14034_v19, 1 }
 0x4bd   :  { %v5279_v43 = vadd.f32 %v5219_v47, %v13987_v25  ;;  %v4977_v46 = vrot.slane %v4677_v41, 2  ;;  %v6209_v16 = vrot.slane %v5935_v1, 2  ;;  %v6210_v61 = vrot.slane %v5937_v7, 2 }
 0x4be   :  { %v2433_v5 = vrot.slane %v2303_v57, 7  ;;  %v3408_v28 = vmul.f32 %v11627_v51, %v13996_v32  ;;  %v4396_v53 = vsel %vm3019_vm4, %v4394_v55, %v4395_v2  ;;  %v4556_v4 = vadd.f32 %v4390_v17, %v3967_v26 }
 0x4bf   :  { %v4983_v13 = vrot.slane %v4681_v6, 2  ;;  %v4984_v63 = vrot.slane %v4683_v14, 2  ;;  %v5670_v24 = vsel %vm3019_vm4, %v5668_v29, %v5669_v33  ;;  %v4558_v18 = vadd.f32 %v4396_v53, %v3969_v27 }
 0x4c0   :  { %v5397_v30 = vmul.f32 %v11587_v50, %v14011_v31  ;;  %v2701_v25 = vmul.f32 %v11647_v49, %v13996_v32  ;;  %v8990_v19 = vmul.f32 -1.442695, %v14031_v56  ;;  %v5820_v47 = vadd.f32 %v5670_v24, %v5279_v43 }
 0x4c1   :  { %v4979_v45 = vsel %vm3555_vm5, %v4977_v46, %v4978_v60  ;;  %v3685_v1 = vrot.slane %v3408_v28, 2  ;;  %v5399_v17 = vmul.f32 %v11587_v50, %v14020_v58  ;;  %v2564_v41 = vsel %vm2515_vm3, 0.0, %v2433_v5 }
 0x4c2   :  { %v2629_v7 = vsel %vm2515_vm3, %v2433_v5, 0.0  ;;  %v3295_v22 = vadd.f32 %v3151_v40, %v2701_v25  ;;  %v6211_v26 = vsel %vm3555_vm5, %v6209_v16, %v6210_v61  ;;  %v4985_v55 = vsel %vm3555_vm5, %v4983_v13, %v4984_v63 }
 0x4c3   :  { %v5145_v2 = vadd.f32 %v4979_v45, %v4556_v4  ;;  %v5220_v6 = vmul.f32 %v16363_v35, %v14011_v31  ;;  %v5147_v14 = vadd.f32 %v4985_v55, %v4558_v18  ;;  %v5671_v57 = vrot.slane %v5397_v30, 1  ;;  %v16408_v4 = vld [vmem:[#allocation70_spill] sm:$0xff] }
 0x4c4   :  { %v5938_v28 = vmul.f32 %v16290_v38, %v14011_v31  ;;  %v3904_v60 = vmul.f32 %v16196_v10, %v13996_v32  ;;  %v3687_v29 = vsel %vm3555_vm5, %v3685_v1, %v3686_v9  ;;  %v4093_v5 = vmul.f32 %v16193_v0, %v2564_v41  ;;  %v16409_v1 = vld [vmem:[#allocation117_spill] sm:$0xff] }
 0x4c5   :  { %v4095_v40 = vmul.f32 %v16193_v0, %v2629_v7  ;;  %v4678_v33 = vmul.f32 %v11672_v37, %v13996_v32  ;;  %v5672_v27 = vrot.slane %v5399_v17, 1  ;;  %v5940_v43 = vmul.f32 %v16290_v38, %v14020_v58 }
 0x4c6   :  { %v3831_v46 = vadd.f32 %v3687_v29, %v3295_v22  ;;  %v3968_v16 = vadd.f32 %v3904_v60, %v13985_v12  ;;  %v4393_v31 = vsel %vm3019_vm4, %v4391_v15, %v4392_v54  ;;  %v4981_v61 = vrot.slane %v14039_v39, 2  ;;  %v16410_v22 = vld [vmem:[#allocation72_spill] sm:$0xff] }
 0x4c7   :  { %v14101_v53 = vadd.f32 %v6211_v26, %v5820_v47  ;;  %v5280_v9 = vadd.f32 %v5220_v6, %v5145_v2  ;;  %v5282_v13 = vadd.f32 %v16408_v4, %v5147_v14  ;;  %v3906_v63 = vmul.f32 %v16196_v10, %v2564_v41 }
 0x4c8   :  { %v4682_v32 = vmul.f32 %v11672_v37, %v2564_v41  ;;  %v4684_v24 = vmul.f32 %v11672_v37, %v2629_v7  ;;  %v6212_v18 = vrot.slane %v5938_v28, 2  ;;  %v4397_v58 = vrot.slane %v4093_v5, 1  ;;  %v16411_v5 = vld [vmem:[#allocation109_spill] sm:$0xff] }
 0x4c9   :  { %16407 = vst [vmem:[#allocation124_spill] sm:$0xff] %v14101_v53  ;;  %v4398_v30 = vrot.slane %v4095_v40, 1  ;;  %v4980_v25 = vrot.slane %v4678_v33, 2  ;;  %v5673_v12 = vsel %vm3019_vm4, %v5671_v57, %v5672_v27  ;;  %v6213_v54 = vrot.slane %v5940_v43, 2  ;;  %v16413_v33 = vld [vmem:[#allocation88_spill] sm:$0xff] }
 0x4ca   :  { %v3970_v15 = vadd.f32 %v3906_v63, %v3831_v46  ;;  %v4557_v39 = vadd.f32 %v4393_v31, %v3968_v16  ;;  %10013 = vpow2.f32 %v13964_v3  ;;  %v8991_v47 = vmul.f32 -1.442695, %v14101_v53  ;;  %v16414_v43 = vld [vmem:[#allocation76_spill] sm:$0xff]  ;;  %v16416_v63 = vld [vmem:[#allocation107_spill] sm:$0xff]  ;;  %v16477_v53 = vld [vmem:[#allocation113_spill] sm:$0xff] }
 0x4cb   :  { %v5821_v45 = vadd.f32 %v5673_v12, %v5280_v9  ;;  %v2113_v17 = vadd.f32 1.0, %v16409_v1  ;;  %10015 = vpow2.f32 %v14016_v62  ;;  %v5823_v26 = vadd.f32 %v16410_v22, %v5282_v13  ;;  %v16426_v1 = vld [vmem:[#allocation91_spill] sm:$0xff] }
 0x4cc   :  { %v4986_v55 = vrot.slane %v4682_v32, 2  ;;  %v4987_v2 = vrot.slane %v4684_v24, 2  ;;  %v4399_v6 = vsel %vm3019_vm4, %v4397_v58, %v4398_v30  ;;  %v4982_v14 = vsel %vm3555_vm5, %v4980_v25, %v4981_v61  ;;  %v16418_v30 = vld [vmem:[#allocation81_spill] sm:$0xff]  ;;  %v16419_v25 = vld [vmem:[#allocation90_spill] sm:$0xff] }
 0x4cd   :  { %v5398_v57 = vmul.f32 %v11735_v59, %v2564_v41  ;;  %v5400_v28 = vmul.f32 %v11735_v59, %v2629_v7  ;;  %10017 = vpow2.f32 %v8990_v19  ;;  %v6214_v3 = vsel %vm3555_vm5, %v6212_v18, %v6213_v54  ;;  %v16417_v18 = vld [vmem:[#allocation115_spill] sm:$0xff]  ;;  %v16421_v54 = vld [vmem:[#allocation69_spill] sm:$0xff] }
 0x4ce   :  { %v4559_v60 = vadd.f32 %v4399_v6, %v3970_v15  ;;  %v5146_v29 = vadd.f32 %v4982_v14, %v4557_v39  ;;  %v6608_v40 = vadd.f32 1.0, %v16411_v5  ;;  %10019 = vpow2.f32 %v8991_v47  ;;  %v16422_v39 = vld [vmem:[#allocation111_spill] sm:$0xff]  ;;  %v16431_v5 = vld [vmem:[#allocation85_spill] sm:$0xff] }
 0x4cf   :  { %v14119_v62 = vadd.f32 %v6214_v3, %v5821_v45  ;;  %v8928_v27 = vmul.f32 -1.442695, %v16413_v33  ;;  %v14123_v46 = vadd.f32 %v16414_v43, %v5823_v26  ;;  %v4988_v16 = vsel %vm3555_vm5, %v4986_v55, %v4987_v2  ;;  %v16423_v47 = vld [vmem:[#allocation79_spill] sm:$0xff]  ;;  %v16424_v45 = vld [vmem:[#allocation100_spill] sm:$0xff] }
 0x4d0   :  { %v5221_v31 = vmul.f32 %v16369_v34, %v2564_v41  ;;  %v5939_v19 = vmul.f32 %v16370_v11, %v2564_v41  ;;  %v5674_v61 = vrot.slane %v5398_v57, 1  ;;  %v5675_v9 = vrot.slane %v5400_v28, 1  ;;  %v16429_v28 = vld [vmem:[#allocation71_spill] sm:$0xff] }
 0x4d1   :  { %16412 = vst [vmem:[#allocation117_spill] sm:$0xff] %v14119_v62  ;;  %16415 = vst [vmem:[#allocation109_spill] sm:$0xff] %v14123_v46  ;;  %v5941_v13 = vmul.f32 %v16370_v11, %v2629_v7  ;;  %10021 = vrcp.f32 %v2113_v17  ;;  %v5148_v32 = vadd.f32 %v4988_v16, %v4559_v60  ;;  %v8929_v58 = vmul.f32 -1.442695, %v16417_v18  ;;  %v16427_v17 = vld [vmem:[#allocation102_spill] sm:$0xff]  ;;  %v16432_v16 = vld [vmem:[#allocation116_spill] sm:$0xff] }
 0x4d2   :  { %10023 = vrcp.f32 %v16416_v63  ;;  %v5281_v24 = vadd.f32 %v5221_v31, %v5146_v29  ;;  %v14133_v12 = vmul.f32 %v16419_v25, %v16418_v30  ;;  %v6609_v15 = vadd.f32 1.0, %v16421_v54  ;;  %v16430_v60 = vld [vmem:[#allocation118_spill] sm:$0xff]  ;;  %v16439_v54 = vld [vmem:[#allocation103_spill] sm:$0xff] }
 0x4d3   :  { %10025 = vrcp.f32 %v6608_v40  ;;  %v2304_v41 = vmul.f32 %v14013_v20, %v16422_v39  ;;  %v14140_v7 = vmul.f32 %v16424_v45, %v16423_v47  ;;  %v14144_v26 = vmul.f32 %v16427_v17, %v16426_v1  ;;  %v16433_v30 = vld [vmem:[#allocation98_spill] sm:$0xff]  ;;  %v16441_v45 = vld [vmem:[#allocation51_spill] sm:$0xff] }
 0x4d4   :  { %16420 = vst [vmem:[#allocation88_spill] sm:$0xff] %v14133_v12  ;;  %v8992_v55 = vmul.f32 -1.442695, %v14119_v62  ;;  %10027 = vpow2.f32 %v8928_v27  ;;  %v8994_v2 = vmul.f32 -1.442695, %v14123_v46  ;;  %v5676_v6 = vsel %vm3019_vm4, %v5674_v61, %v5675_v9  ;;  %v16434_v61 = vld [vmem:[#allocation86_spill] sm:$0xff] }
 0x4d5   :  { %16425 = vst [vmem:[#allocation107_spill] sm:$0xff] %v14140_v7  ;;  %16428 = vst [vmem:[#allocation115_spill] sm:$0xff] %v14144_v26  ;;  %v6215_v14 = vrot.slane %v5939_v19, 2  ;;  %v6216_v57 = vrot.slane %v5941_v13, 2  ;;  %v5283_v3 = vadd.f32 %v16429_v28, %v5148_v32  ;;  %v5822_v20 = vadd.f32 %v5676_v6, %v5281_v24  ;;  %v16435_v19 = vld [vmem:[#allocation45_spill] sm:$0xff]  ;;  %v16437_v13 = vld [vmem:[#allocation63_spill] sm:$0xff] }
 0x4d6   :  { %v2114_v29 = vadd.f32 1.0, %v16430_v60  ;;  %10029 = vpow2.f32 %v8929_v58  ;;  %v6845_v40 = vadd.f32 %v16431_v5, %v14133_v12  ;;  %v6610_v31 = vadd.f32 1.0, %v16432_v16  ;;  %v16438_v58 = vld [vmem:[#allocation80_spill] sm:$0xff]  ;;  %v16444_v16 = vld [vmem:[#allocation105_spill] sm:$0xff] }
 0x4d7   :  { %10031 = vrcp.f32 %v6609_v15  ;;  %v2434_v63 = vrot.slane %v2304_v41, 7  ;;  %v10014_v27 = vpop.eup %10013  ;;  %v6852_v25 = vadd.f32 %v16433_v30, %v14140_v7  ;;  %v14158_v9 = vmul.f32 %v16435_v19, %v16434_v61  ;;  %v16449_v61 = vld [vmem:[#allocation41_spill] sm:$0xff]  ;;  %v16464_v7 = vld [vmem:[#allocation92_spill] sm:$0xff] }
 0x4d8   :  { %v6611_v32 = vadd.f32 1.0, %v16437_v13  ;;  %10033 = vpow2.f32 %v8992_v55  ;;  %v10016_v24 = vpop.eup %10015  ;;  %v14163_v39 = vmul.f32 %v16439_v54, %v16438_v58  ;;  %v6612_v15 = vadd.f32 1.0, %v13929_v52 }
 0x4d9   :  { %16436 = vst [vmem:[#allocation81_spill] sm:$0xff] %v14158_v9  ;;  %10035 = vpow2.f32 %v8994_v2  ;;  %v6217_v41 = vsel %vm3555_vm5, %v6215_v14, %v6216_v57  ;;  %v6846_v47 = vadd.f32 %v6845_v40, %v14144_v26  ;;  %v5824_v1 = vadd.f32 %v16441_v45, %v5283_v3  ;;  %v16443_v2 = vld [vmem:[#allocation59_spill] sm:$0xff]  ;;  %v16446_v57 = vld [vmem:[#allocation57_spill] sm:$0xff] }
 0x4da   :  { %16440 = vst [vmem:[#allocation90_spill] sm:$0xff] %v14163_v39  ;;  %v14169_v17 = vadd.f32 %v6217_v41, %v5822_v20  ;;  %10037 = vrcp.f32 %v2114_v29  ;;  %v10018_v6 = vpop.eup %10017  ;;  %v6613_v55 = vadd.f32 1.0, %v13974_v36  ;;  %v14173_v60 = vsel %vm2515_vm3, 0.0, %v2434_v63  ;;  %v16447_v40 = vld [vmem:[#allocation43_spill] sm:$0xff] }
 0x4db   :  { %10039 = vrcp.f32 %v6610_v31  ;;  %v2630_v5 = vsel %vm2515_vm3, %v2434_v63, 0.0  ;;  %v10020_v52 = vpop.eup %10019  ;;  %v14178_v14 = vmul.f32 %v16444_v16, %v16443_v2  ;;  %v14182_v3 = vmul.f32 %v16447_v40, %v16446_v57  ;;  %v16460_v26 = vld [vmem:[#allocation99_spill] sm:$0xff] }
 0x4dc   :  { %16442 = vst [vmem:[#allocation69_spill] sm:$0xff] %v14169_v17  ;;  %10041 = vrcp.f32 %v6611_v32  ;;  %v6614_v20 = vadd.f32 1.0, %v10014_v27  ;;  %v6853_v29 = vadd.f32 %v6852_v25, %v14158_v9  ;;  %v6847_v36 = vadd.f32 %v6846_v47, %v14163_v39  ;;  %v16451_v32 = vld [vmem:[#allocation67_spill] sm:$0xff]  ;;  %v16452_v27 = vld [vmem:[#allocation66_spill] sm:$0xff] }
 0x4dd   :  { %16445 = vst [vmem:[#allocation111_spill] sm:$0xff] %v14178_v14  ;;  %16448 = vst [vmem:[#allocation79_spill] sm:$0xff] %v14182_v3  ;;  %10043 = vrcp.f32 %v6612_v15  ;;  %v6615_v31 = vadd.f32 1.0, %v10016_v24  ;;  %v14187_v63 = vadd.f32 %v16449_v61, %v5824_v1  ;;  %v8993_v19 = vmul.f32 -1.442695, %v14169_v17  ;;  %v16454_v25 = vld [vmem:[#allocation87_spill] sm:$0xff] }
 0x4de   :  { %v10022_v30 = vpop.eup %10021  ;;  %v2875_v13 = vmul.f32 %v16345_v23, %v14173_v60  ;;  %v2877_v58 = vmul.f32 %v16345_v23, %v2630_v5  ;;  %v14195_v41 = vadd.f32 %v16452_v27, %v16451_v32  ;;  %v16455_v47 = vld [vmem:[#allocation94_spill] sm:$0xff]  ;;  %10045 = vrcp.f32 %v6613_v55  ;;  %v16457_v24 = vld [vmem:[#allocation119_spill] sm:$0xff] }
 0x4df   :  { %16450 = vst [vmem:[#allocation100_spill] sm:$0xff] %v14187_v63  ;;  %v10024_v54 = vpop.eup %10023  ;;  %v14199_v15 = vmul.f32 %v16455_v47, %v16454_v25  ;;  %v2115_v1 = vadd.f32 1.0, %v16457_v24  ;;  %v14203_v16 = vadd.f32 %v6847_v36, %v14182_v3  ;;  %v14206_v57 = vadd.f32 %v6853_v29, %v14178_v14  ;;  %v16461_v27 = vld [vmem:[#allocation42_spill] sm:$0xff]  ;;  %v16463_v47 = vld [vmem:[#allocation112_spill] sm:$0xff] }
 0x4e0   :  { %16453 = vst [vmem:[#allocation91_spill] sm:$0xff] %v14195_v41  ;;  %v10026_v2 = vpop.eup %10025  ;;  %10047 = vrcp.f32 %v6614_v20  ;;  %v6616_v40 = vadd.f32 1.0, %v10018_v6  ;;  %v14210_v12 = vmul.f32 %v16461_v27, %v16460_v26  ;;  %v6617_v25 = vadd.f32 1.0, %v10020_v52  ;;  %v16465_v29 = vld [vmem:[#allocation108_spill] sm:$0xff]  ;;  %v16468_v52 = vld [vmem:[#allocation55_spill] sm:$0xff] }
 0x4e1   :  { %16456 = vst [vmem:[#allocation102_spill] sm:$0xff] %v14199_v15  ;;  %16458 = vst [vmem:[#allocation118_spill] sm:$0xff] %v14203_v16  ;;  %v10028_v39 = vpop.eup %10027  ;;  %10049 = vrcp.f32 %v6615_v31  ;;  %v2305_v55 = vmul.f32 %v10022_v30, %v16463_v47  ;;  %v8995_v24 = vmul.f32 -1.442695, %v14187_v63  ;;  %v3152_v9 = vrot.slane %v2875_v13, 1  ;;  %v16470_v30 = vld [vmem:[#allocation97_spill] sm:$0xff] }
 0x4e2   :  { %16459 = vst [vmem:[#allocation85_spill] sm:$0xff] %v14206_v57  ;;  %16462 = vst [vmem:[#allocation116_spill] sm:$0xff] %v14210_v12  ;;  %10051 = vpow2.f32 %v8993_v19  ;;  %v3153_v36 = vrot.slane %v2877_v58, 1  ;;  %v14216_v14 = vmul.f32 %v16465_v29, %v16464_v7  ;;  %v4096_v6 = vmul.f32 %v11518_v8, %v14173_v60  ;;  %v1847_v7 = vpop.f32.mrf.mxu1  ;;  %v16478_v57 = vld [vmem:[#allocation38_spill] sm:$0xff] }
 0x4e3   :  { %v10030_v3 = vpop.eup %10029  ;;  %v4098_v26 = vmul.f32 %v11518_v8, %v2630_v5  ;;  %10053 = vrcp.f32 %v2115_v1  ;;  %v14224_v31 = vmul.f32 %v10024_v54, %v16468_v52  ;;  %v14227_v19 = vmul.f32 %v10026_v2, %v16470_v30 }
 0x4e4   :  { %16466 = vst [vmem:[#allocation98_spill] sm:$0xff] %v14216_v14  ;;  %v14221_v20 = vpop.eup %10031  ;;  %10055 = vrcp.f32 %v6616_v40  ;;  %v3411_v13 = vmul.f32 %v16358_v48, %v14173_v60  ;;  %v3413_v27 = vmul.f32 %v16358_v48, %v2630_v5  ;;  %v2435_v47 = vrot.slane %v2305_v55, 7  ;;  %v1849_v63 = vpop.f32.mrf.mxu1 }
 0x4e5   :  { %16467 = vst [vmem:[#allocation86_spill] sm:$0xff] %v14221_v20  ;;  %16469 = vst [vmem:[#allocation45_spill] sm:$0xff] %v14224_v31  ;;  %v10034_v58 = vpop.eup %10033  ;;  %10057 = vrcp.f32 %v6617_v25  ;;  %v2116_v29 = vadd.f32 1.0, %v10028_v39  ;;  %v3154_v32 = vsel %vm3019_vm4, %v3152_v9, %v3153_v36  ;;  %v3907_v54 = vmul.f32 %v16278_v44, %v14173_v60  ;;  %v16473_v9 = vld [vmem:[#allocation37_spill] sm:$0xff] }
 0x4e6   :  { %16471 = vst [vmem:[#allocation63_spill] sm:$0xff] %v14227_v19  ;;  %v10036_v1 = vpop.eup %10035  ;;  %10059 = vpow2.f32 %v8995_v24  ;;  %v2117_v2 = vadd.f32 1.0, %v10030_v3  ;;  %v4400_v40 = vrot.slane %v4096_v6, 1  ;;  %v4401_v30 = vrot.slane %v4098_v26, 1  ;;  %v16488_v19 = vld [vmem:[#allocation58_spill] sm:$0xff] }
 0x4e7   :  { %v10038_v52 = vpop.eup %10037  ;;  %v4685_v41 = vmul.f32 %v16277_v21, %v14173_v60  ;;  %v4687_v25 = vmul.f32 %v16277_v21, %v2630_v5  ;;  %v6618_v55 = vadd.f32 1.0, %v10034_v58  ;;  %v2702_v39 = vmul.f32 %v16357_v42, %v14173_v60  ;;  %v16476_v58 = vld [vmem:[#allocation46_spill] sm:$0xff] }
 0x4e8   :  { %v14238_v15 = vpop.eup %10039  ;;  %v3688_v24 = vrot.slane %v3411_v13, 2  ;;  %v14243_v36 = vadd.f32 %v1847_v7, %v16473_v9  ;;  %v6620_v6 = vadd.f32 1.0, %v10036_v1  ;;  %v3689_v26 = vrot.slane %v3413_v27, 2  ;;  %v1853_v13 = vpop.f32.mrf.mxu1 }
 0x4e9   :  { %16472 = vst [vmem:[#allocation80_spill] sm:$0xff] %v14238_v15  ;;  %v14245_v3 = vpop.eup %10041  ;;  %v2566_v46 = vsel %vm2515_vm3, 0.0, %v2435_v47  ;;  %v2631_v17 = vsel %vm2515_vm3, %v2435_v47, 0.0  ;;  %v3296_v16 = vadd.f32 %v3154_v32, %v2702_v39  ;;  %v3971_v62 = vadd.f32 %v3907_v54, %v16476_v58  ;;  %v16481_v47 = vld [vmem:[#allocation47_spill] sm:$0xff] }
 0x4ea   :  { %16474 = vst [vmem:[#allocation103_spill] sm:$0xff] %v14245_v3  ;;  %v14249_v5 = vpop.eup %10043  ;;  %v2306_v60 = vmul.f32 %v10038_v52, %v16477_v53  ;;  %10061 = vrcp.f32 %v2116_v29  ;;  %v4402_v7 = vsel %vm3019_vm4, %v4400_v40, %v4401_v30  ;;  %v4989_v56 = vrot.slane %v4685_v41, 2 }
 0x4eb   :  { %16475 = vst [vmem:[#allocation59_spill] sm:$0xff] %v14249_v5  ;;  %v4990_v31 = vrot.slane %v4687_v25, 2  ;;  %v14255_v1 = vadd.f32 %v1849_v63, %v16478_v57  ;;  %v14257_v27 = vpop.eup %10045  ;;  %10063 = vrcp.f32 %v6618_v55  ;;  %v2876_v12 = vmul.f32 %v16481_v47, %v2566_v46  ;;  %v1855_v25 = vpop.f32.mrf.mxu1 }
 0x4ec   :  { %16480 = vst [vmem:[#allocation57_spill] sm:$0xff] %v14257_v27  ;;  %v2878_v32 = vmul.f32 %v16481_v47, %v2631_v17  ;;  %v8930_v54 = vmul.f32 -1.442695, %v14243_v36  ;;  %10065 = vrcp.f32 %v6620_v6  ;;  %v3690_v53 = vsel %vm3555_vm5, %v3688_v24, %v3689_v26 }
 0x4ed   :  { %16479 = vst [vmem:[#allocation105_spill] sm:$0xff] %v14255_v1  ;;  %v14262_v39 = vpop.eup %10047  ;;  %v4097_v41 = vmul.f32 %v16193_v0, %v2566_v46  ;;  %v4099_v29 = vmul.f32 %v16193_v0, %v2631_v17  ;;  %v14269_v52 = vadd.f32 %v3690_v53, %v3296_v16  ;;  %v4560_v40 = vadd.f32 %v4402_v7, %v3971_v62 }
 0x4ee   :  { %16482 = vst [vmem:[#allocation43_spill] sm:$0xff] %v14262_v39  ;;  %v14267_v63 = vpop.eup %10049  ;;  %v2436_v30 = vrot.slane %v2306_v60, 7  ;;  %10067 = vrcp.f32 %v2117_v2  ;;  %v4991_v58 = vsel %vm3555_vm5, %v4989_v56, %v4990_v31  ;;  %v3412_v39 = vmul.f32 %v11627_v51, %v2566_v46 }
 0x4ef   :  { %16483 = vst [vmem:[#allocation66_spill] sm:$0xff] %v14267_v63  ;;  %v10052_v55 = vpop.eup %10051  ;;  %v3414_v6 = vmul.f32 %v11627_v51, %v2631_v17  ;;  %v8931_v24 = vmul.f32 -1.442695, %v14255_v1  ;;  %v3155_v27 = vrot.slane %v2876_v12, 1  ;;  %v3156_v61 = vrot.slane %v2878_v32, 1 }
 0x4f0   :  { %v10054_v26 = vpop.eup %10053  ;;  %v3908_v63 = vmul.f32 %v16196_v10, %v2566_v46  ;;  %10069 = vpow2.f32 %v8930_v54  ;;  %v4403_v62 = vrot.slane %v4097_v41, 1  ;;  %v4404_v2 = vrot.slane %v4099_v29, 1  ;;  %v1857_v29 = vpop.f32.mrf.mxu1 }
 0x4f1   :  { %v14276_v16 = vpop.eup %10055  ;;  %v14279_v60 = vadd.f32 %v1853_v13, %v16473_v9  ;;  %v14282_v56 = vadd.f32 %v1855_v25, %v16478_v57  ;;  %v6619_v7 = vadd.f32 1.0, %v10052_v55  ;;  %v5149_v53 = vadd.f32 %v4991_v58, %v4560_v40 }
 0x4f2   :  { %16484 = vst [vmem:[#allocation87_spill] sm:$0xff] %v14276_v16  ;;  %v14284_v31 = vpop.eup %10057  ;;  %v2567_v12 = vsel %vm2515_vm3, 0.0, %v2436_v30  ;;  %v2632_v32 = vsel %vm2515_vm3, %v2436_v30, 0.0  ;;  %v3691_v54 = vrot.slane %v3412_v39, 2  ;;  %v3692_v3 = vrot.slane %v3414_v6, 2  ;;  %v16487_v16 = vld [vmem:[#allocation114_spill] sm:$0xff] }
 0x4f3   :  { %16485 = vst [vmem:[#allocation94_spill] sm:$0xff] %v14279_v60  ;;  %16486 = vst [vmem:[#allocation119_spill] sm:$0xff] %v14284_v31  ;;  %v10060_v5 = vpop.eup %10059  ;;  %v2307_v41 = vmul.f32 %v10054_v26, %v16487_v16  ;;  %10071 = vpow2.f32 %v8931_v24  ;;  %v3157_v13 = vsel %vm3019_vm4, %v3155_v27, %v3156_v61  ;;  %v3972_v25 = vadd.f32 %v3908_v63, %v16488_v19 }
 0x4f4   :  { %v14292_v14 = vmul.f32 %v11672_v37, %v2566_v46  ;;  %v4688_v40 = vmul.f32 %v11672_v37, %v2631_v17  ;;  %v2703_v55 = vmul.f32 %v11647_v49, %v2566_v46  ;;  %v4405_v30 = vsel %vm3019_vm4, %v4403_v62, %v4404_v2 }
 0x4f5   :  { %v2879_v39 = vmul.f32 %v16345_v23, %v2567_v12  ;;  %v2881_v58 = vmul.f32 %v16345_v23, %v2632_v32  ;;  %v6621_v6 = vadd.f32 1.0, %v10060_v5  ;;  %10073 = vrcp.f32 %v6619_v7 }
 0x4f6   :  { %v14300_v24 = vmul.f32 -1.442695, %v14279_v60  ;;  %v14303_v61 = vadd.f32 %v1857_v29, %v16473_v9  ;;  %v3297_v27 = vadd.f32 %v3157_v13, %v2703_v55  ;;  %v3693_v17 = vsel %vm3555_vm5, %v3691_v54, %v3692_v3 }
 0x4f7   :  { %v10062_v19 = vpop.eup %10061  ;;  %v4100_v46 = vmul.f32 %v11518_v8, %v2567_v12  ;;  %v4102_v63 = vmul.f32 %v11518_v8, %v2632_v32  ;;  %v4561_v26 = vadd.f32 %v4405_v30, %v3972_v25  ;;  %v4992_v16 = vrot.slane %v14292_v14, 2 }
 0x4f8   :  { %v4993_v62 = vrot.slane %v4688_v40, 2  ;;  %v2437_v5 = vrot.slane %v2307_v41, 7  ;;  %v14309_v2 = vpop.eup %10063  ;;  %v3158_v7 = vrot.slane %v2879_v39, 1  ;;  %v3159_v31 = vrot.slane %v2881_v58, 1 }
 0x4f9   :  { %16489 = vst [vmem:[#allocation99_spill] sm:$0xff] %v14309_v2  ;;  %v5401_v29 = vmul.f32 %v11587_v50, %v2567_v12  ;;  %v5403_v45 = vmul.f32 %v11587_v50, %v2632_v32  ;;  %v14313_v13 = vpop.eup %10065  ;;  %v3415_v3 = vmul.f32 %v16358_v48, %v2567_v12  ;;  %v3417_v54 = vmul.f32 %v16358_v48, %v2632_v32 }
 0x4fa   :  { %16490 = vst [vmem:[#allocation42_spill] sm:$0xff] %v14313_v13  ;;  %v3909_v25 = vmul.f32 %v16278_v44, %v2567_v12  ;;  %v2308_v14 = vmul.f32 %v10062_v19, %v16413_v33  ;;  %v4406_v41 = vrot.slane %v4100_v46, 1  ;;  %v4407_v55 = vrot.slane %v4102_v63, 1 }
 0x4fb   :  { %v14319_v40 = vpop.eup %10067  ;;  %v4689_v30 = vmul.f32 %v16277_v21, %v2567_v12  ;;  %v4691_v39 = vmul.f32 %v16277_v21, %v2632_v32  ;;  %v2704_v58 = vmul.f32 %v16357_v42, %v2567_v12  ;;  %v5222_v2 = vmul.f32 %v16363_v35, %v2567_v12 }
 0x4fc   :  { %v3973_v13 = vadd.f32 %v3909_v25, %v14269_v52  ;;  %v5942_v15 = vmul.f32 %v16290_v38, %v2567_v12  ;;  %v3160_v33 = vsel %vm3019_vm4, %v3158_v7, %v3159_v31  ;;  %v5677_v19 = vrot.slane %v5401_v29, 1 }
 0x4fd   :  { %v14327_v20 = vpop.eup %10069  ;;  %v5678_v28 = vrot.slane %v5403_v45, 1  ;;  %v5944_v46 = vmul.f32 %v16290_v38, %v2632_v32  ;;  %v3694_v63 = vrot.slane %v3415_v3, 2  ;;  %v5284_v43 = vadd.f32 %v5222_v2, %v5149_v53 }
 0x4fe   :  { %v14332_v22 = vsel %vm2515_vm3, 0.0, %v2437_v5  ;;  %v2633_v4 = vsel %vm2515_vm3, %v2437_v5, 0.0  ;;  %v3695_v52 = vrot.slane %v3417_v54, 2  ;;  %v4408_v25 = vsel %vm3019_vm4, %v4406_v41, %v4407_v55 }
 0x4ff   :  { %v4995_v60 = vrot.slane %v4689_v30, 2  ;;  %v4996_v12 = vrot.slane %v4691_v39, 2  ;;  %10075 = vrcp.f32 %v6621_v6  ;;  %v3298_v31 = vadd.f32 %v3160_v33, %v2704_v58 }
 0x500   :  { %v14336_v1 = vpop.eup %10071  ;;  %v4562_v7 = vadd.f32 %v4408_v25, %v3973_v13  ;;  %v6218_v45 = vrot.slane %v5942_v15, 2  ;;  %v5679_v32 = vsel %vm3019_vm4, %v5677_v19, %v5678_v28  ;;  %v6219_v29 = vrot.slane %v5944_v46, 2 }
 0x501   :  { %v2880_v53 = vmul.f32 %v16481_v47, %v14332_v22  ;;  %v2882_v2 = vmul.f32 %v16481_v47, %v2633_v4  ;;  %v3833_v5 = vadd.f32 %v3693_v17, %v3297_v27  ;;  %v4994_v3 = vsel %vm3555_vm5, %v4992_v16, %v4993_v62 }
 0x502   :  { %v5825_v54 = vadd.f32 %v5679_v32, %v5284_v43  ;;  %v2438_v41 = vrot.slane %v2308_v14, 7  ;;  %v14343_v55 = vpop.eup %10073  ;;  %v5150_v30 = vadd.f32 %v4994_v3, %v4561_v26  ;;  %v3696_v6 = vsel %vm3555_vm5, %v3694_v63, %v3695_v52 }
 0x503   :  { %16491 = vst [vmem:[#allocation112_spill] sm:$0xff] %v14343_v55  ;;  %v4997_v15 = vsel %vm3555_vm5, %v4995_v60, %v4996_v12  ;;  %v3416_v28 = vmul.f32 %v11627_v51, %v14332_v22  ;;  %v14349_v13 = vadd.f32 %v3696_v6, %v3298_v31  ;;  %v5402_v27 = vmul.f32 %v11735_v59, %v14332_v22 }
 0x504   :  { %v5151_v39 = vadd.f32 %v4997_v15, %v4562_v7  ;;  %v5404_v17 = vmul.f32 %v11735_v59, %v2633_v4  ;;  %v6220_v43 = vsel %vm3555_vm5, %v6218_v45, %v6219_v29  ;;  %v3161_v16 = vrot.slane %v2880_v53, 1 }
 0x505   :  { %v3162_v62 = vrot.slane %v2882_v2, 1  ;;  %v3418_v26 = vmul.f32 %v11627_v51, %v2633_v4  ;;  %v14356_v14 = vadd.f32 %v6220_v43, %v5825_v54  ;;  %v3910_v60 = vmul.f32 %v16196_v10, %v14332_v22 }
 0x506   :  { %v14361_v58 = vsel %vm2515_vm3, 0.0, %v2438_v41  ;;  %v14364_v33 = vsel %vm2515_vm3, %v2438_v41, 0.0  ;;  %v3697_v19 = vrot.slane %v3416_v28, 2  ;;  %v4101_v46 = vmul.f32 %v16193_v0, %v14332_v22 }
 0x507   :  { %16492 = vst [vmem:[#allocation92_spill] sm:$0xff] %v14356_v14  ;;  %v4103_v63 = vmul.f32 %v16193_v0, %v2633_v4  ;;  %v5943_v52 = vmul.f32 %v16370_v11, %v14332_v22  ;;  %v5223_v25 = vmul.f32 %v16369_v34, %v14332_v22  ;;  %v5680_v12 = vrot.slane %v5402_v27, 1 }
 0x508   :  { %v5681_v31 = vrot.slane %v5404_v17, 1  ;;  %v5945_v7 = vmul.f32 %v16370_v11, %v2633_v4  ;;  %v3163_v45 = vsel %vm3019_vm4, %v3161_v16, %v3162_v62  ;;  %v3698_v32 = vrot.slane %v3418_v26, 2 }
 0x509   :  { %v5405_v29 = vmul.f32 %v11587_v50, %v14361_v58  ;;  %v5407_v53 = vmul.f32 %v11587_v50, %v14364_v33  ;;  %v8996_v2 = vmul.f32 -1.442695, %v14356_v14  ;;  %v3974_v3 = vadd.f32 %v3910_v60, %v3833_v5 }
 0x50a   :  { %v4690_v54 = vmul.f32 %v11672_v37, %v14332_v22  ;;  %v5285_v41 = vadd.f32 %v5223_v25, %v5150_v30  ;;  %v4409_v6 = vrot.slane %v4101_v46, 1  ;;  %v4410_v15 = vrot.slane %v4103_v63, 1 }
 0x50b   :  { %v4692_v28 = vmul.f32 %v11672_v37, %v2633_v4  ;;  %v6221_v27 = vrot.slane %v5943_v52, 2  ;;  %v5682_v17 = vsel %vm3019_vm4, %v5680_v12, %v5681_v31  ;;  %v6222_v43 = vrot.slane %v5945_v7, 2 }
 0x50c   :  { %v5224_v16 = vmul.f32 %v16363_v35, %v14361_v58  ;;  %v2309_v62 = vmul.f32 %v14319_v40, %v16417_v18  ;;  %v14388_v26 = vpop.eup %10075  ;;  %v5683_v5 = vrot.slane %v5405_v29, 1  ;;  %v5684_v60 = vrot.slane %v5407_v53, 1 }
 0x50d   :  { %16493 = vst [vmem:[#allocation108_spill] sm:$0xff] %v14388_v26  ;;  %v5946_v30 = vmul.f32 %v16290_v38, %v14361_v58  ;;  %v5948_v4 = vmul.f32 %v16290_v38, %v14364_v33  ;;  %10077 = vpow2.f32 %v8996_v2  ;;  %v4998_v46 = vrot.slane %v4690_v54, 2 }
 0x50e   :  { %v5826_v63 = vadd.f32 %v5682_v17, %v5285_v41  ;;  %v5286_v52 = vadd.f32 %v5224_v16, %v5151_v39  ;;  %v4411_v25 = vsel %vm3019_vm4, %v4409_v6, %v4410_v15  ;;  %v4999_v12 = vrot.slane %v4692_v28, 2 }
 0x50f   :  { %v2883_v18 = vmul.f32 %v16345_v23, %v14361_v58  ;;  %v2885_v40 = vmul.f32 %v16345_v23, %v14364_v33  ;;  %v2705_v31 = vmul.f32 %v11647_v49, %v14332_v22  ;;  %v4563_v7 = vadd.f32 %v4411_v25, %v3974_v3 }
 0x510   :  { %v2439_v29 = vrot.slane %v2309_v62, 7  ;;  %v2118_v53 = vadd.f32 1.0, %v14327_v20  ;;  %v6223_v2 = vsel %vm3555_vm5, %v6221_v27, %v6222_v43  ;;  %v5685_v39 = vsel %vm3019_vm4, %v5683_v5, %v5684_v60 }
 0x511   :  { %v6224_v54 = vrot.slane %v5946_v30, 2  ;;  %v6225_v41 = vrot.slane %v5948_v4, 2  ;;  %v3299_v6 = vadd.f32 %v3163_v45, %v2705_v31  ;;  %v3699_v15 = vsel %vm3555_vm5, %v3697_v19, %v3698_v32 }
 0x512   :  { %v14405_v28 = vadd.f32 %v6223_v2, %v5826_v63  ;;  %v5827_v17 = vadd.f32 %v5685_v39, %v5286_v52  ;;  %v5000_v16 = vsel %vm3555_vm5, %v4998_v46, %v4999_v12  ;;  %v3164_v26 = vrot.slane %v2883_v18, 1  ;;  %v1859_v46 = vpop.f32.mrf.mxu1 }
 0x513   :  { %v3165_v22 = vrot.slane %v2885_v40, 1  ;;  %v3419_v3 = vmul.f32 %v16358_v48, %v14361_v58  ;;  %v5152_v20 = vadd.f32 %v5000_v16, %v4563_v7  ;;  %v3421_v27 = vmul.f32 %v16358_v48, %v14364_v33 }
 0x514   :  { %16494 = vst [vmem:[#allocation55_spill] sm:$0xff] %v14405_v28  ;;  %v4104_v43 = vmul.f32 %v11518_v8, %v14361_v58  ;;  %v4106_v19 = vmul.f32 %v11518_v8, %v14364_v33  ;;  %v6226_v45 = vsel %vm3555_vm5, %v6224_v54, %v6225_v41  ;;  %v14418_v32 = vsel %vm2515_vm3, 0.0, %v2439_v29  ;;  %v1863_v39 = vpop.f32.mrf.mxu1 }
 0x515   :  { %v14421_v62 = vsel %vm2515_vm3, %v2439_v29, 0.0  ;;  %10079 = vrcp.f32 %v2118_v53  ;;  %v8997_v5 = vmul.f32 -1.442695, %v14405_v28  ;;  %v2706_v60 = vmul.f32 %v16357_v42, %v14361_v58 }
 0x516   :  { %v4693_v30 = vmul.f32 %v16277_v21, %v14361_v58  ;;  %v14428_v4 = vadd.f32 %v6226_v45, %v5827_v17  ;;  %v3166_v63 = vsel %vm3019_vm4, %v3164_v26, %v3165_v22  ;;  %v3700_v52 = vrot.slane %v3419_v3, 2 }
 0x517   :  { %v3911_v25 = vmul.f32 %v16278_v44, %v14361_v58  ;;  %v4695_v12 = vmul.f32 %v16277_v21, %v14364_v33  ;;  %v3701_v18 = vrot.slane %v3421_v27, 2  ;;  %v5406_v40 = vmul.f32 %v11735_v59, %v14418_v32 }
 0x518   :  { %16495 = vst [vmem:[#allocation97_spill] sm:$0xff] %v14428_v4  ;;  %v5408_v31 = vmul.f32 %v11735_v59, %v14421_v62  ;;  %10081 = vpow2.f32 %v14300_v24  ;;  %v4412_v29 = vrot.slane %v4104_v43, 1  ;;  %v4413_v26 = vrot.slane %v4106_v19, 1 }
 0x519   :  { %v3975_v7 = vadd.f32 %v3911_v25, %v14349_v13  ;;  %v2119_v53 = vadd.f32 1.0, %v14336_v1  ;;  %10083 = vpow2.f32 %v8997_v5  ;;  %v3300_v58 = vadd.f32 %v3166_v63, %v2706_v60 }
 0x51a   :  { %v5001_v2 = vrot.slane %v4693_v30, 2  ;;  %v8998_v33 = vmul.f32 -1.442695, %v14428_v4  ;;  %v10078_v54 = vpop.eup %10077  ;;  %v5002_v41 = vrot.slane %v4695_v12, 2  ;;  %v2884_v17 = vmul.f32 %v16481_v47, %v14418_v32  ;;  %v1865_v30 = vpop.f32.mrf.mxu1 }
 0x51b   :  { %v2886_v24 = vmul.f32 %v16481_v47, %v14421_v62  ;;  %v5225_v13 = vmul.f32 %v16369_v34, %v14418_v32  ;;  %v5686_v16 = vrot.slane %v5406_v40, 1  ;;  %v5687_v22 = vrot.slane %v5408_v31, 1 }
 0x51c   :  { %v5947_v1 = vmul.f32 %v16370_v11, %v14418_v32  ;;  %v5949_v3 = vmul.f32 %v16370_v11, %v14421_v62  ;;  %v3835_v27 = vadd.f32 %v3699_v15, %v3299_v6  ;;  %v3702_v43 = vsel %vm3555_vm5, %v3700_v52, %v3701_v18 }
 0x51d   :  { %v5287_v19 = vadd.f32 %v5225_v13, %v5152_v20  ;;  %10085 = vrcp.f32 %v2119_v53  ;;  %v14454_v45 = vadd.f32 %v3702_v43, %v3300_v58  ;;  %v4414_v5 = vsel %vm3019_vm4, %v4412_v29, %v4413_v26 }
 0x51e   :  { %10087 = vpow2.f32 %v8998_v33  ;;  %v3420_v60 = vmul.f32 %v11627_v51, %v14418_v32  ;;  %v6622_v63 = vadd.f32 1.0, %v10078_v54  ;;  %v4564_v25 = vadd.f32 %v4414_v5, %v3975_v7  ;;  %v1867_v54 = vpop.f32.mrf.mxu1 }
 0x51f   :  { %v5003_v12 = vsel %vm3555_vm5, %v5001_v2, %v5002_v41  ;;  %v3167_v40 = vrot.slane %v2884_v17, 1  ;;  %v3168_v31 = vrot.slane %v2886_v24, 1  ;;  %v5688_v6 = vsel %vm3019_vm4, %v5686_v16, %v5687_v22 }
 0x520   :  { %v6227_v15 = vrot.slane %v5947_v1, 2  ;;  %v6228_v20 = vrot.slane %v5949_v3, 2  ;;  %v2707_v52 = vmul.f32 %v11647_v49, %v14418_v32  ;;  %v3422_v18 = vmul.f32 %v11627_v51, %v14421_v62 }
 0x521   :  { %v4105_v29 = vmul.f32 %v16193_v0, %v14418_v32  ;;  %v5828_v26 = vadd.f32 %v5688_v6, %v5287_v19  ;;  %v3703_v7 = vrot.slane %v3420_v60, 2  ;;  %v3912_v58 = vmul.f32 %v16196_v10, %v14418_v32 }
 0x522   :  { %v10080_v53 = vpop.eup %10079  ;;  %v8933_v2 = vmul.f32 -1.442695, %v14282_v56  ;;  %v14471_v33 = vadd.f32 %v1859_v46, %v16478_v57  ;;  %v4107_v41 = vmul.f32 %v16193_v0, %v14421_v62  ;;  %v8934_v24 = vmul.f32 -1.442695, %v14303_v61 }
 0x523   :  { %v2310_v17 = vmul.f32 %v10080_v53, %v14243_v36  ;;  %v14478_v13 = vadd.f32 %v1863_v39, %v16473_v9  ;;  %v3169_v16 = vsel %vm3019_vm4, %v3167_v40, %v3168_v31  ;;  %v4694_v22 = vmul.f32 %v11672_v37, %v14418_v32  ;;  %v1869_v31 = vpop.f32.mrf.mxu1 }
 0x524   :  { %v4696_v46 = vmul.f32 %v11672_v37, %v14421_v62  ;;  %v6229_v1 = vsel %vm3555_vm5, %v6227_v15, %v6228_v20  ;;  %v3704_v43 = vrot.slane %v3422_v18, 2  ;;  %v3976_v19 = vadd.f32 %v3912_v58, %v3835_v27 }
 0x525   :  { %v10082_v3 = vpop.eup %10081  ;;  %v4415_v5 = vrot.slane %v4105_v29, 1  ;;  %v14486_v36 = vadd.f32 %v6229_v1, %v5828_v26  ;;  %v2440_v60 = vrot.slane %v2310_v17, 7  ;;  %10089 = vpow2.f32 %v8933_v2 }
 0x526   :  { %v8935_v39 = vmul.f32 -1.442695, %v14471_v33  ;;  %v14490_v40 = vadd.f32 %v1865_v30, %v16478_v57  ;;  %v14492_v32 = vpop.eup %10083  ;;  %v3301_v6 = vadd.f32 %v3169_v16, %v2707_v52  ;;  %v4416_v62 = vrot.slane %v4107_v41, 1 }
 0x527   :  { %16496 = vst [vmem:[#allocation37_spill] sm:$0xff] %v14486_v36  ;;  %16497 = vst [vmem:[#allocation46_spill] sm:$0xff] %v14492_v32  ;;  %10091 = vpow2.f32 %v8934_v24  ;;  %v8936_v15 = vmul.f32 -1.442695, %v14478_v13  ;;  %v5004_v20 = vrot.slane %v4694_v22, 2  ;;  %v5005_v27 = vrot.slane %v4696_v46, 2 }
 0x528   :  { %v2120_v18 = vadd.f32 1.0, %v10082_v3  ;;  %v14496_v29 = vadd.f32 %v1867_v54, %v16473_v9  ;;  %10093 = vrcp.f32 %v6622_v63  ;;  %v5153_v26 = vadd.f32 %v5003_v12, %v4564_v25  ;;  %v16500_v54 = vld [vmem:[#allocation105_spill] sm:$0xff] }
 0x529   :  { %v8999_v53 = vmul.f32 -1.442695, %v14486_v36  ;;  %v14500_v30 = vadd.f32 %v1869_v31, %v16478_v57  ;;  %v3705_v52 = vsel %vm3555_vm5, %v3703_v7, %v3704_v43  ;;  %v2571_v2 = vsel %vm2515_vm3, 0.0, %v2440_v60 }
 0x52a   :  { %16498 = vst [vmem:[#allocation113_spill] sm:$0xff] %v14496_v29  ;;  %v10086_v58 = vpop.eup %10085  ;;  %10095 = vpow2.f32 %v8935_v39  ;;  %v8937_v41 = vmul.f32 -1.442695, %v14490_v40  ;;  %v14505_v24 = vadd.f32 %v3705_v52, %v3301_v6  ;;  %v4417_v9 = vsel %vm3019_vm4, %v4415_v5, %v4416_v62 }
 0x52b   :  { %16499 = vst [vmem:[#allocation38_spill] sm:$0xff] %v14500_v30  ;;  %v10088_v17 = vpop.eup %10087  ;;  %v2636_v63 = vsel %vm2515_vm3, %v2440_v60, 0.0  ;;  %10097 = vpow2.f32 %v8936_v15  ;;  %v4565_v25 = vadd.f32 %v4417_v9, %v3976_v19  ;;  %v5006_v57 = vsel %vm3555_vm5, %v5004_v20, %v5005_v27 }
 0x52c   :  { %10099 = vrcp.f32 %v2120_v18  ;;  %v8938_v12 = vmul.f32 -1.442695, %v14496_v29  ;;  %v5226_v7 = vmul.f32 %v16363_v35, %v2571_v2  ;;  %v2311_v16 = vmul.f32 %v10086_v58, %v16500_v54 }
 0x52d   :  { %10101 = vpow2.f32 %v8999_v53  ;;  %v8939_v22 = vmul.f32 -1.442695, %v14500_v30  ;;  %v6624_v46 = vadd.f32 1.0, %v10088_v17  ;;  %v5409_v1 = vmul.f32 %v11587_v50, %v2571_v2 }
 0x52e   :  { %v5411_v3 = vmul.f32 %v11587_v50, %v2636_v63  ;;  %10103 = vpow2.f32 %v8937_v41  ;;  %v2887_v43 = vmul.f32 %v16345_v23, %v2571_v2  ;;  %v2889_v19 = vmul.f32 %v16345_v23, %v2636_v63 }
 0x52f   :  { %v4108_v5 = vmul.f32 %v11518_v8, %v2571_v2  ;;  %v5288_v60 = vadd.f32 %v5226_v7, %v5153_v26  ;;  %v4110_v39 = vmul.f32 %v11518_v8, %v2636_v63  ;;  %v5689_v31 = vrot.slane %v5409_v1, 1 }
 0x530   :  { %v5690_v6 = vrot.slane %v5411_v3, 1  ;;  %v5950_v62 = vmul.f32 %v16290_v38, %v2571_v2  ;;  %v3913_v15 = vmul.f32 %v16278_v44, %v2571_v2  ;;  %v5952_v20 = vmul.f32 %v16290_v38, %v2636_v63 }
 0x531   :  { %v2441_v27 = vrot.slane %v2311_v16, 7  ;;  %10105 = vpow2.f32 %v8938_v12  ;;  %v4697_v18 = vmul.f32 %v16277_v21, %v2571_v2  ;;  %v4699_v53 = vmul.f32 %v16277_v21, %v2636_v63 }
 0x532   :  { %v5691_v58 = vsel %vm3019_vm4, %v5689_v31, %v5690_v6  ;;  %v6230_v52 = vrot.slane %v5950_v62, 2  ;;  %v10090_v26 = vpop.eup %10089  ;;  %v3170_v41 = vrot.slane %v2887_v43, 1  ;;  %v3171_v17 = vrot.slane %v2889_v19, 1 }
 0x533   :  { %v5829_v9 = vadd.f32 %v5691_v58, %v5288_v60  ;;  %v6231_v7 = vrot.slane %v5952_v20, 2  ;;  %v5154_v1 = vadd.f32 %v5006_v57, %v4565_v25  ;;  %v4418_v3 = vrot.slane %v4108_v5, 1 }
 0x534   :  { %v10092_v54 = vpop.eup %10091  ;;  %v4419_v28 = vrot.slane %v4110_v39, 1  ;;  %10107 = vpow2.f32 %v8939_v22  ;;  %v3423_v16 = vmul.f32 %v16358_v48, %v2571_v2  ;;  %v3425_v12 = vmul.f32 %v16358_v48, %v2636_v63 }
 0x535   :  { %v3977_v36 = vadd.f32 %v3913_v15, %v14454_v45  ;;  %v6232_v14 = vsel %vm3555_vm5, %v6230_v52, %v6231_v7  ;;  %v14530_v31 = vpop.eup %10093  ;;  %v5007_v6 = vrot.slane %v4697_v18, 2  ;;  %v5008_v43 = vrot.slane %v4699_v53, 2 }
 0x536   :  { %16501 = vst [vmem:[#allocation47_spill] sm:$0xff] %v14530_v31  ;;  %v14532_v19 = vadd.f32 %v6232_v14, %v5829_v9  ;;  %v2572_v60 = vsel %vm2515_vm3, 0.0, %v2441_v27  ;;  %10109 = vrcp.f32 %v6624_v46  ;;  %v3172_v57 = vsel %vm3019_vm4, %v3170_v41, %v3171_v17 }
 0x537   :  { %v14535_v25 = vpop.eup %10095  ;;  %v2121_v22 = vadd.f32 1.0, %v10090_v26  ;;  %v2122_v5 = vadd.f32 1.0, %v10092_v54  ;;  %v2708_v45 = vmul.f32 %v16357_v42, %v2571_v2  ;;  %v4420_v39 = vsel %vm3019_vm4, %v4418_v3, %v4419_v28  ;;  %v16504_v3 = vld [vmem:[#allocation94_spill] sm:$0xff] }
 0x538   :  { %16502 = vst [vmem:[#allocation114_spill] sm:$0xff] %v14532_v19  ;;  %v14538_v63 = vpop.eup %10097  ;;  %v9000_v62 = vmul.f32 -1.442695, %v14532_v19  ;;  %v2637_v14 = vsel %vm2515_vm3, %v2441_v27, 0.0  ;;  %v3706_v20 = vrot.slane %v3423_v16, 2  ;;  %v3707_v18 = vrot.slane %v3425_v12, 2 }
 0x539   :  { %v10100_v15 = vpop.eup %10099  ;;  %v4566_v53 = vadd.f32 %v4420_v39, %v3977_v36  ;;  %v5410_v46 = vmul.f32 %v11735_v59, %v2572_v60  ;;  %v14547_v52 = vadd.f32 %v3172_v57, %v2708_v45  ;;  %v5009_v26 = vsel %vm3555_vm5, %v5007_v6, %v5008_v43 }
 0x53a   :  { %v14545_v58 = vpop.eup %10101  ;;  %v2888_v2 = vmul.f32 %v16481_v47, %v2572_v60  ;;  %v5227_v28 = vmul.f32 %v16369_v34, %v2572_v60  ;;  %10111 = vpow2.f32 %v9000_v62  ;;  %v2890_v27 = vmul.f32 %v16481_v47, %v2637_v14 }
 0x53b   :  { %16503 = vst [vmem:[#allocation58_spill] sm:$0xff] %v14545_v58  ;;  %v14552_v41 = vpop.eup %10103  ;;  %v5412_v17 = vmul.f32 %v11735_v59, %v2637_v14  ;;  %v5692_v36 = vrot.slane %v5410_v46, 1  ;;  %v5951_v7 = vmul.f32 %v16370_v11, %v2572_v60  ;;  %v5953_v54 = vmul.f32 %v16370_v11, %v2637_v14 }
 0x53c   :  { %v5289_v9 = vadd.f32 %v5227_v28, %v5154_v1  ;;  %v2312_v16 = vmul.f32 %v10100_v15, %v16504_v3  ;;  %v14560_v12 = vsel %vm3555_vm5, %v3706_v20, %v3707_v18  ;;  %v14562_v6 = vadd.f32 %v5009_v26, %v4566_v53 }
 0x53d   :  { %v5693_v43 = vrot.slane %v5412_v17, 1  ;;  %10113 = vrcp.f32 %v2121_v22  ;;  %v3424_v45 = vmul.f32 %v11627_v51, %v2572_v60  ;;  %v6233_v39 = vrot.slane %v5951_v7, 2 }
 0x53e   :  { %v14564_v57 = vpop.eup %10105  ;;  %v6234_v62 = vrot.slane %v5953_v54, 2  ;;  %v2442_v1 = vrot.slane %v2312_v16, 7  ;;  %v3173_v46 = vrot.slane %v2888_v2, 1  ;;  %v3426_v28 = vmul.f32 %v11627_v51, %v2637_v14 }
 0x53f   :  { %v4109_v19 = vmul.f32 %v16193_v0, %v2572_v60  ;;  %v5694_v15 = vsel %vm3019_vm4, %v5692_v36, %v5693_v43  ;;  %v3174_v20 = vrot.slane %v2890_v27, 1  ;;  %v2709_v17 = vmul.f32 %v11647_v49, %v2572_v60 }
 0x540   :  { %v5830_v18 = vadd.f32 %v5694_v15, %v5289_v9  ;;  %v14571_v53 = vsel %vm2515_vm3, 0.0, %v2442_v1  ;;  %v2638_v22 = vsel %vm2515_vm3, %v2442_v1, 0.0  ;;  %v4111_v7 = vmul.f32 %v16193_v0, %v2637_v14 }
 0x541   :  { %v14574_v26 = vpop.eup %10107  ;;  %v4698_v2 = vmul.f32 %v11672_v37, %v2572_v60  ;;  %v4700_v54 = vmul.f32 %v11672_v37, %v2637_v14  ;;  %v3709_v3 = vrot.slane %v3424_v45, 2  ;;  %v3914_v36 = vmul.f32 %v16196_v10, %v2572_v60 }
 0x542   :  { %v6235_v27 = vsel %vm3555_vm5, %v6233_v39, %v6234_v62  ;;  %v14584_v9 = vmul.f32 %v16345_v23, %v14571_v53  ;;  %v3710_v16 = vrot.slane %v3426_v28, 2  ;;  %v2893_v1 = vmul.f32 %v16345_v23, %v2638_v22 }
 0x543   :  { %v14586_v43 = vadd.f32 %v6235_v27, %v5830_v18  ;;  %10115 = vrcp.f32 %v2122_v5  ;;  %v14589_v15 = vpop.eup %10109  ;;  %v3175_v31 = vsel %vm3019_vm4, %v3173_v46, %v3174_v20  ;;  %v3978_v14 = vadd.f32 %v3914_v36, %v14505_v24 }
 0x544   :  { %16506 = vst [vmem:[#allocation94_spill] sm:$0xff] %v14589_v15  ;;  %v4421_v45 = vrot.slane %v4109_v19, 1  ;;  %v14595_v60 = vmul.f32 %v16358_v48, %v14571_v53  ;;  %v4422_v39 = vrot.slane %v4111_v7, 1  ;;  %v5010_v62 = vrot.slane %v4698_v2, 2 }
 0x545   :  { %16505 = vst [vmem:[#allocation105_spill] sm:$0xff] %v14586_v43  ;;  %v5011_v55 = vrot.slane %v4700_v54, 2  ;;  %v14598_v28 = vadd.f32 1.0, %v14535_v25  ;;  %v3176_v18 = vrot.slane %v14584_v9, 1  ;;  %v14602_v5 = vmul.f32 %v16358_v48, %v2638_v22 }
 0x546   :  { %v14606_v46 = vmul.f32 %v11518_v8, %v14571_v53  ;;  %v14609_v24 = vadd.f32 1.0, %v14538_v63  ;;  %v9001_v19 = vmul.f32 -1.442695, %v14586_v43  ;;  %v3177_v20 = vrot.slane %v2893_v1, 1  ;;  %v9457_v63 = vld [vmem:[%s15865_s6 + $0x78] sm:$0xff]  }
 0x547   :  { %v5228_v7 = vmul.f32 %v16363_v35, %v14571_v53  ;;  %v5413_v25 = vmul.f32 %v11587_v50, %v14571_v53  ;;  %v10112_v2 = vpop.eup %10111  ;;  %v3303_v54 = vadd.f32 %v3175_v31, %v2709_v17  ;;  %v3711_v36 = vsel %vm3555_vm5, %v3709_v3, %v3710_v16  ;;  %v9458_v31 = vld [vmem:[%s15865_s6 + $0x38] sm:$0xff]   ;;  %9169 = vmatprep.subr.bf16.mxu0 %v9457_v63  ;;  %v9460_v63 = vld [vmem:[%s15865_s6 + $0x30] sm:$0xff]  }
 0x548   :  { %v3712_v27 = vrot.slane %v14595_v60, 2  ;;  %v4114_v9 = vmul.f32 %v11518_v8, %v2638_v22  ;;  %v4423_v1 = vsel %vm3019_vm4, %v4421_v45, %v4422_v39  ;;  %v5415_v43 = vmul.f32 %v11587_v50, %v2638_v22  ;;  %v9459_v45 = vld [vmem:[%s15865_s6 + $0x70] sm:$0xff]   ;;  %9170 = vmatpush3.bf16.msra.mxu0 %v9458_v31 }
 0x549   :  { %v5695_v15 = vrot.slane %v5413_v25, 1  ;;  %v5954_v4 = vmul.f32 %v16290_v38, %v14571_v53  ;;  %v4567_v3 = vadd.f32 %v4423_v1, %v3978_v14  ;;  %v5012_v16 = vsel %vm3555_vm5, %v5010_v62, %v5011_v55  ;;  %9171 = vmatprep.subr.bf16.mxu0 %v9459_v45 }
 0x54a   :  { %v10114_v17 = vpop.eup %10113  ;;  %v3713_v60 = vrot.slane %v14602_v5, 2  ;;  %v5956_v58 = vmul.f32 %v16290_v38, %v2638_v22  ;;  %v4424_v39 = vrot.slane %v14606_v46, 1  ;;  %v5290_v25 = vadd.f32 %v5228_v7, %v14562_v6  ;;  %v9461_v6 = vld [vmem:[%s15865_s6 + $0x68] sm:$0xff]  }
 0x54b   :  { %v5696_v32 = vrot.slane %v5415_v43, 1  ;;  %v2313_v30 = vmul.f32 %v10114_v17, %v14282_v56  ;;  %v6626_v14 = vadd.f32 1.0, %v10112_v2  ;;  %v3915_v55 = vmul.f32 %v16278_v44, %v14571_v53  ;;  %v9462_v17 = vld [vmem:[%s15865_s6 + $0x28] sm:$0xff]  }
 0x54c   :  { %v4425_v62 = vrot.slane %v4114_v9, 1  ;;  %v4701_v5 = vmul.f32 %v16277_v21, %v14571_v53  ;;  %v4703_v56 = vmul.f32 %v16277_v21, %v2638_v22  ;;  %v6236_v46 = vrot.slane %v5954_v4, 2  ;;  %9172 = vmatpush3.bf16.msra.mxu0 %v9460_v63 }
 0x54d   :  { %v5697_v43 = vsel %vm3019_vm4, %v5695_v15, %v5696_v32  ;;  %v2443_v7 = vrot.slane %v2313_v30, 7  ;;  %v3838_v2 = vadd.f32 %v14560_v12, %v14547_v52  ;;  %v14652_v9 = vadd.f32 %v3711_v36, %v3303_v54  ;;  %9173 = vmatprep.subr.bf16.mxu0 %v9461_v6  ;;  %v9463_v15 = vld [vmem:[%s15865_s6 + $0x60] sm:$0xff]  }
 0x54e   :  { %v14654_v1 = vadd.f32 %v5012_v16, %v4567_v3  ;;  %v6237_v31 = vrot.slane %v5956_v58, 2  ;;  %v3178_v45 = vsel %vm3019_vm4, %v3176_v18, %v3177_v20  ;;  %v5831_v29 = vadd.f32 %v5697_v43, %v5290_v25 }
 0x54f   :  { %v14661_v22 = vsel %vm2515_vm3, 0.0, %v2443_v7  ;;  %v14664_v4 = vsel %vm2515_vm3, %v2443_v7, 0.0  ;;  %v2710_v30 = vmul.f32 %v16357_v42, %v14571_v53  ;;  %v2125_v12 = vadd.f32 1.0, %v14552_v41 }
 0x550   :  { %v10116_v32 = vpop.eup %10115  ;;  %v2892_v58 = vmul.f32 %v16481_v47, %v14661_v22  ;;  %v2894_v52 = vmul.f32 %v16481_v47, %v14664_v4  ;;  %10117 = vpow2.f32 %v9001_v19  ;;  %v3979_v18 = vadd.f32 %v3915_v55, %v3838_v2  ;;  %9174 = vmatpush3.bf16.msra.mxu0 %v9462_v17  ;;  %v9464_v19 = vld [vmem:[%s15865_s6 + $0x20] sm:$0xff]   ;;  %v9467_v17 = vld [vmem:[%s15865_s6 + $0x50] sm:$0xff]  }
 0x551   :  { %v5013_v20 = vrot.slane %v4701_v5, 2  ;;  %v5014_v54 = vrot.slane %v4703_v56, 2  ;;  %v14676_v36 = vadd.f32 %v3178_v45, %v2710_v30  ;;  %v14679_v53 = vsel %vm3555_vm5, %v3712_v27, %v3713_v60  ;;  %9175 = vmatprep.subr.bf16.mxu0 %v9463_v15 }
 0x552   :  { %v4426_v3 = vsel %vm3019_vm4, %v4424_v39, %v4425_v62  ;;  %v6238_v16 = vsel %vm3555_vm5, %v6236_v46, %v6237_v31  ;;  %10119 = vrcp.f32 %v6626_v14  ;;  %v2314_v25 = vmul.f32 %v10116_v32, %v14303_v61  ;;  %v9466_v46 = vld [vmem:[%s15865_s6 + $0x18] sm:$0xff]  }
 0x553   :  { %v14683_v41 = vadd.f32 %v6238_v16, %v5831_v29  ;;  %v2126_v63 = vadd.f32 1.0, %v14564_v57  ;;  %v3179_v55 = vrot.slane %v2892_v58, 1  ;;  %v3180_v5 = vrot.slane %v2894_v52, 1  ;;  %v9465_v29 = vld [vmem:[%s15865_s6 + $0x58] sm:$0xff]  }
 0x554   :  { %v4113_v27 = vmul.f32 %v16193_v0, %v14661_v22  ;;  %10121 = vrcp.f32 %v14598_v28  ;;  %v4568_v61 = vadd.f32 %v4426_v3, %v3979_v18  ;;  %v5015_v57 = vsel %vm3555_vm5, %v5013_v20, %v5014_v54  ;;  %9176 = vmatpush3.bf16.msra.mxu0 %v9464_v19 }
 0x555   :  { %v4115_v60 = vmul.f32 %v16193_v0, %v14664_v4  ;;  %10123 = vrcp.f32 %v14609_v24  ;;  %v3428_v39 = vmul.f32 %v11627_v51, %v14661_v22  ;;  %v3430_v14 = vmul.f32 %v11627_v51, %v14664_v4  ;;  %9177 = vmatprep.subr.bf16.mxu0 %v9465_v29 }
 0x556   :  { %v5414_v28 = vmul.f32 %v11735_v59, %v14661_v22  ;;  %v2127_v62 = vadd.f32 1.0, %v14574_v26  ;;  %v9002_v6 = vmul.f32 -1.442695, %v14683_v41  ;;  %v2711_v56 = vmul.f32 %v11647_v49, %v14661_v22 }
 0x557   :  { %v3916_v43 = vmul.f32 %v16196_v10, %v14661_v22  ;;  %v2444_v24 = vrot.slane %v2314_v25, 7  ;;  %v3181_v7 = vsel %vm3019_vm4, %v3179_v55, %v3180_v5  ;;  %v4427_v2 = vrot.slane %v4113_v27, 1  ;;  %v9468_v25 = vld [vmem:[%s15865_s6 + $0x10] sm:$0xff]   ;;  %v9469_v55 = vld [vmem:[%s15865_s6 + $0x48] sm:$0xff]  }
 0x558   :  { %v5229_v26 = vmul.f32 %v16369_v34, %v14661_v22  ;;  %v5416_v31 = vmul.f32 %v11735_v59, %v14664_v4  ;;  %v4428_v45 = vrot.slane %v4115_v60, 1  ;;  %v5698_v32 = vrot.slane %v5414_v28, 1  ;;  %9178 = vmatpush3.bf16.msra.mxu0 %v9466_v46 }
 0x559   :  { %v5955_v30 = vmul.f32 %v16370_v11, %v14661_v22  ;;  %v5957_v58 = vmul.f32 %v16370_v11, %v14664_v4  ;;  %v3715_v52 = vrot.slane %v3428_v39, 2  ;;  %v3716_v15 = vrot.slane %v3430_v14, 2  ;;  %9179 = vmatprep.subr.bf16.mxu0 %v9467_v17 }
 0x55a   :  { %v5699_v18 = vrot.slane %v5416_v31, 1  ;;  %10125 = vrcp.f32 %v2125_v12  ;;  %v3305_v20 = vadd.f32 %v3181_v7, %v2711_v56  ;;  %v3980_v54 = vadd.f32 %v3916_v43, %v14652_v9  ;;  %v9470_v56 = vld [vmem:[%s15865_s6 + $0x8] sm:$0xff]  }
 0x55b   :  { %v2575_v3 = vsel %vm2515_vm3, 0.0, %v2444_v24  ;;  %v2640_v16 = vsel %vm2515_vm3, %v2444_v24, 0.0  ;;  %10127 = vpow2.f32 %v9002_v6  ;;  %v14735_v19 = vmul.f32 %v11672_v37, %v14661_v22 }
 0x55c   :  { %v14739_v12 = vmul.f32 %v11672_v37, %v14664_v4  ;;  %v5291_v9 = vadd.f32 %v5229_v26, %v14654_v1  ;;  %v4429_v5 = vsel %vm3019_vm4, %v4427_v2, %v4428_v45  ;;  %v5700_v27 = vsel %vm3019_vm4, %v5698_v32, %v5699_v18  ;;  %9180 = vmatpush3.bf16.msra.mxu0 %v9468_v25  ;;  %v9472_v18 = vld [vmem:[%s15865_s6] sm:$0xff]  }
 0x55d   :  { %v6239_v29 = vrot.slane %v5955_v30, 2  ;;  %v6240_v60 = vrot.slane %v5957_v58, 2  ;;  %v14747_v39 = vpop.eup %10117  ;;  %v3717_v22 = vsel %vm3555_vm5, %v3715_v52, %v3716_v15  ;;  %v2895_v4 = vmul.f32 %v16345_v23, %v2575_v3  ;;  %9181 = vmatprep.subr.bf16.mxu0 %v9469_v55 }
 0x55e   :  { %v2897_v14 = vmul.f32 %v16345_v23, %v2640_v16  ;;  %10129 = vrcp.f32 %v2126_v63  ;;  %v3840_v1 = vadd.f32 %v14679_v53, %v14676_v36  ;;  %v5157_v28 = vadd.f32 %v5015_v57, %v4568_v61  ;;  %v9471_v36 = vld [vmem:[%s15865_s6 + $0x40] sm:$0xff]  }
 0x55f   :  { %v14754_v6 = vadd.f32 %v3717_v22, %v3305_v20  ;;  %10131 = vrcp.f32 %v2127_v62  ;;  %v14759_v43 = vpop.eup %10119  ;;  %v4569_v24 = vadd.f32 %v4429_v5, %v3980_v54  ;;  %v5832_v46 = vadd.f32 %v5700_v27, %v5291_v9 }
 0x560   :  { %v3431_v7 = vmul.f32 %v16358_v48, %v2575_v3  ;;  %v3433_v63 = vmul.f32 %v16358_v48, %v2640_v16  ;;  %v5016_v61 = vrot.slane %v14735_v19, 2  ;;  %v5017_v57 = vrot.slane %v14739_v12, 2  ;;  %9182 = vmatpush3.bf16.msra.mxu0 %v9470_v56 }
 0x561   :  { %v10122_v53 = vpop.eup %10121  ;;  %v6241_v62 = vsel %vm3555_vm5, %v6239_v29, %v6240_v60  ;;  %v2712_v2 = vmul.f32 %v16357_v42, %v2575_v3  ;;  %v3182_v31 = vrot.slane %v2895_v4, 1  ;;  %v3183_v17 = vrot.slane %v2897_v14, 1  ;;  %9183 = vmatprep.subr.bf16.mxu0 %v9471_v36 }
 0x562   :  { %v10124_v26 = vpop.eup %10123  ;;  %v3917_v45 = vmul.f32 %v16278_v44, %v2575_v3  ;;  %v5417_v32 = vmul.f32 %v11587_v50, %v2575_v3  ;;  %v4116_v30 = vmul.f32 %v11518_v8, %v2575_v3  ;;  %v4118_v58 = vmul.f32 %v11518_v8, %v2640_v16 }
 0x563   :  { %v5230_v52 = vmul.f32 %v16363_v35, %v2575_v3  ;;  %v5419_v15 = vmul.f32 %v11587_v50, %v2640_v16  ;;  %v14779_v20 = vadd.f32 %v6241_v62, %v5832_v46  ;;  %v3718_v54 = vrot.slane %v3431_v7, 2 }
 0x564   :  { %v3719_v25 = vrot.slane %v3433_v63, 2  ;;  %v4705_v19 = vmul.f32 %v16277_v21, %v2575_v3  ;;  %v5701_v9 = vrot.slane %v5417_v32, 1  ;;  %v5958_v5 = vmul.f32 %v16290_v38, %v2575_v3  ;;  %9184 = vmatpush3.bf16.msra.mxu0 %v9472_v18 }
 0x565   :  { %v5292_v12 = vadd.f32 %v5230_v52, %v5157_v28  ;;  %v5702_v55 = vrot.slane %v5419_v15, 1  ;;  %v3184_v27 = vsel %vm3019_vm4, %v3182_v31, %v3183_v17  ;;  %v4707_v29 = vmul.f32 %v16277_v21, %v2640_v16 }
 0x566   :  { %v5960_v60 = vmul.f32 %v16290_v38, %v2640_v16  ;;  %v2315_v22 = vmul.f32 %v10122_v53, %v14471_v33  ;;  %v4430_v14 = vrot.slane %v4116_v30, 1  ;;  %v4431_v56 = vrot.slane %v4118_v58, 1 }
 0x567   :  { %v10126_v4 = vpop.eup %10125  ;;  %v5703_v46 = vsel %vm3019_vm4, %v5701_v9, %v5702_v55  ;;  %v6242_v7 = vrot.slane %v5958_v5, 2  ;;  %v3981_v28 = vadd.f32 %v3917_v45, %v3840_v1  ;;  %v5018_v31 = vsel %vm3555_vm5, %v5016_v61, %v5017_v57 }
 0x568   :  { %v5833_v63 = vadd.f32 %v5703_v46, %v5292_v12  ;;  %v6243_v36 = vrot.slane %v5960_v60, 2  ;;  %v2445_v62 = vrot.slane %v2315_v22, 7  ;;  %v10128_v3 = vpop.eup %10127  ;;  %v9003_v17 = vmul.f32 -1.442695, %v14779_v20 }
 0x569   :  { %v3306_v32 = vadd.f32 %v3184_v27, %v2712_v2  ;;  %v5019_v16 = vrot.slane %v4705_v19, 2  ;;  %v5020_v52 = vrot.slane %v4707_v29, 2  ;;  %v4432_v1 = vsel %vm3019_vm4, %v4430_v14, %v4431_v56 }
 0x56a   :  { %v6244_v33 = vsel %vm3555_vm5, %v6242_v7, %v6243_v36  ;;  %v2576_v53 = vsel %vm2515_vm3, 0.0, %v2445_v62  ;;  %v2641_v30 = vsel %vm2515_vm3, %v2445_v62, 0.0  ;;  %v14798_v18 = vadd.f32 1.0, %v10128_v3 }
 0x56b   :  { %v10130_v58 = vpop.eup %10129  ;;  %v14794_v45 = vadd.f32 %v6244_v33, %v5833_v63  ;;  %v2896_v15 = vmul.f32 %v16481_v47, %v2576_v53  ;;  %v2898_v61 = vmul.f32 %v16481_v47, %v2641_v30  ;;  %v5158_v2 = vadd.f32 %v5018_v31, %v4569_v24 }
 0x56c   :  { %v10132_v57 = vpop.eup %10131  ;;  %v3720_v19 = vsel %vm3555_vm5, %v3718_v54, %v3719_v25  ;;  %v4570_v12 = vadd.f32 %v4432_v1, %v3981_v28  ;;  %10133 = vpow2.f32 %v9003_v17  ;;  %v2316_v55 = vmul.f32 %v10124_v26, %v14478_v13  ;;  %v16507_v26 = vld [vmem:[#allocation113_spill] sm:$0xff] }
 0x56d   :  { %v14801_v9 = vadd.f32 %v3720_v19, %v3306_v32  ;;  %v14805_v5 = vmul.f32 %v10126_v4, %v14490_v40  ;;  %v5021_v27 = vsel %vm3555_vm5, %v5019_v16, %v5020_v52  ;;  %v3432_v29 = vmul.f32 %v11627_v51, %v2576_v53 }
 0x56e   :  { %v3434_v60 = vmul.f32 %v11627_v51, %v2641_v30  ;;  %v4117_v22 = vmul.f32 %v16193_v0, %v2576_v53  ;;  %v9004_v24 = vmul.f32 -1.442695, %v14794_v45  ;;  %v3185_v54 = vrot.slane %v2896_v15, 1 }
 0x56f   :  { %v3186_v25 = vrot.slane %v2898_v61, 1  ;;  %v4119_v14 = vmul.f32 %v16193_v0, %v2641_v30  ;;  %v5159_v56 = vadd.f32 %v5021_v27, %v4570_v12  ;;  %v3918_v13 = vmul.f32 %v16196_v10, %v2576_v53  ;;  %v16508_v27 = vld [vmem:[#allocation38_spill] sm:$0xff] }
 0x570   :  { %v4706_v40 = vmul.f32 %v11672_v37, %v2576_v53  ;;  %v14816_v4 = vmul.f32 %v10130_v58, %v16507_v26  ;;  %v4708_v46 = vmul.f32 %v11672_v37, %v2641_v30  ;;  %v5418_v7 = vmul.f32 %v11735_v59, %v2576_v53 }
 0x571   :  { %v2446_v28 = vrot.slane %v2316_v55, 7  ;;  %v2447_v63 = vrot.slane %v14805_v5, 7  ;;  %v3721_v36 = vrot.slane %v3432_v29, 2  ;;  %v3722_v62 = vrot.slane %v3434_v60, 2 }
 0x572   :  { %v3982_v3 = vadd.f32 %v3918_v13, %v14754_v6  ;;  %v4433_v31 = vrot.slane %v4117_v22, 1  ;;  %10135 = vpow2.f32 %v9004_v24  ;;  %v3187_v17 = vsel %vm3019_vm4, %v3185_v54, %v3186_v25 }
 0x573   :  { %v4434_v32 = vrot.slane %v4119_v14, 1  ;;  %v5420_v16 = vmul.f32 %v11735_v59, %v2641_v30  ;;  %v5022_v52 = vrot.slane %v4706_v40, 2  ;;  %v5231_v33 = vmul.f32 %v16369_v34, %v2576_v53 }
 0x574   :  { %v5959_v58 = vmul.f32 %v16370_v11, %v2576_v53  ;;  %v5961_v1 = vmul.f32 %v16370_v11, %v2641_v30  ;;  %v5023_v15 = vrot.slane %v4708_v46, 2  ;;  %v5704_v61 = vrot.slane %v5418_v7, 1 }
 0x575   :  { %v5705_v19 = vrot.slane %v5420_v16, 1  ;;  %v14828_v12 = vsel %vm2515_vm3, 0.0, %v2446_v28  ;;  %v2713_v6 = vmul.f32 %v11647_v49, %v2576_v53  ;;  %v2642_v55 = vsel %vm2515_vm3, %v2446_v28, 0.0 }
 0x576   :  { %v2448_v5 = vrot.slane %v14816_v4, 7  ;;  %v14834_v29 = vmul.f32 %v10132_v57, %v16508_v27  ;;  %v4435_v60 = vsel %vm3019_vm4, %v4433_v31, %v4434_v32  ;;  %v5293_v22 = vadd.f32 %v5231_v33, %v5158_v2 }
 0x577   :  { %v6245_v24 = vrot.slane %v5959_v58, 2  ;;  %v6246_v30 = vrot.slane %v5961_v1, 2  ;;  %v3307_v54 = vadd.f32 %v3187_v17, %v2713_v6  ;;  %v3723_v25 = vsel %vm3555_vm5, %v3721_v36, %v3722_v62 }
 0x578   :  { %v4571_v14 = vadd.f32 %v4435_v60, %v3982_v3  ;;  %v2899_v13 = vmul.f32 %v16345_v23, %v14828_v12  ;;  %v5024_v53 = vsel %vm3555_vm5, %v5022_v52, %v5023_v15  ;;  %v5706_v40 = vsel %vm3019_vm4, %v5704_v61, %v5705_v19 }
 0x579   :  { %v2901_v26 = vmul.f32 %v16345_v23, %v2642_v55  ;;  %v14844_v57 = vmul.f32 %v16358_v48, %v2642_v55  ;;  %v14846_v46 = vpop.eup %10133  ;;  %v4120_v2 = vmul.f32 %v11518_v8, %v14828_v12  ;;  %v4122_v7 = vmul.f32 %v11518_v8, %v2642_v55 }
 0x57a   :  { %v5232_v28 = vmul.f32 %v16363_v35, %v14828_v12  ;;  %v5421_v36 = vmul.f32 %v11587_v50, %v14828_v12  ;;  %v5834_v62 = vadd.f32 %v5706_v40, %v5293_v22  ;;  %v6247_v3 = vsel %vm3555_vm5, %v6245_v24, %v6246_v30 }
 0x57b   :  { %v5423_v23 = vmul.f32 %v11587_v50, %v2642_v55  ;;  %v5962_v31 = vmul.f32 %v16290_v38, %v14828_v12  ;;  %v3188_v17 = vrot.slane %v2899_v13, 1  ;;  %v5964_v52 = vmul.f32 %v16290_v38, %v2642_v55 }
 0x57c   :  { %v5294_v32 = vadd.f32 %v5232_v28, %v5159_v56  ;;  %v5707_v16 = vrot.slane %v5421_v36, 1  ;;  %v3189_v33 = vrot.slane %v2901_v26, 1  ;;  %v14861_v15 = vsel %vm2515_vm3, 0.0, %v2447_v63 }
 0x57d   :  { %v5708_v58 = vrot.slane %v5423_v23, 1  ;;  %v6248_v1 = vrot.slane %v5962_v31, 2  ;;  %v4436_v61 = vrot.slane %v4120_v2, 1  ;;  %v6249_v19 = vrot.slane %v5964_v52, 2 }
 0x57e   :  { %v2643_v6 = vsel %vm2515_vm3, %v2447_v63, 0.0  ;;  %v2900_v27 = vmul.f32 %v16481_v47, %v14861_v15  ;;  %v4437_v60 = vrot.slane %v4122_v7, 1  ;;  %v14867_v22 = vmul.f32 %v16277_v21, %v2642_v55 }
 0x57f   :  { %v5709_v56 = vsel %vm3019_vm4, %v5707_v16, %v5708_v58  ;;  %v2902_v24 = vmul.f32 %v16481_v47, %v2643_v6  ;;  %v10136_v30 = vpop.eup %10135  ;;  %v14871_v13 = vadd.f32 %v6247_v3, %v5834_v62  ;;  %v14874_v26 = vmul.f32 %v11627_v51, %v2643_v6 }
 0x580   :  { %v5835_v40 = vadd.f32 %v5709_v56, %v5294_v32  ;;  %v4121_v63 = vmul.f32 %v16193_v0, %v14861_v15  ;;  %v6250_v2 = vsel %vm3555_vm5, %v6248_v1, %v6249_v19  ;;  %v3191_v7 = vrot.slane %v2900_v27, 1 }
 0x581   :  { %v3192_v28 = vrot.slane %v2902_v24, 1  ;;  %v4123_v55 = vmul.f32 %v16193_v0, %v2643_v6  ;;  %v14880_v36 = vadd.f32 %v3723_v25, %v3307_v54  ;;  %v5160_v23 = vadd.f32 %v5024_v53, %v4571_v14 }
 0x582   :  { %v14882_v47 = vadd.f32 %v6250_v2, %v5835_v40  ;;  %v14885_v62 = vmul.f32 %v11672_v37, %v2643_v6  ;;  %v3190_v3 = vsel %vm3019_vm4, %v3188_v17, %v3189_v33  ;;  %v3725_v31 = vrot.slane %v14844_v57, 2 }
 0x583   :  { %v4438_v32 = vsel %vm3019_vm4, %v4436_v61, %v4437_v60  ;;  %v5026_v16 = vrot.slane %v14867_v22, 2  ;;  %v14892_v52 = vmul.f32 -1.442695, %v14871_v13  ;;  %v4439_v58 = vrot.slane %v4121_v63, 1 }
 0x584   :  { %v4440_v54 = vrot.slane %v4123_v55, 1  ;;  %v5422_v25 = vmul.f32 %v11735_v59, %v14861_v15  ;;  %v14896_v14 = vadd.f32 1.0, %v10136_v30  ;;  %v14899_v53 = vsel %vm3019_vm4, %v3191_v7, %v3192_v28 }
 0x585   :  { %v3728_v17 = vrot.slane %v14874_v26, 2  ;;  %v5233_v57 = vmul.f32 %v16369_v34, %v14861_v15  ;;  %v9006_v33 = vmul.f32 -1.442695, %v14882_v47  ;;  %v5424_v61 = vmul.f32 %v11735_v59, %v2643_v6 }
 0x586   :  { %v2579_v19 = vsel %vm2515_vm3, 0.0, %v2448_v5  ;;  %v2644_v60 = vsel %vm2515_vm3, %v2448_v5, 0.0  ;;  %v2714_v22 = vmul.f32 %v16357_v42, %v14828_v12  ;;  %v3435_v56 = vmul.f32 %v16358_v48, %v14828_v12 }
 0x587   :  { %v5295_v27 = vadd.f32 %v5233_v57, %v5160_v23  ;;  %v14918_v24 = vsel %vm3019_vm4, %v4439_v58, %v4440_v54  ;;  %v5710_v30 = vrot.slane %v5422_v25, 1  ;;  %v3919_v40 = vmul.f32 %v16278_v44, %v14828_v12 }
 0x588   :  { %v4124_v63 = vmul.f32 %v11518_v8, %v2579_v19  ;;  %v5963_v4 = vmul.f32 %v16370_v11, %v14861_v15  ;;  %v5965_v5 = vmul.f32 %v16370_v11, %v2643_v6  ;;  %v3308_v2 = vadd.f32 %v3190_v3, %v2714_v22 }
 0x589   :  { %v3724_v7 = vrot.slane %v3435_v56, 2  ;;  %v5711_v42 = vrot.slane %v5424_v61, 1  ;;  %v3983_v28 = vadd.f32 %v3919_v40, %v14801_v9  ;;  %v4126_v48 = vmul.f32 %v11518_v8, %v2644_v60 }
 0x58a   :  { %v4709_v55 = vmul.f32 %v16277_v21, %v14828_v12  ;;  %v4442_v58 = vrot.slane %v4124_v63, 1  ;;  %v4713_v54 = vmul.f32 %v16277_v21, %v2579_v19  ;;  %v4715_v25 = vmul.f32 %v16277_v21, %v2644_v60 }
 0x58b   :  { %v3726_v23 = vsel %vm3555_vm5, %v3724_v7, %v3725_v31  ;;  %v3921_v6 = vmul.f32 %v16278_v44, %v2579_v19  ;;  %v4443_v3 = vrot.slane %v4126_v48, 1  ;;  %v4572_v22 = vadd.f32 %v4438_v32, %v3983_v28 }
 0x58c   :  { %v3844_v57 = vadd.f32 %v3726_v23, %v3308_v2  ;;  %10137 = vpow2.f32 %v9006_v33  ;;  %v6251_v61 = vrot.slane %v5963_v4, 2  ;;  %v5025_v9 = vrot.slane %v4709_v55, 2 }
 0x58d   :  { %v5031_v56 = vrot.slane %v4713_v54, 2  ;;  %v5712_v8 = vsel %vm3019_vm4, %v5710_v30, %v5711_v42  ;;  %v6252_v40 = vrot.slane %v5965_v5, 2  ;;  %v5032_v1 = vrot.slane %v4715_v25, 2 }
 0x58e   :  { %v3985_v12 = vadd.f32 %v3921_v6, %v3844_v57  ;;  %v5836_v31 = vadd.f32 %v5712_v8, %v5295_v27  ;;  %v4444_v63 = vsel %vm3019_vm4, %v4442_v58, %v4443_v3  ;;  %v5027_v7 = vsel %vm3555_vm5, %v5025_v9, %v5026_v16  ;;  %v16510_v6 = vld [vmem:[#allocation72_spill] sm:$0xff] }
 0x58f   :  { %v5425_v21 = vmul.f32 %v11587_v50, %v2579_v19  ;;  %v5161_v44 = vadd.f32 %v5027_v7, %v4572_v22  ;;  %v5234_v32 = vmul.f32 %v16363_v35, %v2579_v19  ;;  %v5427_v33 = vmul.f32 %v11587_v50, %v2644_v60 }
 0x590   :  { %v4574_v2 = vadd.f32 %v4444_v63, %v3985_v12  ;;  %v5033_v4 = vsel %vm3555_vm5, %v5031_v56, %v5032_v1  ;;  %v5966_v30 = vmul.f32 %v16290_v38, %v2579_v19  ;;  %v5968_v5 = vmul.f32 %v16290_v38, %v2644_v60  ;;  %v16509_v1 = vld [vmem:[#allocation70_spill] sm:$0xff] }
 0x591   :  { %v5713_v28 = vrot.slane %v5425_v21, 1  ;;  %v5296_v42 = vadd.f32 %v5234_v32, %v5161_v44  ;;  %v5714_v48 = vrot.slane %v5427_v33, 1  ;;  %v2449_v16 = vrot.slane %v14834_v29, 7 }
 0x592   :  { %v5163_v27 = vadd.f32 %v5033_v4, %v4574_v2  ;;  %v6254_v55 = vrot.slane %v5966_v30, 2  ;;  %v6255_v23 = vrot.slane %v5968_v5, 2  ;;  %v2715_v58 = vmul.f32 %v11647_v49, %v14861_v15 }
 0x593   :  { %v3436_v50 = vmul.f32 %v11627_v51, %v14861_v15  ;;  %v6253_v35 = vsel %vm3555_vm5, %v6251_v61, %v6252_v40  ;;  %v5715_v19 = vsel %vm3019_vm4, %v5713_v28, %v5714_v48  ;;  %v2580_v38 = vsel %vm2515_vm3, 0.0, %v2449_v16  ;;  %v16511_v40 = vld [vmem:[#allocation76_spill] sm:$0xff] }
 0x594   :  { %v5298_v54 = vadd.f32 %v16509_v1, %v5163_v27  ;;  %v14952_v60 = vadd.f32 %v6253_v35, %v5836_v31  ;;  %v5837_v25 = vadd.f32 %v5715_v19, %v5296_v42  ;;  %v2645_v29 = vsel %vm2515_vm3, %v2449_v16, 0.0 }
 0x595   :  { %v3309_v57 = vadd.f32 %v14899_v53, %v2715_v58  ;;  %v6256_v3 = vsel %vm3555_vm5, %v6254_v55, %v6255_v23  ;;  %v3727_v51 = vrot.slane %v3436_v50, 2  ;;  %v3920_v22 = vmul.f32 %v16196_v10, %v14861_v15 }
 0x596   :  { %v5839_v49 = vadd.f32 %v16510_v6, %v5298_v54  ;;  %v14960_v61 = vadd.f32 %v6256_v3, %v5837_v25  ;;  %v3922_v9 = vmul.f32 %v16196_v10, %v2580_v38  ;;  %v4125_v56 = vmul.f32 %v16193_v0, %v2580_v38  ;;  %v16515_v6 = vld [vmem:[#allocation86_spill] sm:$0xff]  ;;  %v16517_v3 = vld [vmem:[#allocation80_spill] sm:$0xff] }
 0x597   :  { %v4127_v8 = vmul.f32 %v16193_v0, %v2645_v29  ;;  %v3729_v53 = vsel %vm3555_vm5, %v3727_v51, %v3728_v17  ;;  %v3984_v31 = vadd.f32 %v3920_v22, %v14880_v36  ;;  %v4710_v63 = vmul.f32 %v11672_v37, %v14861_v15 }
 0x598   :  { %v14966_v12 = vadd.f32 %v16511_v40, %v5839_v49  ;;  %v9008_v7 = vmul.f32 -1.442695, %v14960_v61  ;;  %v3845_v21 = vadd.f32 %v3729_v53, %v3309_v57  ;;  %v4445_v10 = vrot.slane %v4125_v56, 1  ;;  %v16514_v57 = vld [vmem:[#allocation106_spill] sm:$0xff]  ;;  %v16520_v56 = vld [vmem:[#allocation51_spill] sm:$0xff] }
 0x599   :  { %v4446_v2 = vrot.slane %v4127_v8, 1  ;;  %v10138_v44 = vpop.eup %10137  ;;  %v4573_v32 = vadd.f32 %v14918_v24, %v3984_v31  ;;  %v4714_v33 = vmul.f32 %v11672_v37, %v2580_v38  ;;  %v4716_v26 = vmul.f32 %v11672_v37, %v2645_v29  ;;  %v16521_v40 = vld [vmem:[#allocation98_spill] sm:$0xff]  ;;  %v16522_v53 = vld [vmem:[#allocation63_spill] sm:$0xff] }
 0x59a   :  { %v9010_v0 = vmul.f32 -1.442695, %v14966_v12  ;;  %v9007_v17 = vmul.f32 -1.442695, %v14952_v60  ;;  %10139 = vpow2.f32 %v9008_v7  ;;  %v3986_v36 = vadd.f32 %v3922_v9, %v3845_v21  ;;  %v16524_v7 = vld [vmem:[#allocation103_spill] sm:$0xff] }
 0x59b   :  { %v5028_v4 = vrot.slane %v4710_v63, 2  ;;  %v4447_v15 = vsel %vm3019_vm4, %v4445_v10, %v4446_v2  ;;  %v5034_v28 = vrot.slane %v4714_v33, 2  ;;  %v5035_v30 = vrot.slane %v4716_v26, 2  ;;  %v16523_v63 = vld [vmem:[#allocation104_spill] sm:$0xff]  ;;  %v16527_v33 = vld [vmem:[#allocation41_spill] sm:$0xff] }
 0x59c   :  { %10141 = vpow2.f32 %v9010_v0  ;;  %v4575_v5 = vadd.f32 %v4447_v15, %v3986_v36  ;;  %v16512_v27 = vrot.slane %v14885_v62, 2  ;;  %v5235_v42 = vmul.f32 %v16369_v34, %v2580_v38  ;;  %v16513_v34 = vld [vmem:[#allocation71_spill] sm:$0xff]  ;;  %v16529_v36 = vld [vmem:[#allocation85_spill] sm:$0xff] }
 0x59d   :  { %10143 = vpow2.f32 %v14892_v52  ;;  %v5036_v37 = vsel %vm3555_vm5, %v5034_v28, %v5035_v30  ;;  %v5426_v16 = vmul.f32 %v11735_v59, %v2580_v38  ;;  %v5428_v55 = vmul.f32 %v11735_v59, %v2645_v29  ;;  %v16516_v59 = vld [vmem:[#allocation110_spill] sm:$0xff]  ;;  %v16526_v0 = vld [vmem:[#allocation59_spill] sm:$0xff]  ;;  %v16530_v15 = vld [vmem:[#allocation45_spill] sm:$0xff] }
 0x59e   :  { %v5030_v24 = vsel %vm3555_vm5, %v5028_v4, %v16512_v27  ;;  %10145 = vpow2.f32 %v9007_v17  ;;  %v5164_v23 = vadd.f32 %v5036_v37, %v4575_v5  ;;  %v5967_v58 = vmul.f32 %v16370_v11, %v2580_v38  ;;  %v16518_v38 = vld [vmem:[#allocation46_spill] sm:$0xff]  ;;  %v16528_v17 = vld [vmem:[#allocation116_spill] sm:$0xff]  ;;  %v16531_v30 = vld [vmem:[#allocation101_spill] sm:$0xff] }
 0x59f   :  { %v5162_v48 = vadd.f32 %v5030_v24, %v4573_v32  ;;  %v5969_v52 = vmul.f32 %v16370_v11, %v2645_v29  ;;  %10147 = vrcp.f32 %v14798_v18  ;;  %v5716_v50 = vrot.slane %v5426_v16, 1  ;;  %v16519_v29 = vld [vmem:[#allocation58_spill] sm:$0xff]  ;;  %v16532_v5 = vld [vmem:[#allocation57_spill] sm:$0xff]  ;;  %v16534_v16 = vld [vmem:[#allocation48_spill] sm:$0xff] }
 0x5a0   :  { %v5717_v35 = vrot.slane %v5428_v55, 1  ;;  %v6632_v1 = vadd.f32 1.0, %v10138_v44  ;;  %v5299_v54 = vadd.f32 %v16513_v34, %v5164_v23  ;;  %v6257_v19 = vrot.slane %v5967_v58, 2  ;;  %v16525_v44 = vld [vmem:[#allocation120_spill] sm:$0xff]  ;;  %v16535_v58 = vld [vmem:[#allocation121_spill] sm:$0xff]  ;;  %v16538_v34 = vld [vmem:[#allocation66_spill] sm:$0xff] }
 0x5a1   :  { %v5297_v62 = vadd.f32 %v5235_v42, %v5162_v48  ;;  %v6258_v25 = vrot.slane %v5969_v52, 2  ;;  %v14995_v49 = vmul.f32 %v16515_v6, %v16514_v57  ;;  %v14999_v51 = vmul.f32 %v16517_v3, %v16516_v59  ;;  %v16533_v48 = vld [vmem:[#allocation53_spill] sm:$0xff]  ;;  %v16536_v52 = vld [vmem:[#allocation43_spill] sm:$0xff] }
 0x5a2   :  { %v6623_v11 = vadd.f32 1.0, %v16518_v38  ;;  %v5718_v18 = vsel %vm3019_vm4, %v5716_v50, %v5717_v35  ;;  %v6625_v22 = vadd.f32 1.0, %v16519_v29  ;;  %10149 = vrcp.f32 %v14896_v14  ;;  %v16539_v57 = vld [vmem:[#allocation123_spill] sm:$0xff] }
 0x5a3   :  { %v5838_v9 = vadd.f32 %v5718_v18, %v5297_v62  ;;  %v5840_v8 = vadd.f32 %v16520_v56, %v5299_v54  ;;  %v6858_v31 = vadd.f32 %v16522_v53, %v16521_v40  ;;  %v15010_v21 = vmul.f32 %v16524_v7, %v16523_v63  ;;  %v16540_v6 = vld [vmem:[#allocation87_spill] sm:$0xff]  ;;  %v16542_v18 = vld [vmem:[#allocation44_spill] sm:$0xff] }
 0x5a4   :  { %v6627_v10 = vadd.f32 1.0, %v14747_v39  ;;  %v6259_v2 = vsel %vm3555_vm5, %v6257_v19, %v6258_v25  ;;  %v15016_v32 = vmul.f32 %v16526_v0, %v16525_v44  ;;  %10151 = vrcp.f32 %v6632_v1  ;;  %v16537_v1 = vld [vmem:[#allocation122_spill] sm:$0xff]  ;;  %v16545_v63 = vld [vmem:[#allocation124_spill] sm:$0xff]  ;;  %v16546_v7 = vld [vmem:[#allocation119_spill] sm:$0xff] }
 0x5a5   :  { %v15018_v14 = vadd.f32 %v6259_v2, %v5838_v9  ;;  %v15021_v26 = vadd.f32 %v16527_v33, %v5840_v8  ;;  %v6855_v4 = vadd.f32 %v16529_v36, %v16528_v17  ;;  %v6865_v28 = vadd.f32 %v14995_v49, %v16530_v15  ;;  %v16544_v9 = vld [vmem:[#allocation54_spill] sm:$0xff]  ;;  %v16547_v2 = vld [vmem:[#allocation117_spill] sm:$0xff] }
 0x5a6   :  { %v6859_v39 = vadd.f32 %v6858_v31, %v14999_v51  ;;  %10153 = vrcp.f32 %v6623_v11  ;;  %v15030_v27 = vmul.f32 %v16532_v5, %v16531_v30  ;;  %v15036_v55 = vmul.f32 %v16534_v16, %v16533_v48  ;;  %v16541_v11 = vld [vmem:[#allocation73_spill] sm:$0xff]  ;;  %v16549_v36 = vld [vmem:[#allocation118_spill] sm:$0xff] }
 0x5a7   :  { %10155 = vrcp.f32 %v6625_v22  ;;  %v9009_v24 = vmul.f32 -1.442695, %v15018_v14  ;;  %v9011_v42 = vmul.f32 -1.442695, %v15021_v26  ;;  %v10140_v37 = vpop.eup %10139  ;;  %v6866_v23 = vadd.f32 %v6865_v28, %v15010_v21  ;;  %v16543_v22 = vld [vmem:[#allocation49_spill] sm:$0xff] }
 0x5a8   :  { %v15041_v62 = vmul.f32 %v16536_v52, %v16535_v58  ;;  %10157 = vrcp.f32 %v6627_v10  ;;  %v6860_v35 = vadd.f32 %v6859_v39, %v15016_v32  ;;  %v15046_v54 = vmul.f32 %v16538_v34, %v16537_v1  ;;  %v16550_v39 = vld [vmem:[#allocation39_spill] sm:$0xff]  ;;  %v16551_v30 = vld [vmem:[#allocation93_spill] sm:$0xff]  ;;  %v16555_v58 = vld [vmem:[#allocation112_spill] sm:$0xff] }
 0x5a9   :  { %v10142_v50 = vpop.eup %10141  ;;  %v6634_v19 = vadd.f32 1.0, %v10140_v37  ;;  %10159 = vpow2.f32 %v9009_v24  ;;  %v15050_v59 = vmul.f32 %v16540_v6, %v16539_v57  ;;  %v6629_v3 = vadd.f32 1.0, %v14846_v46  ;;  %v16548_v46 = vld [vmem:[#allocation99_spill] sm:$0xff]  ;;  %v16552_v24 = vld [vmem:[#allocation97_spill] sm:$0xff]  ;;  %v16557_v1 = vld [vmem:[#allocation42_spill] sm:$0xff] }
 0x5aa   :  { %v10144_v25 = vpop.eup %10143  ;;  %v6636_v38 = vadd.f32 1.0, %v10142_v50  ;;  %10161 = vpow2.f32 %v9011_v42  ;;  %v15055_v29 = vmul.f32 %v16542_v18, %v16541_v11  ;;  %v15059_v56 = vmul.f32 %v16544_v9, %v16543_v22  ;;  %v16553_v42 = vld [vmem:[#allocation94_spill] sm:$0xff]  ;;  %v16559_v57 = vld [vmem:[#allocation47_spill] sm:$0xff] }
 0x5ab   :  { %v6867_v8 = vadd.f32 %v6866_v23, %v15030_v27  ;;  %10163 = vrcp.f32 %v6634_v19  ;;  %v10146_v31 = vpop.eup %10145  ;;  %v15064_v10 = vmul.f32 %v16546_v7, %v16545_v63  ;;  %v15068_v44 = vmul.f32 %v16548_v46, %v16547_v2  ;;  %v16554_v23 = vld [vmem:[#allocation69_spill] sm:$0xff]  ;;  %v16558_v19 = vld [vmem:[#allocation92_spill] sm:$0xff] }
 0x5ac   :  { %v6861_v0 = vadd.f32 %v6860_v35, %v15041_v62  ;;  %10165 = vrcp.f32 %v6636_v38  ;;  %v10148_v33 = vpop.eup %10147  ;;  %v6849_v28 = vadd.f32 %v16549_v36, %v15036_v55  ;;  %v15075_v5 = vmul.f32 %v16551_v30, %v16550_v39  ;;  %v16556_v35 = vld [vmem:[#allocation109_spill] sm:$0xff]  ;;  %v16560_v38 = vld [vmem:[#allocation114_spill] sm:$0xff]  ;;  %v16563_v63 = vld [vmem:[#allocation108_spill] sm:$0xff] }
 0x5ad   :  { %v15079_v37 = vmul.f32 %v16553_v42, %v16552_v24  ;;  %v6631_v48 = vadd.f32 1.0, %v10144_v25  ;;  %v15084_v52 = vmul.f32 %v16555_v58, %v16554_v23  ;;  %v6868_v50 = vadd.f32 %v6867_v8, %v15046_v54  ;;  %v16562_v8 = vld [vmem:[#allocation100_spill] sm:$0xff]  ;;  %v16567_v36 = vld [vmem:[#allocation102_spill] sm:$0xff] }
 0x5ae   :  { %v6862_v16 = vadd.f32 %v6861_v0, %v15050_v59  ;;  %10167 = vrcp.f32 %v6629_v3  ;;  %v15089_v34 = vmul.f32 %v16557_v1, %v16556_v35  ;;  %v15093_v6 = vmul.f32 %v16559_v57, %v16558_v19  ;;  %v16568_v39 = vld [vmem:[#allocation50_spill] sm:$0xff]  ;;  %v16571_v35 = vld [vmem:[#allocation91_spill] sm:$0xff] }
 0x5af   :  { %v15097_v25 = vmul.f32 %v14759_v43, %v16560_v38  ;;  %v6633_v11 = vadd.f32 1.0, %v10146_v31  ;;  %v10150_v18 = vpop.eup %10149  ;;  %v6856_v22 = vadd.f32 %v6855_v4, %v15059_v56  ;;  %v6869_v3 = vadd.f32 %v6868_v50, %v15064_v10  ;;  %v16565_v43 = vld [vmem:[#allocation77_spill] sm:$0xff]  ;;  %v16566_v31 = vld [vmem:[#allocation95_spill] sm:$0xff]  ;;  %v16570_v50 = vld [vmem:[#allocation40_spill] sm:$0xff] }
 0x5b0   :  { %v6863_v9 = vadd.f32 %v6862_v16, %v15068_v44  ;;  %v15104_v7 = vmul.f32 %v16563_v63, %v16562_v8  ;;  %v6872_v2 = vadd.f32 %v15079_v37, %v15093_v6  ;;  %v15109_v46 = vmul.f32 %v10148_v33, %v14683_v41 }
 0x5b1   :  { %16561 = vst [vmem:[#allocation113_spill] sm:$0xff] %v15097_v25  ;;  %10169 = vrcp.f32 %v6631_v48  ;;  %v15113_v0 = vmul.f32 %v16566_v31, %v16565_v43  ;;  %v10152_v4 = vpop.eup %10151  ;;  %v6842_v30 = vadd.f32 %v16568_v39, %v16567_v36  ;;  %v6850_v24 = vadd.f32 %v6849_v28, %v15055_v29 }
 0x5b2   :  { %16564 = vst [vmem:[#allocation38_spill] sm:$0xff] %v15109_v46  ;;  %v6857_v42 = vadd.f32 %v6856_v22, %v15075_v5  ;;  %v6870_v16 = vadd.f32 %v6869_v3, %v15084_v52  ;;  %v6864_v58 = vadd.f32 %v6863_v9, %v15089_v34  ;;  %v6873_v41 = vadd.f32 %v6872_v2, %v15097_v25 }
 0x5b3   :  { %v10154_v23 = vpop.eup %10153  ;;  %v15123_v33 = vmul.f32 %v10150_v18, %v14794_v45  ;;  %10171 = vrcp.f32 %v6633_v11  ;;  %v6836_v1 = vadd.f32 %v16571_v35, %v16570_v50  ;;  %v15130_v38 = vmul.f32 %v10152_v4, %v14882_v47 }
 0x5b4   :  { %v10156_v48 = vpop.eup %10155  ;;  %v6871_v19 = vadd.f32 %v6870_v16, %v15104_v7  ;;  %v6874_v57 = vadd.f32 %v6873_v41, %v15109_v46  ;;  %v6843_v22 = vadd.f32 %v6842_v30, %v15113_v0  ;;  %v6889_v3 = vmul.f32 0.125, %v6850_v24  ;;  %v16574_v24 = vld [vmem:[#allocation37_spill] sm:$0xff] }
 0x5b5   :  { %16569 = vst [vmem:[#allocation70_spill] sm:$0xff] %v15123_v33  ;;  %v10158_v28 = vpop.eup %10157  ;;  %16572 = vst [vmem:[#allocation72_spill] sm:$0xff] %v15130_v38  ;;  %v6891_v45 = vmul.f32 0.125, %v6864_v58  ;;  %v6890_v63 = vmul.f32 0.125, %v6857_v42  ;;  %v6887_v43 = vmul.f32 0.125, %v6836_v1  ;;  %v15139_v35 = vmul.f32 %v10156_v48, %v16574_v24 }
 0x5b6   :  { %v10160_v9 = vpop.eup %10159  ;;  %v6875_v11 = vadd.f32 %v6874_v57, %v15123_v33  ;;  %v6892_v39 = vmul.f32 0.125, %v6871_v19  ;;  %v6888_v4 = vmul.f32 0.125, %v6843_v22  ;;  %v6907_v30 = vrot.slane %v6889_v3, 4 }
 0x5b7   :  { %v10162_v8 = vpop.eup %10161  ;;  %v6635_v18 = vadd.f32 1.0, %v10160_v9  ;;  %v6913_v19 = vrot.slane %v6890_v63, 4  ;;  %v6919_v57 = vrot.slane %v6891_v45, 4  ;;  %v6895_v9 = vrot.slane %v6887_v43, 4 }
 0x5b8   :  { %v10164_v2 = vpop.eup %10163  ;;  %v6637_v31 = vadd.f32 1.0, %v10162_v8  ;;  %v6876_v47 = vadd.f32 %v6875_v11, %v15130_v38  ;;  %v16577_v11 = vld [vmem:[#allocation105_spill] sm:$0xff]  ;;  %v6925_v22 = vrot.slane %v6892_v39, 4 }
 0x5b9   :  { %v10166_v16 = vpop.eup %10165  ;;  %v15135_v41 = vmul.f32 %v10164_v2, %v14960_v61  ;;  %10173 = vrcp.f32 %v6635_v18  ;;  %v16576_v61 = vld [vmem:[#allocation55_spill] sm:$0xff]  ;;  %v15149_v18 = vmul.f32 %v10158_v28, %v16577_v11  ;;  %v6901_v2 = vrot.slane %v6888_v4, 4 }
 0x5ba   :  { %v15142_v58 = vmul.f32 %v10166_v16, %v14966_v12  ;;  %10175 = vrcp.f32 %v6637_v31  ;;  %v15146_v8 = vmul.f32 %v10154_v23, %v16576_v61  ;;  %v6908_v16 = vadd.f32 %v6907_v30, %v6889_v3 }
 0x5bb   :  { %16573 = vst [vmem:[#allocation76_spill] sm:$0xff] %v15135_v41  ;;  %v10168_v42 = vpop.eup %10167  ;;  %v6877_v1 = vadd.f32 %v6876_v47, %v15135_v41  ;;  %v6914_v41 = vadd.f32 %v6913_v19, %v6890_v63  ;;  %v6920_v38 = vadd.f32 %v6919_v57, %v6891_v45  ;;  %v6896_v28 = vadd.f32 %v6895_v9, %v6887_v43 }
 0x5bc   :  { %16575 = vst [vmem:[#allocation71_spill] sm:$0xff] %v15142_v58  ;;  %v6879_v12 = vadd.f32 %v15139_v35, %v15146_v8  ;;  %v15155_v31 = vmul.f32 %v10168_v42, %v14779_v20  ;;  %v6926_v11 = vadd.f32 %v6925_v22, %v6892_v39  ;;  %v6909_v25 = vrot.slane %v6908_v16, 2 }
 0x5bd   :  { %v6878_v48 = vadd.f32 %v6877_v1, %v15142_v58  ;;  %v6902_v1 = vadd.f32 %v6901_v2, %v6888_v4  ;;  %v6915_v3 = vrot.slane %v6914_v41, 2  ;;  %v6921_v30 = vrot.slane %v6920_v38, 2 }
 0x5be   :  { %v10170_v24 = vpop.eup %10169  ;;  %16578 = vst [vmem:[#allocation106_spill] sm:$0xff] %v15155_v31  ;;  %v6880_v61 = vadd.f32 %v6879_v12, %v15149_v18  ;;  %v6897_v45 = vrot.slane %v6896_v28, 2  ;;  %v6927_v42 = vrot.slane %v6926_v11, 2 }
 0x5bf   :  { %v6893_v47 = vmul.f32 0.125, %v6878_v48  ;;  %v15159_v33 = vmul.f32 %v10170_v24, %v14871_v13  ;;  %v6903_v43 = vrot.slane %v6902_v1, 2  ;;  %v6910_v13 = vadd.f32 %v6909_v25, %v6908_v16 }
 0x5c0   :  { %v10172_v23 = vpop.eup %10171  ;;  %v6881_v46 = vadd.f32 %v6880_v61, %v15155_v31  ;;  %v6916_v48 = vadd.f32 %v6915_v3, %v6914_v41  ;;  %v6928_v24 = vadd.f32 %v6927_v42, %v6926_v11 }
 0x5c1   :  { %16579 = vst [vmem:[#allocation86_spill] sm:$0xff] %v15159_v33  ;;  %v6931_v58 = vrot.slane %v6893_v47, 4  ;;  %v15163_v20 = vmul.f32 %v10172_v23, %v14952_v60  ;;  %v6922_v60 = vadd.f32 %v6921_v30, %v6920_v38  ;;  %v6911_v23 = vrot.slane %v6910_v13, 1 }
 0x5c2   :  { %v6882_v19 = vadd.f32 %v6881_v46, %v15159_v33  ;;  %v6917_v16 = vrot.slane %v6916_v48, 1 }
 0x5c3   :  { %16580 = vst [vmem:[#allocation110_spill] sm:$0xff] %v15163_v20  ;;  %v6932_v63 = vadd.f32 %v6931_v58, %v6893_v47  ;;  %v6898_v58 = vadd.f32 %v6897_v45, %v6896_v28  ;;  %v6904_v47 = vadd.f32 %v6903_v43, %v6902_v1  ;;  %v6923_v61 = vrot.slane %v6922_v60, 1 }
 0x5c4   :  { %v6883_v22 = vadd.f32 %v6882_v19, %v15163_v20  ;;  %v6912_v38 = vadd.f32 %v6911_v23, %v6910_v13  ;;  %v6918_v3 = vadd.f32 %v6917_v16, %v6916_v48 }
 0x5c5   :  { %v6933_v39 = vrot.slane %v6932_v63, 2  ;;  %v6905_v41 = vrot.slane %v6904_v47, 1 }
 0x5c6   :  { %v10174_v57 = vpop.eup %10173  ;;  %v6945_v1 = vmul.f32 0.125, %v6912_v38 }
 0x5c7   :  { %v10176_v9 = vpop.eup %10175  ;;  %v15167_v4 = vmul.f32 %v10174_v57, %v15018_v14  ;;  %v6934_v12 = vadd.f32 %v6933_v39, %v6932_v63  ;;  %v6899_v14 = vrot.slane %v6898_v58, 1  ;;  %v6929_v57 = vrot.slane %v6928_v24, 1 }
 0x5c8   :  { %v15171_v2 = vmul.f32 %v10176_v9, %v15021_v26  ;;  %v6924_v26 = vadd.f32 %v6923_v61, %v6922_v60  ;;  %v6906_v45 = vadd.f32 %v6905_v41, %v6904_v47  ;;  %v6946_v39 = vmul.f32 0.125, %v6918_v3 }
 0x5c9   :  { %16581 = vst [vmem:[#allocation80_spill] sm:$0xff] %v15167_v4  ;;  %v6884_v46 = vadd.f32 %v6883_v22, %v15167_v4  ;;  %v6935_v33 = vrot.slane %v6934_v12, 1  ;;  %v6900_v28 = vadd.f32 %v6899_v14, %v6898_v58  ;;  %v6930_v11 = vadd.f32 %v6929_v57, %v6928_v24 }
 0x5ca   :  { %16582 = vst [vmem:[#allocation46_spill] sm:$0xff] %v15171_v2  ;;  %v6947_v9 = vmul.f32 0.125, %v6924_v26  ;;  %v6944_v20 = vmul.f32 0.125, %v6906_v45  ;;  %v6954_v13 = vpack.c.bf16 %v6946_v39, %v6946_v39  ;;  %v9473_v45 = vld [vmem:[%s15866_s8 + $0x70] ss:$8 sps:$4 sm:$0xff]  }
 0x5cb   :  { %v6885_v25 = vadd.f32 %v6884_v46, %v15171_v2  ;;  %v6936_v63 = vadd.f32 %v6935_v33, %v6934_v12  ;;  %v6943_v22 = vmul.f32 0.125, %v6900_v28  ;;  %v6948_v46 = vmul.f32 0.125, %v6930_v11  ;;  %v9481_v39 = vld [vmem:[%s15866_s8 + $0x54] ss:$8 sps:$4 sm:$0xff]  }
 0x5cc   :  { %v6955_v48 = vpack.c.bf16 %v6947_v9, %v6947_v9  ;;  %v6952_v33 = vpack.c.bf16 %v6944_v20, %v6944_v20  ;;  %v7009_v16 = vunpack.c.l.b16 %v6954_v13  ;;  %v9479_v9 = vld [vmem:[%s15866_s8 + $0x50] ss:$8 sps:$4 sm:$0xff]  }
 0x5cd   :  { %v6894_v19 = vmul.f32 0.125, %v6885_v25  ;;  %v6949_v2 = vmul.f32 0.125, %v6936_v63  ;;  %v6953_v25 = vpack.c.bf16 %v6945_v1, %v6945_v1  ;;  %v6951_v60 = vpack.c.bf16 %v6943_v22, %v6943_v22  ;;  %v9478_v1 = vld [vmem:[%s15866_s8 + $0x64] ss:$8 sps:$4 sm:$0xff]   ;;  %v9485_v13 = vld [vmem:[%s15866_s8 + $0x30] ss:$8 sps:$4 sm:$0xff]  }
 0x5ce   :  { %v6956_v23 = vpack.c.bf16 %v6948_v46, %v6948_v46  ;;  %v7010_v61 = vunpack.c.l.b16 %v6955_v48  ;;  %v7007_v38 = vunpack.c.l.b16 %v6952_v33  ;;  %v16583_v63 = vmov 0   ;;  %v9484_v22 = vld [vmem:[%s15866_s8 + $0x44] ss:$8 sps:$4 sm:$0xff]   ;;  %v9482_v46 = vld [vmem:[%s15866_s8 + $0x40] ss:$8 sps:$4 sm:$0xff]  }
 0x5cf   :  { %v6937_v30 = vrot.slane %v6894_v19, 4  ;;  %v6957_v58 = vpack.c.bf16 %v6949_v2, %v6949_v2  ;;  %v7008_v12 = vunpack.c.l.b16 %v6953_v25  ;;  %v7006_v14 = vunpack.c.l.b16 %v6951_v60  ;;  %v9487_v25 = vld [vmem:[%s15866_s8 + $0x34] ss:$8 sps:$4 sm:$0xff]   ;;  %v9490_v48 = vld [vmem:[%s15866_s8 + $0x24] ss:$8 sps:$4 sm:$0xff]  }
 0x5d0   :  { %v7011_v57 = vunpack.c.l.b16 %v6956_v23  ;;  %v9488_v60 = vld [vmem:[%s15866_s8 + $0x20] ss:$8 sps:$4 sm:$0xff]   ;;  %v9493_v23 = vld [vmem:[%s15866_s8 + $0x14] ss:$8 sps:$4 sm:$0xff]  }
 0x5d1   :  { %v6938_v42 = vadd.f32 %v6937_v30, %v6894_v19  ;;  %v7012_v19 = vunpack.c.l.b16 %v6957_v58  ;;  %v7015_v3 = vsel %vm7014_vm6, %v7008_v12, %v7006_v14  ;;  %v9491_v58 = vld [vmem:[%s15866_s8 + $0x10] ss:$8 sps:$4 sm:$0xff]   ;;  %v9494_v33 = vld [vmem:[%s15866_s8] ss:$8 sps:$4 sm:$0xff]  }
 0x5d2   :  { %v7017_v30 = vsel %vm7016_vm7, %v7010_v61, %v7015_v3 }
 0x5d3   :  { %v6939_v43 = vrot.slane %v6938_v42, 2  ;;  %v7019_v20 = vsel %vm7018_vm8, %v7012_v19, %v7017_v30 }
 0x5d4   :  { %v7023_v11 = vpack.c.b16 %v7019_v20, %v7019_v20  ;;  %v9497_v20 = vld [vmem:[%s15868_s10 + $0x78] sm:$0xff]  }
 0x5d5   :  { %v6940_v4 = vadd.f32 %v6939_v43, %v6938_v42  ;;  %v9475_v42 = vld [vmem:[%s15866_s8 + $0x74] ss:$8 sps:$4 sm:$0xff]   ;;  %v9476_v43 = vld [vmem:[%s15866_s8 + $0x60] ss:$8 sps:$4 sm:$0xff]  }
 0x5d6   :  { %7279 = vmatprep.subr.bf16.mxu0 %v9475_v42  ;;  %v9503_v42 = vld [vmem:[%s15868_s10 + $0x60] sm:$0xff]  }
 0x5d7   :  { %v6941_v31 = vrot.slane %v6940_v4, 1 }
 0x5d9   :  { %v6942_v24 = vadd.f32 %v6941_v31, %v6940_v4  ;;  %v7020_v31 = vsel %vm7014_vm6, %v7009_v16, %v7007_v38 }
 0x5da   :  { %v7021_v4 = vsel %vm7016_vm7, %v7011_v57, %v7020_v31 }
 0x5db   :  { %v6950_v47 = vmul.f32 0.125, %v6942_v24  ;;  %v9496_v24 = vld [vmem:[%s15866_s8 + $0x4] ss:$8 sps:$4 sm:$0xff]  }
 0x5dd   :  { %v6958_v41 = vpack.c.bf16 %v6950_v47, %v6950_v47  ;;  %v9012_v47 = vld [vmem:[%s15867_s7] ss:$0 sm:$0xff] }
 0x5df   :  { %v7013_v26 = vunpack.c.l.b16 %v6958_v41 }
 0x5e1   :  { %v7022_v2 = vsel %vm7018_vm8, %v7013_v26, %v7021_v4  ;;  %v9498_v4 = vld [vmem:[%s15868_s10 + $0x38] sm:$0xff]  }
 0x5e2   :  { %v7024_v28 = vpack.c.b16 %v7022_v2, %v7022_v2  ;;  %v9499_v2 = vld [vmem:[%s15868_s10 + $0x70] sm:$0xff]  }
 0x5e4   :  { %7155 = vmatprep.mubr.bf16.mxu0 %v7024_v28  ;;  %v9500_v28 = vld [vmem:[%s15868_s10 + $0x30] sm:$0xff]  }
 0x5e5   :  { %7156 = vmatmul.mubr.bf16.vlgmr.msra.gmra.mxu0 %v7023_v11  ;;  %v9501_v11 = vld [vmem:[%s15868_s10 + $0x68] sm:$0xff]  }
 0x5e6   :  { %7311 = vmatprep.mubr.bf16.mxu0 %v16583_v63  ;;  %7280 = vmatpush1.bf16.msra.mxu0 %v9473_v45  ;;  %v9502_v45 = vld [vmem:[%s15868_s10 + $0x28] sm:$0xff]  }
 0x5e7   :  { %7281 = vmatprep.subr.bf16.mxu0 %v9478_v1  ;;  %v9504_v1 = vld [vmem:[%s15868_s10 + $0x20] sm:$0xff]  }
 0x5ea   :  { %7282 = vmatpush1.bf16.msra.mxu0 %v9476_v43  ;;  %v9505_v43 = vld [vmem:[%s15868_s10 + $0x58] sm:$0xff]  }
 0x5eb   :  { %7283 = vmatprep.subr.bf16.mxu0 %v9481_v39  ;;  %v9506_v39 = vld [vmem:[%s15868_s10 + $0x18] sm:$0xff]  }
 0x5ee   :  { %7284 = vmatpush1.bf16.msra.mxu0 %v9479_v9  ;;  %v9507_v9 = vld [vmem:[%s15868_s10 + $0x50] sm:$0xff]  }
 0x5ef   :  { %7285 = vmatprep.subr.bf16.mxu0 %v9484_v22  ;;  %v9508_v22 = vld [vmem:[%s15868_s10 + $0x10] sm:$0xff]  }
 0x5f2   :  { %7286 = vmatpush1.bf16.msra.mxu0 %v9482_v46  ;;  %v9509_v46 = vld [vmem:[%s15868_s10 + $0x48] sm:$0xff]  }
 0x5f3   :  { %7287 = vmatprep.subr.bf16.mxu0 %v9487_v25  ;;  %v9510_v25 = vld [vmem:[%s15868_s10 + $0x8] sm:$0xff]  }
 0x5f6   :  { %7288 = vmatpush1.bf16.msra.mxu0 %v9485_v13  ;;  %v9511_v13 = vld [vmem:[%s15868_s10 + $0x40] sm:$0xff]  }
 0x5f7   :  { %7289 = vmatprep.subr.bf16.mxu0 %v9490_v48  ;;  %v9512_v48 = vld [vmem:[%s15868_s10] sm:$0xff]  }
 0x5fa   :  { %7290 = vmatpush1.bf16.msra.mxu0 %v9488_v60  ;;  %v7187_v60 = vld [vmem:[%s15869_s9] sm:$0x3] }
 0x5fb   :  { %7291 = vmatprep.subr.bf16.mxu0 %v9493_v23  ;;  %v16584_v23 = vld [vmem:[#allocation35_spill] sm:$0xff] }
 0x5fe   :  { %7292 = vmatpush1.bf16.msra.mxu0 %v9491_v58  ;;  %v7192_v58 = vrot.slane %v7187_v60, %v16584_v23 }
 0x5ff   :  { %7293 = vmatprep.subr.bf16.mxu0 %v9496_v24  ;;  %v9513_v24 = vld [vmem:[%s15870_s12 + $0x70] ss:$8 sps:$4 sm:$0xff]  }
 0x602   :  { %7294 = vmatpush1.bf16.msra.mxu0 %v9494_v33  ;;  %v9515_v33 = vld [vmem:[%s15870_s12 + $0x74] ss:$8 sps:$4 sm:$0xff]  }
 0x603   :  { %9191 = vmatprep.subr.bf16.mxu0 %v9497_v20  ;;  %7947 = vmatprep.subr.bf16.mxu1 %v9515_v33  ;;  %v9527_v33 = vld [vmem:[%s15870_s12 + $0x34] ss:$8 sps:$4 sm:$0xff]  }
 0x604   :  { %7948 = vmatpush1.bf16.msra.mxu1 %v9513_v24  ;;  %v9524_v24 = vld [vmem:[%s15870_s12 + $0x44] ss:$8 sps:$4 sm:$0xff]  }
 0x6a5   :  { %v9185_v12 = vpop.f32.mrf.mxu0 }
 0x6a7   :  { %v9186_v16 = vpop.f32.mrf.mxu0 }
 0x6a8   :  { %v9187_v61 = vadd.f32 %v9186_v16, %v9185_v12  ;;  %v16585_v12 = vld [vmem:[#allocation36_spill] sm:$0xff] }
 0x6a9   :  { %v9188_v14 = vpop.f32.mrf.mxu0 }
 0x6aa   :  { %v7158_v57 = vadd.f32 %v9187_v61, %v9012_v47  ;;  %v7196_v47 = vrot.slane %v7187_v60, %v16585_v12 }
 0x6ab   :  { %v9189_v19 = vpop.f32.mrf.mxu0 }
 0x6ac   :  { %v9029_v41 = vmul.f32 -1.442695, %v7158_v57 }
 0x6ae   :  { %10177 = vpow2.f32 %v9029_v41 }
 0x6bb   :  { %v10178_v38 = vpop.eup %10177 }
 0x6bc   :  { %v7166_v3 = vadd.f32 1.0, %v10178_v38 }
 0x6be   :  { %10179 = vrcp.f32 %v7166_v3 }
 0x6cb   :  { %v10180_v26 = vpop.eup %10179 }
 0x6cc   :  { %v7169_v30 = vmul.f32 %v10180_v26, %v7158_v57  ;;  %v9516_v26 = vld [vmem:[%s15870_s12 + $0x60] ss:$8 sps:$4 sm:$0xff]  }
 0x6ce   :  { %v7170_v31 = vpack.c.bf16 %v7169_v30, %v7169_v30  ;;  %v9518_v30 = vld [vmem:[%s15870_s12 + $0x64] ss:$8 sps:$4 sm:$0xff]  }
 0x6cf   :  { %7949 = vmatprep.subr.bf16.mxu1 %v9518_v30 }
 0x6d0   :  { %7312 = vmatmul.mubr.bf16.vlgmr.msra.gmra.mxu0 %v7170_v31  ;;  %7950 = vmatpush1.bf16.msra.mxu1 %v9516_v26 }
 0x6d1   :  { %9192 = vmatpush3.bf16.msra.mxu0 %v9498_v4 }
 0x6d2   :  { %9193 = vmatprep.subr.bf16.mxu0 %v9499_v2 }
 0x6d5   :  { %9194 = vmatpush3.bf16.msra.mxu0 %v9500_v28  ;;  %v10450_v28 = vmov 1966171168  }
 0x6d6   :  { %9195 = vmatprep.subr.bf16.mxu0 %v9501_v11  ;;  %v7336_v11 = vunpack.c.l.s4 %v10450_v28 }
 0x6d9   :  { %9196 = vmatpush3.bf16.msra.mxu0 %v9502_v45  ;;  %v9519_v45 = vld [vmem:[%s15870_s12 + $0x50] ss:$8 sps:$4 sm:$0xff]  }
 0x6da   :  { %9197 = vmatprep.subr.bf16.mxu0 %v9503_v42  ;;  %v9521_v42 = vld [vmem:[%s15870_s12 + $0x54] ss:$8 sps:$4 sm:$0xff]  }
 0x6db   :  { %7951 = vmatprep.subr.bf16.mxu1 %v9521_v42 }
 0x6dc   :  { %7952 = vmatpush1.bf16.msra.mxu1 %v9519_v45  ;;  %v16593_v45 = vld [vmem:[#allocation56_spill] sm:$0xff] }
 0x6dd   :  { %9198 = vmatpush3.bf16.msra.mxu0 %v9504_v1  ;;  %v7337_v1 = vunpack.c.0.s8 %v7336_v11  ;;  %7953 = vmatprep.subr.bf16.mxu1 %v9524_v24  ;;  %v9530_v11 = vld [vmem:[%s15870_s12 + $0x24] ss:$8 sps:$4 sm:$0xff]  }
 0x6de   :  { %9199 = vmatprep.subr.bf16.mxu0 %v9505_v43 }
 0x6e1   :  { %9200 = vmatpush3.bf16.msra.mxu0 %v9506_v39  ;;  %v16586_v39 = vld [vmem:[#allocation34_spill] sm:$0xff] }
 0x6e2   :  { %9201 = vmatprep.subr.bf16.mxu0 %v9507_v9  ;;  %v7340_v9 = vsub.s32 %v7337_v1, %v16586_v39  ;;  %v16594_v1 = vld [vmem:[#allocation82_spill] sm:$0xff] }
 0x6e3   :  { %v9528_v39 = vld [vmem:[%s15870_s12 + $0x20] ss:$8 sps:$4 sm:$0xff]  }
 0x6e5   :  { %9202 = vmatpush3.bf16.msra.mxu0 %v9508_v22 }
 0x6e6   :  { %9203 = vmatprep.subr.bf16.mxu0 %v9509_v46 }
 0x6e9   :  { %9204 = vmatpush3.bf16.msra.mxu0 %v9510_v25 }
 0x6ea   :  { %9205 = vmatprep.subr.bf16.mxu0 %v9511_v13 }
 0x6ed   :  { %9206 = vmatpush3.bf16.msra.mxu0 %v9512_v48 }
 0x790   :  { %v7313_v16 = vpop.f32.mrf.mxu0 }
 0x791   :  { %v7314_v61 = vadd.f32 %v7313_v16, %v7192_v58  ;;  %v9522_v58 = vld [vmem:[%s15870_s12 + $0x40] ss:$8 sps:$4 sm:$0xff]  }
 0x792   :  { %v7315_v14 = vpop.f32.mrf.mxu0  ;;  %7954 = vmatpush1.bf16.msra.mxu1 %v9522_v58  ;;  %v16596_v58 = vld [vmem:[#allocation74_spill] sm:$0xff] }
 0x793   :  { %v9046_v57 = vmul.f32 -1.442695, %v7314_v61  ;;  %v7316_v19 = vadd.f32 %v7315_v14, %v7196_v47  ;;  %v16587_v47 = vld [vmem:[#allocation84_spill] sm:$0xff]  ;;  %v16588_v61 = vld [vmem:[#allocation78_spill] sm:$0xff]  ;;  %7955 = vmatprep.subr.bf16.mxu1 %v9527_v33 }
 0x794   :  { %v7317_v41 = vpop.f32.mrf.mxu0  ;;  %v9533_v33 = vld [vmem:[%s15870_s12 + $0x14] ss:$8 sps:$4 sm:$0xff]  }
 0x795   :  { %10181 = vpow2.f32 %v9046_v57  ;;  %v9047_v38 = vmul.f32 -1.442695, %v7316_v19  ;;  %v16589_v57 = vld [vmem:[#allocation52_spill] sm:$0xff]  ;;  %v16590_v41 = vld [vmem:[#allocation83_spill] sm:$0xff] }
 0x796   :  { %v7318_v3 = vpop.f32.mrf.mxu0 }
 0x797   :  { %10183 = vpow2.f32 %v9047_v38  ;;  %v16591_v3 = vld [vmem:[#allocation75_spill] sm:$0xff] }
 0x7a2   :  { %v10182_v31 = vpop.eup %10181 }
 0x7a3   :  { %v7326_v20 = vadd.f32 1.0, %v10182_v31  ;;  %v16592_v31 = vld [vmem:[#allocation65_spill] sm:$0xff] }
 0x7a4   :  { %v10184_v4 = vpop.eup %10183 }
 0x7a5   :  { %v7327_v2 = vadd.f32 1.0, %v10184_v4  ;;  %10185 = vrcp.f32 %v7326_v20 }
 0x7a7   :  { %10187 = vrcp.f32 %v7327_v2  ;;  %v9525_v2 = vld [vmem:[%s15870_s12 + $0x30] ss:$8 sps:$4 sm:$0xff]  }
 0x7a8   :  { %7956 = vmatpush1.bf16.msra.mxu1 %v9525_v2 }
 0x7a9   :  { %7957 = vmatprep.subr.bf16.mxu1 %v9530_v11 }
 0x7ac   :  { %7958 = vmatpush1.bf16.msra.mxu1 %v9528_v39  ;;  %v16602_v39 = vld [vmem:[#allocation89_spill] sm:$0xff] }
 0x7ad   :  { %7959 = vmatprep.subr.bf16.mxu1 %v9533_v33 }
 0x7b2   :  { %v10186_v43 = vpop.eup %10185 }
 0x7b4   :  { %v10188_v22 = vpop.eup %10187 }
 0x7b5   :  { %v7334_v46 = vcombine.low %v10186_v43, %v10188_v22  ;;  %v16595_v22 = vld [vmem:[#allocation61_spill] sm:$0xff] }
 0x7b7   :  { %v7341_v25 = vrot.slane %v7334_v46, %v7340_v9 }
 0x7b9   :  { %v15305_v13 = vrot.slane %v7341_v25, %v7340_v9 }
 0x7bb   :  { %v7362_v48 = vrot.slane %v15305_v13, %v16584_v23  ;;  %v7366_v60 = vrot.slane %v15305_v13, %v16585_v12 }
 0x7bd   :  { %v7400_v16 = vmul.f32 %v7366_v60, %v16587_v47  ;;  %v7402_v14 = vmul.f32 %v7366_v60, %v16588_v61  ;;  %v7399_v19 = vmul.f32 %v7362_v48, %v16589_v57  ;;  %v7401_v38 = vmul.f32 %v7362_v48, %v16590_v41  ;;  %v9536_v57 = vld [vmem:[%s15870_s12 + $0x4] ss:$8 sps:$4 sm:$0xff]  }
 0x7be   :  { %v7404_v26 = vmul.f32 %v7366_v60, %v16591_v3  ;;  %v7406_v20 = vmul.f32 %v7366_v60, %v16592_v31  ;;  %v7403_v42 = vmul.f32 %v7362_v48, %v16593_v45  ;;  %v7405_v43 = vmul.f32 %v7362_v48, %v16594_v1  ;;  %v16601_v1 = vld [vmem:[#allocation68_spill] sm:$0xff] }
 0x7bf   :  { %v7464_v30 = vpack.c.bf16 %v7402_v14, %v7400_v16  ;;  %v7463_v4 = vpack.c.bf16 %v7401_v38, %v7399_v19  ;;  %v7408_v46 = vmul.f32 %v7366_v60, %v16595_v22  ;;  %v7410_v24 = vmul.f32 %v7366_v60, %v16596_v58  ;;  %v9531_v16 = vld [vmem:[%s15870_s12 + $0x10] ss:$8 sps:$4 sm:$0xff]   ;;  %v16597_v19 = vld [vmem:[#allocation62_spill] sm:$0xff] }
 0x7c0   :  { %v7466_v28 = vpack.c.bf16 %v7406_v20, %v7404_v26  ;;  %v7465_v47 = vpack.c.bf16 %v7405_v43, %v7403_v42  ;;  %v7342_v61 = vcombine.high %v7341_v25, %v7341_v25  ;;  %v7407_v41 = vmul.f32 %v7362_v48, %v16597_v19  ;;  %v16598_v38 = vld [vmem:[#allocation64_spill] sm:$0xff]  ;;  %7960 = vmatpush1.bf16.msra.mxu1 %v9531_v16  ;;  %v9534_v26 = vld [vmem:[%s15870_s12] ss:$8 sps:$4 sm:$0xff]  }
 0x7c1   :  { %7662 = vmatprep.mubr.bf16.mxu0 %v7464_v30  ;;  %v7468_v14 = vpack.c.bf16 %v7410_v24, %v7408_v46  ;;  %v7409_v3 = vmul.f32 %v7362_v48, %v16598_v38  ;;  %v7412_v25 = vmul.f32 %v7366_v60, %v16567_v36  ;;  %v7414_v31 = vmul.f32 %v7366_v60, %v15113_v0  ;;  %v16600_v42 = vld [vmem:[#allocation96_spill] sm:$0xff]  ;;  %v16604_v24 = vld [vmem:[#allocation107_spill] sm:$0xff] }
 0x7c2   :  { %7663 = vmatmul.mubr.bf16.vlgmr.msra.gmra.mxu0 %v7463_v4  ;;  %v15353_v30 = vrot.slane %v7342_v61, %v7340_v9  ;;  %7961 = vmatprep.subr.bf16.mxu1 %v9536_v57  ;;  %v7413_v45 = vmul.f32 %v7362_v48, %v16570_v50  ;;  %v16603_v46 = vld [vmem:[#allocation60_spill] sm:$0xff]  ;;  %v16607_v57 = vld [vmem:[#allocation115_spill] sm:$0xff] }
 0x7c3   :  { %7670 = vmatprep.mubr.bf16.mxu0 %v7466_v28  ;;  %v7467_v20 = vpack.c.bf16 %v7409_v3, %v7407_v41  ;;  %v7470_v2 = vpack.c.bf16 %v7414_v31, %v7412_v25  ;;  %v16599_v28 = vld [vmem:[#allocation67_spill] sm:$0xff]  ;;  %v16606_v61 = vld [vmem:[#allocation88_spill] sm:$0xff]  ;;  %v16609_v31 = vld [vmem:[#allocation90_spill] sm:$0xff] }
 0x7c4   :  { %7962 = vmatpush1.bf16.msra.mxu1 %v9534_v26  ;;  %v7374_v4 = vrot.slane %v15353_v30, %v16585_v12  ;;  %v7411_v11 = vmul.f32 %v7362_v48, %v16599_v28  ;;  %v7370_v0 = vrot.slane %v15353_v30, %v16584_v23  ;;  %v16608_v41 = vld [vmem:[#allocation111_spill] sm:$0xff] }
 0x7c6   :  { %v7416_v9 = vmul.f32 %v7374_v4, %v16600_v42  ;;  %v7418_v43 = vmul.f32 %v7374_v4, %v16601_v1  ;;  %v7469_v36 = vpack.c.bf16 %v7413_v45, %v7411_v11  ;;  %v7415_v22 = vmul.f32 %v7370_v0, %v16602_v39 }
 0x7c7   :  { %v7417_v58 = vmul.f32 %v7370_v0, %v16603_v46  ;;  %v7420_v33 = vmul.f32 %v7374_v4, %v16604_v24  ;;  %v7421_v19 = vmul.f32 %v7370_v0, %v16607_v57  ;;  %v7424_v38 = vmul.f32 %v7374_v4, %v16608_v41  ;;  %v16611_v57 = vld [vmem:[#allocation106_spill] sm:$0xff] }
 0x7c8   :  { %v7472_v60 = vpack.c.bf16 %v7418_v43, %v7416_v9  ;;  %v7426_v3 = vmul.f32 %v7374_v4, %v16528_v17  ;;  %v7357_v11 = vcombine.high %v15305_v13, %v15305_v13  ;;  %v7428_v45 = vmul.f32 %v7374_v4, %v15059_v56  ;;  %v16613_v41 = vld [vmem:[#allocation38_spill] sm:$0xff] }
 0x7c9   :  { %v7471_v50 = vpack.c.bf16 %v7417_v58, %v7415_v22  ;;  %v7430_v42 = vmul.f32 %v7374_v4, %v15075_v5  ;;  %v7427_v17 = vmul.f32 %v7370_v0, %v15036_v55 }
 0x7ca   :  { %7671 = vmatmul.mubr.bf16.gmra.mxu0 %v7465_v47  ;;  %v16605_v47 = vld [vmem:[#allocation81_spill] sm:$0xff]  ;;  %v7476_v25 = vpack.c.bf16 %v7426_v3, %v7424_v38  ;;  %v7382_v1 = vrot.slane %v7357_v11, %v16585_v12  ;;  %v7378_v13 = vrot.slane %v7357_v11, %v16584_v23  ;;  %v16614_v3 = vld [vmem:[#allocation86_spill] sm:$0xff]  ;;  %v16618_v11 = vld [vmem:[#allocation80_spill] sm:$0xff] }
 0x7cb   :  { %7678 = vmatprep.mubr.bf16.mxu0 %v7468_v14  ;;  %v7422_v16 = vmul.f32 %v7374_v4, %v16605_v47  ;;  %v7419_v14 = vmul.f32 %v7370_v0, %v16606_v61  ;;  %v7478_v43 = vpack.c.bf16 %v7430_v42, %v7428_v45  ;;  %v16619_v42 = vld [vmem:[#allocation46_spill] sm:$0xff] }
 0x7cc   :  { %v7434_v39 = vmul.f32 %v7382_v1, %v14995_v49  ;;  %v7431_v5 = vmul.f32 %v7378_v13, %v16521_v40  ;;  %v7433_v4 = vmul.f32 %v7378_v13, %v16522_v53  ;;  %v7436_v46 = vmul.f32 %v7382_v1, %v15010_v21 }
 0x7cd   :  { %v7474_v48 = vpack.c.bf16 %v7422_v16, %v7420_v33  ;;  %v7473_v26 = vpack.c.bf16 %v7421_v19, %v7419_v14  ;;  %v7438_v55 = vmul.f32 %v7382_v1, %v15030_v27  ;;  %v7435_v49 = vmul.f32 %v7378_v13, %v14999_v51 }
 0x7ce   :  { %v7479_v58 = vpack.c.bf16 %v7433_v4, %v7431_v5  ;;  %v7442_v24 = vmul.f32 %v7382_v1, %v15064_v10  ;;  %v7439_v53 = vmul.f32 %v7378_v13, %v15041_v62  ;;  %v7441_v21 = vmul.f32 %v7378_v13, %v15050_v59  ;;  %v15422_v4 = vld [vmem:[%s15871_s11] ss:$0 sm:$0xff] }
 0x7cf   :  { %v7358_v27 = vcombine.high %v15353_v30, %v15353_v30  ;;  %v7444_v47 = vmul.f32 %v7382_v1, %v15084_v52  ;;  %v7446_v51 = vmul.f32 %v7382_v1, %v15104_v7  ;;  %v7443_v10 = vmul.f32 %v7378_v13, %v15068_v44 }
 0x7d1   :  { %v7486_v16 = vpack.c.bf16 %v7446_v51, %v7444_v47  ;;  %v7386_v30 = vrot.slane %v7358_v27, %v16584_v23 }
 0x7d2   :  { %7679 = vmatmul.mubr.bf16.gmra.mxu0 %v7467_v20  ;;  %v7423_v20 = vmul.f32 %v7370_v0, %v16609_v31 }
 0x7d3   :  { %7686 = vmatprep.mubr.bf16.mxu0 %v7470_v2  ;;  %v16610_v2 = vld [vmem:[#allocation79_spill] sm:$0xff]  ;;  %v7447_v7 = vmul.f32 %v7386_v30, %v15093_v6  ;;  %v7449_v61 = vmul.f32 %v7386_v30, %v15079_v37  ;;  %v7453_v38 = vmul.f32 %v7386_v30, %v16613_v41  ;;  %v16616_v37 = vld [vmem:[#allocation70_spill] sm:$0xff] }
 0x7d4   :  { %v7425_v28 = vmul.f32 %v7370_v0, %v16610_v2  ;;  %v16617_v2 = vld [vmem:[#allocation72_spill] sm:$0xff] }
 0x7d5   :  { %v7487_v19 = vpack.c.bf16 %v7449_v61, %v7447_v7 }
 0x7d6   :  { %v7475_v9 = vpack.c.bf16 %v7425_v28, %v7423_v20  ;;  %v7457_v28 = vmul.f32 %v7386_v30, %v16617_v2 }
 0x7da   :  { %7687 = vmatmul.mubr.bf16.gmra.mxu0 %v7469_v36  ;;  %v7429_v36 = vmul.f32 %v7370_v0, %v15055_v29  ;;  %v7482_v29 = vpack.c.bf16 %v7438_v55, %v7436_v46  ;;  %v7440_v0 = vmul.f32 %v7382_v1, %v15046_v54  ;;  %v7390_v54 = vrot.slane %v7358_v27, %v16585_v12 }
 0x7db   :  { %7694 = vmatprep.mubr.bf16.mxu0 %v7472_v60  ;;  %v7432_v60 = vmul.f32 %v7382_v1, %v16530_v15  ;;  %v7437_v15 = vmul.f32 %v7378_v13, %v15016_v32  ;;  %v7483_v32 = vpack.c.bf16 %v7441_v21, %v7439_v53 }
 0x7dc   :  { %v7477_v22 = vpack.c.bf16 %v7429_v36, %v7427_v17  ;;  %v7484_v40 = vpack.c.bf16 %v7442_v24, %v7440_v0  ;;  %v7448_v62 = vmul.f32 %v7390_v54, %v15146_v8  ;;  %v7450_v59 = vmul.f32 %v7390_v54, %v15139_v35  ;;  %v16612_v8 = vld [vmem:[#allocation113_spill] sm:$0xff]  ;;  %v16620_v17 = vld [vmem:[#allocation76_spill] sm:$0xff]  ;;  %v16622_v24 = vld [vmem:[#allocation2_spill] sm:$0xff] }
 0x7dd   :  { %v7480_v56 = vpack.c.bf16 %v7434_v39, %v7432_v60  ;;  %v7481_v33 = vpack.c.bf16 %v7437_v15, %v7435_v49  ;;  %v7452_v14 = vmul.f32 %v7390_v54, %v15149_v18  ;;  %v7454_v44 = vmul.f32 %v7390_v54, %v16611_v57  ;;  %v16621_v60 = vld [vmem:[#allocation71_spill] sm:$0xff] }
 0x7de   :  { %v7488_v52 = vpack.c.bf16 %v7450_v59, %v7448_v62  ;;  %v7451_v35 = vmul.f32 %v7386_v30, %v16612_v8  ;;  %v7455_v18 = vmul.f32 %v7386_v30, %v16616_v37  ;;  %v7460_v45 = vmul.f32 %v7390_v54, %v16618_v11  ;;  %v16624_v62 = vld [vmem:[#allocation5_spill] sm:$0xff] }
 0x7df   :  { %v7459_v36 = vmul.f32 %v7386_v30, %v16620_v17  ;;  %v7461_v39 = vmul.f32 %v7386_v30, %v16621_v60  ;;  %v16625_v30 = vld [vmem:[#allocation4_spill] sm:$0xff]  ;;  %v16628_v11 = vld [vmem:[#allocation9_spill] sm:$0xff] }
 0x7e0   :  { %v7489_v20 = vpack.c.bf16 %v7453_v38, %v7451_v35  ;;  %v7491_v1 = vpack.c.bf16 %v7457_v28, %v7455_v18  ;;  %v16626_v35 = vld [vmem:[#allocation6_spill] sm:$0xff]  ;;  %v16627_v38 = vld [vmem:[#allocation7_spill] sm:$0xff] }
 0x7e2   :  { %7695 = vmatmul.mubr.bf16.gmra.mxu0 %v7471_v50  ;;  %v7445_v50 = vmul.f32 %v7378_v13, %v15089_v34  ;;  %v7490_v34 = vpack.c.bf16 %v7454_v44, %v7452_v14  ;;  %v7493_v13 = vpack.c.bf16 %v7461_v39, %v7459_v36 }
 0x7e3   :  { %7702 = vmatprep.mubr.bf16.mxu0 %v7474_v48 }
 0x7e4   :  { %v7485_v48 = vpack.c.bf16 %v7445_v50, %v7443_v10 }
 0x7ea   :  { %7703 = vmatmul.mubr.bf16.gmra.mxu0 %v7473_v26  ;;  %v7456_v26 = vmul.f32 %v7390_v54, %v16614_v3 }
 0x7eb   :  { %7710 = vmatprep.mubr.bf16.mxu0 %v7476_v25  ;;  %v16615_v25 = vld [vmem:[#allocation110_spill] sm:$0xff] }
 0x7ec   :  { %v7458_v31 = vmul.f32 %v7390_v54, %v16615_v25 }
 0x7ee   :  { %v7492_v6 = vpack.c.bf16 %v7458_v31, %v7456_v26 }
 0x7f2   :  { %7711 = vmatmul.mubr.bf16.gmra.mxu0 %v7475_v9  ;;  %v7462_v9 = vmul.f32 %v7390_v54, %v16619_v42  ;;  %v16629_v42 = vld [vmem:[#allocation8_spill] sm:$0xff] }
 0x7f3   :  { %7718 = vmatprep.mubr.bf16.mxu0 %v7478_v43 }
 0x7f4   :  { %v7494_v43 = vpack.c.bf16 %v7462_v9, %v7460_v45 }
 0x7fa   :  { %7719 = vmatmul.mubr.bf16.gmra.mxu0 %v7477_v22 }
 0x7fb   :  { %7726 = vmatprep.mubr.bf16.mxu0 %v7480_v56 }
 0x802   :  { %7727 = vmatmul.mubr.bf16.gmra.mxu0 %v7479_v58 }
 0x803   :  { %7734 = vmatprep.mubr.bf16.mxu0 %v7482_v29 }
 0x80a   :  { %7735 = vmatmul.mubr.bf16.gmra.mxu0 %v7481_v33 }
 0x80b   :  { %7742 = vmatprep.mubr.bf16.mxu0 %v7484_v40  ;;  %v16623_v40 = vld [vmem:[#allocation3_spill] sm:$0xff] }
 0x812   :  { %7743 = vmatmul.mubr.bf16.gmra.mxu0 %v7483_v32 }
 0x813   :  { %7750 = vmatprep.mubr.bf16.mxu0 %v7486_v16 }
 0x81a   :  { %7751 = vmatmul.mubr.bf16.gmra.mxu0 %v7485_v48 }
 0x81b   :  { %7758 = vmatprep.mubr.bf16.mxu0 %v7488_v52 }
 0x822   :  { %7759 = vmatmul.mubr.bf16.gmra.mxu0 %v7487_v19 }
 0x823   :  { %7766 = vmatprep.mubr.bf16.mxu0 %v7490_v34 }
 0x82a   :  { %7767 = vmatmul.mubr.bf16.gmra.mxu0 %v7489_v20 }
 0x82b   :  { %7774 = vmatprep.mubr.bf16.mxu0 %v7492_v6 }
 0x832   :  { %7775 = vmatmul.mubr.bf16.gmra.mxu0 %v7491_v1 }
 0x833   :  { %7782 = vmatprep.mubr.bf16.mxu0 %v7494_v43 }
 0x83a   :  { %7783 = vmatmul.mubr.bf16.gmra.mxu0 %v7493_v13 }
 0x882   :  { %v9207_v22 = vpop.f32.mrf.mxu0 }
 0x884   :  { %v9208_v56 = vpop.f32.mrf.mxu0 }
 0x885   :  { %v9209_v5 = vadd.f32 %v9208_v56, %v9207_v22 }
 0x886   :  { %v9210_v46 = vpop.f32.mrf.mxu0 }
 0x887   :  { %v7665_v58 = vadd.f32 %v9209_v5, %v15422_v4  ;;  %v16630_v5 = vld [vmem:[#allocation10_spill] sm:$0xff] }
 0x888   :  { %v9211_v55 = vpop.f32.mrf.mxu0 }
 0x889   :  { %v9212_v29 = vadd.f32 %v9211_v55, %v9210_v46  ;;  %v7791_v33 = vadd.f32 %v7665_v58, %v16622_v24  ;;  %v16631_v55 = vld [vmem:[#allocation11_spill] sm:$0xff] }
 0x88a   :  { %v9213_v49 = vpop.f32.mrf.mxu0 }
 0x88b   :  { %v7668_v15 = vadd.f32 %v9212_v29, %v15422_v4 }
 0x88c   :  { %v9214_v0 = vpop.f32.mrf.mxu0 }
 0x88d   :  { %v7792_v53 = vadd.f32 %v7668_v15, %v16623_v40  ;;  %v9215_v21 = vadd.f32 %v9214_v0, %v9213_v49 }
 0x88e   :  { %v9216_v27 = vpop.f32.mrf.mxu0 }
 0x88f   :  { %v7823_v47 = vpack.c.bf16 %v7792_v53, %v7791_v33  ;;  %v7673_v32 = vadd.f32 %v9215_v21, %v15422_v4 }
 0x890   :  { %v9217_v51 = vpop.f32.mrf.mxu0 }
 0x891   :  { %v9218_v54 = vadd.f32 %v9217_v51, %v9216_v27  ;;  %7980 = vmatmul.mubr.bf16.vlgmr.msra.gmra.mxu1 %v7823_v47  ;;  %v7793_v59 = vadd.f32 %v7673_v32, %v16624_v62  ;;  %v16632_v27 = vld [vmem:[#allocation13_spill] sm:$0xff]  ;;  %v16633_v51 = vld [vmem:[#allocation12_spill] sm:$0xff] }
 0x892   :  { %v9219_v16 = vpop.f32.mrf.mxu0  ;;  %7989 = vmatprep.mubr.bf16.mxu1 %v16583_v63 }
 0x893   :  { %v7676_v10 = vadd.f32 %v9218_v54, %v15422_v4 }
 0x894   :  { %v9220_v50 = vpop.f32.mrf.mxu0 }
 0x895   :  { %v7794_v48 = vadd.f32 %v7676_v10, %v16625_v30  ;;  %v9221_v52 = vadd.f32 %v9220_v50, %v9219_v16 }
 0x896   :  { %v9222_v7 = vpop.f32.mrf.mxu0 }
 0x897   :  { %v7824_v61 = vpack.c.bf16 %v7794_v48, %v7793_v59  ;;  %v7681_v57 = vadd.f32 %v9221_v52, %v15422_v4 }
 0x898   :  { %v9223_v14 = vpop.f32.mrf.mxu0 }
 0x899   :  { %v9224_v44 = vadd.f32 %v9223_v14, %v9222_v7  ;;  %7990 = vmatmul.mubr.bf16.gmra.mxu1 %v7824_v61  ;;  %v7795_v41 = vadd.f32 %v7681_v57, %v16626_v35  ;;  %v16634_v7 = vld [vmem:[#allocation14_spill] sm:$0xff]  ;;  %v16635_v14 = vld [vmem:[#allocation15_spill] sm:$0xff] }
 0x89a   :  { %v9225_v19 = vpop.f32.mrf.mxu0  ;;  %7999 = vmatprep.mubr.bf16.mxu1 %v16583_v63 }
 0x89b   :  { %v7684_v34 = vadd.f32 %v9224_v44, %v15422_v4 }
 0x89c   :  { %v9226_v8 = vpop.f32.mrf.mxu0 }
 0x89d   :  { %v7796_v3 = vadd.f32 %v7684_v34, %v16627_v38  ;;  %v9227_v26 = vadd.f32 %v9226_v8, %v9225_v19 }
 0x89e   :  { %v9228_v25 = vpop.f32.mrf.mxu0 }
 0x89f   :  { %v7825_v31 = vpack.c.bf16 %v7796_v3, %v7795_v41  ;;  %v7689_v6 = vadd.f32 %v9227_v26, %v15422_v4 }
 0x8a0   :  { %v9229_v20 = vpop.f32.mrf.mxu0 }
 0x8a1   :  { %v9230_v37 = vadd.f32 %v9229_v20, %v9228_v25  ;;  %8000 = vmatmul.mubr.bf16.gmra.mxu1 %v7825_v31  ;;  %v7797_v45 = vadd.f32 %v7689_v6, %v16628_v11  ;;  %v16636_v25 = vld [vmem:[#allocation17_spill] sm:$0xff]  ;;  %v16637_v20 = vld [vmem:[#allocation16_spill] sm:$0xff] }
 0x8a2   :  { %v9231_v18 = vpop.f32.mrf.mxu0  ;;  %8009 = vmatprep.mubr.bf16.mxu1 %v16583_v63 }
 0x8a3   :  { %v7692_v2 = vadd.f32 %v9230_v37, %v15422_v4 }
 0x8a4   :  { %v9232_v28 = vpop.f32.mrf.mxu0 }
 0x8a5   :  { %v7798_v9 = vadd.f32 %v7692_v2, %v16629_v42  ;;  %v9233_v1 = vadd.f32 %v9232_v28, %v9231_v18 }
 0x8a6   :  { %v9234_v43 = vpop.f32.mrf.mxu0 }
 0x8a7   :  { %v7826_v17 = vpack.c.bf16 %v7798_v9, %v7797_v45  ;;  %v7697_v60 = vadd.f32 %v9233_v1, %v15422_v4 }
 0x8a8   :  { %v9235_v36 = vpop.f32.mrf.mxu0 }
 0x8a9   :  { %v9236_v39 = vadd.f32 %v9235_v36, %v9234_v43  ;;  %8010 = vmatmul.mubr.bf16.gmra.mxu1 %v7826_v17  ;;  %v7799_v46 = vadd.f32 %v7697_v60, %v16630_v5  ;;  %v16638_v43 = vld [vmem:[#allocation18_spill] sm:$0xff]  ;;  %v16639_v36 = vld [vmem:[#allocation19_spill] sm:$0xff] }
 0x8aa   :  { %v9237_v13 = vpop.f32.mrf.mxu0  ;;  %8019 = vmatprep.mubr.bf16.mxu1 %v16583_v63 }
 0x8ab   :  { %v7700_v22 = vadd.f32 %v9236_v39, %v15422_v4 }
 0x8ac   :  { %v9238_v56 = vpop.f32.mrf.mxu0 }
 0x8ad   :  { %v7800_v58 = vadd.f32 %v7700_v22, %v16631_v55  ;;  %v9239_v29 = vadd.f32 %v9238_v56, %v9237_v13 }
 0x8ae   :  { %v9240_v49 = vpop.f32.mrf.mxu0 }
 0x8af   :  { %v7827_v15 = vpack.c.bf16 %v7800_v58, %v7799_v46  ;;  %v7705_v24 = vadd.f32 %v9239_v29, %v15422_v4 }
 0x8b0   :  { %v9241_v0 = vpop.f32.mrf.mxu0 }
 0x8b1   :  { %v9242_v33 = vadd.f32 %v9241_v0, %v9240_v49  ;;  %8020 = vmatmul.mubr.bf16.gmra.mxu1 %v7827_v15  ;;  %v7801_v47 = vadd.f32 %v7705_v24, %v16632_v27  ;;  %v16640_v49 = vld [vmem:[#allocation21_spill] sm:$0xff]  ;;  %v16641_v0 = vld [vmem:[#allocation20_spill] sm:$0xff] }
 0x8b2   :  { %v9243_v40 = vpop.f32.mrf.mxu0  ;;  %8029 = vmatprep.mubr.bf16.mxu1 %v16583_v63 }
 0x8b3   :  { %v7708_v53 = vadd.f32 %v9242_v33, %v15422_v4 }
 0x8b4   :  { %v9244_v21 = vpop.f32.mrf.mxu0 }
 0x8b5   :  { %v7802_v32 = vadd.f32 %v7708_v53, %v16633_v51  ;;  %v9245_v54 = vadd.f32 %v9244_v21, %v9243_v40 }
 0x8b6   :  { %v9246_v16 = vpop.f32.mrf.mxu0 }
 0x8b7   :  { %v7828_v10 = vpack.c.bf16 %v7802_v32, %v7801_v47  ;;  %v7713_v62 = vadd.f32 %v9245_v54, %v15422_v4 }
 0x8b8   :  { %v9247_v50 = vpop.f32.mrf.mxu0 }
 0x8b9   :  { %v9248_v59 = vadd.f32 %v9247_v50, %v9246_v16  ;;  %8030 = vmatmul.mubr.bf16.gmra.mxu1 %v7828_v10  ;;  %v7803_v61 = vadd.f32 %v7713_v62, %v16634_v7  ;;  %v16642_v16 = vld [vmem:[#allocation22_spill] sm:$0xff]  ;;  %v16643_v50 = vld [vmem:[#allocation23_spill] sm:$0xff] }
 0x8ba   :  { %v9249_v30 = vpop.f32.mrf.mxu0  ;;  %8039 = vmatprep.mubr.bf16.mxu1 %v16583_v63 }
 0x8bb   :  { %v7716_v48 = vadd.f32 %v9248_v59, %v15422_v4 }
 0x8bc   :  { %v9250_v52 = vpop.f32.mrf.mxu0 }
 0x8bd   :  { %v7804_v57 = vadd.f32 %v7716_v48, %v16635_v14  ;;  %v9251_v44 = vadd.f32 %v9250_v52, %v9249_v30 }
 0x8be   :  { %v9252_v19 = vpop.f32.mrf.mxu0 }
 0x8bf   :  { %v7829_v34 = vpack.c.bf16 %v7804_v57, %v7803_v61  ;;  %v7721_v35 = vadd.f32 %v9251_v44, %v15422_v4 }
 0x8c0   :  { %v9253_v8 = vpop.f32.mrf.mxu0 }
 0x8c1   :  { %v9254_v41 = vadd.f32 %v9253_v8, %v9252_v19  ;;  %8040 = vmatmul.mubr.bf16.gmra.mxu1 %v7829_v34  ;;  %v7805_v31 = vadd.f32 %v7721_v35, %v16636_v25  ;;  %v16644_v19 = vld [vmem:[#allocation25_spill] sm:$0xff]  ;;  %v16645_v8 = vld [vmem:[#allocation24_spill] sm:$0xff] }
 0x8c2   :  { %v9255_v38 = vpop.f32.mrf.mxu0  ;;  %8049 = vmatprep.mubr.bf16.mxu1 %v16583_v63 }
 0x8c3   :  { %v7724_v3 = vadd.f32 %v9254_v41, %v15422_v4 }
 0x8c4   :  { %v9256_v26 = vpop.f32.mrf.mxu0 }
 0x8c5   :  { %v7806_v6 = vadd.f32 %v7724_v3, %v16637_v20  ;;  %v9257_v37 = vadd.f32 %v9256_v26, %v9255_v38 }
 0x8c6   :  { %v9258_v18 = vpop.f32.mrf.mxu0 }
 0x8c7   :  { %v7830_v2 = vpack.c.bf16 %v7806_v6, %v7805_v31  ;;  %v7729_v11 = vadd.f32 %v9257_v37, %v15422_v4 }
 0x8c8   :  { %v9259_v28 = vpop.f32.mrf.mxu0 }
 0x8c9   :  { %v9260_v45 = vadd.f32 %v9259_v28, %v9258_v18  ;;  %8050 = vmatmul.mubr.bf16.gmra.mxu1 %v7830_v2  ;;  %v7807_v17 = vadd.f32 %v7729_v11, %v16638_v43  ;;  %v16646_v18 = vld [vmem:[#allocation26_spill] sm:$0xff]  ;;  %v16647_v28 = vld [vmem:[#allocation27_spill] sm:$0xff] }
 0x8ca   :  { %v9261_v42 = vpop.f32.mrf.mxu0  ;;  %8059 = vmatprep.mubr.bf16.mxu1 %v16583_v63 }
 0x8cb   :  { %v7732_v9 = vadd.f32 %v9260_v45, %v15422_v4 }
 0x8cc   :  { %v9262_v1 = vpop.f32.mrf.mxu0 }
 0x8cd   :  { %v7808_v60 = vadd.f32 %v7732_v9, %v16639_v36  ;;  %v9263_v39 = vadd.f32 %v9262_v1, %v9261_v42 }
 0x8ce   :  { %v9264_v13 = vpop.f32.mrf.mxu0 }
 0x8cf   :  { %v7831_v22 = vpack.c.bf16 %v7808_v60, %v7807_v17  ;;  %v7737_v5 = vadd.f32 %v9263_v39, %v15422_v4 }
 0x8d0   :  { %v9265_v56 = vpop.f32.mrf.mxu0 }
 0x8d1   :  { %v9266_v46 = vadd.f32 %v9265_v56, %v9264_v13  ;;  %8060 = vmatmul.mubr.bf16.gmra.mxu1 %v7831_v22  ;;  %v7809_v15 = vadd.f32 %v7737_v5, %v16640_v49  ;;  %v16648_v13 = vld [vmem:[#allocation29_spill] sm:$0xff]  ;;  %v16649_v56 = vld [vmem:[#allocation28_spill] sm:$0xff] }
 0x8d2   :  { %v9267_v55 = vpop.f32.mrf.mxu0  ;;  %8069 = vmatprep.mubr.bf16.mxu1 %v16583_v63 }
 0x8d3   :  { %v7740_v58 = vadd.f32 %v9266_v46, %v15422_v4 }
 0x8d4   :  { %v9268_v29 = vpop.f32.mrf.mxu0 }
 0x8d5   :  { %v7810_v24 = vadd.f32 %v7740_v58, %v16641_v0  ;;  %v9269_v33 = vadd.f32 %v9268_v29, %v9267_v55 }
 0x8d6   :  { %v9270_v40 = vpop.f32.mrf.mxu0 }
 0x8d7   :  { %v7832_v53 = vpack.c.bf16 %v7810_v24, %v7809_v15  ;;  %v7745_v27 = vadd.f32 %v9269_v33, %v15422_v4 }
 0x8d8   :  { %v9271_v21 = vpop.f32.mrf.mxu0 }
 0x8d9   :  { %v9272_v47 = vadd.f32 %v9271_v21, %v9270_v40  ;;  %8070 = vmatmul.mubr.bf16.gmra.mxu1 %v7832_v53  ;;  %v7811_v10 = vadd.f32 %v7745_v27, %v16642_v16  ;;  %v16650_v40 = vld [vmem:[#allocation30_spill] sm:$0xff]  ;;  %v16651_v21 = vld [vmem:[#allocation31_spill] sm:$0xff] }
 0x8da   :  { %v9273_v51 = vpop.f32.mrf.mxu0  ;;  %8079 = vmatprep.mubr.bf16.mxu1 %v16583_v63 }
 0x8db   :  { %v7748_v32 = vadd.f32 %v9272_v47, %v15422_v4 }
 0x8dc   :  { %v9274_v54 = vpop.f32.mrf.mxu0 }
 0x8dd   :  { %v7812_v62 = vadd.f32 %v7748_v32, %v16643_v50  ;;  %v9275_v59 = vadd.f32 %v9274_v54, %v9273_v51 }
 0x8de   :  { %v9276_v30 = vpop.f32.mrf.mxu0 }
 0x8df   :  { %v7833_v48 = vpack.c.bf16 %v7812_v62, %v7811_v10  ;;  %v7753_v7 = vadd.f32 %v9275_v59, %v15422_v4  ;;  %v16652_v62 = vld [vmem:[#allocation33_spill] sm:$0xff] }
 0x8e0   :  { %v9277_v52 = vpop.f32.mrf.mxu0 }
 0x8e1   :  { %v9278_v61 = vadd.f32 %v9277_v52, %v9276_v30  ;;  %8080 = vmatmul.mubr.bf16.gmra.mxu1 %v7833_v48  ;;  %v7813_v34 = vadd.f32 %v7753_v7, %v16644_v19  ;;  %v16653_v30 = vld [vmem:[#allocation32_spill] sm:$0xff]  ;;  %v7855_v7 = vld [vmem:[%s15872_s13] sm:$0x3] }
 0x8e2   :  { %v9279_v14 = vpop.f32.mrf.mxu0  ;;  %8089 = vmatprep.mubr.bf16.mxu1 %v16583_v63 }
 0x8e3   :  { %v7756_v57 = vadd.f32 %v9278_v61, %v15422_v4  ;;  %v15507_v61 = vrot.slane %v7855_v7, %v16584_v23 }
 0x8e4   :  { %v9280_v44 = vpop.f32.mrf.mxu0 }
 0x8e5   :  { %v7814_v35 = vadd.f32 %v7756_v57, %v16645_v8  ;;  %v9281_v41 = vadd.f32 %v9280_v44, %v9279_v14  ;;  %v15510_v14 = vrot.slane %v7855_v7, %v16585_v12 }
 0x8e6   :  { %v9282_v38 = vpop.f32.mrf.mxu0 }
 0x8e7   :  { %v7834_v3 = vpack.c.bf16 %v7814_v35, %v7813_v34  ;;  %v7761_v25 = vadd.f32 %v9281_v41, %v15422_v4 }
 0x8e8   :  { %v9283_v26 = vpop.f32.mrf.mxu0 }
 0x8e9   :  { %v9284_v31 = vadd.f32 %v9283_v26, %v9282_v38  ;;  %8090 = vmatmul.mubr.bf16.gmra.mxu1 %v7834_v3  ;;  %v7815_v2 = vadd.f32 %v7761_v25, %v16646_v18 }
 0x8ea   :  { %v9285_v20 = vpop.f32.mrf.mxu0  ;;  %8099 = vmatprep.mubr.bf16.mxu1 %v16583_v63 }
 0x8eb   :  { %v7764_v6 = vadd.f32 %v9284_v31, %v15422_v4 }
 0x8ec   :  { %v9286_v37 = vpop.f32.mrf.mxu0 }
 0x8ed   :  { %v7816_v11 = vadd.f32 %v7764_v6, %v16647_v28  ;;  %v9287_v45 = vadd.f32 %v9286_v37, %v9285_v20 }
 0x8ee   :  { %v9288_v42 = vpop.f32.mrf.mxu0 }
 0x8ef   :  { %v7835_v9 = vpack.c.bf16 %v7816_v11, %v7815_v2  ;;  %v7769_v43 = vadd.f32 %v9287_v45, %v15422_v4 }
 0x8f0   :  { %v9289_v1 = vpop.f32.mrf.mxu0 }
 0x8f1   :  { %v9290_v17 = vadd.f32 %v9289_v1, %v9288_v42  ;;  %8100 = vmatmul.mubr.bf16.gmra.mxu1 %v7835_v9  ;;  %v7817_v22 = vadd.f32 %v7769_v43, %v16648_v13 }
 0x8f2   :  { %v9291_v36 = vpop.f32.mrf.mxu0  ;;  %8109 = vmatprep.mubr.bf16.mxu1 %v16583_v63 }
 0x8f3   :  { %v7772_v60 = vadd.f32 %v9290_v17, %v15422_v4 }
 0x8f4   :  { %v9292_v39 = vpop.f32.mrf.mxu0 }
 0x8f5   :  { %v7818_v5 = vadd.f32 %v7772_v60, %v16649_v56  ;;  %v9293_v46 = vadd.f32 %v9292_v39, %v9291_v36 }
 0x8f6   :  { %v9294_v55 = vpop.f32.mrf.mxu0 }
 0x8f7   :  { %v7836_v58 = vpack.c.bf16 %v7818_v5, %v7817_v22  ;;  %v7777_v49 = vadd.f32 %v9293_v46, %v15422_v4 }
 0x8f8   :  { %v9295_v29 = vpop.f32.mrf.mxu0 }
 0x8f9   :  { %v9296_v15 = vadd.f32 %v9295_v29, %v9294_v55  ;;  %8110 = vmatmul.mubr.bf16.gmra.mxu1 %v7836_v58  ;;  %v7819_v53 = vadd.f32 %v7777_v49, %v16650_v40 }
 0x8fa   :  { %v9297_v0 = vpop.f32.mrf.mxu0  ;;  %8119 = vmatprep.mubr.bf16.mxu1 %v16583_v63 }
 0x8fb   :  { %v7780_v24 = vadd.f32 %v9296_v15, %v15422_v4 }
 0x8fc   :  { %v9298_v33 = vpop.f32.mrf.mxu0 }
 0x8fd   :  { %v7820_v27 = vadd.f32 %v7780_v24, %v16651_v21  ;;  %v9299_v47 = vadd.f32 %v9298_v33, %v9297_v0 }
 0x8fe   :  { %v9300_v51 = vpop.f32.mrf.mxu0 }
 0x8ff   :  { %v7837_v32 = vpack.c.bf16 %v7820_v27, %v7819_v53  ;;  %v7785_v16 = vadd.f32 %v9299_v47, %v15422_v4 }
 0x900   :  { %v9301_v54 = vpop.f32.mrf.mxu0 }
 0x901   :  { %v9302_v10 = vadd.f32 %v9301_v54, %v9300_v51  ;;  %8120 = vmatmul.mubr.bf16.gmra.mxu1 %v7837_v32  ;;  %v7821_v59 = vadd.f32 %v7785_v16, %v16652_v62 }
 0x902   :  { %8129 = vmatprep.mubr.bf16.mxu1 %v16583_v63 }
 0x903   :  { %v7788_v50 = vadd.f32 %v9302_v10, %v15422_v4 }
 0x905   :  { %v7822_v48 = vadd.f32 %v7788_v50, %v16653_v30 }
 0x907   :  { %v7838_v52 = vpack.c.bf16 %v7822_v48, %v7821_v59 }
 0x909   :  { %8130 = vmatmul.mubr.bf16.gmra.mxu1 %v7838_v52 }
 0x951   :  { %v7981_v57 = vpop.f32.mrf.mxu1 }
 0x952   :  { %v15513_v63 = vadd.f32 %v7981_v57, %v15507_v61 }
 0x953   :  { %v7983_v4 = vpop.f32.mrf.mxu1 }
 0x954   :  { %v9081_v44 = vmul.f32 -1.442695, %v15513_v63  ;;  %v15517_v19 = vadd.f32 %v7983_v4, %v15510_v14 }
 0x955   :  { %v7985_v34 = vpop.f32.mrf.mxu1 }
 0x956   :  { %10189 = vpow2.f32 %v9081_v44  ;;  %v9082_v8 = vmul.f32 -1.442695, %v15517_v19  ;;  %v15521_v23 = vadd.f32 %v7985_v34, %v15507_v61 }
 0x957   :  { %v7987_v35 = vpop.f32.mrf.mxu1 }
 0x958   :  { %10191 = vpow2.f32 %v9082_v8  ;;  %v9083_v12 = vmul.f32 -1.442695, %v15521_v23  ;;  %v15525_v41 = vadd.f32 %v7987_v35, %v15510_v14 }
 0x959   :  { %v7991_v38 = vpop.f32.mrf.mxu1 }
 0x95a   :  { %10193 = vpow2.f32 %v9083_v12  ;;  %v9084_v3 = vmul.f32 -1.442695, %v15525_v41  ;;  %v15529_v26 = vadd.f32 %v7991_v38, %v15507_v61 }
 0x95b   :  { %v7993_v25 = vpop.f32.mrf.mxu1 }
 0x95c   :  { %10195 = vpow2.f32 %v9084_v3  ;;  %v9085_v31 = vmul.f32 -1.442695, %v15529_v26  ;;  %v15533_v20 = vadd.f32 %v7993_v25, %v15510_v14 }
 0x95d   :  { %v7995_v6 = vpop.f32.mrf.mxu1 }
 0x95e   :  { %10197 = vpow2.f32 %v9085_v31  ;;  %v9086_v37 = vmul.f32 -1.442695, %v15533_v20  ;;  %v15537_v18 = vadd.f32 %v7995_v6, %v15507_v61 }
 0x95f   :  { %v7997_v2 = vpop.f32.mrf.mxu1 }
 0x960   :  { %10199 = vpow2.f32 %v9086_v37  ;;  %v9087_v28 = vmul.f32 -1.442695, %v15537_v18  ;;  %v15541_v11 = vadd.f32 %v7997_v2, %v15510_v14 }
 0x961   :  { %v8001_v45 = vpop.f32.mrf.mxu1 }
 0x962   :  { %10201 = vpow2.f32 %v9087_v28  ;;  %v9088_v42 = vmul.f32 -1.442695, %v15541_v11  ;;  %v15545_v9 = vadd.f32 %v8001_v45, %v15507_v61 }
 0x963   :  { %v10190_v1 = vpop.eup %10189  ;;  %v8003_v43 = vpop.f32.mrf.mxu1 }
 0x964   :  { %v8332_v17 = vadd.f32 1.0, %v10190_v1  ;;  %10203 = vpow2.f32 %v9088_v42  ;;  %v9089_v36 = vmul.f32 -1.442695, %v15545_v9  ;;  %v15549_v60 = vadd.f32 %v8003_v43, %v15510_v14 }
 0x965   :  { %v10192_v39 = vpop.eup %10191  ;;  %v8005_v13 = vpop.f32.mrf.mxu1 }
 0x966   :  { %10205 = vrcp.f32 %v8332_v17  ;;  %v8333_v22 = vadd.f32 1.0, %v10192_v39  ;;  %v9090_v56 = vmul.f32 -1.442695, %v15549_v60  ;;  %v15553_v5 = vadd.f32 %v8005_v13, %v15507_v61 }
 0x967   :  { %v10194_v46 = vpop.eup %10193  ;;  %10207 = vpow2.f32 %v9089_v36  ;;  %v8007_v55 = vpop.f32.mrf.mxu1 }
 0x968   :  { %10209 = vrcp.f32 %v8333_v22  ;;  %v8334_v58 = vadd.f32 1.0, %v10194_v46  ;;  %v9091_v29 = vmul.f32 -1.442695, %v15553_v5  ;;  %v15557_v49 = vadd.f32 %v8007_v55, %v15510_v14 }
 0x969   :  { %v10196_v15 = vpop.eup %10195  ;;  %10211 = vpow2.f32 %v9090_v56  ;;  %v8011_v0 = vpop.f32.mrf.mxu1 }
 0x96a   :  { %10213 = vrcp.f32 %v8334_v58  ;;  %v8335_v24 = vadd.f32 1.0, %v10196_v15  ;;  %v9092_v33 = vmul.f32 -1.442695, %v15557_v49  ;;  %v15561_v40 = vadd.f32 %v8011_v0, %v15507_v61 }
 0x96b   :  { %v10198_v53 = vpop.eup %10197  ;;  %10215 = vpow2.f32 %v9091_v29  ;;  %v8013_v21 = vpop.f32.mrf.mxu1 }
 0x96c   :  { %10217 = vrcp.f32 %v8335_v24  ;;  %v8336_v27 = vadd.f32 1.0, %v10198_v53  ;;  %v9093_v47 = vmul.f32 -1.442695, %v15561_v40  ;;  %v15565_v51 = vadd.f32 %v8013_v21, %v15510_v14 }
 0x96d   :  { %v10200_v32 = vpop.eup %10199  ;;  %10219 = vpow2.f32 %v9092_v33  ;;  %v8015_v54 = vpop.f32.mrf.mxu1 }
 0x96e   :  { %10221 = vrcp.f32 %v8336_v27  ;;  %v8337_v16 = vadd.f32 1.0, %v10200_v32  ;;  %v9094_v10 = vmul.f32 -1.442695, %v15565_v51  ;;  %v15569_v50 = vadd.f32 %v8015_v54, %v15507_v61 }
 0x96f   :  { %v10202_v62 = vpop.eup %10201  ;;  %10223 = vpow2.f32 %v9093_v47  ;;  %v8017_v59 = vpop.f32.mrf.mxu1 }
 0x970   :  { %10225 = vrcp.f32 %v8337_v16  ;;  %v8338_v30 = vadd.f32 1.0, %v10202_v62  ;;  %v9095_v48 = vmul.f32 -1.442695, %v15569_v50  ;;  %v15573_v52 = vadd.f32 %v8017_v59, %v15510_v14 }
 0x971   :  { %v10204_v7 = vpop.eup %10203  ;;  %10227 = vpow2.f32 %v9094_v10  ;;  %v8021_v57 = vpop.f32.mrf.mxu1 }
 0x972   :  { %10229 = vrcp.f32 %v8338_v30  ;;  %v8339_v4 = vadd.f32 1.0, %v10204_v7  ;;  %v9096_v44 = vmul.f32 -1.442695, %v15573_v52  ;;  %v15577_v34 = vadd.f32 %v8021_v57, %v15507_v61 }
 0x973   :  { %v10206_v8 = vpop.eup %10205  ;;  %10231 = vpow2.f32 %v9095_v48  ;;  %v8023_v35 = vpop.f32.mrf.mxu1 }
 0x974   :  { %v10208_v12 = vpop.eup %10207  ;;  %10233 = vrcp.f32 %v8339_v4  ;;  %v9097_v38 = vmul.f32 -1.442695, %v15577_v34  ;;  %v15581_v3 = vadd.f32 %v8023_v35, %v15510_v14  ;;  %v8524_v42 = vmul.f32 %v10206_v8, %v15513_v63 }
 0x975   :  { %v10210_v25 = vpop.eup %10209  ;;  %v8340_v31 = vadd.f32 1.0, %v10208_v12  ;;  %10235 = vpow2.f32 %v9096_v44  ;;  %v8025_v6 = vpop.f32.mrf.mxu1 }
 0x976   :  { %v10212_v37 = vpop.eup %10211  ;;  %10237 = vpow2.f32 %v9097_v38  ;;  %v9098_v2 = vmul.f32 -1.442695, %v15581_v3  ;;  %v15585_v28 = vadd.f32 %v8025_v6, %v15507_v61  ;;  %v8525_v56 = vmul.f32 %v10210_v25, %v15517_v19 }
 0x977   :  { %v10214_v45 = vpop.eup %10213  ;;  %10239 = vrcp.f32 %v8340_v31  ;;  %v8341_v1 = vadd.f32 1.0, %v10212_v37  ;;  %v8027_v43 = vpop.f32.mrf.mxu1 }
 0x978   :  { %v10216_v17 = vpop.eup %10215  ;;  %v8526_v36 = vmul.f32 %v10214_v45, %v15521_v23  ;;  %10241 = vpow2.f32 %v9098_v2  ;;  %v9099_v39 = vmul.f32 -1.442695, %v15585_v28  ;;  %v15591_v13 = vadd.f32 %v8027_v43, %v15510_v14 }
 0x979   :  { %v10218_v22 = vpop.eup %10217  ;;  %10243 = vrcp.f32 %v8341_v1  ;;  %v8342_v46 = vadd.f32 1.0, %v10216_v17  ;;  %v8031_v55 = vpop.f32.mrf.mxu1 }
 0x97a   :  { %v10220_v58 = vpop.eup %10219  ;;  %v8588_v63 = vadd.f32 %v8526_v36, %v8524_v42  ;;  %v8527_v29 = vmul.f32 %v10218_v22, %v15525_v41  ;;  %10245 = vpow2.f32 %v9099_v39  ;;  %v9100_v15 = vmul.f32 -1.442695, %v15591_v13 }
 0x97b   :  { %v10222_v23 = vpop.eup %10221  ;;  %10247 = vrcp.f32 %v8342_v46  ;;  %v8343_v0 = vadd.f32 1.0, %v10220_v58  ;;  %v15597_v24 = vadd.f32 %v8031_v55, %v15507_v61  ;;  %v8033_v33 = vpop.f32.mrf.mxu1 }
 0x97c   :  { %v10224_v53 = vpop.eup %10223  ;;  %v8601_v21 = vadd.f32 %v8527_v29, %v8525_v56  ;;  %v8528_v19 = vmul.f32 %v10222_v23, %v15529_v26  ;;  %10249 = vpow2.f32 %v9100_v15  ;;  %v15601_v27 = vadd.f32 %v8033_v33, %v15510_v14 }
 0x97d   :  { %v10226_v47 = vpop.eup %10225  ;;  %10251 = vrcp.f32 %v8343_v0  ;;  %v8344_v41 = vadd.f32 1.0, %v10224_v53  ;;  %v9101_v32 = vmul.f32 -1.442695, %v15597_v24  ;;  %v8035_v54 = vpop.f32.mrf.mxu1 }
 0x97e   :  { %v10228_v16 = vpop.eup %10227  ;;  %v8589_v10 = vadd.f32 %v8588_v63, %v8528_v19  ;;  %v8529_v62 = vmul.f32 %v10226_v47, %v15533_v20  ;;  %v9102_v59 = vmul.f32 -1.442695, %v15601_v27  ;;  %v15607_v30 = vadd.f32 %v8035_v54, %v15507_v61 }
 0x97f   :  { %v10230_v26 = vpop.eup %10229  ;;  %10253 = vrcp.f32 %v8344_v41  ;;  %v8345_v48 = vadd.f32 1.0, %v10228_v16  ;;  %v8037_v7 = vpop.f32.mrf.mxu1 }
 0x980   :  { %v10232_v57 = vpop.eup %10231  ;;  %v8602_v4 = vadd.f32 %v8601_v21, %v8529_v62  ;;  %v8530_v44 = vmul.f32 %v10230_v26, %v15537_v18  ;;  %10255 = vpow2.f32 %v9101_v32  ;;  %v9103_v8 = vmul.f32 -1.442695, %v15607_v30 }
 0x981   :  { %v10234_v35 = vpop.eup %10233  ;;  %10257 = vrcp.f32 %v8345_v48  ;;  %v8346_v12 = vadd.f32 1.0, %v10232_v57  ;;  %v15612_v20 = vadd.f32 %v8037_v7, %v15510_v14  ;;  %v8041_v38 = vpop.f32.mrf.mxu1 }
 0x982   :  { %v10236_v25 = vpop.eup %10235  ;;  %v8590_v31 = vadd.f32 %v8589_v10, %v8530_v44  ;;  %v8531_v6 = vmul.f32 %v10234_v35, %v15541_v11  ;;  %10259 = vpow2.f32 %v9102_v59  ;;  %v15616_v37 = vadd.f32 %v8041_v38, %v15507_v61 }
 0x983   :  { %v10238_v2 = vpop.eup %10237  ;;  %10261 = vrcp.f32 %v8346_v12  ;;  %v8347_v18 = vadd.f32 1.0, %v10236_v25  ;;  %v9104_v45 = vmul.f32 -1.442695, %v15612_v20  ;;  %v8043_v42 = vpop.f32.mrf.mxu1 }
 0x984   :  { %v10240_v1 = vpop.eup %10239  ;;  %v8603_v43 = vadd.f32 %v8602_v4, %v8531_v6  ;;  %v8348_v17 = vadd.f32 1.0, %v10238_v2  ;;  %10263 = vpow2.f32 %v9103_v8  ;;  %v9105_v11 = vmul.f32 -1.442695, %v15616_v37 }
 0x985   :  { %v10242_v36 = vpop.eup %10241  ;;  %v8532_v39 = vmul.f32 %v10240_v1, %v15545_v9  ;;  %10265 = vrcp.f32 %v8347_v18  ;;  %v15622_v22 = vadd.f32 %v8043_v42, %v15510_v14  ;;  %v8045_v56 = vpop.f32.mrf.mxu1 }
 0x986   :  { %v10244_v46 = vpop.eup %10243  ;;  %10267 = vrcp.f32 %v8348_v17  ;;  %v8349_v55 = vadd.f32 1.0, %v10242_v36  ;;  %v15625_v58 = vadd.f32 %v8045_v56, %v15507_v61 }
 0x987   :  { %v10246_v63 = vpop.eup %10245  ;;  %v8591_v29 = vadd.f32 %v8590_v31, %v8532_v39  ;;  %v8533_v15 = vmul.f32 %v10244_v46, %v15549_v60  ;;  %10269 = vpow2.f32 %v9104_v45  ;;  %v9106_v9 = vmul.f32 -1.442695, %v15622_v22  ;;  %v8047_v23 = vpop.f32.mrf.mxu1 }
 0x988   :  { %v10248_v0 = vpop.eup %10247  ;;  %10271 = vrcp.f32 %v8349_v55  ;;  %v8350_v33 = vadd.f32 1.0, %v10246_v63  ;;  %v15630_v53 = vadd.f32 %v8047_v23, %v15510_v14  ;;  %v9107_v41 = vmul.f32 -1.442695, %v15625_v58 }
 0x989   :  { %v10250_v21 = vpop.eup %10249  ;;  %v8604_v19 = vadd.f32 %v8603_v43, %v8533_v15  ;;  %v8534_v47 = vmul.f32 %v10248_v0, %v15553_v5  ;;  %10273 = vpow2.f32 %v9105_v11  ;;  %v8051_v32 = vpop.f32.mrf.mxu1 }
 0x98a   :  { %v10252_v54 = vpop.eup %10251  ;;  %10275 = vrcp.f32 %v8350_v33  ;;  %v8351_v60 = vadd.f32 1.0, %v10250_v21  ;;  %v9108_v16 = vmul.f32 -1.442695, %v15630_v53  ;;  %v15636_v10 = vadd.f32 %v8051_v32, %v15507_v61 }
 0x98b   :  { %v8592_v62 = vadd.f32 %v8591_v29, %v8534_v47  ;;  %v8535_v59 = vmul.f32 %v10252_v54, %v15557_v49  ;;  %10277 = vpow2.f32 %v9106_v9  ;;  %v8053_v26 = vpop.f32.mrf.mxu1 }
 0x98c   :  { %v10254_v48 = vpop.eup %10253  ;;  %10279 = vrcp.f32 %v8351_v60  ;;  %v9109_v5 = vmul.f32 -1.442695, %v15636_v10  ;;  %v15641_v7 = vadd.f32 %v8053_v26, %v15510_v14 }
 0x98d   :  { %v10256_v57 = vpop.eup %10255  ;;  %v8605_v4 = vadd.f32 %v8604_v19, %v8535_v59  ;;  %v8536_v44 = vmul.f32 %v10254_v48, %v15561_v40  ;;  %10281 = vpow2.f32 %v9107_v41  ;;  %v8055_v8 = vpop.f32.mrf.mxu1 }
 0x98e   :  { %v10258_v35 = vpop.eup %10257  ;;  %v8352_v12 = vadd.f32 1.0, %v10256_v57  ;;  %10283 = vpow2.f32 %v9108_v16  ;;  %v9110_v49 = vmul.f32 -1.442695, %v15641_v7  ;;  %v15646_v38 = vadd.f32 %v8055_v8, %v15507_v61 }
 0x98f   :  { %v10260_v25 = vpop.eup %10259  ;;  %v8593_v31 = vadd.f32 %v8592_v62, %v8536_v44  ;;  %v8537_v6 = vmul.f32 %v10258_v35, %v15565_v51  ;;  %10285 = vpow2.f32 %v9109_v5  ;;  %v8057_v2 = vpop.f32.mrf.mxu1 }
 0x990   :  { %v10262_v18 = vpop.eup %10261  ;;  %10287 = vrcp.f32 %v8352_v12  ;;  %v8353_v45 = vadd.f32 1.0, %v10260_v25  ;;  %v9111_v40 = vmul.f32 -1.442695, %v15646_v38  ;;  %v15651_v42 = vadd.f32 %v8057_v2, %v15510_v14 }
 0x991   :  { %v10264_v1 = vpop.eup %10263  ;;  %v8606_v43 = vadd.f32 %v8605_v4, %v8537_v6  ;;  %v8538_v17 = vmul.f32 %v10262_v18, %v15569_v50  ;;  %10289 = vpow2.f32 %v9110_v49  ;;  %v8061_v36 = vpop.f32.mrf.mxu1 }
 0x992   :  { %v10266_v39 = vpop.eup %10265  ;;  %10291 = vrcp.f32 %v8353_v45  ;;  %v8354_v11 = vadd.f32 1.0, %v10264_v1  ;;  %v9112_v51 = vmul.f32 -1.442695, %v15651_v42  ;;  %v15656_v56 = vadd.f32 %v8061_v36, %v15507_v61 }
 0x993   :  { %v10268_v46 = vpop.eup %10267  ;;  %v8594_v55 = vadd.f32 %v8593_v31, %v8538_v17  ;;  %v8539_v63 = vmul.f32 %v10266_v39, %v15573_v52  ;;  %10293 = vpow2.f32 %v9111_v40  ;;  %v8063_v29 = vpop.f32.mrf.mxu1 }
 0x994   :  { %v10270_v15 = vpop.eup %10269  ;;  %v8540_v9 = vmul.f32 %v10268_v46, %v15577_v34  ;;  %10295 = vrcp.f32 %v8354_v11  ;;  %v9113_v50 = vmul.f32 -1.442695, %v15656_v56  ;;  %v15662_v23 = vadd.f32 %v8063_v29, %v15510_v14 }
 0x995   :  { %v10272_v0 = vpop.eup %10271  ;;  %v8595_v33 = vrot.slane %v8594_v55, 4  ;;  %v8607_v21 = vadd.f32 %v8606_v43, %v8539_v63  ;;  %v8355_v19 = vadd.f32 1.0, %v10270_v15  ;;  %10297 = vpow2.f32 %v9112_v51  ;;  %v8065_v47 = vpop.f32.mrf.mxu1 }
 0x996   :  { %v10274_v41 = vpop.eup %10273  ;;  %v8541_v52 = vmul.f32 %v10272_v0, %v15581_v3  ;;  %10299 = vpow2.f32 %v9113_v50  ;;  %v9114_v32 = vmul.f32 -1.442695, %v15662_v23  ;;  %v15667_v34 = vadd.f32 %v8065_v47, %v15507_v61 }
 0x997   :  { %v10276_v54 = vpop.eup %10275  ;;  %v8596_v60 = vadd.f32 %v8595_v33, %v8594_v55  ;;  %v8608_v16 = vrot.slane %v8607_v21, 4  ;;  %10301 = vrcp.f32 %v8355_v19  ;;  %v8356_v62 = vadd.f32 1.0, %v10274_v41  ;;  %v8067_v59 = vpop.f32.mrf.mxu1 }
 0x998   :  { %v10278_v26 = vpop.eup %10277  ;;  %v8542_v48 = vmul.f32 %v10276_v54, %v15585_v28  ;;  %10303 = vpow2.f32 %v9114_v32  ;;  %v9115_v5 = vmul.f32 -1.442695, %v15667_v34  ;;  %v15672_v3 = vadd.f32 %v8067_v59, %v15510_v14 }
 0x999   :  { %v10280_v57 = vpop.eup %10279  ;;  %v8597_v4 = vrot.slane %v8596_v60, 2  ;;  %v8609_v44 = vadd.f32 %v8608_v16, %v8607_v21  ;;  %10305 = vrcp.f32 %v8356_v62  ;;  %v8357_v8 = vadd.f32 1.0, %v10278_v26  ;;  %v8071_v35 = vpop.f32.mrf.mxu1 }
 0x99a   :  { %v10282_v12 = vpop.eup %10281  ;;  %v8614_v49 = vadd.f32 %v8542_v48, %v8540_v9  ;;  %v8543_v25 = vmul.f32 %v10280_v57, %v15591_v13  ;;  %10307 = vpow2.f32 %v9115_v5  ;;  %v9116_v31 = vmul.f32 -1.442695, %v15672_v3 }
 0x99b   :  { %v10284_v28 = vpop.eup %10283  ;;  %v8598_v6 = vadd.f32 %v8597_v4, %v8596_v60  ;;  %v8610_v2 = vrot.slane %v8609_v44, 2  ;;  %10309 = vrcp.f32 %v8357_v8  ;;  %v8358_v18 = vadd.f32 1.0, %v10282_v12  ;;  %v8073_v45 = vpop.f32.mrf.mxu1 }
 0x99c   :  { %v10286_v40 = vpop.eup %10285  ;;  %v8627_v1 = vadd.f32 %v8543_v25, %v8541_v52  ;;  %v8359_v43 = vadd.f32 1.0, %v10284_v28  ;;  %10311 = vpow2.f32 %v9116_v31  ;;  %v15677_v17 = vadd.f32 %v8071_v35, %v15507_v61 }
 0x99d   :  { %v10288_v36 = vpop.eup %10287  ;;  %v8599_v39 = vrot.slane %v8598_v6, 1  ;;  %v8611_v11 = vadd.f32 %v8610_v2, %v8609_v44  ;;  %10313 = vrcp.f32 %v8358_v18  ;;  %v8360_v13 = vadd.f32 1.0, %v10286_v40  ;;  %v8075_v51 = vpop.f32.mrf.mxu1 }
 0x99e   :  { %v10290_v46 = vpop.eup %10289  ;;  %v8544_v55 = vmul.f32 %v10288_v36, %v15597_v24  ;;  %10315 = vrcp.f32 %v8359_v43  ;;  %v9117_v63 = vmul.f32 -1.442695, %v15677_v17  ;;  %v15682_v29 = vadd.f32 %v8073_v45, %v15510_v14 }
 0x99f   :  { %v10292_v15 = vpop.eup %10291  ;;  %v8600_v9 = vadd.f32 %v8599_v39, %v8598_v6  ;;  %v8612_v50 = vrot.slane %v8611_v11, 1  ;;  %10317 = vrcp.f32 %v8360_v13  ;;  %v8361_v0 = vadd.f32 1.0, %v10290_v46  ;;  %v8077_v33 = vpop.f32.mrf.mxu1 }
 0x9a0   :  { %v10294_v21 = vpop.eup %10293  ;;  %v8615_v19 = vadd.f32 %v8614_v49, %v8544_v55  ;;  %v8545_v47 = vmul.f32 %v10292_v15, %v15601_v27  ;;  %10319 = vpow2.f32 %v9117_v63  ;;  %v9118_v41 = vmul.f32 -1.442695, %v15682_v29 }
 0x9a1   :  { %v10296_v24 = vpop.eup %10295  ;;  %v8613_v52 = vadd.f32 %v8612_v50, %v8611_v11  ;;  %10321 = vrcp.f32 %v8361_v0  ;;  %v8362_v32 = vadd.f32 1.0, %v10294_v21  ;;  %v8081_v54 = vpop.f32.mrf.mxu1  ;;  %v15686_v16 = vmul.f32 0.015625, %v8600_v9 }
 0x9a2   :  { %v10298_v60 = vpop.eup %10297  ;;  %v8628_v62 = vadd.f32 %v8627_v1, %v8545_v47  ;;  %v8546_v59 = vmul.f32 %v10296_v24, %v15607_v30  ;;  %v15690_v26 = vadd.f32 %v8075_v51, %v15507_v61  ;;  %v15695_v57 = vadd.f32 %v8077_v33, %v15510_v14 }
 0x9a3   :  { %v10300_v48 = vpop.eup %10299  ;;  %v15692_v5 = vmul.f32 0.015625, %v8613_v52  ;;  %10323 = vrcp.f32 %v8362_v32  ;;  %v8363_v27 = vadd.f32 1.0, %v10298_v60  ;;  %v8083_v4 = vpop.f32.mrf.mxu1  ;;  %v15699_v12 = vadd.f32 %v8081_v54, %v15507_v61 }
 0x9a4   :  { %v10302_v44 = vpop.eup %10301  ;;  %v8616_v8 = vadd.f32 %v8615_v19, %v8546_v59  ;;  %10325 = vpow2.f32 %v9118_v41  ;;  %v9119_v35 = vmul.f32 -1.442695, %v15690_v26  ;;  %v9120_v31 = vmul.f32 -1.442695, %v15695_v57 }
 0x9a5   :  { %v10304_v30 = vpop.eup %10303  ;;  %v8709_v49 = vcombine.low %v15686_v16, %v15692_v5  ;;  %v8547_v25 = vmul.f32 %v10302_v44, %v15612_v20  ;;  %10327 = vrcp.f32 %v8363_v27  ;;  %v8085_v28 = vpop.f32.mrf.mxu1  ;;  %v8364_v2 = vadd.f32 1.0, %v10300_v48 }
 0x9a6   :  { %v10306_v6 = vpop.eup %10305  ;;  %v9121_v18 = vmul.f32 -1.442695, %v15699_v12  ;;  %v15707_v45 = vadd.f32 %v8083_v4, %v15510_v14  ;;  %10329 = vpow2.f32 %v9119_v35  ;;  %v15711_v36 = vadd.f32 %v8085_v28, %v15507_v61 }
 0x9a7   :  { %v10308_v40 = vpop.eup %10307  ;;  %v8629_v1 = vadd.f32 %v8628_v62, %v8547_v25  ;;  %v8548_v43 = vmul.f32 %v10306_v6, %v15616_v37  ;;  %v8087_v20 = vpop.f32.mrf.mxu1  ;;  %v8365_v11 = vadd.f32 1.0, %v10304_v30  ;;  %10331 = vpow2.f32 %v9120_v31 }
 0x9a8   :  { %v10310_v39 = vpop.eup %10309  ;;  %v15714_v13 = vadd.f32 %v8087_v20, %v15510_v14  ;;  %v9122_v63 = vmul.f32 -1.442695, %v15707_v45  ;;  %10333 = vrcp.f32 %v8364_v2  ;;  %v9123_v37 = vmul.f32 -1.442695, %v15711_v36 }
 0x9a9   :  { %v10312_v51 = vpop.eup %10311  ;;  %v8617_v46 = vadd.f32 %v8616_v8, %v8548_v43  ;;  %v8549_v55 = vmul.f32 %v10310_v39, %v15622_v22  ;;  %v8091_v15 = vpop.f32.mrf.mxu1  ;;  %10335 = vpow2.f32 %v9121_v18  ;;  %v8366_v24 = vadd.f32 1.0, %v10308_v40 }
 0x9aa   :  { %v10314_v9 = vpop.eup %10313  ;;  %v15720_v50 = vadd.f32 %v8091_v15, %v15507_v61  ;;  %v9124_v19 = vmul.f32 -1.442695, %v15714_v13  ;;  %10337 = vrcp.f32 %v8365_v11  ;;  %v8367_v27 = vadd.f32 1.0, %v10312_v51 }
 0x9ab   :  { %v10316_v0 = vpop.eup %10315  ;;  %v8630_v33 = vadd.f32 %v8629_v1, %v8549_v55  ;;  %v8550_v21 = vmul.f32 %v10314_v9, %v15625_v58  ;;  %v8093_v47 = vpop.f32.mrf.mxu1  ;;  %10339 = vpow2.f32 %v9122_v63 }
 0x9ac   :  { %v10318_v22 = vpop.eup %10317  ;;  %v8551_v41 = vmul.f32 %v10316_v0, %v15630_v53  ;;  %v15726_v52 = vadd.f32 %v8093_v47, %v15510_v14  ;;  %v9125_v62 = vmul.f32 -1.442695, %v15720_v50  ;;  %10341 = vpow2.f32 %v9123_v37 }
 0x9ad   :  { %v10320_v32 = vpop.eup %10319  ;;  %v8618_v54 = vadd.f32 %v8617_v46, %v8550_v21  ;;  %v8552_v60 = vmul.f32 %v10318_v22, %v15636_v10  ;;  %v8095_v58 = vpop.f32.mrf.mxu1  ;;  %10343 = vpow2.f32 %v9124_v19 }
 0x9ae   :  { %v10322_v59 = vpop.eup %10321  ;;  %v8631_v48 = vadd.f32 %v8630_v33, %v8551_v41  ;;  %v9126_v4 = vmul.f32 -1.442695, %v15726_v52  ;;  %v15733_v8 = vadd.f32 %v8095_v58, %v15507_v61  ;;  %10345 = vrcp.f32 %v8366_v24 }
 0x9af   :  { %v8619_v53 = vadd.f32 %v8618_v54, %v8552_v60  ;;  %v8553_v44 = vmul.f32 %v10322_v59, %v15641_v7  ;;  %v8097_v35 = vpop.f32.mrf.mxu1  ;;  %10347 = vpow2.f32 %v9125_v62  ;;  %v8368_v7 = vadd.f32 1.0, %v10320_v32 }
 0x9b0   :  { %v10324_v30 = vpop.eup %10323  ;;  %v15736_v10 = vadd.f32 %v8097_v35, %v15510_v14  ;;  %v9127_v28 = vmul.f32 -1.442695, %v15733_v8  ;;  %10349 = vrcp.f32 %v8367_v27 }
 0x9b1   :  { %v10326_v25 = vpop.eup %10325  ;;  %v8554_v31 = vmul.f32 %v10324_v30, %v15646_v38  ;;  %v8101_v6 = vpop.f32.mrf.mxu1  ;;  %v8632_v1 = vadd.f32 %v8631_v48, %v8553_v44  ;;  %10351 = vpow2.f32 %v9126_v4 }
 0x9b2   :  { %v10328_v2 = vpop.eup %10327  ;;  %v9128_v18 = vmul.f32 -1.442695, %v15736_v10  ;;  %v15742_v40 = vadd.f32 %v8101_v6, %v15507_v61  ;;  %10353 = vpow2.f32 %v9127_v28  ;;  %v8369_v63 = vadd.f32 1.0, %v10326_v25 }
 0x9b3   :  { %v8620_v43 = vadd.f32 %v8619_v53, %v8554_v31  ;;  %v8555_v20 = vmul.f32 %v10328_v2, %v15651_v42  ;;  %v8103_v39 = vpop.f32.mrf.mxu1  ;;  %v10330_v11 = vpop.eup %10329 }
 0x9b4   :  { %v9129_v38 = vmul.f32 -1.442695, %v15742_v40  ;;  %v15747_v51 = vadd.f32 %v8103_v39, %v15510_v14  ;;  %10355 = vpow2.f32 %v9128_v18  ;;  %v10332_v9 = vpop.eup %10331  ;;  %v8370_v37 = vadd.f32 1.0, %v10330_v11 }
 0x9b5   :  { %v8621_v46 = vrot.slane %v8620_v43, 4  ;;  %v8633_v55 = vadd.f32 %v8632_v1, %v8555_v20  ;;  %v8105_v15 = vpop.f32.mrf.mxu1  ;;  %v15753_v33 = vpop.eup %10333  ;;  %v8371_v47 = vadd.f32 1.0, %v10332_v9 }
 0x9b6   :  { %10357 = vpow2.f32 %v9129_v38  ;;  %v9130_v0 = vmul.f32 -1.442695, %v15747_v51  ;;  %v15751_v42 = vadd.f32 %v8105_v15, %v15507_v61  ;;  %v10336_v41 = vpop.eup %10335 }
 0x9b7   :  { %v8622_v21 = vadd.f32 %v8621_v46, %v8620_v43  ;;  %v8634_v19 = vrot.slane %v8633_v55, 4  ;;  %10359 = vrcp.f32 %v8368_v7  ;;  %v8107_v22 = vpop.f32.mrf.mxu1  ;;  %v15759_v54 = vpop.eup %10337  ;;  %v8372_v58 = vadd.f32 1.0, %v10336_v41 }
 0x9b8   :  { %10361 = vpow2.f32 %v9130_v0  ;;  %v9131_v24 = vmul.f32 -1.442695, %v15751_v42  ;;  %v15757_v32 = vadd.f32 %v8107_v22, %v15510_v14  ;;  %v10340_v48 = vpop.eup %10339 }
 0x9b9   :  { %v8623_v60 = vrot.slane %v8622_v21, 2  ;;  %v8635_v62 = vadd.f32 %v8634_v19, %v8633_v55  ;;  %10363 = vrcp.f32 %v8369_v63  ;;  %v8111_v59 = vpop.f32.mrf.mxu1  ;;  %v10342_v4 = vpop.eup %10341  ;;  %v8373_v35 = vadd.f32 1.0, %v10340_v48 }
 0x9ba   :  { %10365 = vrcp.f32 %v8370_v37  ;;  %v9132_v27 = vmul.f32 -1.442695, %v15757_v32  ;;  %v10344_v25 = vpop.eup %10343  ;;  %v8374_v31 = vadd.f32 1.0, %v10342_v4  ;;  %v15763_v28 = vadd.f32 %v8111_v59, %v15507_v61 }
 0x9bb   :  { %v8624_v53 = vadd.f32 %v8623_v60, %v8622_v21  ;;  %v8636_v44 = vrot.slane %v8635_v62, 2  ;;  %10367 = vrcp.f32 %v8371_v47  ;;  %v8113_v30 = vpop.f32.mrf.mxu1  ;;  %v15765_v6 = vpop.eup %10345  ;;  %v8375_v18 = vadd.f32 1.0, %v10344_v25 }
 0x9bc   :  { %10369 = vpow2.f32 %v9131_v24  ;;  %v10348_v43 = vpop.eup %10347  ;;  %v9133_v20 = vmul.f32 -1.442695, %v15763_v28  ;;  %v15769_v39 = vadd.f32 %v8113_v30, %v15510_v14 }
 0x9bd   :  { %v8625_v2 = vrot.slane %v8624_v53, 1  ;;  %v8637_v7 = vadd.f32 %v8636_v44, %v8635_v62  ;;  %10371 = vrcp.f32 %v8372_v58  ;;  %v8115_v1 = vpop.f32.mrf.mxu1  ;;  %v10350_v11 = vpop.eup %10349  ;;  %v8376_v15 = vadd.f32 1.0, %v10348_v43 }
 0x9be   :  { %10373 = vpow2.f32 %v9132_v27  ;;  %v10352_v63 = vpop.eup %10351  ;;  %v9134_v9 = vmul.f32 -1.442695, %v15769_v39  ;;  %v15773_v41 = vadd.f32 %v8115_v1, %v15507_v61  ;;  %v8559_v16 = vmul.f32 %v10350_v11, %v15672_v3 }
 0x9bf   :  { %v8626_v38 = vadd.f32 %v8625_v2, %v8624_v53  ;;  %v8638_v46 = vrot.slane %v8637_v7, 1  ;;  %10375 = vrcp.f32 %v8373_v35  ;;  %v8117_v55 = vpop.f32.mrf.mxu1  ;;  %v10354_v37 = vpop.eup %10353  ;;  %v8377_v21 = vadd.f32 1.0, %v10352_v63 }
 0x9c0   :  { %10377 = vrcp.f32 %v8374_v31  ;;  %v8378_v22 = vadd.f32 1.0, %v10354_v37  ;;  %v15776_v58 = vadd.f32 %v8117_v55, %v15510_v14  ;;  %v9135_v4 = vmul.f32 -1.442695, %v15773_v41 }
 0x9c1   :  { %v8639_v0 = vadd.f32 %v8638_v46, %v8637_v7  ;;  %10379 = vrcp.f32 %v8375_v18  ;;  %v8121_v19 = vpop.f32.mrf.mxu1  ;;  %v10356_v47 = vpop.eup %10355  ;;  %v8695_v60 = vmul.f32 0.015625, %v8626_v38 }
 0x9c2   :  { %10381 = vpow2.f32 %v9133_v20  ;;  %v8379_v27 = vadd.f32 1.0, %v10356_v47  ;;  %v15780_v53 = vadd.f32 %v8121_v19, %v15507_v61  ;;  %v9136_v30 = vmul.f32 -1.442695, %v15776_v58 }
 0x9c3   :  { %v10358_v24 = vpop.eup %10357  ;;  %v8696_v62 = vmul.f32 0.015625, %v8639_v0  ;;  %10383 = vpow2.f32 %v9134_v9  ;;  %v8123_v59 = vpop.f32.mrf.mxu1  ;;  %v8558_v19 = vmul.f32 %v15765_v6, %v15667_v34 }
 0x9c4   :  { %v10360_v48 = vpop.eup %10359  ;;  %10385 = vrcp.f32 %v8376_v15  ;;  %v8380_v2 = vadd.f32 1.0, %v10358_v24  ;;  %v15784_v7 = vadd.f32 %v8123_v59, %v15510_v14  ;;  %v9137_v43 = vmul.f32 -1.442695, %v15780_v53 }
 0x9c5   :  { %v10362_v44 = vpop.eup %10361  ;;  %v8710_v35 = vcombine.low %v8695_v60, %v8696_v62  ;;  %10387 = vrcp.f32 %v8377_v21  ;;  %v8125_v25 = vpop.f32.mrf.mxu1  ;;  %v8556_v24 = vmul.f32 %v15753_v33, %v15656_v56  ;;  %v8557_v56 = vmul.f32 %v15759_v54, %v15662_v23 }
 0x9c6   :  { %v10364_v31 = vpop.eup %10363  ;;  %10389 = vrcp.f32 %v8378_v22  ;;  %v8381_v46 = vadd.f32 1.0, %v10362_v44  ;;  %v15788_v55 = vadd.f32 %v8125_v25, %v15507_v61  ;;  %v9138_v9 = vmul.f32 -1.442695, %v15784_v7 }
 0x9c7   :  { %v10366_v18 = vpop.eup %10365  ;;  %v8713_v1 = vrot.slane %v8710_v35, 7  ;;  %10391 = vpow2.f32 %v9135_v4  ;;  %v8127_v20 = vpop.f32.mrf.mxu1  ;;  %v8561_v3 = vmul.f32 %v10364_v31, %v15682_v29  ;;  %v8640_v4 = vadd.f32 %v8558_v19, %v8556_v24 }
 0x9c8   :  { %v10368_v38 = vpop.eup %10367  ;;  %10393 = vrcp.f32 %v8379_v27  ;;  %v9139_v47 = vmul.f32 -1.442695, %v15788_v55  ;;  %v15804_v5 = vadd.f32 %v8127_v20, %v15510_v14  ;;  %v8653_v25 = vadd.f32 %v8559_v16, %v8557_v56 }
 0x9c9   :  { %v10370_v63 = vpop.eup %10369  ;;  %v8714_v15 = vsel %vm7014_vm6, %v8713_v1, %v8709_v49  ;;  %10395 = vpow2.f32 %v9136_v30  ;;  %v8131_v37 = vpop.f32.mrf.mxu1  ;;  %v8563_v29 = vmul.f32 %v10368_v38, %v15695_v57 }
 0x9ca   :  { %v10372_v0 = vpop.eup %10371  ;;  %v15795_v21 = vsel %vm8715_vm9, %v8713_v1, %v8714_v15  ;;  %10397 = vrcp.f32 %v8380_v2  ;;  %v8382_v62 = vadd.f32 1.0, %v10370_v63  ;;  %v15807_v59 = vadd.f32 %v8131_v37, %v15507_v61 }
 0x9cb   :  { %v10374_v22 = vpop.eup %10373  ;;  %10399 = vpow2.f32 %v9137_v43  ;;  %v8133_v49 = vpop.f32.mrf.mxu1  ;;  %v9140_v33 = vmul.f32 -1.442695, %v15804_v5  ;;  %v8560_v2 = vmul.f32 %v10360_v48, %v15677_v17  ;;  %v8562_v63 = vmul.f32 %v10366_v18, %v15690_v26 }
 0x9cc   :  { %v10376_v60 = vpop.eup %10375  ;;  %10401 = vrcp.f32 %v8381_v46  ;;  %v15810_v34 = vadd.f32 %v8133_v49, %v15510_v14  ;;  %v8383_v44 = vadd.f32 1.0, %v10374_v22  ;;  %v9141_v35 = vmul.f32 -1.442695, %v15807_v59 }
 0x9cd   :  { %v10378_v6 = vpop.eup %10377  ;;  %10403 = vpow2.f32 %v9138_v9  ;;  %v8135_v11 = vpop.f32.mrf.mxu1  ;;  %v8654_v46 = vadd.f32 %v8653_v25, %v8561_v3  ;;  %v8565_v17 = vmul.f32 %v10376_v60, %v15707_v45 }
 0x9ce   :  { %v10380_v27 = vpop.eup %10379  ;;  %10405 = vpow2.f32 %v9139_v47  ;;  %v9142_v1 = vmul.f32 -1.442695, %v15810_v34  ;;  %v15821_v31 = vadd.f32 %v8135_v11, %v15507_v61  ;;  %v8641_v61 = vadd.f32 %v8640_v4, %v8560_v2 }
 0x9cf   :  { %v10382_v30 = vpop.eup %10381  ;;  %10407 = vpow2.f32 %v9140_v33  ;;  %v8137_v23 = vpop.f32.mrf.mxu1  ;;  %v8655_v19 = vadd.f32 %v8654_v46, %v8563_v29  ;;  %v8564_v47 = vmul.f32 %v10372_v0, %v15699_v12  ;;  %v8567_v26 = vmul.f32 %v10380_v27, %v15714_v13 }
 0x9d0   :  { %v10384_v54 = vpop.eup %10383  ;;  %10409 = vrcp.f32 %v8382_v62  ;;  %v15824_v43 = vadd.f32 %v8137_v23, %v15510_v14  ;;  %v8384_v15 = vadd.f32 1.0, %v10382_v30  ;;  %v9143_v9 = vmul.f32 -1.442695, %v15821_v31 }
 0x9d1   :  { %v10386_v20 = vpop.eup %10385  ;;  %10411 = vpow2.f32 %v9141_v35  ;;  %v8385_v37 = vadd.f32 1.0, %v10384_v54  ;;  %v8642_v24 = vadd.f32 %v8641_v61, %v8562_v63  ;;  %v8656_v16 = vadd.f32 %v8655_v19, %v8565_v17 }
 0x9d2   :  { %v10388_v48 = vpop.eup %10387  ;;  %10413 = vrcp.f32 %v8383_v44  ;;  %v9144_v57 = vmul.f32 -1.442695, %v15824_v43  ;;  %v8566_v49 = vmul.f32 %v10378_v6, %v15711_v36  ;;  %v8568_v0 = vmul.f32 %v10386_v20, %v15720_v50 }
 0x9d3   :  { %v10390_v38 = vpop.eup %10389  ;;  %10415 = vpow2.f32 %v9142_v1  ;;  %v8569_v62 = vmul.f32 %v10388_v48, %v15726_v52  ;;  %v8643_v33 = vadd.f32 %v8642_v24, %v8564_v47  ;;  %v8657_v12 = vadd.f32 %v8656_v16, %v8567_v26 }
 0x9d4   :  { %v10392_v14 = vpop.eup %10391  ;;  %10417 = vpow2.f32 %v9143_v9  ;;  %v8570_v35 = vmul.f32 %v10390_v38, %v15733_v8 }
 0x9d5   :  { %v10394_v45 = vpop.eup %10393  ;;  %v8386_v18 = vadd.f32 1.0, %v10392_v14  ;;  %10419 = vpow2.f32 %v9144_v57  ;;  %v8644_v44 = vadd.f32 %v8643_v33, %v8566_v49  ;;  %v8658_v6 = vadd.f32 %v8657_v12, %v8569_v62 }
 0x9d6   :  { %v10396_v22 = vpop.eup %10395  ;;  %10421 = vrcp.f32 %v8384_v15  ;;  %v8571_v11 = vmul.f32 %v10394_v45, %v15736_v10 }
 0x9d7   :  { %v10398_v60 = vpop.eup %10397  ;;  %10423 = vrcp.f32 %v8385_v37  ;;  %v8387_v56 = vadd.f32 1.0, %v10396_v22  ;;  %v8645_v1 = vadd.f32 %v8644_v44, %v8568_v0 }
 0x9d8   :  { %v10400_v3 = vpop.eup %10399  ;;  %10425 = vrcp.f32 %v8386_v18  ;;  %v8659_v23 = vadd.f32 %v8658_v6, %v8571_v11  ;;  %v8572_v45 = vmul.f32 %v10398_v60, %v15742_v40 }
 0x9d9   :  { %v10402_v13 = vpop.eup %10401  ;;  %10427 = vrcp.f32 %v8387_v56  ;;  %v8388_v27 = vadd.f32 1.0, %v10400_v3  ;;  %v8646_v29 = vadd.f32 %v8645_v1, %v8570_v35 }
 0x9da   :  { %v10404_v4 = vpop.eup %10403  ;;  %v8660_v17 = vrot.slane %v8659_v23, 4  ;;  %v8573_v24 = vmul.f32 %v10402_v13, %v15747_v51 }
 0x9db   :  { %v10406_v36 = vpop.eup %10405  ;;  %10429 = vrcp.f32 %v8388_v27  ;;  %v8389_v52 = vadd.f32 1.0, %v10404_v4  ;;  %v8647_v57 = vrot.slane %v8646_v29, 4 }
 0x9dc   :  { %v10408_v30 = vpop.eup %10407  ;;  %v8390_v25 = vadd.f32 1.0, %v10406_v36  ;;  %v8661_v19 = vadd.f32 %v8660_v17, %v8659_v23 }
 0x9dd   :  { %v10410_v2 = vpop.eup %10409  ;;  %10431 = vrcp.f32 %v8389_v52  ;;  %v8391_v54 = vadd.f32 1.0, %v10408_v30  ;;  %v8648_v22 = vadd.f32 %v8647_v57, %v8646_v29 }
 0x9de   :  { %v10412_v50 = vpop.eup %10411  ;;  %10433 = vrcp.f32 %v8390_v25  ;;  %v8574_v37 = vmul.f32 %v10410_v2, %v15751_v42  ;;  %v8662_v56 = vrot.slane %v8661_v19, 2 }
 0x9df   :  { %v10414_v10 = vpop.eup %10413  ;;  %10435 = vrcp.f32 %v8391_v54  ;;  %v8392_v20 = vadd.f32 1.0, %v10412_v50  ;;  %v8649_v60 = vrot.slane %v8648_v22, 2 }
 0x9e0   :  { %v10416_v46 = vpop.eup %10415  ;;  %v8575_v47 = vmul.f32 %v10414_v10, %v15757_v32  ;;  %v8666_v62 = vadd.f32 %v8574_v37, %v8572_v45  ;;  %v8663_v27 = vadd.f32 %v8662_v56, %v8661_v19 }
 0x9e1   :  { %v10418_v63 = vpop.eup %10417  ;;  %10437 = vrcp.f32 %v8392_v20  ;;  %v8393_v8 = vadd.f32 1.0, %v10416_v46 }
 0x9e2   :  { %v10420_v48 = vpop.eup %10419  ;;  %v8394_v15 = vadd.f32 1.0, %v10418_v63  ;;  %v8679_v3 = vadd.f32 %v8575_v47, %v8573_v24  ;;  %v8664_v25 = vrot.slane %v8663_v27, 1 }
 0x9e3   :  { %v10422_v9 = vpop.eup %10421  ;;  %10439 = vrcp.f32 %v8393_v8  ;;  %v8395_v38 = vadd.f32 1.0, %v10420_v48 }
 0x9e4   :  { %v10424_v61 = vpop.eup %10423  ;;  %10441 = vrcp.f32 %v8394_v15  ;;  %v8576_v18 = vmul.f32 %v10422_v9, %v15763_v28  ;;  %v8665_v29 = vadd.f32 %v8664_v25, %v8663_v27 }
 0x9e5   :  { %v10426_v14 = vpop.eup %10425  ;;  %10443 = vrcp.f32 %v8395_v38  ;;  %v8577_v16 = vmul.f32 %v10424_v61, %v15769_v39 }
 0x9e6   :  { %v10428_v26 = vpop.eup %10427  ;;  %v8578_v42 = vmul.f32 %v10426_v14, %v15773_v41  ;;  %v8667_v12 = vadd.f32 %v8666_v62, %v8576_v18  ;;  %v8698_v8 = vmul.f32 0.015625, %v8665_v29 }
 0x9e7   :  { %v8579_v33 = vmul.f32 %v10428_v26, %v15776_v58  ;;  %v8680_v28 = vadd.f32 %v8679_v3, %v8577_v16  ;;  %v8650_v58 = vadd.f32 %v8649_v60, %v8648_v22 }
 0x9e8   :  { %v10430_v49 = vpop.eup %10429  ;;  %v8668_v13 = vadd.f32 %v8667_v12, %v8578_v42 }
 0x9e9   :  { %v8580_v0 = vmul.f32 %v10430_v49, %v15780_v53  ;;  %v8681_v4 = vadd.f32 %v8680_v28, %v8579_v33  ;;  %v8651_v54 = vrot.slane %v8650_v58, 1 }
 0x9ea   :  { %v10432_v32 = vpop.eup %10431 }
 0x9eb   :  { %v10434_v40 = vpop.eup %10433  ;;  %v8581_v11 = vmul.f32 %v10432_v32, %v15784_v7  ;;  %v8669_v36 = vadd.f32 %v8668_v13, %v8580_v0 }
 0x9ec   :  { %v10436_v51 = vpop.eup %10435  ;;  %v8582_v39 = vmul.f32 %v10434_v40, %v15788_v55 }
 0x9ed   :  { %v8583_v41 = vmul.f32 %v10436_v51, %v15804_v5  ;;  %v8682_v6 = vadd.f32 %v8681_v4, %v8581_v11 }
 0x9ee   :  { %v10438_v44 = vpop.eup %10437  ;;  %v8670_v52 = vadd.f32 %v8669_v36, %v8582_v39 }
 0x9ef   :  { %v8584_v35 = vmul.f32 %v10438_v44, %v15807_v59  ;;  %v8683_v2 = vadd.f32 %v8682_v6, %v8583_v41  ;;  %v8652_v59 = vadd.f32 %v8651_v54, %v8650_v58 }
 0x9f0   :  { %v10440_v53 = vpop.eup %10439 }
 0x9f1   :  { %v10442_v30 = vpop.eup %10441  ;;  %v8585_v7 = vmul.f32 %v10440_v53, %v15810_v34  ;;  %v8671_v23 = vadd.f32 %v8670_v52, %v8584_v35  ;;  %v8697_v9 = vmul.f32 0.015625, %v8652_v59 }
 0x9f2   :  { %v10444_v1 = vpop.eup %10443  ;;  %v8586_v55 = vmul.f32 %v10442_v30, %v15821_v31 }
 0x9f3   :  { %v8684_v50 = vadd.f32 %v8683_v2, %v8585_v7  ;;  %v8587_v5 = vmul.f32 %v10444_v1, %v15824_v43  ;;  %v8711_v38 = vcombine.low %v8697_v9, %v8698_v8 }
 0x9f4   :  { %v8672_v10 = vadd.f32 %v8671_v23, %v8586_v55 }
 0x9f5   :  { %v8685_v20 = vadd.f32 %v8684_v50, %v8587_v5  ;;  %v8717_v19 = vrot.slane %v8711_v38, 6 }
 0x9f6   :  { %v8673_v46 = vrot.slane %v8672_v10, 4 }
 0x9f7   :  { %v8686_v63 = vrot.slane %v8685_v20, 4  ;;  %v8718_v45 = vsel %vm7016_vm7, %v8717_v19, %v15795_v21 }
 0x9f8   :  { %v8674_v17 = vadd.f32 %v8673_v46, %v8672_v10  ;;  %v8720_v24 = vsel %vm8719_vm10, %v8717_v19, %v8718_v45 }
 0x9f9   :  { %v8687_v48 = vadd.f32 %v8686_v63, %v8685_v20 }
 0x9fa   :  { %v8675_v15 = vrot.slane %v8674_v17, 2 }
 0x9fb   :  { %v8688_v34 = vrot.slane %v8687_v48, 2 }
 0x9fc   :  { %v8676_v57 = vadd.f32 %v8675_v15, %v8674_v17 }
 0x9fd   :  { %v8689_v61 = vadd.f32 %v8688_v34, %v8687_v48 }
 0x9fe   :  { %v8677_v31 = vrot.slane %v8676_v57, 1 }
 0x9ff   :  { %v8690_v37 = vrot.slane %v8689_v61, 1 }
 0xa00   :  { %v8678_v14 = vadd.f32 %v8677_v31, %v8676_v57 }
 0xa01   :  { %v8691_v43 = vadd.f32 %v8690_v37, %v8689_v61 }
 0xa02   :  { %v8699_v47 = vmul.f32 0.015625, %v8678_v14 }
 0xa03   :  { %v8700_v26 = vmul.f32 0.015625, %v8691_v43 }
 0xa05   :  { %v8712_v18 = vcombine.low %v8699_v47, %v8700_v26 }
 0xa07   :  { %v8721_v22 = vrot.slane %v8712_v18, 5 }
 0xa09   :  { %v8722_v16 = vsel %vm7018_vm8, %v8721_v22, %v8720_v24 }
 0xa0a   :  { %v8724_v49 = vsel %vm8723_vm11, %v8721_v22, %v8722_v16 }
 0xa0b   :  { %8726 = vst [vmem:[%s15873_s14] sm:$0xff] %v8724_v49 }

</bundles_post_ra>
